<compile_context>
chip_gen: v5e
topology: v5e:2x2
jax: 0.10.0
libtpu: 0.0.40
codegen_flags: <defaults>
</compile_context>

<pallas_src>
import functools

import jax
import jax.numpy as jnp
from jax import lax
from jax.experimental import pallas as pl
from jax.experimental.pallas import tpu as pltpu


# ------------------------------ Pallas kernel -------------------------------

def _net_kernel(x_ref, w1_ref, b1_ref, w2_ref, b2_ref,
                wf1_ref, bf1_ref, wf2_ref, bf2_ref, wf3_ref, bf3_ref,
                out_ref,
                xe1_ref, a1_ref, p1_ref, xe2_ref, a2_ref, p2_ref, feat_ref,
                *, B, SZ, W_a1, W_p1, W_c2, W_p2, W_xe1, W_xe2):
    f32 = jnp.float32
    bf16 = jnp.bfloat16

    # -------- conv1 (3->6, 5x5, valid) + bias + ReLU, f32 accumulation -------
    # Row-expanded input: xe1[i*4 + c, t] = x[c, t + i*32] (4th channel = 0).
    xe1_ref[20:32, :] = jnp.zeros((12, W_xe1), bf16)          # zero K padding
    for i in range(5):                                        # kernel rows
        xe1_ref[i * 4:(i + 1) * 4, :] = x_ref[:, i * 32: i * 32 + W_xe1]
    acc = jnp.dot(w1_ref[0], xe1_ref[:, 0:W_a1], preferred_element_type=f32)
    for j in range(1, 5):                                     # kernel cols
        acc = acc + jnp.dot(w1_ref[j], xe1_ref[:, j:j + W_a1],
                            preferred_element_type=f32)
    a1_ref[...] = jnp.maximum(acc + b1_ref[...], 0.0)

    # -------- maxpool 2x2/2: max of 4 lane-shifted slices ---------------------
    p1 = jnp.maximum(
        jnp.maximum(a1_ref[0:6, 0:W_p1], a1_ref[0:6, 1:1 + W_p1]),
        jnp.maximum(a1_ref[0:6, 32:32 + W_p1], a1_ref[0:6, 33:33 + W_p1]))
    p1_ref[...] = p1.astype(bf16)

    # -------- conv2 (6->16, 5x5) on the (row=64, col=2) dilated grid ----------
    xe2_ref[30:32, :] = jnp.zeros((2, W_xe2), bf16)           # zero K padding
    for i in range(5):
        xe2_ref[i * 6:(i + 1) * 6, :] = p1_ref[:, i * 64: i * 64 + W_xe2]
    acc = jnp.dot(w2_ref[0], xe2_ref[:, 0:W_c2], preferred_element_type=f32)
    for j in range(1, 5):
        acc = acc + jnp.dot(w2_ref[j], xe2_ref[:, 2 * j: 2 * j + W_c2],
                            preferred_element_type=f32)
    a2_ref[...] = jnp.maximum(acc + b2_ref[...], 0.0)

    # -------- second maxpool 2x2/2 (now on the (row=128, col=4) grid) ---------
    p2 = jnp.maximum(
        jnp.maximum(a2_ref[:, 0:W_p2], a2_ref[:, 2:2 + W_p2]),
        jnp.maximum(a2_ref[:, 64:64 + W_p2], a2_ref[:, 66:66 + W_p2]))
    p2_ref[...] = p2.astype(bf16)

    # -------- flatten: gather the 25 valid 5x5 positions into (400, B) --------
    # fc1 weights are pre-permuted to the (position-major, channel-minor) order
    # used here, so these are plain aligned copies.
    for qh in range(5):
        for qw in range(5):
            p = qh * 5 + qw
            for b in range(B):
                src = b * SZ + qh * 128 + qw * 4
                feat_ref[p * 16:(p + 1) * 16, b:b + 1] = p2_ref[:, src:src + 1]

    # -------- fc1 -> relu -> fc2 -> relu -> fc3 (transposed, N = batch) -------
    h = jnp.dot(wf1_ref[...], feat_ref[...], preferred_element_type=f32)
    h = jnp.maximum(h + bf1_ref[...], 0.0)
    h = jnp.dot(wf2_ref[...], h.astype(bf16), preferred_element_type=f32)
    h = jnp.maximum(h + bf2_ref[...], 0.0)
    h = jnp.dot(wf3_ref[...], h.astype(bf16), preferred_element_type=f32)
    out_ref[...] = h + bf3_ref[...]


# ------------------------------ forward wrapper ------------------------------

def net_forward(packed, x):
    """x: (B, 3, 32, 32) f32 -> logits (B, 3) f32."""
    B, C, H, W = x.shape
    assert (C, H, W) == (3, 32, 32), "Net requires 3x32x32 inputs"
    SZ = H * W                                   # 1024 flat pixels per image
    LX = B * SZ
    # Telescoped lane widths: each stage computes just enough lanes for the
    # next stage's largest shift; with these values no slice is out of bounds
    # and the conv1 slices end exactly at LX.
    W_p2 = (B - 1) * SZ + 4 * 128 + 4 * 4 + 1    # pooled-2 lanes
    W_c2 = W_p2 + 66                             # conv2-out lanes
    W_p1 = W_c2 + 264                            # pooled-1 lanes
    W_a1 = W_p1 + 33                             # conv1-out lanes
    W_xe1 = W_a1 + 4                             # row-expanded conv1 input
    W_xe2 = W_c2 + 8                             # row-expanded conv2 input

    # (B, 3, 32, 32) f32 -> (4, B*1024) bf16 channel-major flat layout.
    # The zero 4th channel keeps the in-kernel row-group stores 4-row aligned.
    xf = jnp.transpose(x, (1, 0, 2, 3)).reshape(3, LX)
    xf = jnp.pad(xf, ((0, 1), (0, 0))).astype(jnp.bfloat16)

    kernel = functools.partial(
        _net_kernel, B=B, SZ=SZ, W_a1=W_a1, W_p1=W_p1, W_c2=W_c2, W_p2=W_p2,
        W_xe1=W_xe1, W_xe2=W_xe2)

    out = pl.pallas_call(
        kernel,
        out_shape=jax.ShapeDtypeStruct((128, B), jnp.float32),
        grid=(1,),
        in_specs=[
            pl.BlockSpec((4, LX), lambda i: (0, 0)),          # x (flat)
            pl.BlockSpec((5, 8, 32), lambda i: (0, 0, 0)),    # conv1 w
            pl.BlockSpec((8, 1), lambda i: (0, 0)),           # conv1 b
            pl.BlockSpec((5, 16, 32), lambda i: (0, 0, 0)),   # conv2 w
            pl.BlockSpec((16, 1), lambda i: (0, 0)),          # conv2 b
            pl.BlockSpec((128, 400), lambda i: (0, 0)),       # fc1 w (permuted)
            pl.BlockSpec((128, 1), lambda i: (0, 0)),         # fc1 b
            pl.BlockSpec((128, 128), lambda i: (0, 0)),       # fc2 w^T
            pl.BlockSpec((128, 1), lambda i: (0, 0)),         # fc2 b
            pl.BlockSpec((128, 128), lambda i: (0, 0)),       # fc3 w^T
            pl.BlockSpec((128, 1), lambda i: (0, 0)),         # fc3 b
        ],
        out_specs=pl.BlockSpec((128, B), lambda i: (0, 0)),
        scratch_shapes=[
            pltpu.VMEM((32, W_xe1), jnp.bfloat16),   # xe1 (row-expanded x)
            pltpu.VMEM((8, W_a1), jnp.float32),      # conv1 out (f32)
            pltpu.VMEM((6, W_p1), jnp.bfloat16),     # pooled-1 (bf16)
            pltpu.VMEM((32, W_xe2), jnp.bfloat16),   # xe2 (row-expanded p1)
            pltpu.VMEM((16, W_c2), jnp.float32),     # conv2 out (f32)
            pltpu.VMEM((16, W_p2), jnp.bfloat16),    # pooled-2 (bf16)
            pltpu.VMEM((400, B), jnp.bfloat16),      # flattened features
        ],
        compiler_params=pltpu.CompilerParams(
            dimension_semantics=("arbitrary",)),
    )(xf, packed["c1w"], packed["c1b"], packed["c2w"], packed["c2b"],
      packed["fc1_w"], packed["fc1_b"], packed["fc2_w"], packed["fc2_b"],
      packed["fc3_w"], packed["fc3_b"])

    return out[:3, :].T                           # (B, 3) logits


# ----------------------------- Net definition -------------------------------

def init_params(key):
    """PyTorch-style default init U(-1/sqrt(fan_in), +1/sqrt(fan_in))."""
    def uni(k, shape, fan_in):
        bound = 1.0 / (fan_in ** 0.5)
        return jax.random.uniform(k, shape, jnp.float32, -bound, bound)

    ks = jax.random.split(key, 10)
    return {
        "conv1_w": uni(ks[0], (6, 3, 5, 5), 3 * 5 * 5),
        "conv1_b": uni(ks[1], (6,), 3 * 5 * 5),
        "conv2_w": uni(ks[2], (16, 6, 5, 5), 6 * 5 * 5),
        "conv2_b": uni(ks[3], (16,), 6 * 5 * 5),
        "fc1_w": uni(ks[4], (16 * 5 * 5, 120), 16 * 5 * 5),
        "fc1_b": uni(ks[5], (120,), 16 * 5 * 5),
        "fc2_w": uni(ks[6], (120, 84), 120),
        "fc2_b": uni(ks[7], (84,), 120),
        "fc3_w": uni(ks[8], (84, 3), 84),
        "fc3_b": uni(ks[9], (3,), 84),
    }


def prepare_params(params):
    """One-time packing: kernel-column-major conv weights, permuted/transposed
    FC weights, zero-padded to MXU-friendly K, bf16 matmul operands, f32 bias."""
    f32, bf16 = jnp.float32, jnp.bfloat16

    # conv1: (oc,c,i,j) -> w1[j, oc, i*4 + c], oc 6->8, c 3->4, K 20->32.
    c1 = jnp.transpose(params["conv1_w"], (3, 0, 2, 1))        # (5, 6, 5, 3)
    c1 = jnp.pad(c1, ((0, 0), (0, 2), (0, 0), (0, 1)))         # (5, 8, 5, 4)
    c1 = jnp.pad(c1.reshape(5, 8, 20), ((0, 0), (0, 0), (0, 12)))
    c1b = jnp.pad(params["conv1_b"], (0, 2)).reshape(8, 1)

    # conv2: (oc,c,i,j) -> w2[j, oc, i*6 + c], K 30->32.
    c2 = jnp.transpose(params["conv2_w"], (3, 0, 2, 1)).reshape(5, 16, 30)
    c2 = jnp.pad(c2, ((0, 0), (0, 0), (0, 2)))
    c2b = params["conv2_b"].reshape(16, 1)

    # fc1: (400,120) -> w[n, p*16 + c] with p = qh*5 + qw (torch flatten is
    # f = c*25 + p); rows padded 120 -> 128.
    f1 = params["fc1_w"].reshape(16, 25, 120)                  # [c, p, n]
    f1 = jnp.transpose(f1, (2, 1, 0)).reshape(120, 400)        # [n, p*16 + c]
    f1 = jnp.pad(f1, ((0, 8), (0, 0)))
    f1b = jnp.pad(params["fc1_b"], (0, 8)).reshape(128, 1)

    f2 = jnp.pad(params["fc2_w"].T, ((0, 44), (0, 8)))         # (128, 128)
    f2b = jnp.pad(params["fc2_b"], (0, 44)).reshape(128, 1)

    f3 = jnp.pad(params["fc3_w"].T, ((0, 125), (0, 44)))       # (128, 128)
    f3b = jnp.pad(params["fc3_b"], (0, 125)).reshape(128, 1)

    return {
        "c1w": c1.astype(bf16), "c1b": c1b.astype(f32),
        "c2w": c2.astype(bf16), "c2b": c2b.astype(f32),
        "fc1_w": f1.astype(bf16), "fc1_b": f1b.astype(f32),
        "fc2_w": f2.astype(bf16), "fc2_b": f2b.astype(f32),
        "fc3_w": f3.astype(bf16), "fc3_b": f3b.astype(f32),
    }


# --------------------------- pure-JAX reference ------------------------------

def reference_forward(params, x):
    dn = ("NCHW", "OIHW", "NCHW")
    y = lax.conv_general_dilated(x, params["conv1_w"], (1, 1), "VALID",
                                 dimension_numbers=dn)
    y = jax.nn.relu(y + params["conv1_b"].reshape(1, 6, 1, 1))
    y = lax.reduce_window(y, -jnp.inf, lax.max, (1, 1, 2, 2), (1, 1, 2, 2), "VALID")
    y = lax.conv_general_dilated(y, params["conv2_w"], (1, 1), "VALID",
                                 dimension_numbers=dn)
    y = jax.nn.relu(y + params["conv2_b"].reshape(1, 16, 1, 1))
    y = lax.reduce_window(y, -jnp.inf, lax.max, (1, 1, 2, 2), (1, 1, 2, 2), "VALID")
    y = y.reshape(y.shape[0], -1)
    y = jax.nn.relu(y @ params["fc1_w"] + params["fc1_b"])
    y = jax.nn.relu(y @ params["fc2_w"] + params["fc2_b"])
    return y @ params["fc3_w"] + params["fc3_b"]


if __name__ == "__main__":
    key = jax.random.PRNGKey(0)
    pkey, xkey = jax.random.split(key)
    params = init_params(pkey)
    packed = prepare_params(params)
    # Module implies 3x32x32 inputs (16*5*5 flatten after two conv+pool stages).
    x = jax.random.normal(xkey, (2, 3, 32, 32), dtype=jnp.float32)

    fwd = jax.jit(net_forward)
    logits = fwd(packed, x)
    jax.block_until_ready(logits)
    assert logits.shape == (2, 3) and logits.dtype == jnp.float32

    ref = reference_forward(params, x)
    err = float(jnp.max(jnp.abs(logits - ref)))
    assert err < 1e-1, f"mismatch vs f32 reference: max abs err = {err}"
    print("KERNEL_OK")
</pallas_src>

<mosaic_0001>
module attributes {stable_mosaic.version = 11 : i64} {
  func.func @_net_kernel(%arg0: i32, %arg1: memref<4x2048xbf16, #tpu.memory_space<vmem>>, %arg2: memref<5x8x32xbf16, #tpu.memory_space<vmem>>, %arg3: memref<8x1xf32, #tpu.memory_space<vmem>>, %arg4: memref<5x16x32xbf16, #tpu.memory_space<vmem>>, %arg5: memref<16x1xf32, #tpu.memory_space<vmem>>, %arg6: memref<128x400xbf16, #tpu.memory_space<vmem>>, %arg7: memref<128x1xf32, #tpu.memory_space<vmem>>, %arg8: memref<128x128xbf16, #tpu.memory_space<vmem>>, %arg9: memref<128x1xf32, #tpu.memory_space<vmem>>, %arg10: memref<128x128xbf16, #tpu.memory_space<vmem>>, %arg11: memref<128x1xf32, #tpu.memory_space<vmem>>, %arg12: memref<128x2xf32, #tpu.memory_space<vmem>>, %arg13: memref<32x1920xbf16, #tpu.memory_space<vmem>>, %arg14: memref<8x1916xf32, #tpu.memory_space<vmem>>, %arg15: memref<6x1883xbf16, #tpu.memory_space<vmem>>, %arg16: memref<32x1627xbf16, #tpu.memory_space<vmem>>, %arg17: memref<16x1619xf32, #tpu.memory_space<vmem>>, %arg18: memref<16x1553xbf16, #tpu.memory_space<vmem>>, %arg19: memref<400x2xbf16, #tpu.memory_space<vmem>>) attributes {dimension_semantics = [#tpu.dimension_semantics<arbitrary>], iteration_bounds = array<i64: 1>, scalar_prefetch = 0 : i64, scratch_operands = 7 : i64, tpu.core_type = #tpu.core_type<tc>, window_params = [{pipeline_mode = #tpu.pipeline_mode<synchronous>, transform_indices = @transform_0, window_bounds = array<i64: 4, 2048>}, {pipeline_mode = #tpu.pipeline_mode<synchronous>, transform_indices = @transform_1, window_bounds = array<i64: 5, 8, 32>}, {pipeline_mode = #tpu.pipeline_mode<synchronous>, transform_indices = @transform_2, window_bounds = array<i64: 8, 1>}, {pipeline_mode = #tpu.pipeline_mode<synchronous>, transform_indices = @transform_3, window_bounds = array<i64: 5, 16, 32>}, {pipeline_mode = #tpu.pipeline_mode<synchronous>, transform_indices = @transform_4, window_bounds = array<i64: 16, 1>}, {pipeline_mode = #tpu.pipeline_mode<synchronous>, transform_indices = @transform_5, window_bounds = array<i64: 128, 400>}, {pipeline_mode = #tpu.pipeline_mode<synchronous>, transform_indices = @transform_6, window_bounds = array<i64: 128, 1>}, {pipeline_mode = #tpu.pipeline_mode<synchronous>, transform_indices = @transform_7, window_bounds = array<i64: 128, 128>}, {pipeline_mode = #tpu.pipeline_mode<synchronous>, transform_indices = @transform_8, window_bounds = array<i64: 128, 1>}, {pipeline_mode = #tpu.pipeline_mode<synchronous>, transform_indices = @transform_9, window_bounds = array<i64: 128, 128>}, {pipeline_mode = #tpu.pipeline_mode<synchronous>, transform_indices = @transform_10, window_bounds = array<i64: 128, 1>}, {pipeline_mode = #tpu.pipeline_mode<synchronous>, transform_indices = @transform_11, window_bounds = array<i64: 128, 2>}]} {
    %cst = arith.constant 0.000000e+00 : bf16
    %0 = vector.broadcast %cst : bf16 to vector<12x1920xbf16>
    %c20 = arith.constant 20 : index
    %c0 = arith.constant 0 : index
    %1 = vector.load %arg13[%c20, %c0] : memref<32x1920xbf16, #tpu.memory_space<vmem>>, vector<12x1920xbf16>
    tpu.vector_store %arg13[%c20, %c0], %0 {strides = array<i32>} : memref<32x1920xbf16, #tpu.memory_space<vmem>>, vector<12x1920xbf16>,
    %c0_0 = arith.constant 0 : index
    %c0_1 = arith.constant 0 : index
    %2 = vector.load %arg1[%c0_0, %c0_1] : memref<4x2048xbf16, #tpu.memory_space<vmem>>, vector<4x1920xbf16>
    %c0_2 = arith.constant 0 : index
    %c0_3 = arith.constant 0 : index
    %3 = vector.load %arg13[%c0_2, %c0_3] : memref<32x1920xbf16, #tpu.memory_space<vmem>>, vector<4x1920xbf16>
    tpu.vector_store %arg13[%c0_2, %c0_3], %2 {strides = array<i32>} : memref<32x1920xbf16, #tpu.memory_space<vmem>>, vector<4x1920xbf16>,
    %c0_4 = arith.constant 0 : index
    %c32 = arith.constant 32 : index
    %4 = vector.load %arg1[%c0_4, %c32] : memref<4x2048xbf16, #tpu.memory_space<vmem>>, vector<4x1920xbf16>
    %c4 = arith.constant 4 : index
    %c0_5 = arith.constant 0 : index
    %5 = vector.load %arg13[%c4, %c0_5] : memref<32x1920xbf16, #tpu.memory_space<vmem>>, vector<4x1920xbf16>
    tpu.vector_store %arg13[%c4, %c0_5], %4 {strides = array<i32>} : memref<32x1920xbf16, #tpu.memory_space<vmem>>, vector<4x1920xbf16>,
    %c0_6 = arith.constant 0 : index
    %c64 = arith.constant 64 : index
    %6 = vector.load %arg1[%c0_6, %c64] : memref<4x2048xbf16, #tpu.memory_space<vmem>>, vector<4x1920xbf16>
    %c8 = arith.constant 8 : index
    %c0_7 = arith.constant 0 : index
    %7 = vector.load %arg13[%c8, %c0_7] : memref<32x1920xbf16, #tpu.memory_space<vmem>>, vector<4x1920xbf16>
    tpu.vector_store %arg13[%c8, %c0_7], %6 {strides = array<i32>} : memref<32x1920xbf16, #tpu.memory_space<vmem>>, vector<4x1920xbf16>,
    %c0_8 = arith.constant 0 : index
    %c96 = arith.constant 96 : index
    %8 = vector.load %arg1[%c0_8, %c96] : memref<4x2048xbf16, #tpu.memory_space<vmem>>, vector<4x1920xbf16>
    %c12 = arith.constant 12 : index
    %c0_9 = arith.constant 0 : index
    %9 = vector.load %arg13[%c12, %c0_9] : memref<32x1920xbf16, #tpu.memory_space<vmem>>, vector<4x1920xbf16>
    tpu.vector_store %arg13[%c12, %c0_9], %8 {strides = array<i32>} : memref<32x1920xbf16, #tpu.memory_space<vmem>>, vector<4x1920xbf16>,
    %c0_10 = arith.constant 0 : index
    %c128 = arith.constant 128 : index
    %10 = vector.load %arg1[%c0_10, %c128] : memref<4x2048xbf16, #tpu.memory_space<vmem>>, vector<4x1920xbf16>
    %c16 = arith.constant 16 : index
    %c0_11 = arith.constant 0 : index
    %11 = vector.load %arg13[%c16, %c0_11] : memref<32x1920xbf16, #tpu.memory_space<vmem>>, vector<4x1920xbf16>
    tpu.vector_store %arg13[%c16, %c0_11], %10 {strides = array<i32>} : memref<32x1920xbf16, #tpu.memory_space<vmem>>, vector<4x1920xbf16>,
    %c0_12 = arith.constant 0 : index
    %c0_13 = arith.constant 0 : index
    %c0_14 = arith.constant 0 : index
    %12 = vector.load %arg2[%c0_12, %c0_13, %c0_14] : memref<5x8x32xbf16, #tpu.memory_space<vmem>>, vector<1x8x32xbf16>
    %13 = vector.shape_cast %12 : vector<1x8x32xbf16> to vector<8x32xbf16>
    %c0_15 = arith.constant 0 : index
    %c0_16 = arith.constant 0 : index
    %14 = vector.load %arg13[%c0_15, %c0_16] : memref<32x1920xbf16, #tpu.memory_space<vmem>>, vector<32x1916xbf16>
    %cst_17 = arith.constant dense<0.000000e+00> : vector<8x1916xf32>
    %15 = tpu.matmul %13, %14, %cst_17 {dimension_numbers = #tpu.dot_dimension_numbers<[1], [0], [0], [1], [0, 0, 1, 1], [], []>} : vector<8x32xbf16>, vector<32x1916xbf16>, vector<8x1916xf32> -> vector<8x1916xf32>
    %c1 = arith.constant 1 : index
    %c0_18 = arith.constant 0 : index
    %c0_19 = arith.constant 0 : index
    %16 = vector.load %arg2[%c1, %c0_18, %c0_19] : memref<5x8x32xbf16, #tpu.memory_space<vmem>>, vector<1x8x32xbf16>
    %17 = vector.shape_cast %16 : vector<1x8x32xbf16> to vector<8x32xbf16>
    %c0_20 = arith.constant 0 : index
    %c1_21 = arith.constant 1 : index
    %18 = vector.load %arg13[%c0_20, %c1_21] : memref<32x1920xbf16, #tpu.memory_space<vmem>>, vector<32x1916xbf16>
    %cst_22 = arith.constant dense<0.000000e+00> : vector<8x1916xf32>
    %19 = tpu.matmul %17, %18, %cst_22 {dimension_numbers = #tpu.dot_dimension_numbers<[1], [0], [0], [1], [0, 0, 1, 1], [], []>} : vector<8x32xbf16>, vector<32x1916xbf16>, vector<8x1916xf32> -> vector<8x1916xf32>
    %20 = arith.addf %15, %19 : vector<8x1916xf32>
    %c2 = arith.constant 2 : index
    %c0_23 = arith.constant 0 : index
    %c0_24 = arith.constant 0 : index
    %21 = vector.load %arg2[%c2, %c0_23, %c0_24] : memref<5x8x32xbf16, #tpu.memory_space<vmem>>, vector<1x8x32xbf16>
    %22 = vector.shape_cast %21 : vector<1x8x32xbf16> to vector<8x32xbf16>
    %c0_25 = arith.constant 0 : index
    %c2_26 = arith.constant 2 : index
    %23 = vector.load %arg13[%c0_25, %c2_26] : memref<32x1920xbf16, #tpu.memory_space<vmem>>, vector<32x1916xbf16>
    %cst_27 = arith.constant dense<0.000000e+00> : vector<8x1916xf32>
    %24 = tpu.matmul %22, %23, %cst_27 {dimension_numbers = #tpu.dot_dimension_numbers<[1], [0], [0], [1], [0, 0, 1, 1], [], []>} : vector<8x32xbf16>, vector<32x1916xbf16>, vector<8x1916xf32> -> vector<8x1916xf32>
    %25 = arith.addf %20, %24 : vector<8x1916xf32>
    %c3 = arith.constant 3 : index
    %c0_28 = arith.constant 0 : index
    %c0_29 = arith.constant 0 : index
    %26 = vector.load %arg2[%c3, %c0_28, %c0_29] : memref<5x8x32xbf16, #tpu.memory_space<vmem>>, vector<1x8x32xbf16>
    %27 = vector.shape_cast %26 : vector<1x8x32xbf16> to vector<8x32xbf16>
    %c0_30 = arith.constant 0 : index
    %c3_31 = arith.constant 3 : index
    %28 = vector.load %arg13[%c0_30, %c3_31] : memref<32x1920xbf16, #tpu.memory_space<vmem>>, vector<32x1916xbf16>
    %cst_32 = arith.constant dense<0.000000e+00> : vector<8x1916xf32>
    %29 = tpu.matmul %27, %28, %cst_32 {dimension_numbers = #tpu.dot_dimension_numbers<[1], [0], [0], [1], [0, 0, 1, 1], [], []>} : vector<8x32xbf16>, vector<32x1916xbf16>, vector<8x1916xf32> -> vector<8x1916xf32>
    %30 = arith.addf %25, %29 : vector<8x1916xf32>
    %c4_33 = arith.constant 4 : index
    %c0_34 = arith.constant 0 : index
    %c0_35 = arith.constant 0 : index
    %31 = vector.load %arg2[%c4_33, %c0_34, %c0_35] : memref<5x8x32xbf16, #tpu.memory_space<vmem>>, vector<1x8x32xbf16>
    %32 = vector.shape_cast %31 : vector<1x8x32xbf16> to vector<8x32xbf16>
    %c0_36 = arith.constant 0 : index
    %c4_37 = arith.constant 4 : index
    %33 = vector.load %arg13[%c0_36, %c4_37] : memref<32x1920xbf16, #tpu.memory_space<vmem>>, vector<32x1916xbf16>
    %cst_38 = arith.constant dense<0.000000e+00> : vector<8x1916xf32>
    %34 = tpu.matmul %32, %33, %cst_38 {dimension_numbers = #tpu.dot_dimension_numbers<[1], [0], [0], [1], [0, 0, 1, 1], [], []>} : vector<8x32xbf16>, vector<32x1916xbf16>, vector<8x1916xf32> -> vector<8x1916xf32>
    %35 = arith.addf %30, %34 : vector<8x1916xf32>
    %c0_39 = arith.constant 0 : index
    %c0_40 = arith.constant 0 : index
    %36 = vector.load %arg3[%c0_39, %c0_40] : memref<8x1xf32, #tpu.memory_space<vmem>>, vector<8x1xf32>
    %37 = vector.broadcast %36 : vector<8x1xf32> to vector<8x1916xf32>
    %38 = arith.addf %35, %37 : vector<8x1916xf32>
    %cst_41 = arith.constant 0.000000e+00 : f32
    %39 = vector.broadcast %cst_41 : f32 to vector<8x1916xf32>
    %40 = arith.maximumf %38, %39 : vector<8x1916xf32>
    %c0_42 = arith.constant 0 : index
    %c0_43 = arith.constant 0 : index
    %41 = vector.load %arg14[%c0_42, %c0_43] : memref<8x1916xf32, #tpu.memory_space<vmem>>, vector<8x1916xf32>
    tpu.vector_store %arg14[%c0_42, %c0_43], %40 {strides = array<i32>} : memref<8x1916xf32, #tpu.memory_space<vmem>>, vector<8x1916xf32>,
    %c0_44 = arith.constant 0 : index
    %c0_45 = arith.constant 0 : index
    %42 = vector.load %arg14[%c0_44, %c0_45] : memref<8x1916xf32, #tpu.memory_space<vmem>>, vector<6x1883xf32>
    %c0_46 = arith.constant 0 : index
    %c1_47 = arith.constant 1 : index
    %43 = vector.load %arg14[%c0_46, %c1_47] : memref<8x1916xf32, #tpu.memory_space<vmem>>, vector<6x1883xf32>
    %44 = arith.maximumf %42, %43 : vector<6x1883xf32>
    %c0_48 = arith.constant 0 : index
    %c32_49 = arith.constant 32 : index
    %45 = vector.load %arg14[%c0_48, %c32_49] : memref<8x1916xf32, #tpu.memory_space<vmem>>, vector<6x1883xf32>
    %c0_50 = arith.constant 0 : index
    %c33 = arith.constant 33 : index
    %46 = vector.load %arg14[%c0_50, %c33] : memref<8x1916xf32, #tpu.memory_space<vmem>>, vector<6x1883xf32>
    %47 = arith.maximumf %45, %46 : vector<6x1883xf32>
    %48 = arith.maximumf %44, %47 : vector<6x1883xf32>
    %49 = arith.truncf %48 : vector<6x1883xf32> to vector<6x1883xbf16>
    %c0_51 = arith.constant 0 : index
    %c0_52 = arith.constant 0 : index
    %50 = vector.load %arg15[%c0_51, %c0_52] : memref<6x1883xbf16, #tpu.memory_space<vmem>>, vector<6x1883xbf16>
    tpu.vector_store %arg15[%c0_51, %c0_52], %49 {strides = array<i32>} : memref<6x1883xbf16, #tpu.memory_space<vmem>>, vector<6x1883xbf16>,
    %cst_53 = arith.constant 0.000000e+00 : bf16
    %51 = vector.broadcast %cst_53 : bf16 to vector<2x1627xbf16>
    %c30 = arith.constant 30 : index
    %c0_54 = arith.constant 0 : index
    %52 = vector.load %arg16[%c30, %c0_54] : memref<32x1627xbf16, #tpu.memory_space<vmem>>, vector<2x1627xbf16>
    tpu.vector_store %arg16[%c30, %c0_54], %51 {strides = array<i32>} : memref<32x1627xbf16, #tpu.memory_space<vmem>>, vector<2x1627xbf16>,
    %c0_55 = arith.constant 0 : index
    %c0_56 = arith.constant 0 : index
    %53 = vector.load %arg15[%c0_55, %c0_56] : memref<6x1883xbf16, #tpu.memory_space<vmem>>, vector<6x1627xbf16>
    %c0_57 = arith.constant 0 : index
    %c0_58 = arith.constant 0 : index
    %54 = vector.load %arg16[%c0_57, %c0_58] : memref<32x1627xbf16, #tpu.memory_space<vmem>>, vector<6x1627xbf16>
    tpu.vector_store %arg16[%c0_57, %c0_58], %53 {strides = array<i32>} : memref<32x1627xbf16, #tpu.memory_space<vmem>>, vector<6x1627xbf16>,
    %c0_59 = arith.constant 0 : index
    %c64_60 = arith.constant 64 : index
    %55 = vector.load %arg15[%c0_59, %c64_60] : memref<6x1883xbf16, #tpu.memory_space<vmem>>, vector<6x1627xbf16>
    %c6 = arith.constant 6 : index
    %c0_61 = arith.constant 0 : index
    %56 = vector.load %arg16[%c6, %c0_61] : memref<32x1627xbf16, #tpu.memory_space<vmem>>, vector<6x1627xbf16>
    tpu.vector_store %arg16[%c6, %c0_61], %55 {strides = array<i32>} : memref<32x1627xbf16, #tpu.memory_space<vmem>>, vector<6x1627xbf16>,
    %c0_62 = arith.constant 0 : index
    %c128_63 = arith.constant 128 : index
    %57 = vector.load %arg15[%c0_62, %c128_63] : memref<6x1883xbf16, #tpu.memory_space<vmem>>, vector<6x1627xbf16>
    %c12_64 = arith.constant 12 : index
    %c0_65 = arith.constant 0 : index
    %58 = vector.load %arg16[%c12_64, %c0_65] : memref<32x1627xbf16, #tpu.memory_space<vmem>>, vector<6x1627xbf16>
    tpu.vector_store %arg16[%c12_64, %c0_65], %57 {strides = array<i32>} : memref<32x1627xbf16, #tpu.memory_space<vmem>>, vector<6x1627xbf16>,
    %c0_66 = arith.constant 0 : index
    %c192 = arith.constant 192 : index
    %59 = vector.load %arg15[%c0_66, %c192] : memref<6x1883xbf16, #tpu.memory_space<vmem>>, vector<6x1627xbf16>
    %c18 = arith.constant 18 : index
    %c0_67 = arith.constant 0 : index
    %60 = vector.load %arg16[%c18, %c0_67] : memref<32x1627xbf16, #tpu.memory_space<vmem>>, vector<6x1627xbf16>
    tpu.vector_store %arg16[%c18, %c0_67], %59 {strides = array<i32>} : memref<32x1627xbf16, #tpu.memory_space<vmem>>, vector<6x1627xbf16>,
    %c0_68 = arith.constant 0 : index
    %c256 = arith.constant 256 : index
    %61 = vector.load %arg15[%c0_68, %c256] : memref<6x1883xbf16, #tpu.memory_space<vmem>>, vector<6x1627xbf16>
    %c24 = arith.constant 24 : index
    %c0_69 = arith.constant 0 : index
    %62 = vector.load %arg16[%c24, %c0_69] : memref<32x1627xbf16, #tpu.memory_space<vmem>>, vector<6x1627xbf16>
    tpu.vector_store %arg16[%c24, %c0_69], %61 {strides = array<i32>} : memref<32x1627xbf16, #tpu.memory_space<vmem>>, vector<6x1627xbf16>,
    %c0_70 = arith.constant 0 : index
    %c0_71 = arith.constant 0 : index
    %c0_72 = arith.constant 0 : index
    %63 = vector.load %arg4[%c0_70, %c0_71, %c0_72] : memref<5x16x32xbf16, #tpu.memory_space<vmem>>, vector<1x16x32xbf16>
    %64 = vector.shape_cast %63 : vector<1x16x32xbf16> to vector<16x32xbf16>
    %c0_73 = arith.constant 0 : index
    %c0_74 = arith.constant 0 : index
    %65 = vector.load %arg16[%c0_73, %c0_74] : memref<32x1627xbf16, #tpu.memory_space<vmem>>, vector<32x1619xbf16>
    %cst_75 = arith.constant dense<0.000000e+00> : vector<16x1619xf32>
    %66 = tpu.matmul %64, %65, %cst_75 {dimension_numbers = #tpu.dot_dimension_numbers<[1], [0], [0], [1], [0, 0, 1, 1], [], []>} : vector<16x32xbf16>, vector<32x1619xbf16>, vector<16x1619xf32> -> vector<16x1619xf32>
    %c1_76 = arith.constant 1 : index
    %c0_77 = arith.constant 0 : index
    %c0_78 = arith.constant 0 : index
    %67 = vector.load %arg4[%c1_76, %c0_77, %c0_78] : memref<5x16x32xbf16, #tpu.memory_space<vmem>>, vector<1x16x32xbf16>
    %68 = vector.shape_cast %67 : vector<1x16x32xbf16> to vector<16x32xbf16>
    %c0_79 = arith.constant 0 : index
    %c2_80 = arith.constant 2 : index
    %69 = vector.load %arg16[%c0_79, %c2_80] : memref<32x1627xbf16, #tpu.memory_space<vmem>>, vector<32x1619xbf16>
    %cst_81 = arith.constant dense<0.000000e+00> : vector<16x1619xf32>
    %70 = tpu.matmul %68, %69, %cst_81 {dimension_numbers = #tpu.dot_dimension_numbers<[1], [0], [0], [1], [0, 0, 1, 1], [], []>} : vector<16x32xbf16>, vector<32x1619xbf16>, vector<16x1619xf32> -> vector<16x1619xf32>
    %71 = arith.addf %66, %70 : vector<16x1619xf32>
    %c2_82 = arith.constant 2 : index
    %c0_83 = arith.constant 0 : index
    %c0_84 = arith.constant 0 : index
    %72 = vector.load %arg4[%c2_82, %c0_83, %c0_84] : memref<5x16x32xbf16, #tpu.memory_space<vmem>>, vector<1x16x32xbf16>
    %73 = vector.shape_cast %72 : vector<1x16x32xbf16> to vector<16x32xbf16>
    %c0_85 = arith.constant 0 : index
    %c4_86 = arith.constant 4 : index
    %74 = vector.load %arg16[%c0_85, %c4_86] : memref<32x1627xbf16, #tpu.memory_space<vmem>>, vector<32x1619xbf16>
    %cst_87 = arith.constant dense<0.000000e+00> : vector<16x1619xf32>
    %75 = tpu.matmul %73, %74, %cst_87 {dimension_numbers = #tpu.dot_dimension_numbers<[1], [0], [0], [1], [0, 0, 1, 1], [], []>} : vector<16x32xbf16>, vector<32x1619xbf16>, vector<16x1619xf32> -> vector<16x1619xf32>
    %76 = arith.addf %71, %75 : vector<16x1619xf32>
    %c3_88 = arith.constant 3 : index
    %c0_89 = arith.constant 0 : index
    %c0_90 = arith.constant 0 : index
    %77 = vector.load %arg4[%c3_88, %c0_89, %c0_90] : memref<5x16x32xbf16, #tpu.memory_space<vmem>>, vector<1x16x32xbf16>
    %78 = vector.shape_cast %77 : vector<1x16x32xbf16> to vector<16x32xbf16>
    %c0_91 = arith.constant 0 : index
    %c6_92 = arith.constant 6 : index
    %79 = vector.load %arg16[%c0_91, %c6_92] : memref<32x1627xbf16, #tpu.memory_space<vmem>>, vector<32x1619xbf16>
    %cst_93 = arith.constant dense<0.000000e+00> : vector<16x1619xf32>
    %80 = tpu.matmul %78, %79, %cst_93 {dimension_numbers = #tpu.dot_dimension_numbers<[1], [0], [0], [1], [0, 0, 1, 1], [], []>} : vector<16x32xbf16>, vector<32x1619xbf16>, vector<16x1619xf32> -> vector<16x1619xf32>
    %81 = arith.addf %76, %80 : vector<16x1619xf32>
    %c4_94 = arith.constant 4 : index
    %c0_95 = arith.constant 0 : index
    %c0_96 = arith.constant 0 : index
    %82 = vector.load %arg4[%c4_94, %c0_95, %c0_96] : memref<5x16x32xbf16, #tpu.memory_space<vmem>>, vector<1x16x32xbf16>
    %83 = vector.shape_cast %82 : vector<1x16x32xbf16> to vector<16x32xbf16>
    %c0_97 = arith.constant 0 : index
    %c8_98 = arith.constant 8 : index
    %84 = vector.load %arg16[%c0_97, %c8_98] : memref<32x1627xbf16, #tpu.memory_space<vmem>>, vector<32x1619xbf16>
    %cst_99 = arith.constant dense<0.000000e+00> : vector<16x1619xf32>
    %85 = tpu.matmul %83, %84, %cst_99 {dimension_numbers = #tpu.dot_dimension_numbers<[1], [0], [0], [1], [0, 0, 1, 1], [], []>} : vector<16x32xbf16>, vector<32x1619xbf16>, vector<16x1619xf32> -> vector<16x1619xf32>
    %86 = arith.addf %81, %85 : vector<16x1619xf32>
    %c0_100 = arith.constant 0 : index
    %c0_101 = arith.constant 0 : index
    %87 = vector.load %arg5[%c0_100, %c0_101] : memref<16x1xf32, #tpu.memory_space<vmem>>, vector<16x1xf32>
    %88 = vector.broadcast %87 : vector<16x1xf32> to vector<16x1619xf32>
    %89 = arith.addf %86, %88 : vector<16x1619xf32>
    %cst_102 = arith.constant 0.000000e+00 : f32
    %90 = vector.broadcast %cst_102 : f32 to vector<16x1619xf32>
    %91 = arith.maximumf %89, %90 : vector<16x1619xf32>
    %c0_103 = arith.constant 0 : index
    %c0_104 = arith.constant 0 : index
    %92 = vector.load %arg17[%c0_103, %c0_104] : memref<16x1619xf32, #tpu.memory_space<vmem>>, vector<16x1619xf32>
    tpu.vector_store %arg17[%c0_103, %c0_104], %91 {strides = array<i32>} : memref<16x1619xf32, #tpu.memory_space<vmem>>, vector<16x1619xf32>,
    %c0_105 = arith.constant 0 : index
    %c0_106 = arith.constant 0 : index
    %93 = vector.load %arg17[%c0_105, %c0_106] : memref<16x1619xf32, #tpu.memory_space<vmem>>, vector<16x1553xf32>
    %c0_107 = arith.constant 0 : index
    %c2_108 = arith.constant 2 : index
    %94 = vector.load %arg17[%c0_107, %c2_108] : memref<16x1619xf32, #tpu.memory_space<vmem>>, vector<16x1553xf32>
    %95 = arith.maximumf %93, %94 : vector<16x1553xf32>
    %c0_109 = arith.constant 0 : index
    %c64_110 = arith.constant 64 : index
    %96 = vector.load %arg17[%c0_109, %c64_110] : memref<16x1619xf32, #tpu.memory_space<vmem>>, vector<16x1553xf32>
    %c0_111 = arith.constant 0 : index
    %c66 = arith.constant 66 : index
    %97 = vector.load %arg17[%c0_111, %c66] : memref<16x1619xf32, #tpu.memory_space<vmem>>, vector<16x1553xf32>
    %98 = arith.maximumf %96, %97 : vector<16x1553xf32>
    %99 = arith.maximumf %95, %98 : vector<16x1553xf32>
    %100 = arith.truncf %99 : vector<16x1553xf32> to vector<16x1553xbf16>
    %c0_112 = arith.constant 0 : index
    %c0_113 = arith.constant 0 : index
    %101 = vector.load %arg18[%c0_112, %c0_113] : memref<16x1553xbf16, #tpu.memory_space<vmem>>, vector<16x1553xbf16>
    tpu.vector_store %arg18[%c0_112, %c0_113], %100 {strides = array<i32>} : memref<16x1553xbf16, #tpu.memory_space<vmem>>, vector<16x1553xbf16>,
    %c0_114 = arith.constant 0 : index
    %c0_115 = arith.constant 0 : index
    %102 = vector.load %arg18[%c0_114, %c0_115] : memref<16x1553xbf16, #tpu.memory_space<vmem>>, vector<16x1xbf16>
    %c0_116 = arith.constant 0 : index
    %c0_117 = arith.constant 0 : index
    %103 = vector.load %arg19[%c0_116, %c0_117] : memref<400x2xbf16, #tpu.memory_space<vmem>>, vector<16x1xbf16>
    tpu.vector_store %arg19[%c0_116, %c0_117], %102 {strides = array<i32>} : memref<400x2xbf16, #tpu.memory_space<vmem>>, vector<16x1xbf16>,
    %c0_118 = arith.constant 0 : index
    %c1024 = arith.constant 1024 : index
    %104 = vector.load %arg18[%c0_118, %c1024] : memref<16x1553xbf16, #tpu.memory_space<vmem>>, vector<16x1xbf16>
    %c0_119 = arith.constant 0 : index
    %c1_120 = arith.constant 1 : index
    %105 = vector.load %arg19[%c0_119, %c1_120] : memref<400x2xbf16, #tpu.memory_space<vmem>>, vector<16x1xbf16>
    tpu.vector_store %arg19[%c0_119, %c1_120], %104 {strides = array<i32>} : memref<400x2xbf16, #tpu.memory_space<vmem>>, vector<16x1xbf16>,
    %c0_121 = arith.constant 0 : index
    %c4_122 = arith.constant 4 : index
    %106 = vector.load %arg18[%c0_121, %c4_122] : memref<16x1553xbf16, #tpu.memory_space<vmem>>, vector<16x1xbf16>
    %c16_123 = arith.constant 16 : index
    %c0_124 = arith.constant 0 : index
    %107 = vector.load %arg19[%c16_123, %c0_124] : memref<400x2xbf16, #tpu.memory_space<vmem>>, vector<16x1xbf16>
    tpu.vector_store %arg19[%c16_123, %c0_124], %106 {strides = array<i32>} : memref<400x2xbf16, #tpu.memory_space<vmem>>, vector<16x1xbf16>,
    %c0_125 = arith.constant 0 : index
    %c1028 = arith.constant 1028 : index
    %108 = vector.load %arg18[%c0_125, %c1028] : memref<16x1553xbf16, #tpu.memory_space<vmem>>, vector<16x1xbf16>
    %c16_126 = arith.constant 16 : index
    %c1_127 = arith.constant 1 : index
    %109 = vector.load %arg19[%c16_126, %c1_127] : memref<400x2xbf16, #tpu.memory_space<vmem>>, vector<16x1xbf16>
    tpu.vector_store %arg19[%c16_126, %c1_127], %108 {strides = array<i32>} : memref<400x2xbf16, #tpu.memory_space<vmem>>, vector<16x1xbf16>,
    %c0_128 = arith.constant 0 : index
    %c8_129 = arith.constant 8 : index
    %110 = vector.load %arg18[%c0_128, %c8_129] : memref<16x1553xbf16, #tpu.memory_space<vmem>>, vector<16x1xbf16>
    %c32_130 = arith.constant 32 : index
    %c0_131 = arith.constant 0 : index
    %111 = vector.load %arg19[%c32_130, %c0_131] : memref<400x2xbf16, #tpu.memory_space<vmem>>, vector<16x1xbf16>
    tpu.vector_store %arg19[%c32_130, %c0_131], %110 {strides = array<i32>} : memref<400x2xbf16, #tpu.memory_space<vmem>>, vector<16x1xbf16>,
    %c0_132 = arith.constant 0 : index
    %c1032 = arith.constant 1032 : index
    %112 = vector.load %arg18[%c0_132, %c1032] : memref<16x1553xbf16, #tpu.memory_space<vmem>>, vector<16x1xbf16>
    %c32_133 = arith.constant 32 : index
    %c1_134 = arith.constant 1 : index
    %113 = vector.load %arg19[%c32_133, %c1_134] : memref<400x2xbf16, #tpu.memory_space<vmem>>, vector<16x1xbf16>
    tpu.vector_store %arg19[%c32_133, %c1_134], %112 {strides = array<i32>} : memref<400x2xbf16, #tpu.memory_space<vmem>>, vector<16x1xbf16>,
    %c0_135 = arith.constant 0 : index
    %c12_136 = arith.constant 12 : index
    %114 = vector.load %arg18[%c0_135, %c12_136] : memref<16x1553xbf16, #tpu.memory_space<vmem>>, vector<16x1xbf16>
    %c48 = arith.constant 48 : index
    %c0_137 = arith.constant 0 : index
    %115 = vector.load %arg19[%c48, %c0_137] : memref<400x2xbf16, #tpu.memory_space<vmem>>, vector<16x1xbf16>
    tpu.vector_store %arg19[%c48, %c0_137], %114 {strides = array<i32>} : memref<400x2xbf16, #tpu.memory_space<vmem>>, vector<16x1xbf16>,
    %c0_138 = arith.constant 0 : index
    %c1036 = arith.constant 1036 : index
    %116 = vector.load %arg18[%c0_138, %c1036] : memref<16x1553xbf16, #tpu.memory_space<vmem>>, vector<16x1xbf16>
    %c48_139 = arith.constant 48 : index
    %c1_140 = arith.constant 1 : index
    %117 = vector.load %arg19[%c48_139, %c1_140] : memref<400x2xbf16, #tpu.memory_space<vmem>>, vector<16x1xbf16>
    tpu.vector_store %arg19[%c48_139, %c1_140], %116 {strides = array<i32>} : memref<400x2xbf16, #tpu.memory_space<vmem>>, vector<16x1xbf16>,
    %c0_141 = arith.constant 0 : index
    %c16_142 = arith.constant 16 : index
    %118 = vector.load %arg18[%c0_141, %c16_142] : memref<16x1553xbf16, #tpu.memory_space<vmem>>, vector<16x1xbf16>
    %c64_143 = arith.constant 64 : index
    %c0_144 = arith.constant 0 : index
    %119 = vector.load %arg19[%c64_143, %c0_144] : memref<400x2xbf16, #tpu.memory_space<vmem>>, vector<16x1xbf16>
    tpu.vector_store %arg19[%c64_143, %c0_144], %118 {strides = array<i32>} : memref<400x2xbf16, #tpu.memory_space<vmem>>, vector<16x1xbf16>,
    %c0_145 = arith.constant 0 : index
    %c1040 = arith.constant 1040 : index
    %120 = vector.load %arg18[%c0_145, %c1040] : memref<16x1553xbf16, #tpu.memory_space<vmem>>, vector<16x1xbf16>
    %c64_146 = arith.constant 64 : index
    %c1_147 = arith.constant 1 : index
    %121 = vector.load %arg19[%c64_146, %c1_147] : memref<400x2xbf16, #tpu.memory_space<vmem>>, vector<16x1xbf16>
    tpu.vector_store %arg19[%c64_146, %c1_147], %120 {strides = array<i32>} : memref<400x2xbf16, #tpu.memory_space<vmem>>, vector<16x1xbf16>,
    %c0_148 = arith.constant 0 : index
    %c128_149 = arith.constant 128 : index
    %122 = vector.load %arg18[%c0_148, %c128_149] : memref<16x1553xbf16, #tpu.memory_space<vmem>>, vector<16x1xbf16>
    %c80 = arith.constant 80 : index
    %c0_150 = arith.constant 0 : index
    %123 = vector.load %arg19[%c80, %c0_150] : memref<400x2xbf16, #tpu.memory_space<vmem>>, vector<16x1xbf16>
    tpu.vector_store %arg19[%c80, %c0_150], %122 {strides = array<i32>} : memref<400x2xbf16, #tpu.memory_space<vmem>>, vector<16x1xbf16>,
    %c0_151 = arith.constant 0 : index
    %c1152 = arith.constant 1152 : index
    %124 = vector.load %arg18[%c0_151, %c1152] : memref<16x1553xbf16, #tpu.memory_space<vmem>>, vector<16x1xbf16>
    %c80_152 = arith.constant 80 : index
    %c1_153 = arith.constant 1 : index
    %125 = vector.load %arg19[%c80_152, %c1_153] : memref<400x2xbf16, #tpu.memory_space<vmem>>, vector<16x1xbf16>
    tpu.vector_store %arg19[%c80_152, %c1_153], %124 {strides = array<i32>} : memref<400x2xbf16, #tpu.memory_space<vmem>>, vector<16x1xbf16>,
    %c0_154 = arith.constant 0 : index
    %c132 = arith.constant 132 : index
    %126 = vector.load %arg18[%c0_154, %c132] : memref<16x1553xbf16, #tpu.memory_space<vmem>>, vector<16x1xbf16>
    %c96_155 = arith.constant 96 : index
    %c0_156 = arith.constant 0 : index
    %127 = vector.load %arg19[%c96_155, %c0_156] : memref<400x2xbf16, #tpu.memory_space<vmem>>, vector<16x1xbf16>
    tpu.vector_store %arg19[%c96_155, %c0_156], %126 {strides = array<i32>} : memref<400x2xbf16, #tpu.memory_space<vmem>>, vector<16x1xbf16>,
    %c0_157 = arith.constant 0 : index
    %c1156 = arith.constant 1156 : index
    %128 = vector.load %arg18[%c0_157, %c1156] : memref<16x1553xbf16, #tpu.memory_space<vmem>>, vector<16x1xbf16>
    %c96_158 = arith.constant 96 : index
    %c1_159 = arith.constant 1 : index
    %129 = vector.load %arg19[%c96_158, %c1_159] : memref<400x2xbf16, #tpu.memory_space<vmem>>, vector<16x1xbf16>
    tpu.vector_store %arg19[%c96_158, %c1_159], %128 {strides = array<i32>} : memref<400x2xbf16, #tpu.memory_space<vmem>>, vector<16x1xbf16>,
    %c0_160 = arith.constant 0 : index
    %c136 = arith.constant 136 : index
    %130 = vector.load %arg18[%c0_160, %c136] : memref<16x1553xbf16, #tpu.memory_space<vmem>>, vector<16x1xbf16>
    %c112 = arith.constant 112 : index
    %c0_161 = arith.constant 0 : index
    %131 = vector.load %arg19[%c112, %c0_161] : memref<400x2xbf16, #tpu.memory_space<vmem>>, vector<16x1xbf16>
    tpu.vector_store %arg19[%c112, %c0_161], %130 {strides = array<i32>} : memref<400x2xbf16, #tpu.memory_space<vmem>>, vector<16x1xbf16>,
    %c0_162 = arith.constant 0 : index
    %c1160 = arith.constant 1160 : index
    %132 = vector.load %arg18[%c0_162, %c1160] : memref<16x1553xbf16, #tpu.memory_space<vmem>>, vector<16x1xbf16>
    %c112_163 = arith.constant 112 : index
    %c1_164 = arith.constant 1 : index
    %133 = vector.load %arg19[%c112_163, %c1_164] : memref<400x2xbf16, #tpu.memory_space<vmem>>, vector<16x1xbf16>
    tpu.vector_store %arg19[%c112_163, %c1_164], %132 {strides = array<i32>} : memref<400x2xbf16, #tpu.memory_space<vmem>>, vector<16x1xbf16>,
    %c0_165 = arith.constant 0 : index
    %c140 = arith.constant 140 : index
    %134 = vector.load %arg18[%c0_165, %c140] : memref<16x1553xbf16, #tpu.memory_space<vmem>>, vector<16x1xbf16>
    %c128_166 = arith.constant 128 : index
    %c0_167 = arith.constant 0 : index
    %135 = vector.load %arg19[%c128_166, %c0_167] : memref<400x2xbf16, #tpu.memory_space<vmem>>, vector<16x1xbf16>
    tpu.vector_store %arg19[%c128_166, %c0_167], %134 {strides = array<i32>} : memref<400x2xbf16, #tpu.memory_space<vmem>>, vector<16x1xbf16>,
    %c0_168 = arith.constant 0 : index
    %c1164 = arith.constant 1164 : index
    %136 = vector.load %arg18[%c0_168, %c1164] : memref<16x1553xbf16, #tpu.memory_space<vmem>>, vector<16x1xbf16>
    %c128_169 = arith.constant 128 : index
    %c1_170 = arith.constant 1 : index
    %137 = vector.load %arg19[%c128_169, %c1_170] : memref<400x2xbf16, #tpu.memory_space<vmem>>, vector<16x1xbf16>
    tpu.vector_store %arg19[%c128_169, %c1_170], %136 {strides = array<i32>} : memref<400x2xbf16, #tpu.memory_space<vmem>>, vector<16x1xbf16>,
    %c0_171 = arith.constant 0 : index
    %c144 = arith.constant 144 : index
    %138 = vector.load %arg18[%c0_171, %c144] : memref<16x1553xbf16, #tpu.memory_space<vmem>>, vector<16x1xbf16>
    %c144_172 = arith.constant 144 : index
    %c0_173 = arith.constant 0 : index
    %139 = vector.load %arg19[%c144_172, %c0_173] : memref<400x2xbf16, #tpu.memory_space<vmem>>, vector<16x1xbf16>
    tpu.vector_store %arg19[%c144_172, %c0_173], %138 {strides = array<i32>} : memref<400x2xbf16, #tpu.memory_space<vmem>>, vector<16x1xbf16>,
    %c0_174 = arith.constant 0 : index
    %c1168 = arith.constant 1168 : index
    %140 = vector.load %arg18[%c0_174, %c1168] : memref<16x1553xbf16, #tpu.memory_space<vmem>>, vector<16x1xbf16>
    %c144_175 = arith.constant 144 : index
    %c1_176 = arith.constant 1 : index
    %141 = vector.load %arg19[%c144_175, %c1_176] : memref<400x2xbf16, #tpu.memory_space<vmem>>, vector<16x1xbf16>
    tpu.vector_store %arg19[%c144_175, %c1_176], %140 {strides = array<i32>} : memref<400x2xbf16, #tpu.memory_space<vmem>>, vector<16x1xbf16>,
    %c0_177 = arith.constant 0 : index
    %c256_178 = arith.constant 256 : index
    %142 = vector.load %arg18[%c0_177, %c256_178] : memref<16x1553xbf16, #tpu.memory_space<vmem>>, vector<16x1xbf16>
    %c160 = arith.constant 160 : index
    %c0_179 = arith.constant 0 : index
    %143 = vector.load %arg19[%c160, %c0_179] : memref<400x2xbf16, #tpu.memory_space<vmem>>, vector<16x1xbf16>
    tpu.vector_store %arg19[%c160, %c0_179], %142 {strides = array<i32>} : memref<400x2xbf16, #tpu.memory_space<vmem>>, vector<16x1xbf16>,
    %c0_180 = arith.constant 0 : index
    %c1280 = arith.constant 1280 : index
    %144 = vector.load %arg18[%c0_180, %c1280] : memref<16x1553xbf16, #tpu.memory_space<vmem>>, vector<16x1xbf16>
    %c160_181 = arith.constant 160 : index
    %c1_182 = arith.constant 1 : index
    %145 = vector.load %arg19[%c160_181, %c1_182] : memref<400x2xbf16, #tpu.memory_space<vmem>>, vector<16x1xbf16>
    tpu.vector_store %arg19[%c160_181, %c1_182], %144 {strides = array<i32>} : memref<400x2xbf16, #tpu.memory_space<vmem>>, vector<16x1xbf16>,
    %c0_183 = arith.constant 0 : index
    %c260 = arith.constant 260 : index
    %146 = vector.load %arg18[%c0_183, %c260] : memref<16x1553xbf16, #tpu.memory_space<vmem>>, vector<16x1xbf16>
    %c176 = arith.constant 176 : index
    %c0_184 = arith.constant 0 : index
    %147 = vector.load %arg19[%c176, %c0_184] : memref<400x2xbf16, #tpu.memory_space<vmem>>, vector<16x1xbf16>
    tpu.vector_store %arg19[%c176, %c0_184], %146 {strides = array<i32>} : memref<400x2xbf16, #tpu.memory_space<vmem>>, vector<16x1xbf16>,
    %c0_185 = arith.constant 0 : index
    %c1284 = arith.constant 1284 : index
    %148 = vector.load %arg18[%c0_185, %c1284] : memref<16x1553xbf16, #tpu.memory_space<vmem>>, vector<16x1xbf16>
    %c176_186 = arith.constant 176 : index
    %c1_187 = arith.constant 1 : index
    %149 = vector.load %arg19[%c176_186, %c1_187] : memref<400x2xbf16, #tpu.memory_space<vmem>>, vector<16x1xbf16>
    tpu.vector_store %arg19[%c176_186, %c1_187], %148 {strides = array<i32>} : memref<400x2xbf16, #tpu.memory_space<vmem>>, vector<16x1xbf16>,
    %c0_188 = arith.constant 0 : index
    %c264 = arith.constant 264 : index
    %150 = vector.load %arg18[%c0_188, %c264] : memref<16x1553xbf16, #tpu.memory_space<vmem>>, vector<16x1xbf16>
    %c192_189 = arith.constant 192 : index
    %c0_190 = arith.constant 0 : index
    %151 = vector.load %arg19[%c192_189, %c0_190] : memref<400x2xbf16, #tpu.memory_space<vmem>>, vector<16x1xbf16>
    tpu.vector_store %arg19[%c192_189, %c0_190], %150 {strides = array<i32>} : memref<400x2xbf16, #tpu.memory_space<vmem>>, vector<16x1xbf16>,
    %c0_191 = arith.constant 0 : index
    %c1288 = arith.constant 1288 : index
    %152 = vector.load %arg18[%c0_191, %c1288] : memref<16x1553xbf16, #tpu.memory_space<vmem>>, vector<16x1xbf16>
    %c192_192 = arith.constant 192 : index
    %c1_193 = arith.constant 1 : index
    %153 = vector.load %arg19[%c192_192, %c1_193] : memref<400x2xbf16, #tpu.memory_space<vmem>>, vector<16x1xbf16>
    tpu.vector_store %arg19[%c192_192, %c1_193], %152 {strides = array<i32>} : memref<400x2xbf16, #tpu.memory_space<vmem>>, vector<16x1xbf16>,
    %c0_194 = arith.constant 0 : index
    %c268 = arith.constant 268 : index
    %154 = vector.load %arg18[%c0_194, %c268] : memref<16x1553xbf16, #tpu.memory_space<vmem>>, vector<16x1xbf16>
    %c208 = arith.constant 208 : index
    %c0_195 = arith.constant 0 : index
    %155 = vector.load %arg19[%c208, %c0_195] : memref<400x2xbf16, #tpu.memory_space<vmem>>, vector<16x1xbf16>
    tpu.vector_store %arg19[%c208, %c0_195], %154 {strides = array<i32>} : memref<400x2xbf16, #tpu.memory_space<vmem>>, vector<16x1xbf16>,
    %c0_196 = arith.constant 0 : index
    %c1292 = arith.constant 1292 : index
    %156 = vector.load %arg18[%c0_196, %c1292] : memref<16x1553xbf16, #tpu.memory_space<vmem>>, vector<16x1xbf16>
    %c208_197 = arith.constant 208 : index
    %c1_198 = arith.constant 1 : index
    %157 = vector.load %arg19[%c208_197, %c1_198] : memref<400x2xbf16, #tpu.memory_space<vmem>>, vector<16x1xbf16>
    tpu.vector_store %arg19[%c208_197, %c1_198], %156 {strides = array<i32>} : memref<400x2xbf16, #tpu.memory_space<vmem>>, vector<16x1xbf16>,
    %c0_199 = arith.constant 0 : index
    %c272 = arith.constant 272 : index
    %158 = vector.load %arg18[%c0_199, %c272] : memref<16x1553xbf16, #tpu.memory_space<vmem>>, vector<16x1xbf16>
    %c224 = arith.constant 224 : index
    %c0_200 = arith.constant 0 : index
    %159 = vector.load %arg19[%c224, %c0_200] : memref<400x2xbf16, #tpu.memory_space<vmem>>, vector<16x1xbf16>
    tpu.vector_store %arg19[%c224, %c0_200], %158 {strides = array<i32>} : memref<400x2xbf16, #tpu.memory_space<vmem>>, vector<16x1xbf16>,
    %c0_201 = arith.constant 0 : index
    %c1296 = arith.constant 1296 : index
    %160 = vector.load %arg18[%c0_201, %c1296] : memref<16x1553xbf16, #tpu.memory_space<vmem>>, vector<16x1xbf16>
    %c224_202 = arith.constant 224 : index
    %c1_203 = arith.constant 1 : index
    %161 = vector.load %arg19[%c224_202, %c1_203] : memref<400x2xbf16, #tpu.memory_space<vmem>>, vector<16x1xbf16>
    tpu.vector_store %arg19[%c224_202, %c1_203], %160 {strides = array<i32>} : memref<400x2xbf16, #tpu.memory_space<vmem>>, vector<16x1xbf16>,
    %c0_204 = arith.constant 0 : index
    %c384 = arith.constant 384 : index
    %162 = vector.load %arg18[%c0_204, %c384] : memref<16x1553xbf16, #tpu.memory_space<vmem>>, vector<16x1xbf16>
    %c240 = arith.constant 240 : index
    %c0_205 = arith.constant 0 : index
    %163 = vector.load %arg19[%c240, %c0_205] : memref<400x2xbf16, #tpu.memory_space<vmem>>, vector<16x1xbf16>
    tpu.vector_store %arg19[%c240, %c0_205], %162 {strides = array<i32>} : memref<400x2xbf16, #tpu.memory_space<vmem>>, vector<16x1xbf16>,
    %c0_206 = arith.constant 0 : index
    %c1408 = arith.constant 1408 : index
    %164 = vector.load %arg18[%c0_206, %c1408] : memref<16x1553xbf16, #tpu.memory_space<vmem>>, vector<16x1xbf16>
    %c240_207 = arith.constant 240 : index
    %c1_208 = arith.constant 1 : index
    %165 = vector.load %arg19[%c240_207, %c1_208] : memref<400x2xbf16, #tpu.memory_space<vmem>>, vector<16x1xbf16>
    tpu.vector_store %arg19[%c240_207, %c1_208], %164 {strides = array<i32>} : memref<400x2xbf16, #tpu.memory_space<vmem>>, vector<16x1xbf16>,
    %c0_209 = arith.constant 0 : index
    %c388 = arith.constant 388 : index
    %166 = vector.load %arg18[%c0_209, %c388] : memref<16x1553xbf16, #tpu.memory_space<vmem>>, vector<16x1xbf16>
    %c256_210 = arith.constant 256 : index
    %c0_211 = arith.constant 0 : index
    %167 = vector.load %arg19[%c256_210, %c0_211] : memref<400x2xbf16, #tpu.memory_space<vmem>>, vector<16x1xbf16>
    tpu.vector_store %arg19[%c256_210, %c0_211], %166 {strides = array<i32>} : memref<400x2xbf16, #tpu.memory_space<vmem>>, vector<16x1xbf16>,
    %c0_212 = arith.constant 0 : index
    %c1412 = arith.constant 1412 : index
    %168 = vector.load %arg18[%c0_212, %c1412] : memref<16x1553xbf16, #tpu.memory_space<vmem>>, vector<16x1xbf16>
    %c256_213 = arith.constant 256 : index
    %c1_214 = arith.constant 1 : index
    %169 = vector.load %arg19[%c256_213, %c1_214] : memref<400x2xbf16, #tpu.memory_space<vmem>>, vector<16x1xbf16>
    tpu.vector_store %arg19[%c256_213, %c1_214], %168 {strides = array<i32>} : memref<400x2xbf16, #tpu.memory_space<vmem>>, vector<16x1xbf16>,
    %c0_215 = arith.constant 0 : index
    %c392 = arith.constant 392 : index
    %170 = vector.load %arg18[%c0_215, %c392] : memref<16x1553xbf16, #tpu.memory_space<vmem>>, vector<16x1xbf16>
    %c272_216 = arith.constant 272 : index
    %c0_217 = arith.constant 0 : index
    %171 = vector.load %arg19[%c272_216, %c0_217] : memref<400x2xbf16, #tpu.memory_space<vmem>>, vector<16x1xbf16>
    tpu.vector_store %arg19[%c272_216, %c0_217], %170 {strides = array<i32>} : memref<400x2xbf16, #tpu.memory_space<vmem>>, vector<16x1xbf16>,
    %c0_218 = arith.constant 0 : index
    %c1416 = arith.constant 1416 : index
    %172 = vector.load %arg18[%c0_218, %c1416] : memref<16x1553xbf16, #tpu.memory_space<vmem>>, vector<16x1xbf16>
    %c272_219 = arith.constant 272 : index
    %c1_220 = arith.constant 1 : index
    %173 = vector.load %arg19[%c272_219, %c1_220] : memref<400x2xbf16, #tpu.memory_space<vmem>>, vector<16x1xbf16>
    tpu.vector_store %arg19[%c272_219, %c1_220], %172 {strides = array<i32>} : memref<400x2xbf16, #tpu.memory_space<vmem>>, vector<16x1xbf16>,
    %c0_221 = arith.constant 0 : index
    %c396 = arith.constant 396 : index
    %174 = vector.load %arg18[%c0_221, %c396] : memref<16x1553xbf16, #tpu.memory_space<vmem>>, vector<16x1xbf16>
    %c288 = arith.constant 288 : index
    %c0_222 = arith.constant 0 : index
    %175 = vector.load %arg19[%c288, %c0_222] : memref<400x2xbf16, #tpu.memory_space<vmem>>, vector<16x1xbf16>
    tpu.vector_store %arg19[%c288, %c0_222], %174 {strides = array<i32>} : memref<400x2xbf16, #tpu.memory_space<vmem>>, vector<16x1xbf16>,
    %c0_223 = arith.constant 0 : index
    %c1420 = arith.constant 1420 : index
    %176 = vector.load %arg18[%c0_223, %c1420] : memref<16x1553xbf16, #tpu.memory_space<vmem>>, vector<16x1xbf16>
    %c288_224 = arith.constant 288 : index
    %c1_225 = arith.constant 1 : index
    %177 = vector.load %arg19[%c288_224, %c1_225] : memref<400x2xbf16, #tpu.memory_space<vmem>>, vector<16x1xbf16>
    tpu.vector_store %arg19[%c288_224, %c1_225], %176 {strides = array<i32>} : memref<400x2xbf16, #tpu.memory_space<vmem>>, vector<16x1xbf16>,
    %c0_226 = arith.constant 0 : index
    %c400 = arith.constant 400 : index
    %178 = vector.load %arg18[%c0_226, %c400] : memref<16x1553xbf16, #tpu.memory_space<vmem>>, vector<16x1xbf16>
    %c304 = arith.constant 304 : index
    %c0_227 = arith.constant 0 : index
    %179 = vector.load %arg19[%c304, %c0_227] : memref<400x2xbf16, #tpu.memory_space<vmem>>, vector<16x1xbf16>
    tpu.vector_store %arg19[%c304, %c0_227], %178 {strides = array<i32>} : memref<400x2xbf16, #tpu.memory_space<vmem>>, vector<16x1xbf16>,
    %c0_228 = arith.constant 0 : index
    %c1424 = arith.constant 1424 : index
    %180 = vector.load %arg18[%c0_228, %c1424] : memref<16x1553xbf16, #tpu.memory_space<vmem>>, vector<16x1xbf16>
    %c304_229 = arith.constant 304 : index
    %c1_230 = arith.constant 1 : index
    %181 = vector.load %arg19[%c304_229, %c1_230] : memref<400x2xbf16, #tpu.memory_space<vmem>>, vector<16x1xbf16>
    tpu.vector_store %arg19[%c304_229, %c1_230], %180 {strides = array<i32>} : memref<400x2xbf16, #tpu.memory_space<vmem>>, vector<16x1xbf16>,
    %c0_231 = arith.constant 0 : index
    %c512 = arith.constant 512 : index
    %182 = vector.load %arg18[%c0_231, %c512] : memref<16x1553xbf16, #tpu.memory_space<vmem>>, vector<16x1xbf16>
    %c320 = arith.constant 320 : index
    %c0_232 = arith.constant 0 : index
    %183 = vector.load %arg19[%c320, %c0_232] : memref<400x2xbf16, #tpu.memory_space<vmem>>, vector<16x1xbf16>
    tpu.vector_store %arg19[%c320, %c0_232], %182 {strides = array<i32>} : memref<400x2xbf16, #tpu.memory_space<vmem>>, vector<16x1xbf16>,
    %c0_233 = arith.constant 0 : index
    %c1536 = arith.constant 1536 : index
    %184 = vector.load %arg18[%c0_233, %c1536] : memref<16x1553xbf16, #tpu.memory_space<vmem>>, vector<16x1xbf16>
    %c320_234 = arith.constant 320 : index
    %c1_235 = arith.constant 1 : index
    %185 = vector.load %arg19[%c320_234, %c1_235] : memref<400x2xbf16, #tpu.memory_space<vmem>>, vector<16x1xbf16>
    tpu.vector_store %arg19[%c320_234, %c1_235], %184 {strides = array<i32>} : memref<400x2xbf16, #tpu.memory_space<vmem>>, vector<16x1xbf16>,
    %c0_236 = arith.constant 0 : index
    %c516 = arith.constant 516 : index
    %186 = vector.load %arg18[%c0_236, %c516] : memref<16x1553xbf16, #tpu.memory_space<vmem>>, vector<16x1xbf16>
    %c336 = arith.constant 336 : index
    %c0_237 = arith.constant 0 : index
    %187 = vector.load %arg19[%c336, %c0_237] : memref<400x2xbf16, #tpu.memory_space<vmem>>, vector<16x1xbf16>
    tpu.vector_store %arg19[%c336, %c0_237], %186 {strides = array<i32>} : memref<400x2xbf16, #tpu.memory_space<vmem>>, vector<16x1xbf16>,
    %c0_238 = arith.constant 0 : index
    %c1540 = arith.constant 1540 : index
    %188 = vector.load %arg18[%c0_238, %c1540] : memref<16x1553xbf16, #tpu.memory_space<vmem>>, vector<16x1xbf16>
    %c336_239 = arith.constant 336 : index
    %c1_240 = arith.constant 1 : index
    %189 = vector.load %arg19[%c336_239, %c1_240] : memref<400x2xbf16, #tpu.memory_space<vmem>>, vector<16x1xbf16>
    tpu.vector_store %arg19[%c336_239, %c1_240], %188 {strides = array<i32>} : memref<400x2xbf16, #tpu.memory_space<vmem>>, vector<16x1xbf16>,
    %c0_241 = arith.constant 0 : index
    %c520 = arith.constant 520 : index
    %190 = vector.load %arg18[%c0_241, %c520] : memref<16x1553xbf16, #tpu.memory_space<vmem>>, vector<16x1xbf16>
    %c352 = arith.constant 352 : index
    %c0_242 = arith.constant 0 : index
    %191 = vector.load %arg19[%c352, %c0_242] : memref<400x2xbf16, #tpu.memory_space<vmem>>, vector<16x1xbf16>
    tpu.vector_store %arg19[%c352, %c0_242], %190 {strides = array<i32>} : memref<400x2xbf16, #tpu.memory_space<vmem>>, vector<16x1xbf16>,
    %c0_243 = arith.constant 0 : index
    %c1544 = arith.constant 1544 : index
    %192 = vector.load %arg18[%c0_243, %c1544] : memref<16x1553xbf16, #tpu.memory_space<vmem>>, vector<16x1xbf16>
    %c352_244 = arith.constant 352 : index
    %c1_245 = arith.constant 1 : index
    %193 = vector.load %arg19[%c352_244, %c1_245] : memref<400x2xbf16, #tpu.memory_space<vmem>>, vector<16x1xbf16>
    tpu.vector_store %arg19[%c352_244, %c1_245], %192 {strides = array<i32>} : memref<400x2xbf16, #tpu.memory_space<vmem>>, vector<16x1xbf16>,
    %c0_246 = arith.constant 0 : index
    %c524 = arith.constant 524 : index
    %194 = vector.load %arg18[%c0_246, %c524] : memref<16x1553xbf16, #tpu.memory_space<vmem>>, vector<16x1xbf16>
    %c368 = arith.constant 368 : index
    %c0_247 = arith.constant 0 : index
    %195 = vector.load %arg19[%c368, %c0_247] : memref<400x2xbf16, #tpu.memory_space<vmem>>, vector<16x1xbf16>
    tpu.vector_store %arg19[%c368, %c0_247], %194 {strides = array<i32>} : memref<400x2xbf16, #tpu.memory_space<vmem>>, vector<16x1xbf16>,
    %c0_248 = arith.constant 0 : index
    %c1548 = arith.constant 1548 : index
    %196 = vector.load %arg18[%c0_248, %c1548] : memref<16x1553xbf16, #tpu.memory_space<vmem>>, vector<16x1xbf16>
    %c368_249 = arith.constant 368 : index
    %c1_250 = arith.constant 1 : index
    %197 = vector.load %arg19[%c368_249, %c1_250] : memref<400x2xbf16, #tpu.memory_space<vmem>>, vector<16x1xbf16>
    tpu.vector_store %arg19[%c368_249, %c1_250], %196 {strides = array<i32>} : memref<400x2xbf16, #tpu.memory_space<vmem>>, vector<16x1xbf16>,
    %c0_251 = arith.constant 0 : index
    %c528 = arith.constant 528 : index
    %198 = vector.load %arg18[%c0_251, %c528] : memref<16x1553xbf16, #tpu.memory_space<vmem>>, vector<16x1xbf16>
    %c384_252 = arith.constant 384 : index
    %c0_253 = arith.constant 0 : index
    %199 = vector.load %arg19[%c384_252, %c0_253] : memref<400x2xbf16, #tpu.memory_space<vmem>>, vector<16x1xbf16>
    tpu.vector_store %arg19[%c384_252, %c0_253], %198 {strides = array<i32>} : memref<400x2xbf16, #tpu.memory_space<vmem>>, vector<16x1xbf16>,
    %c0_254 = arith.constant 0 : index
    %c1552 = arith.constant 1552 : index
    %200 = vector.load %arg18[%c0_254, %c1552] : memref<16x1553xbf16, #tpu.memory_space<vmem>>, vector<16x1xbf16>
    %c384_255 = arith.constant 384 : index
    %c1_256 = arith.constant 1 : index
    %201 = vector.load %arg19[%c384_255, %c1_256] : memref<400x2xbf16, #tpu.memory_space<vmem>>, vector<16x1xbf16>
    tpu.vector_store %arg19[%c384_255, %c1_256], %200 {strides = array<i32>} : memref<400x2xbf16, #tpu.memory_space<vmem>>, vector<16x1xbf16>,
    %c0_257 = arith.constant 0 : index
    %c0_258 = arith.constant 0 : index
    %202 = vector.load %arg6[%c0_257, %c0_258] : memref<128x400xbf16, #tpu.memory_space<vmem>>, vector<128x400xbf16>
    %c0_259 = arith.constant 0 : index
    %c0_260 = arith.constant 0 : index
    %203 = vector.load %arg19[%c0_259, %c0_260] : memref<400x2xbf16, #tpu.memory_space<vmem>>, vector<400x2xbf16>
    %cst_261 = arith.constant dense<0.000000e+00> : vector<128x2xf32>
    %204 = tpu.matmul %202, %203, %cst_261 {dimension_numbers = #tpu.dot_dimension_numbers<[1], [0], [0], [1], [0, 0, 1, 1], [], []>} : vector<128x400xbf16>, vector<400x2xbf16>, vector<128x2xf32> -> vector<128x2xf32>
    %c0_262 = arith.constant 0 : index
    %c0_263 = arith.constant 0 : index
    %205 = vector.load %arg7[%c0_262, %c0_263] : memref<128x1xf32, #tpu.memory_space<vmem>>, vector<128x1xf32>
    %206 = vector.broadcast %205 : vector<128x1xf32> to vector<128x2xf32>
    %207 = arith.addf %204, %206 : vector<128x2xf32>
    %cst_264 = arith.constant 0.000000e+00 : f32
    %208 = vector.broadcast %cst_264 : f32 to vector<128x2xf32>
    %209 = arith.maximumf %207, %208 : vector<128x2xf32>
    %c0_265 = arith.constant 0 : index
    %c0_266 = arith.constant 0 : index
    %210 = vector.load %arg8[%c0_265, %c0_266] : memref<128x128xbf16, #tpu.memory_space<vmem>>, vector<128x128xbf16>
    %211 = arith.truncf %209 : vector<128x2xf32> to vector<128x2xbf16>
    %cst_267 = arith.constant dense<0.000000e+00> : vector<128x2xf32>
    %212 = tpu.matmul %210, %211, %cst_267 {dimension_numbers = #tpu.dot_dimension_numbers<[1], [0], [0], [1], [0, 0, 1, 1], [], []>} : vector<128x128xbf16>, vector<128x2xbf16>, vector<128x2xf32> -> vector<128x2xf32>
    %c0_268 = arith.constant 0 : index
    %c0_269 = arith.constant 0 : index
    %213 = vector.load %arg9[%c0_268, %c0_269] : memref<128x1xf32, #tpu.memory_space<vmem>>, vector<128x1xf32>
    %214 = vector.broadcast %213 : vector<128x1xf32> to vector<128x2xf32>
    %215 = arith.addf %212, %214 : vector<128x2xf32>
    %cst_270 = arith.constant 0.000000e+00 : f32
    %216 = vector.broadcast %cst_270 : f32 to vector<128x2xf32>
    %217 = arith.maximumf %215, %216 : vector<128x2xf32>
    %c0_271 = arith.constant 0 : index
    %c0_272 = arith.constant 0 : index
    %218 = vector.load %arg10[%c0_271, %c0_272] : memref<128x128xbf16, #tpu.memory_space<vmem>>, vector<128x128xbf16>
    %219 = arith.truncf %217 : vector<128x2xf32> to vector<128x2xbf16>
    %cst_273 = arith.constant dense<0.000000e+00> : vector<128x2xf32>
    %220 = tpu.matmul %218, %219, %cst_273 {dimension_numbers = #tpu.dot_dimension_numbers<[1], [0], [0], [1], [0, 0, 1, 1], [], []>} : vector<128x128xbf16>, vector<128x2xbf16>, vector<128x2xf32> -> vector<128x2xf32>
    %c0_274 = arith.constant 0 : index
    %c0_275 = arith.constant 0 : index
    %221 = vector.load %arg11[%c0_274, %c0_275] : memref<128x1xf32, #tpu.memory_space<vmem>>, vector<128x1xf32>
    %222 = vector.broadcast %221 : vector<128x1xf32> to vector<128x2xf32>
    %223 = arith.addf %220, %222 : vector<128x2xf32>
    %c0_276 = arith.constant 0 : index
    %c0_277 = arith.constant 0 : index
    %224 = vector.load %arg12[%c0_276, %c0_277] : memref<128x2xf32, #tpu.memory_space<vmem>>, vector<128x2xf32>
    tpu.vector_store %arg12[%c0_276, %c0_277], %223 {strides = array<i32>} : memref<128x2xf32, #tpu.memory_space<vmem>>, vector<128x2xf32>,
    return
  }
  func.func @transform_0(%arg0: i32) -> (i32, i32) {
    %c0_i32 = arith.constant 0 : i32
    %c0_i32_0 = arith.constant 0 : i32
    %c0_i32_1 = arith.constant 0 : i32
    return %c0_i32, %c0_i32_0 : i32, i32
  }
  func.func @transform_1(%arg0: i32) -> (i32, i32, i32) {
    %c0_i32 = arith.constant 0 : i32
    %c0_i32_0 = arith.constant 0 : i32
    %c0_i32_1 = arith.constant 0 : i32
    %c0_i32_2 = arith.constant 0 : i32
    return %c0_i32, %c0_i32_0, %c0_i32_1 : i32, i32, i32
  }
  func.func @transform_2(%arg0: i32) -> (i32, i32) {
    %c0_i32 = arith.constant 0 : i32
    %c0_i32_0 = arith.constant 0 : i32
    %c0_i32_1 = arith.constant 0 : i32
    return %c0_i32, %c0_i32_0 : i32, i32
  }
  func.func @transform_3(%arg0: i32) -> (i32, i32, i32) {
    %c0_i32 = arith.constant 0 : i32
    %c0_i32_0 = arith.constant 0 : i32
    %c0_i32_1 = arith.constant 0 : i32
    %c0_i32_2 = arith.constant 0 : i32
    return %c0_i32, %c0_i32_0, %c0_i32_1 : i32, i32, i32
  }
  func.func @transform_4(%arg0: i32) -> (i32, i32) {
    %c0_i32 = arith.constant 0 : i32
    %c0_i32_0 = arith.constant 0 : i32
    %c0_i32_1 = arith.constant 0 : i32
    return %c0_i32, %c0_i32_0 : i32, i32
  }
  func.func @transform_5(%arg0: i32) -> (i32, i32) {
    %c0_i32 = arith.constant 0 : i32
    %c0_i32_0 = arith.constant 0 : i32
    %c0_i32_1 = arith.constant 0 : i32
    return %c0_i32, %c0_i32_0 : i32, i32
  }
  func.func @transform_6(%arg0: i32) -> (i32, i32) {
    %c0_i32 = arith.constant 0 : i32
    %c0_i32_0 = arith.constant 0 : i32
    %c0_i32_1 = arith.constant 0 : i32
    return %c0_i32, %c0_i32_0 : i32, i32
  }
  func.func @transform_7(%arg0: i32) -> (i32, i32) {
    %c0_i32 = arith.constant 0 : i32
    %c0_i32_0 = arith.constant 0 : i32
    %c0_i32_1 = arith.constant 0 : i32
    return %c0_i32, %c0_i32_0 : i32, i32
  }
  func.func @transform_8(%arg0: i32) -> (i32, i32) {
    %c0_i32 = arith.constant 0 : i32
    %c0_i32_0 = arith.constant 0 : i32
    %c0_i32_1 = arith.constant 0 : i32
    return %c0_i32, %c0_i32_0 : i32, i32
  }
  func.func @transform_9(%arg0: i32) -> (i32, i32) {
    %c0_i32 = arith.constant 0 : i32
    %c0_i32_0 = arith.constant 0 : i32
    %c0_i32_1 = arith.constant 0 : i32
    return %c0_i32, %c0_i32_0 : i32, i32
  }
  func.func @transform_10(%arg0: i32) -> (i32, i32) {
    %c0_i32 = arith.constant 0 : i32
    %c0_i32_0 = arith.constant 0 : i32
    %c0_i32_1 = arith.constant 0 : i32
    return %c0_i32, %c0_i32_0 : i32, i32
  }
  func.func @transform_11(%arg0: i32) -> (i32, i32) {
    %c0_i32 = arith.constant 0 : i32
    %c0_i32_0 = arith.constant 0 : i32
    %c0_i32_1 = arith.constant 0 : i32
    return %c0_i32, %c0_i32_0 : i32, i32
  }
}

</mosaic_0001>

<bundles_post_ra>
// kernel: net_forward.1
= control target key start
LH: loop header
LB: loop body
LE: loop exit
PB: predicated region body
PF: predicated region fallthrough
CT: control target
= control target key end

     0   :  { %s7534_s23 = smov 96   ;;  %s7535_s26 = smov 64   ;;  %v7537_v42 = vmov 0   ;;  %vm150_vm0 = vcmask 1043456   ;;  %vm239_vm1 = vcmask 523264   ;;  %vm152_vm2 = vcmask 785408   ;;  %s10998_s0 = inlined_call_operand.vmem [shape: bf16[4,2048], index: 0, kind: input, shape index: {}]   ;;  %s10999_s1 = inlined_call_operand.vmem [shape: bf16[5,8,32], index: 1, kind: input, shape index: {}]   ;;  %s11000_s2 = inlined_call_operand.vmem [shape: f32[8,1], index: 2, kind: input, shape index: {}]   ;;  %s11001_s3 = inlined_call_operand.vmem [shape: bf16[5,16,32], index: 3, kind: input, shape index: {}]   ;;  %s11002_s4 = inlined_call_operand.vmem [shape: f32[16,1], index: 4, kind: input, shape index: {}]   ;;  %s11003_s6 = inlined_call_operand.vmem [shape: f32[128,1], index: 6, kind: input, shape index: {}]   ;;  %s11004_s8 = inlined_call_operand.vmem [shape: f32[128,1], index: 8, kind: input, shape index: {}]   ;;  %s11005_s5 = inlined_call_operand.vmem [shape: bf16[128,400], index: 5, kind: input, shape index: {}]   ;;  %s11006_s10 = inlined_call_operand.vmem [shape: f32[128,1], index: 10, kind: input, shape index: {}]   ;;  %s11007_s7 = inlined_call_operand.vmem [shape: bf16[128,128], index: 7, kind: input, shape index: {}]   ;;  %s11008_s9 = inlined_call_operand.vmem [shape: bf16[128,128], index: 9, kind: input, shape index: {}]   ;;  %s11009_s11 = inlined_call_operand.vmem [shape: f32[128,2], index: 11, kind: output, shape index: {}]  }
   0x1   :  { %v56_v0 = vld [vmem:[%s10998_s0 + $0x8] sm:$0xff]  ;;  %v55_v1 = vld [vmem:[%s10998_s0] sm:$0xff]  ;;  %v57_v2 = vld [vmem:[%s10998_s0 + $0x10] sm:$0xff]  ;;  %s7536_s16 = smov 32   ;;  %40 = vst [vmem:[#allocation2 + $0x80] sm:$0xcc] %v7537_v42  ;;  %7328 = vset.pattern.permute.xlu0 %v7537_v42  ;;  %7399 = vset.pattern.permute.xlu2 %v7537_v42 }
   0x2   :  { %63 = vst [vmem:[#allocation1 + $0x10] ss:$2 sm:$0xff] %v56_v0  ;;  %v58_v11 = vld [vmem:[%s10998_s0 + $0x18] sm:$0x3f]  ;;  %v359_v25 = vld [vmem:[%s10998_s0 + $0xa] sm:$0xff]  ;;  %v358_v30 = vld [vmem:[%s10998_s0 + $0x2] sm:$0xff]  ;;  %7525 = vset.pattern.permute.xlu1 %v7537_v42 }
   0x3   :  { %60 = vst [vmem:[#allocation1] ss:$2 sm:$0xff] %v55_v1  ;;  %v97_v22 = vld [vmem:[%s10998_s0 + $0x18] sm:$0xff]  ;;  %vm327_vm3 = vcmask 261120   ;;  %s7539_s19 = smov 126   ;;  %vm614_vm4 = vcmask 1039360  }
   0x4   :  { %66 = vst [vmem:[#allocation1 + $0x20] ss:$2 sm:$0xff] %v57_v2  ;;  %v360_v35 = vld [vmem:[%s10998_s0 + $0x12] sm:$0xff]  ;;  %v361_v38 = vld [vmem:[%s10998_s0 + $0x1a] sm:$0x3f]  ;;  %s7538_s0 = smov 127  }
   0x5   :  { %69 = vst [vmem:[#allocation1 + $0x30] ss:$2 sm:$0xff] %v58_v11  ;;  %s7540_s22 = smov 125   ;;  %vm1162_vm5 = vcmask 1031168   ;;  %s7541_s27 = smov 124   ;;  %vm1496_vm6 = vcmask 1022976  }
   0x6   :  { %48 = vst [vmem:[#allocation2 + $0xbc] sm:$0xff] %v7537_v42  ;;  %vm1830_vm7 = vcmask 1014784   ;;  %vm2372_vm8 = vcmask 740355   ;;  %vm2364_vm9 = vcmask 739328   ;;  %vm2569_vm10 = vcmask 737280   ;;  %s7546_s14 = smov 117  }
   0x7   :  { %39 = vst [vmem:[#allocation2 + $0x78] sm:$0xcc] %v7537_v42  ;;  %vm2561_vm11 = vcmask 740354   ;;  %vm2511_vm12 = vcmask 738304   ;;  %vm2639_vm13 = vcmask 740353   ;;  %vm3683_vm14 = vcmask 998400  }
   0x8   :  { %41 = vst [vmem:[#allocation2 + $0x88] sm:$0xcc] %v7537_v42  ;;  %vm4005_vm15 = vcmask 982016   ;;  %s7548_s15 = smov 1  }
   0x9   :  { %v72_v3 = vld.sshfl [vmem:[#allocation1 + $0x10] sm:$0xff pattern:$0x75643120]  ;;  %v73_v4 = vld.sshfl [vmem:[#allocation1 + $0x18] sm:$0xff pattern:$0x75643120] }
   0xa   :  { %103 = vst [vmem:[#allocation1 + $0x11] ss:$2 sm:$0xff] %v56_v0  ;;  %v70_v5 = vld.sshfl [vmem:[#allocation1] sm:$0xff pattern:$0x75643120] }
   0xb   :  { %88 = vst [vmem:[#allocation2 + $0x10] sm:$0x33] %v72_v3  ;;  %v71_v6 = vld.sshfl [vmem:[#allocation1 + $0x8] sm:$0xff pattern:$0x75643120] }
   0xc   :  { %89 = vst [vmem:[#allocation2 + $0x18] sm:$0x33] %v73_v4  ;;  %v74_v7 = vld.sshfl [vmem:[#allocation1 + $0x20] sm:$0xff pattern:$0x75643120] }
   0xd   :  { %100 = vst [vmem:[#allocation1 + $0x1] ss:$2 sm:$0xff] %v55_v1  ;;  %v75_v8 = vld.sshfl [vmem:[#allocation1 + $0x28] sm:$0xff pattern:$0x75643120] }
   0xe   :  { %86 = vst [vmem:[#allocation2] sm:$0x33] %v70_v5  ;;  %v76_v20 = vld.sshfl [vmem:[#allocation1 + $0x30] sm:$0xff pattern:$0x75643120] }
   0xf   :  { %87 = vst [vmem:[#allocation2 + $0x8] sm:$0x33] %v71_v6  ;;  %v77_v21 = vld.sshfl [vmem:[#allocation1 + $0x38] sm:$0xff pattern:$0x75643120] }
  0x10   :  { %106 = vst [vmem:[#allocation1 + $0x21] ss:$2 sm:$0xff] %v57_v2  ;;  %v6546_v44 = vld [vmem:[#allocation2 + $0xbc] sm:$0xf0]  ;;  %v7192_v49 = vld [vmem:[#allocation2 + $0xb8] sm:$0xf0] }
  0x11   :  { %v116_v9 = vld.sshfl [vmem:[#allocation1 + $0x18] sm:$0xff pattern:$0x75643120]  ;;  %90 = vst [vmem:[#allocation2 + $0x20] sm:$0x33] %v74_v7 }
  0x12   :  { %132 = vrot.lane.b32.xlu1 %v116_v9, %s7534_s23  ;;  %91 = vst [vmem:[#allocation2 + $0x28] sm:$0x33] %v75_v8  ;;  %v114_v10 = vld.sshfl [vmem:[#allocation1 + $0x10] sm:$0xff pattern:$0x75643120] }
  0x13   :  { %191 = vst [vmem:[#allocation1 + $0x10] ss:$2 sm:$0xff] %v56_v0 }
  0x14   :  { %v112_v12 = vld.sshfl [vmem:[#allocation1 + $0x8] sm:$0xff pattern:$0x75643120]  ;;  %v110_v13 = vld.sshfl [vmem:[#allocation1] sm:$0xff pattern:$0x75643120] }
  0x15   :  { %128 = vrot.lane.b32.xlu0 %v112_v12, %s7534_s23  ;;  %188 = vst [vmem:[#allocation1] ss:$2 sm:$0xff] %v55_v1 }
  0x16   :  { %92 = vst [vmem:[#allocation2 + $0x30] sm:$0x33] %v76_v20 }
  0x17   :  { %v120_v14 = vld.sshfl [vmem:[#allocation1 + $0x28] sm:$0xff pattern:$0x75643120]  ;;  %v118_v15 = vld.sshfl [vmem:[#allocation1 + $0x20] sm:$0xff pattern:$0x75643120] }
  0x18   :  { %194 = vst [vmem:[#allocation1 + $0x20] ss:$2 sm:$0xff] %v57_v2 }
  0x19   :  { %109 = vst [vmem:[#allocation1 + $0x31] ss:$2 sm:$0xff] %v97_v22 }
  0x1a   :  { %136 = vrot.lane.b32.xlu1 %v120_v14, %s7534_s23  ;;  %v202_v16 = vld.sshfl [vmem:[#allocation1 + $0x10] sm:$0xff pattern:$0x75643120]  ;;  %v204_v17 = vld.sshfl [vmem:[#allocation1 + $0x18] sm:$0xff pattern:$0x75643120] }
  0x1b   :  { %218 = vrot.lane.b32.xlu2 %v202_v16, %s7535_s26  ;;  %279 = vst [vmem:[#allocation1 + $0x11] ss:$2 sm:$0xff] %v56_v0 }
  0x1c   :  { %v200_v18 = vld.sshfl [vmem:[#allocation1 + $0x8] sm:$0xff pattern:$0x75643120]  ;;  %v198_v19 = vld.sshfl [vmem:[#allocation1] sm:$0xff pattern:$0x75643120] }
  0x1d   :  { %130 = vrot.lane.b32.xlu0 %v114_v10, %s7534_s23  ;;  %276 = vst [vmem:[#allocation1 + $0x1] ss:$2 sm:$0xff] %v55_v1 }
  0x1e   :  { %93 = vst [vmem:[#allocation2 + $0x38] sm:$0x3] %v77_v21 }
  0x1f   :  { %v206_v23 = vld.sshfl [vmem:[#allocation1 + $0x20] sm:$0xff pattern:$0x75643120]  ;;  %v208_v24 = vld.sshfl [vmem:[#allocation1 + $0x28] sm:$0xff pattern:$0x75643120] }
  0x20   :  { %282 = vst [vmem:[#allocation1 + $0x21] ss:$2 sm:$0xff] %v57_v2  ;;  %v124_v31 = vld.sshfl [vmem:[#allocation1 + $0x38] sm:$0xff pattern:$0x75643120] }
  0x21   :  { %v122_v32 = vld.sshfl [vmem:[#allocation1 + $0x30] sm:$0xff pattern:$0x75643120]  ;;  %42 = vst [vmem:[#allocation2 + $0x90] sm:$0xcc] %v7537_v42 }
  0x22   :  { %216 = vrot.lane.b32.xlu1 %v200_v18, %s7535_s26  ;;  %v290_v26 = vld.sshfl [vmem:[#allocation1 + $0x10] sm:$0xff pattern:$0x75643120]  ;;  %v292_v27 = vld.sshfl [vmem:[#allocation1 + $0x18] sm:$0xff pattern:$0x75643120] }
  0x23   :  { %220 = vrot.lane.b32.xlu2 %v204_v17, %s7535_s26  ;;  %366 = vst [vmem:[#allocation1 + $0x10] ss:$2 sm:$0xff] %v359_v25 }
  0x24   :  { %v288_v28 = vld.sshfl [vmem:[#allocation1 + $0x8] sm:$0xff pattern:$0x75643120]  ;;  %v286_v29 = vld.sshfl [vmem:[#allocation1] sm:$0xff pattern:$0x75643120] }
  0x25   :  { %126 = vrot.lane.b32.xlu0 %v110_v13, %s7534_s23  ;;  %363 = vst [vmem:[#allocation1] ss:$2 sm:$0xff] %v358_v30 }
  0x26   :  { %197 = vst [vmem:[#allocation1 + $0x30] ss:$2 sm:$0xff] %v97_v22 }
  0x27   :  { %v294_v33 = vld.sshfl [vmem:[#allocation1 + $0x20] sm:$0xff pattern:$0x75643120]  ;;  %v296_v34 = vld.sshfl [vmem:[#allocation1 + $0x28] sm:$0xff pattern:$0x75643120] }
  0x28   :  { %369 = vst [vmem:[#allocation1 + $0x20] ss:$2 sm:$0xff] %v360_v35 }
  0x29   :  { %43 = vst [vmem:[#allocation2 + $0x98] sm:$0xcc] %v7537_v42 }
  0x2a   :  { %214 = vrot.lane.b32.xlu1 %v198_v19, %s7535_s26  ;;  %44 = vst [vmem:[#allocation2 + $0xa0] sm:$0xcc] %v7537_v42  ;;  %v375_v56 = vld.sshfl [vmem:[#allocation1 + $0x10] sm:$0xff pattern:$0x75643120] }
  0x2b   :  { %222 = vrot.lane.b32.xlu2 %v206_v23, %s7535_s26  ;;  %45 = vst [vmem:[#allocation2 + $0xa8] sm:$0xcc] %v7537_v42  ;;  %v376_v60 = vld.sshfl [vmem:[#allocation1 + $0x18] sm:$0xff pattern:$0x75643120] }
  0x2c   :  { %v374_v41 = vld.sshfl [vmem:[#allocation1 + $0x8] sm:$0xff pattern:$0x75643120]  ;;  %46 = vst [vmem:[#allocation2 + $0xb0] sm:$0xc] %v7537_v42 }
  0x2d   :  { %134 = vrot.lane.b32.xlu0 %v118_v15, %s7534_s23  ;;  %v210_v36 = vld.sshfl [vmem:[#allocation1 + $0x30] sm:$0xff pattern:$0x75643120]  ;;  %v212_v37 = vld.sshfl [vmem:[#allocation1 + $0x38] sm:$0xff pattern:$0x75643120] }
  0x2e   :  { %285 = vst [vmem:[#allocation1 + $0x31] ss:$2 sm:$0xff] %v97_v22  ;;  %v373_v55 = vld.sshfl [vmem:[#allocation1] sm:$0xff pattern:$0x75643120] }
  0x2f   :  { %390 = vst [vmem:[#allocation2 + $0x80] sm:$0x33] %v374_v41  ;;  %v377_v62 = vld.sshfl [vmem:[#allocation1 + $0x20] sm:$0xff pattern:$0x75643120] }
  0x30   :  { %47 = vst [vmem:[#allocation2 + $0xb4] sm:$0xff] %v7537_v42 }
  0x31   :  { %49 = vst [vmem:[#allocation2 + $0xc4] sm:$0xff] %v7537_v42 }
  0x32   :  { %306 = vrot.lane.b32.xlu1 %v290_v26, %s7536_s16  ;;  %50 = vst [vmem:[#allocation2 + $0xcc] sm:$0xff] %v7537_v42 }
  0x33   :  { %308 = vrot.lane.b32.xlu2 %v292_v27, %s7536_s16  ;;  %51 = vst [vmem:[#allocation2 + $0xd4] sm:$0xff] %v7537_v42 }
  0x34   :  { %52 = vst [vmem:[#allocation2 + $0xdc] sm:$0xff] %v7537_v42 }
  0x35   :  { %304 = vrot.lane.b32.xlu0 %v288_v28, %s7536_s16  ;;  %v298_v39 = vld.sshfl [vmem:[#allocation1 + $0x30] sm:$0xff pattern:$0x75643120]  ;;  %v300_v40 = vld.sshfl [vmem:[#allocation1 + $0x38] sm:$0xff pattern:$0x75643120] }
  0x36   :  { %372 = vst [vmem:[#allocation1 + $0x30] ss:$2 sm:$0xff] %v361_v38  ;;  %v7185_v45 = vld [vmem:[#allocation2 + $0x84] sm:$0xf]  ;;  %v6544_v48 = vld [vmem:[#allocation2 + $0x80] sm:$0xf] }
  0x37   :  { %v7655_v46 = vor.u32 %v7185_v45, %v6546_v44  ;;  %53 = vst [vmem:[#allocation2 + $0xe4] sm:$0xff] %v7537_v42  ;;  %v7660_v51 = vor.u32 %v7192_v49, %v6544_v48  ;;  %v6538_v1 = vld [vmem:[#allocation2 + $0xb4] sm:$0xf0]  ;;  %v7191_v2 = vld [vmem:[#allocation2 + $0xb0] sm:$0xf0] }
  0x38   :  { %54 = vst [vmem:[#allocation2 + $0xec] sm:$0xf] %v7537_v42  ;;  %v7193_v3 = vld [vmem:[#allocation2 + $0xc0] sm:$0xf0] }
  0x39   :  { %2366 = vst [vmem:[#allocation5 + $0x9c] sm:$0x88] %v7537_v42  ;;  %v7194_v19 = vld [vmem:[#allocation2 + $0xc8] sm:$0xf0]  ;;  %v6562_v21 = vld [vmem:[#allocation2 + $0xcc] sm:$0xf0] }
  0x3a   :  { %310 = vrot.lane.b32.xlu1 %v294_v33, %s7536_s16  ;;  %2367 = vst [vmem:[#allocation5 + $0xa4] sm:$0x88] %v7537_v42  ;;  %v7195_v14 = vld [vmem:[#allocation2 + $0xd0] sm:$0xf0] }
  0x3b   :  { %302 = vrot.lane.b32.xlu2 %v286_v29, %s7536_s16  ;;  %2368 = vst [vmem:[#allocation5 + $0xac] sm:$0x88] %v7537_v42 }
  0x3c   :  { %2369 = vst [vmem:[#allocation5 + $0xb4] sm:$0x88] %v7537_v42 }
  0x3d   :  { %224 = vrot.lane.b32.xlu0 %v208_v24, %s7535_s26  ;;  %2370 = vst [vmem:[#allocation5 + $0xbc] sm:$0x88] %v7537_v42 }
  0x3e   :  { %2371 = vst [vmem:[#allocation5 + $0xc4] sm:$0x88] %v7537_v42 }
  0x3f   :  { %389 = vst [vmem:[#allocation2 + $0x78] sm:$0x33] %v373_v55 }
  0x40   :  { %391 = vst [vmem:[#allocation2 + $0x88] sm:$0x33] %v375_v56 }
  0x41   :  { %392 = vst [vmem:[#allocation2 + $0x90] sm:$0x33] %v376_v60 }
  0x42   :  { %140 = vrot.lane.b32.xlu1 %v124_v31, %s7534_s23  ;;  %393 = vst [vmem:[#allocation2 + $0x98] sm:$0x33] %v377_v62 }
  0x43   :  { %312 = vrot.lane.b32.xlu2 %v296_v34, %s7536_s16 }
  0x45   :  { %138 = vrot.lane.b32.xlu0 %v122_v32, %s7534_s23 }
  0x46   :  { %v7184_v5 = vld [vmem:[#allocation2 + $0x7c] sm:$0xf]  ;;  %v6536_v6 = vld [vmem:[#allocation2 + $0x78] sm:$0xf] }
  0x47   :  { %v7682_v8 = vor.u32 %v7184_v5, %v6538_v1  ;;  %v6552_v9 = vld [vmem:[#allocation2 + $0x88] sm:$0xf]  ;;  %v7684_v10 = vor.u32 %v7191_v2, %v6536_v6 }
  0x48   :  { %v7686_v11 = vor.u32 %v7193_v3, %v6552_v9  ;;  %v6560_v15 = vld [vmem:[#allocation2 + $0x90] sm:$0xf]  ;;  %v7187_v20 = vld [vmem:[#allocation2 + $0x94] sm:$0xf] }
  0x49   :  { %v6568_v18 = vld [vmem:[#allocation2 + $0x98] sm:$0xf]  ;;  %v7701_v27 = vor.u32 %v7194_v19, %v6560_v15  ;;  %v7703_v29 = vor.u32 %v7187_v20, %v6562_v21 }
  0x4a   :  { %314 = vrot.lane.b32.xlu1 %v298_v39, %s7536_s16  ;;  %v7699_v26 = vor.u32 %v7195_v14, %v6568_v18 }
  0x4b   :  { %226 = vrot.lane.b32.xlu2 %v210_v36, %s7535_s26 }
  0x4d   :  { %228 = vrot.lane.b32.xlu0 %v212_v37, %s7535_s26 }
  0x52   :  { %590 = vrot.lane.b32.xlu1 %v7655_v46, %s7538_s0 }
  0x53   :  { %316 = vrot.lane.b32.xlu2 %v300_v40, %s7536_s16  ;;  %s7542_s16 = smov 122  }
  0x55   :  { %588 = vrot.lane.b32.xlu0 %v7660_v51, %s7538_s0 }
  0x5a   :  { %586 = vrot.lane.b32.xlu1 %v7682_v8, %s7538_s0 }
  0x5b   :  { %592 = vrot.lane.b32.xlu2 %v7686_v11, %s7538_s0 }
  0x5d   :  { %584 = vrot.lane.b32.xlu0 %v7684_v10, %s7538_s0 }
  0x62   :  { %596 = vrot.lane.b32.xlu1 %v7701_v27, %s7538_s0 }
  0x63   :  { %598 = vrot.lane.b32.xlu2 %v7703_v29, %s7538_s0 }
  0x65   :  { %600 = vrot.lane.b32.xlu0 %v7699_v26, %s7538_s0 }
  0x75   :  { %v7653_v43 = vpop.permute.xlu2 %218 }
  0x76   :  { %v232_v47 = vrot.slane %v7653_v43, 4 }
  0x7d   :  { %v221_v50 = vpop.permute.xlu2 %220 }
  0x7e   :  { %v233_v52 = vrot.slane %v221_v50, 4 }
  0x80   :  { %v243_v53 = vsel %vm150_vm0, %v232_v47, %v233_v52 }
  0x81   :  { %v244_v54 = vsel %vm239_vm1, %v7653_v43, %v243_v53 }
  0x82   :  { %264 = vst [vmem:[#allocation2 + $0x4c] sm:$0x33] %v244_v54  ;;  %v378_v54 = vld.sshfl [vmem:[#allocation1 + $0x28] sm:$0xff pattern:$0x75643120] }
  0x83   :  { %394 = vst [vmem:[#allocation2 + $0xa0] sm:$0x33] %v378_v54 }
  0x84   :  { %v7669_v57 = vpop.permute.xlu1 %132 }
  0x85   :  { %v7671_v58 = vpop.permute.xlu2 %222  ;;  %v145_v12 = vrot.slane %v7669_v57, 4 }
  0x86   :  { %v234_v59 = vrot.slane %v7671_v58, 4 }
  0x87   :  { %v129_v61 = vpop.permute.xlu0 %128 }
  0x88   :  { %v245_v63 = vsel %vm150_vm0, %v233_v52, %v234_v59  ;;  %v143_v16 = vrot.slane %v129_v61, 4 }
  0x89   :  { %v246_v0 = vsel %vm239_vm1, %v221_v50, %v245_v63 }
  0x8a   :  { %265 = vst [vmem:[#allocation2 + $0x54] sm:$0x33] %v246_v0 }
  0x8c   :  { %v7678_v4 = vpop.permute.xlu1 %136 }
  0x8d   :  { %v7680_v7 = vpop.permute.xlu2 %308  ;;  %v147_v43 = vrot.slane %v7678_v4, 4 }
  0x8e   :  { %v321_v49 = vrot.slane %v7680_v7, 4 }
  0x8f   :  { %v131_v13 = vpop.permute.xlu0 %130 }
  0x90   :  { %v144_v17 = vrot.slane %v131_v13, 4 }
  0x92   :  { %v154_v22 = vsel %vm150_vm0, %v143_v16, %v144_v17  ;;  %v156_v23 = vsel %vm150_vm0, %v144_v17, %v145_v12 }
  0x93   :  { %v155_v24 = vsel %vm152_vm2, %v129_v61, %v154_v22  ;;  %v157_v25 = vsel %vm152_vm2, %v131_v13, %v156_v23 }
  0x94   :  { %176 = vst [vmem:[#allocation2 + $0x8] sm:$0xcc] %v155_v24  ;;  %v217_v28 = vpop.permute.xlu1 %216 }
  0x95   :  { %177 = vst [vmem:[#allocation2 + $0x10] sm:$0xcc] %v157_v25  ;;  %v231_v30 = vrot.slane %v217_v28, 4  ;;  %v303_v31 = vpop.permute.xlu2 %302 }
  0x96   :  { %v318_v60 = vrot.slane %v303_v31, 4 }
  0x97   :  { %v127_v32 = vpop.permute.xlu0 %126  ;;  %v241_v33 = vsel %vm150_vm0, %v231_v30, %v232_v47 }
  0x98   :  { %v142_v34 = vrot.slane %v127_v32, 4  ;;  %v242_v35 = vsel %vm239_vm1, %v217_v28, %v241_v33  ;;  %v379_v33 = vld.sshfl [vmem:[#allocation1 + $0x30] sm:$0xff pattern:$0x75643120] }
  0x99   :  { %263 = vst [vmem:[#allocation2 + $0x44] sm:$0x33] %v242_v35 }
  0x9a   :  { %v151_v36 = vsel %vm150_vm0, %v142_v34, %v143_v16  ;;  %395 = vst [vmem:[#allocation2 + $0xa8] sm:$0x33] %v379_v33 }
  0x9b   :  { %v153_v37 = vsel %vm152_vm2, %v127_v32, %v151_v36  ;;  %v6484_v28 = vld [vmem:[#allocation2 + $0x8] sm:$0xf] }
  0x9c   :  { %175 = vst [vmem:[#allocation2] sm:$0xcc] %v153_v37  ;;  %v215_v38 = vpop.permute.xlu1 %214  ;;  %v6492_v21 = vld [vmem:[#allocation2 + $0x10] sm:$0xf] }
  0x9d   :  { %v230_v39 = vrot.slane %v215_v38, 4  ;;  %v7717_v40 = vpop.permute.xlu2 %312 }
  0x9e   :  { %v323_v5 = vrot.slane %v7717_v40, 4 }
  0x9f   :  { %v135_v41 = vpop.permute.xlu0 %134  ;;  %v238_v42 = vsel %vm150_vm0, %v230_v39, %v231_v30  ;;  %v7170_v30 = vld [vmem:[#allocation2 + $0xc] sm:$0xf] }
  0xa0   :  { %v146_v44 = vrot.slane %v135_v41, 4  ;;  %v240_v45 = vsel %vm239_vm1, %v215_v38, %v238_v42  ;;  %v7186_v42 = vld [vmem:[#allocation2 + $0x8c] sm:$0xf] }
  0xa1   :  { %262 = vst [vmem:[#allocation2 + $0x3c] sm:$0x33] %v240_v45 }
  0xa2   :  { %v158_v47 = vsel %vm150_vm0, %v145_v12, %v146_v44  ;;  %v160_v48 = vsel %vm150_vm0, %v146_v44, %v147_v43  ;;  %v6554_v44 = vld [vmem:[#allocation2 + $0xc4] sm:$0xf0] }
  0xa3   :  { %v159_v50 = vsel %vm152_vm2, %v7669_v57, %v158_v47  ;;  %v161_v52 = vsel %vm152_vm2, %v135_v41, %v160_v48  ;;  %v6476_v47 = vld [vmem:[#allocation2] sm:$0xf] }
  0xa4   :  { %178 = vst [vmem:[#allocation2 + $0x18] sm:$0xcc] %v159_v50  ;;  %v307_v53 = vpop.permute.xlu1 %306 }
  0xa5   :  { %179 = vst [vmem:[#allocation2 + $0x20] sm:$0xcc] %v161_v52  ;;  %v320_v55 = vrot.slane %v307_v53, 4  ;;  %v7730_v56 = vpop.permute.xlu2 %226 }
  0xa6   :  { %v236_v13 = vrot.slane %v7730_v56, 4 }
  0xa7   :  { %v331_v61 = vsel %vm150_vm0, %v320_v55, %v321_v49  ;;  %v305_v62 = vpop.permute.xlu0 %304 }
  0xa8   :  { %v332_v63 = vsel %vm327_vm3, %v307_v53, %v331_v61  ;;  %v319_v0 = vrot.slane %v305_v62, 4 }
  0xa9   :  { %352 = vst [vmem:[#allocation2 + $0x4c] sm:$0xcc] %v332_v63 }
  0xaa   :  { %v326_v57 = vsel %vm150_vm0, %v318_v60, %v319_v0  ;;  %v329_v1 = vsel %vm150_vm0, %v319_v0, %v320_v55  ;;  %v7783_v55 = vor.u32 %v7186_v42, %v6554_v44  ;;  %v7169_v60 = vld [vmem:[#allocation2 + $0x4] sm:$0xf]  ;;  %v7188_v44 = vld [vmem:[#allocation2 + $0x9c] sm:$0xf] }
  0xab   :  { %v328_v2 = vsel %vm327_vm3, %v303_v31, %v326_v57  ;;  %v330_v3 = vsel %vm327_vm3, %v305_v62, %v329_v1 }
  0xac   :  { %350 = vst [vmem:[#allocation2 + $0x3c] sm:$0xcc] %v328_v2  ;;  %v311_v6 = vpop.permute.xlu1 %310 }
  0xad   :  { %351 = vst [vmem:[#allocation2 + $0x44] sm:$0xcc] %v330_v3  ;;  %v322_v9 = vrot.slane %v311_v6, 4  ;;  %v7739_v12 = vpop.permute.xlu2 %316 }
  0xae   :  { %v325_v14 = vrot.slane %v7739_v12, 4 }
  0xaf   :  { %v333_v15 = vsel %vm150_vm0, %v321_v49, %v322_v9  ;;  %v335_v16 = vsel %vm150_vm0, %v322_v9, %v323_v5  ;;  %v225_v17 = vpop.permute.xlu0 %224 }
  0xb0   :  { %v334_v18 = vsel %vm327_vm3, %v7680_v7, %v333_v15  ;;  %v336_v19 = vsel %vm327_vm3, %v311_v6, %v335_v16  ;;  %v235_v20 = vrot.slane %v225_v17, 4  ;;  %v7178_v22 = vld [vmem:[#allocation2 + $0x48] sm:$0xf0]  ;;  %v341_v23 = vsel %vm327_vm3, %v7739_v12, %v325_v14  ;;  %v7172_v6 = vld [vmem:[#allocation2 + $0x1c] sm:$0xf] }
  0xb1   :  { %353 = vst [vmem:[#allocation2 + $0x54] sm:$0xcc] %v334_v18  ;;  %v7752_v24 = vor.u32 %v7178_v22, %v6492_v21  ;;  %v6508_v18 = vld [vmem:[#allocation2 + $0x20] sm:$0xf]  ;;  %v7171_v21 = vld [vmem:[#allocation2 + $0x14] sm:$0xf] }
  0xb2   :  { %354 = vst [vmem:[#allocation2 + $0x5c] sm:$0xcc] %v336_v19  ;;  %v247_v25 = vsel %vm150_vm0, %v234_v59, %v235_v20  ;;  %v249_v7 = vsel %vm150_vm0, %v235_v20, %v236_v13  ;;  %v7189_v22 = vld [vmem:[#allocation2 + $0xa4] sm:$0xf] }
  0xb3   :  { %v248_v31 = vsel %vm239_vm1, %v7671_v58, %v247_v25  ;;  %v250_v32 = vsel %vm239_vm1, %v225_v17, %v249_v7  ;;  %562 = vrot.lane.b32.xlu2 %v7752_v24, %s7538_s0  ;;  %357 = vst [vmem:[#allocation2 + $0x74] sm:$0xc] %v341_v23  ;;  %v7176_v39 = vld [vmem:[#allocation2 + $0x38] sm:$0xf0]  ;;  %v6478_v52 = vld [vmem:[#allocation2 + $0x3c] sm:$0xf0] }
  0xb4   :  { %266 = vst [vmem:[#allocation2 + $0x5c] sm:$0x33] %v248_v31  ;;  %v7177_v34 = vld [vmem:[#allocation2 + $0x40] sm:$0xf0]  ;;  %v6486_v35 = vld [vmem:[#allocation2 + $0x44] sm:$0xf0]  ;;  %v141_v59 = vpop.permute.xlu1 %140  ;;  %v7774_v48 = vor.u32 %v7176_v39, %v6476_v47  ;;  %v7787_v62 = vor.u32 %v7169_v60, %v6478_v52 }
  0xb5   :  { %267 = vst [vmem:[#allocation2 + $0x64] sm:$0x33] %v250_v32  ;;  %v7765_v36 = vor.u32 %v7177_v34, %v6484_v28  ;;  %v7767_v37 = vor.u32 %v7170_v30, %v6486_v35  ;;  %v149_v38 = vrot.slane %v141_v59, 4  ;;  %v6500_v17 = vld [vmem:[#allocation2 + $0x18] sm:$0xf] }
  0xb6   :  { %v6576_v23 = vld [vmem:[#allocation2 + $0xa0] sm:$0xf]  ;;  %v7196_v25 = vld [vmem:[#allocation2 + $0xd8] sm:$0xf0]  ;;  %v6584_v31 = vld [vmem:[#allocation2 + $0xa8] sm:$0xf] }
  0xb7   :  { %558 = vrot.lane.b32.xlu0 %v7765_v36, %s7538_s0  ;;  %560 = vrot.lane.b32.xlu1 %v7767_v37, %s7538_s0  ;;  %v166_v58 = vsel %vm152_vm2, %v141_v59, %v149_v38  ;;  %v139_v41 = vpop.permute.xlu0 %138  ;;  %v7824_v30 = vor.u32 %v7196_v25, %v6576_v23  ;;  %v7197_v32 = vld [vmem:[#allocation2 + $0xe0] sm:$0xf0] }
  0xb8   :  { %182 = vst [vmem:[#allocation2 + $0x38] sm:$0xc] %v166_v58  ;;  %v148_v45 = vrot.slane %v139_v41, 4  ;;  %v6502_v63 = vld [vmem:[#allocation2 + $0x54] sm:$0xf0]  ;;  %v7830_v33 = vor.u32 %v7197_v32, %v6584_v31 }
  0xb9   :  { %v7179_v9 = vld [vmem:[#allocation2 + $0x50] sm:$0xf0]  ;;  %v7800_v12 = vor.u32 %v7172_v6, %v6502_v63  ;;  %v7173_v52 = vld [vmem:[#allocation2 + $0x24] sm:$0xf]  ;;  %v6586_v63 = vld [vmem:[#allocation2 + $0xe4] sm:$0xf0] }
  0xba   :  { %v162_v49 = vsel %vm150_vm0, %v147_v43, %v148_v45  ;;  %v164_v50 = vsel %vm150_vm0, %v148_v45, %v149_v38  ;;  %v7810_v19 = vor.u32 %v7179_v9, %v6500_v17  ;;  %v6570_v45 = vld [vmem:[#allocation2 + $0xd4] sm:$0xf0]  ;;  %v7874_v9 = vpop.permute.xlu2 %592 }
  0xbb   :  { %v163_v53 = vsel %vm152_vm2, %v7678_v4, %v162_v49  ;;  %v165_v54 = vsel %vm152_vm2, %v139_v41, %v164_v50  ;;  %554 = vrot.lane.b32.xlu2 %v7774_v48, %s7538_s0  ;;  %v7180_v15 = vld [vmem:[#allocation2 + $0x58] sm:$0xf0]  ;;  %v6510_v49 = vld [vmem:[#allocation2 + $0x5c] sm:$0xf0]  ;;  %v7846_v50 = vor.u32 %v7188_v44, %v6570_v45 }
  0xbc   :  { %180 = vst [vmem:[#allocation2 + $0x28] sm:$0xcc] %v163_v53  ;;  %v315_v61 = vpop.permute.xlu1 %314  ;;  %v7812_v20 = vor.u32 %v7180_v15, %v6508_v18  ;;  %v7848_v60 = vor.u32 %v7173_v52, %v6510_v49  ;;  %v7933_v44 = vld [vmem:[%s10999_s1 + $0x4] sm:$0xf] }
  0xbd   :  { %181 = vst [vmem:[#allocation2 + $0x30] sm:$0xcc] %v165_v54  ;;  %v324_v43 = vrot.slane %v315_v61, 4  ;;  %v7198_v54 = vld [vmem:[#allocation2 + $0xe8] sm:$0xf0] }
  0xbf   :  { %594 = vrot.lane.b32.xlu1 %v7783_v55, %s7538_s0  ;;  %556 = vrot.lane.b32.xlu0 %v7787_v62, %s7538_s0  ;;  %v337_v4 = vsel %vm150_vm0, %v323_v5, %v324_v43  ;;  %v229_v0 = vpop.permute.xlu0 %228  ;;  %v339_v57 = vsel %vm150_vm0, %v324_v43, %v325_v14  ;;  %v380_v14 = vld.sshfl [vmem:[#allocation1 + $0x38] sm:$0xff pattern:$0x75643120]  ;;  %v7190_v43 = vld [vmem:[#allocation2 + $0xac] sm:$0xf] }
  0xc0   :  { %v338_v1 = vsel %vm327_vm3, %v7717_v40, %v337_v4  ;;  %v237_v2 = vrot.slane %v229_v0, 4  ;;  %v340_v3 = vsel %vm327_vm3, %v315_v61, %v339_v57  ;;  %396 = vst [vmem:[#allocation2 + $0xb0] sm:$0x3] %v380_v14  ;;  %v6532_v57 = vld [vmem:[#allocation2 + $0x38] sm:$0xf] }
  0xc1   :  { %355 = vst [vmem:[#allocation2 + $0x64] sm:$0xcc] %v338_v1 }
  0xc2   :  { %v251_v16 = vsel %vm150_vm0, %v236_v13, %v237_v2  ;;  %v253_v5 = vsel %vm239_vm1, %v229_v0, %v237_v2  ;;  %356 = vst [vmem:[#allocation2 + $0x6c] sm:$0xcc] %v340_v3  ;;  %v6494_v13 = vld [vmem:[#allocation2 + $0x4c] sm:$0xf0]  ;;  %v7856_v0 = vor.u32 %v7190_v43, %v6586_v63 }
  0xc3   :  { %v252_v40 = vsel %vm239_vm1, %v7730_v56, %v251_v16  ;;  %269 = vst [vmem:[#allocation2 + $0x74] sm:$0x3] %v253_v5  ;;  %568 = vrot.lane.b32.xlu2 %v7800_v12, %s7538_s0  ;;  %v6578_v56 = vld [vmem:[#allocation2 + $0xdc] sm:$0xf0]  ;;  %v7818_v7 = vor.u32 %v7171_v21, %v6494_v13  ;;  %v7174_v59 = vld [vmem:[#allocation2 + $0x2c] sm:$0xf] }
  0xc4   :  { %268 = vst [vmem:[#allocation2 + $0x6c] sm:$0x33] %v252_v40  ;;  %v7820_v28 = vor.u32 %v7189_v22, %v6578_v56  ;;  %v6516_v38 = vld [vmem:[#allocation2 + $0x28] sm:$0xf]  ;;  %v6524_v41 = vld [vmem:[#allocation2 + $0x30] sm:$0xf]  ;;  %v591_v15 = vpop.permute.xlu1 %590  ;;  %v599_v56 = vpop.permute.xlu2 %598 }
  0xc5   :  { %v7175_v2 = vld [vmem:[#allocation2 + $0x34] sm:$0xf]  ;;  %v632_v16 = vsel %vm614_vm4, %v591_v15, %v7874_v9 }
  0xc6   :  { %722 = vmatpush.bf16.msra.mxu3 %v632_v16 }
  0xc7   :  { %566 = vrot.lane.b32.xlu1 %v7810_v19, %s7538_s0  ;;  %570 = vrot.lane.b32.xlu0 %v7812_v20, %s7538_s0  ;;  %v6592_v53 = vld [vmem:[#allocation2 + $0xb0] sm:$0xf]  ;;  %v589_v5 = vpop.permute.xlu0 %588 }
  0xc8   :  { %v6518_v34 = vld [vmem:[#allocation2 + $0x64] sm:$0xf0]  ;;  %v7181_v35 = vld [vmem:[#allocation2 + $0x60] sm:$0xf0]  ;;  %v7854_v61 = vor.u32 %v7198_v54, %v6592_v53  ;;  %v631_v14 = vsel %vm614_vm4, %v589_v5, %v591_v15 }
  0xc9   :  { %v7834_v39 = vor.u32 %v7174_v59, %v6518_v34  ;;  %v7836_v58 = vor.u32 %v7181_v35, %v6516_v38  ;;  %709 = vmatpush.bf16.msra.mxu2 %v631_v14 }
  0xca   :  { %v7183_v4 = vld [vmem:[#allocation2 + $0x70] sm:$0xf0] }
  0xcb   :  { %564 = vrot.lane.b32.xlu2 %v7818_v7, %s7538_s0  ;;  %v7182_v42 = vld [vmem:[#allocation2 + $0x68] sm:$0xf0]  ;;  %v7860_v1 = vor.u32 %v7183_v4, %v6532_v57  ;;  %v6526_v3 = vld [vmem:[#allocation2 + $0x6c] sm:$0xf0] }
  0xcc   :  { %v7842_v47 = vor.u32 %v7182_v42, %v6524_v41  ;;  %v7866_v6 = vor.u32 %v7175_v2, %v6526_v3  ;;  %v587_v40 = vpop.permute.xlu1 %586 }
  0xcd   :  { %v630_v18 = vsel %vm614_vm4, %v587_v40, %v589_v5 }
  0xce   :  { %696 = vmatpush.bf16.msra.mxu1 %v630_v18 }
  0xcf   :  { %606 = vrot.lane.b32.xlu1 %v7820_v28, %s7538_s0  ;;  %604 = vrot.lane.b32.xlu0 %v7824_v30, %s7538_s0  ;;  %v585_v17 = vpop.permute.xlu0 %584 }
  0xd0   :  { %v629_v13 = vsel %vm614_vm4, %v585_v17, %v587_v40 }
  0xd1   :  { %683 = vmatpush.bf16.msra.mxu0 %v629_v13 }
  0xd3   :  { %608 = vrot.lane.b32.xlu2 %v7830_v33, %s7538_s0 }
  0xd4   :  { %v597_v31 = vpop.permute.xlu1 %596 }
  0xd5   :  { %v635_v41 = vsel %vm614_vm4, %v597_v31, %v599_v56 }
  0xd7   :  { %576 = vrot.lane.b32.xlu1 %v7834_v39, %s7538_s0  ;;  %574 = vrot.lane.b32.xlu0 %v7836_v58, %s7538_s0  ;;  %v7917_v25 = vpop.permute.xlu0 %600 }
  0xd8   :  { %v636_v42 = vsel %vm614_vm4, %v599_v56, %v7917_v25 }
  0xdb   :  { %578 = vrot.lane.b32.xlu2 %v7842_v47, %s7538_s0 }
  0xdf   :  { %572 = vrot.lane.b32.xlu1 %v7848_v60, %s7538_s0  ;;  %602 = vrot.lane.b32.xlu0 %v7846_v50, %s7538_s0 }
  0xe3   :  { %612 = vrot.lane.b32.xlu2 %v7854_v61, %s7538_s0 }
  0xe7   :  { %610 = vrot.lane.b32.xlu1 %v7856_v0, %s7538_s0  ;;  %582 = vrot.lane.b32.xlu0 %v7860_v1, %s7538_s0 }
  0xeb   :  { %580 = vrot.lane.b32.xlu2 %v7866_v6, %s7538_s0 }
  0xef   :  { %1134 = vrot.lane.b32.xlu1 %v7682_v8, %s7539_s19  ;;  %1132 = vrot.lane.b32.xlu0 %v7684_v10, %s7539_s19 }
  0xf3   :  { %1136 = vrot.lane.b32.xlu2 %v7660_v51, %s7539_s19 }
  0xf7   :  { %1142 = vrot.lane.b32.xlu1 %v7783_v55, %s7539_s19  ;;  %1140 = vrot.lane.b32.xlu0 %v7686_v11, %s7539_s19 }
  0xfb   :  { %1144 = vrot.lane.b32.xlu2 %v7701_v27, %s7539_s19 }
  0xff   :  { %1104 = vrot.lane.b32.xlu1 %v7787_v62, %s7539_s19  ;;  %1102 = vrot.lane.b32.xlu0 %v7774_v48, %s7539_s19 }
 0x103   :  { %1106 = vrot.lane.b32.xlu2 %v7765_v36, %s7539_s19 }
 0x107   :  { %1112 = vrot.lane.b32.xlu1 %v7818_v7, %s7539_s19  ;;  %1110 = vrot.lane.b32.xlu0 %v7752_v24, %s7539_s19 }
 0x10b   :  { %1114 = vrot.lane.b32.xlu2 %v7810_v19, %s7539_s19 }
 0x10d   :  { %v563_v21 = vpop.permute.xlu2 %562 }
 0x10f   :  { %1108 = vrot.lane.b32.xlu1 %v7767_v37, %s7539_s19  ;;  %1138 = vrot.lane.b32.xlu0 %v7655_v46, %s7539_s19 }
 0x113   :  { %1148 = vrot.lane.b32.xlu2 %v7699_v26, %s7539_s19 }
 0x115   :  { %v555_v22 = vpop.permute.xlu2 %554 }
 0x117   :  { %1152 = vrot.lane.b32.xlu1 %v7824_v30, %s7539_s19  ;;  %1150 = vrot.lane.b32.xlu0 %v7846_v50, %s7539_s19 }
 0x11b   :  { %1118 = vrot.lane.b32.xlu2 %v7812_v20, %s7539_s19 }
 0x11d   :  { %v569_v23 = vpop.permute.xlu2 %568 }
 0x11f   :  { %1122 = vrot.lane.b32.xlu1 %v7836_v58, %s7539_s19  ;;  %1120 = vrot.lane.b32.xlu0 %v7848_v60, %s7539_s19 }
 0x123   :  { %1146 = vrot.lane.b32.xlu2 %v7703_v29, %s7539_s19 }
 0x125   :  { %v565_v32 = vpop.permute.xlu2 %564 }
 0x126   :  { %v619_v57 = vsel %vm614_vm4, %v563_v21, %v565_v32 }
 0x127   :  { %1156 = vrot.lane.b32.xlu1 %v7830_v33, %s7539_s19  ;;  %1116 = vrot.lane.b32.xlu0 %v7800_v12, %s7539_s19 }
 0x129   :  { %v559_v34 = vpop.permute.xlu0 %558  ;;  %v561_v35 = vpop.permute.xlu1 %560 }
 0x12a   :  { %v617_v59 = vsel %vm614_vm4, %v559_v34, %v561_v35  ;;  %v618_v38 = vsel %vm614_vm4, %v561_v35, %v563_v21 }
 0x12b   :  { %710 = vmatpush.bf16.msra.mxu2 %v617_v59  ;;  %723 = vmatpush.bf16.msra.mxu3 %v618_v38 }
 0x12c   :  { %1158 = vrot.lane.b32.xlu2 %v7856_v0, %s7539_s19 }
 0x12d   :  { %v7937_v45 = vpop.permute.xlu2 %608 }
 0x12e   :  { %6596 = vmatmul.msk.bf16.vlgmr.msra.gmra.mxu2 %vm327_vm3, %v7933_v44  ;;  %6597 = vmatmul.msk.bf16.vlgmr.msra.gmra.mxu3 %vm327_vm3, %v7933_v44 }
 0x12f   :  { %761 = vmatpush.bf16.msrb.mxu2 %v635_v41  ;;  %774 = vmatpush.bf16.msrb.mxu3 %v636_v42 }
 0x130   :  { %1126 = vrot.lane.b32.xlu1 %v7842_v47, %s7539_s19  ;;  %1160 = vrot.lane.b32.xlu0 %v7854_v61, %s7539_s19 }
 0x131   :  { %v595_v49 = vpop.permute.xlu1 %594  ;;  %v557_v52 = vpop.permute.xlu0 %556 }
 0x132   :  { %v615_v53 = vsel %vm614_vm4, %v555_v22, %v557_v52  ;;  %v616_v54 = vsel %vm614_vm4, %v557_v52, %v559_v34  ;;  %v633_v43 = vsel %vm614_vm4, %v7874_v9, %v595_v49  ;;  %v634_v63 = vsel %vm614_vm4, %v595_v49, %v597_v31 }
 0x133   :  { %684 = vmatpush.bf16.msra.mxu0 %v615_v53  ;;  %697 = vmatpush.bf16.msra.mxu1 %v616_v54  ;;  %v8034_v54 = vld [vmem:[%s10999_s1] sm:$0xf] }
 0x134   :  { %1128 = vrot.lane.b32.xlu2 %v7866_v6, %s7539_s19 }
 0x135   :  { %v7954_v4 = vpop.permute.xlu2 %578 }
 0x136   :  { %6594 = vmatmul.msk.bf16.vlgmr.msra.gmra.mxu0 %vm327_vm3, %v7933_v44  ;;  %6595 = vmatmul.msk.bf16.vlgmr.msra.gmra.mxu1 %vm327_vm3, %v7933_v44 }
 0x137   :  { %735 = vmatpush.bf16.msrb.mxu0 %v633_v43  ;;  %748 = vmatpush.bf16.msrb.mxu1 %v634_v63 }
 0x138   :  { %1154 = vrot.lane.b32.xlu1 %v7820_v28, %s7539_s19  ;;  %1130 = vrot.lane.b32.xlu0 %v7860_v1, %s7539_s19 }
 0x139   :  { %v567_v2 = vpop.permute.xlu1 %566  ;;  %v571_v3 = vpop.permute.xlu0 %570 }
 0x13a   :  { %v620_v9 = vsel %vm614_vm4, %v565_v32, %v567_v2  ;;  %v621_v15 = vsel %vm614_vm4, %v567_v2, %v569_v23  ;;  %v622_v16 = vsel %vm614_vm4, %v569_v23, %v571_v3 }
 0x13b   :  { %736 = vmatpush.bf16.msrb.mxu0 %v619_v57  ;;  %749 = vmatpush.bf16.msrb.mxu1 %v620_v9 }
 0x13c   :  { %762 = vmatpush.bf16.msrb.mxu2 %v621_v15  ;;  %775 = vmatpush.bf16.msrb.mxu3 %v622_v16 }
 0x13d   :  { %1124 = vrot.lane.b32.xlu2 %v7834_v39, %s7539_s19  ;;  %v613_v5 = vpop.permute.xlu2 %612 }
 0x13f   :  { %6600 = vmatmul.msk.bf16.vlgmr.msrb.gmra.mxu2 %vm327_vm3, %v7933_v44  ;;  %6601 = vmatmul.msk.bf16.vlgmr.msrb.gmra.mxu3 %vm327_vm3, %v7933_v44 }
 0x140   :  { %1470 = vrot.lane.b32.xlu1 %v7660_v51, %s7540_s22  ;;  %1468 = vrot.lane.b32.xlu0 %v7682_v8, %s7540_s22 }
 0x141   :  { %v607_v14 = vpop.permute.xlu1 %606  ;;  %v605_v40 = vpop.permute.xlu0 %604 }
 0x142   :  { %v639_v17 = vsel %vm614_vm4, %v605_v40, %v607_v14  ;;  %v640_v18 = vsel %vm614_vm4, %v607_v14, %v7937_v45 }
 0x143   :  { %813 = vmatpush.bf16.msra.mxu2 %v639_v17  ;;  %826 = vmatpush.bf16.msra.mxu3 %v640_v18 }
 0x145   :  { %1472 = vrot.lane.b32.xlu2 %v7655_v46, %s7540_s22  ;;  %v581_v13 = vpop.permute.xlu2 %580 }
 0x146   :  { %6598 = vmatmul.msk.bf16.vlgmr.msrb.gmra.mxu0 %vm327_vm3, %v7933_v44  ;;  %6599 = vmatmul.msk.bf16.vlgmr.msrb.gmra.mxu1 %vm327_vm3, %v7933_v44 }
 0x148   :  { %1440 = vrot.lane.b32.xlu1 %v7765_v36, %s7540_s22  ;;  %1438 = vrot.lane.b32.xlu0 %v7787_v62, %s7540_s22 }
 0x149   :  { %v577_v56 = vpop.permute.xlu1 %576  ;;  %v575_v21 = vpop.permute.xlu0 %574 }
 0x14a   :  { %v625_v22 = vsel %vm614_vm4, %v575_v21, %v577_v56  ;;  %v626_v23 = vsel %vm614_vm4, %v577_v56, %v7954_v4 }
 0x14b   :  { %814 = vmatpush.bf16.msra.mxu2 %v625_v22  ;;  %827 = vmatpush.bf16.msra.mxu3 %v626_v23 }
 0x14d   :  { %1442 = vrot.lane.b32.xlu2 %v7767_v37, %s7540_s22  ;;  %v7997_v31 = vpop.permute.xlu2 %1136 }
 0x14f   :  { %911 = vmatpush.bf16.msrb.mxu3 %v7684_v10  ;;  %865 = vmatpush.bf16.msrb.mxu2 %v613_v5 }
 0x150   :  { %6604 = vmatmul.msk.bf16.vlgmr.msra.gmra.mxu2 %vm327_vm3, %v7933_v44  ;;  %6605 = vmatmul.msk.bf16.vlgmr.msra.gmra.mxu3 %vm327_vm3, %v7933_v44 }
 0x151   :  { %1436 = vrot.lane.b32.xlu1 %v7774_v48, %s7540_s22  ;;  %1466 = vrot.lane.b32.xlu0 %v7684_v10, %s7540_s22  ;;  %v573_v32 = vpop.permute.xlu1 %572  ;;  %v603_v34 = vpop.permute.xlu0 %602 }
 0x152   :  { %v637_v35 = vsel %vm614_vm4, %v7917_v25, %v603_v34  ;;  %v638_v59 = vsel %vm614_vm4, %v603_v34, %v605_v40  ;;  %v623_v41 = vsel %vm614_vm4, %v571_v3, %v573_v32  ;;  %v624_v42 = vsel %vm614_vm4, %v573_v32, %v575_v21 }
 0x153   :  { %912 = vmatpush.bf16.msrb.mxu3 %v7774_v48  ;;  %787 = vmatpush.bf16.msra.mxu0 %v637_v35 }
 0x154   :  { %800 = vmatpush.bf16.msra.mxu1 %v638_v59 }
 0x155   :  { %1476 = vrot.lane.b32.xlu2 %v7783_v55, %s7540_s22  ;;  %v8015_v38 = vpop.permute.xlu2 %1144 }
 0x157   :  { %963 = vmatpush.bf16.msra.mxu3 %v7686_v11  ;;  %788 = vmatpush.bf16.msra.mxu0 %v623_v41 }
 0x158   :  { %801 = vmatpush.bf16.msra.mxu1 %v624_v42 }
 0x159   :  { %1480 = vrot.lane.b32.xlu1 %v7703_v29, %s7540_s22  ;;  %1478 = vrot.lane.b32.xlu0 %v7701_v27, %s7540_s22  ;;  %v611_v25 = vpop.permute.xlu1 %610  ;;  %v583_v49 = vpop.permute.xlu0 %582 }
 0x15a   :  { %6602 = vmatmul.msk.bf16.vlgmr.msra.gmra.mxu0 %vm327_vm3, %v7933_v44  ;;  %866 = vmatpush.bf16.msrb.mxu2 %v583_v49  ;;  %v641_v52 = vsel %vm614_vm4, %v7937_v45, %v611_v25  ;;  %v642_v53 = vsel %vm614_vm4, %v611_v25, %v613_v5  ;;  %v627_v45 = vsel %vm614_vm4, %v7954_v4, %v581_v13 }
 0x15b   :  { %964 = vmatpush.bf16.msra.mxu3 %v7752_v24  ;;  %6603 = vmatmul.msk.bf16.vlgmr.msra.gmra.mxu1 %vm327_vm3, %v7933_v44  ;;  %v628_v63 = vsel %vm614_vm4, %v581_v13, %v583_v49 }
 0x15c   :  { %839 = vmatpush.bf16.msrb.mxu0 %v641_v52  ;;  %852 = vmatpush.bf16.msrb.mxu1 %v642_v53 }
 0x15d   :  { %1446 = vrot.lane.b32.xlu2 %v7818_v7, %s7540_s22  ;;  %v8038_v43 = vpop.permute.xlu2 %1106 }
 0x15e   :  { %950 = vmatpush.bf16.msra.mxu2 %v7655_v46 }
 0x160   :  { %6608 = vmatmul.msk.bf16.vlgmr.msrb.gmra.mxu2 %vm327_vm3, %v7933_v44  ;;  %6609 = vmatmul.msk.bf16.vlgmr.msrb.gmra.mxu3 %vm327_vm3, %v8034_v54 }
 0x161   :  { %1450 = vrot.lane.b32.xlu1 %v7800_v12, %s7540_s22  ;;  %1015 = vmatpush.bf16.msrb.mxu3 %v7699_v26  ;;  %v1135_v57 = vpop.permute.xlu1 %1134  ;;  %v1133_v2 = vpop.permute.xlu0 %1132 }
 0x162   :  { %1448 = vrot.lane.b32.xlu0 %v7810_v19, %s7540_s22  ;;  %840 = vmatpush.bf16.msrb.mxu0 %v627_v45  ;;  %v1177_v18 = vsel %vm1162_vm5, %v1133_v2, %v1135_v57  ;;  %v1178_v13 = vsel %vm1162_vm5, %v1135_v57, %v7997_v31 }
 0x163   :  { %853 = vmatpush.bf16.msrb.mxu1 %v628_v63  ;;  %951 = vmatpush.bf16.msra.mxu2 %v7767_v37 }
 0x165   :  { %1016 = vmatpush.bf16.msrb.mxu3 %v7812_v20  ;;  %1474 = vrot.lane.b32.xlu2 %v7686_v11, %s7540_s22  ;;  %v8059_v4 = vpop.permute.xlu2 %1114 }
 0x166   :  { %924 = vmatpush.bf16.msra.mxu0 %v7682_v8 }
 0x167   :  { %937 = vmatpush.bf16.msra.mxu1 %v7660_v51  ;;  %1002 = vmatpush.bf16.msrb.mxu2 %v7703_v29 }
 0x169   :  { %1484 = vrot.lane.b32.xlu1 %v7846_v50, %s7540_s22  ;;  %v8068_v3 = vpop.permute.xlu1 %1142  ;;  %v8070_v9 = vpop.permute.xlu0 %1140 }
 0x16a   :  { %925 = vmatpush.bf16.msra.mxu0 %v7787_v62  ;;  %1444 = vrot.lane.b32.xlu0 %v7752_v24, %s7540_s22  ;;  %v1181_v59 = vsel %vm1162_vm5, %v8070_v9, %v8068_v3  ;;  %v1182_v42 = vsel %vm1162_vm5, %v8068_v3, %v8015_v38 }
 0x16b   :  { %938 = vmatpush.bf16.msra.mxu1 %v7765_v36  ;;  %1003 = vmatpush.bf16.msrb.mxu2 %v7800_v12 }
 0x16c   :  { %6606 = vmatmul.msk.bf16.vlgmr.msrb.gmra.mxu0 %vm327_vm3, %v7933_v44  ;;  %6607 = vmatmul.msk.bf16.vlgmr.msrb.gmra.mxu1 %vm327_vm3, %v7933_v44 }
 0x16d   :  { %1486 = vrot.lane.b32.xlu2 %v7824_v30, %s7540_s22  ;;  %v8080_v15 = vpop.permute.xlu2 %1148 }
 0x16e   :  { %976 = vmatpush.bf16.msrb.mxu0 %v7783_v55 }
 0x16f   :  { %989 = vmatpush.bf16.msrb.mxu1 %v7701_v27 }
 0x170   :  { %6612 = vmatmul.msk.bf16.vlgmr.msra.gmra.mxu2 %vm327_vm3, %v8034_v54  ;;  %6613 = vmatmul.msk.bf16.vlgmr.msra.gmra.mxu3 %vm327_vm3, %v8034_v54 }
 0x171   :  { %1054 = vmatpush.bf16.msra.mxu2 %v7820_v28  ;;  %1067 = vmatpush.bf16.msra.mxu3 %v7830_v33  ;;  %v1105_v44 = vpop.permute.xlu1 %1104  ;;  %v1103_v16 = vpop.permute.xlu0 %1102 }
 0x172   :  { %977 = vmatpush.bf16.msrb.mxu0 %v7818_v7  ;;  %1454 = vrot.lane.b32.xlu1 %v7848_v60, %s7540_s22  ;;  %v1163_v22 = vsel %vm1162_vm5, %v1103_v16, %v1105_v44  ;;  %v1164_v23 = vsel %vm1162_vm5, %v1105_v44, %v8038_v43 }
 0x173   :  { %990 = vmatpush.bf16.msrb.mxu1 %v7810_v19  ;;  %1488 = vrot.lane.b32.xlu0 %v7820_v28, %s7540_s22 }
 0x175   :  { %1055 = vmatpush.bf16.msra.mxu2 %v7834_v39  ;;  %1068 = vmatpush.bf16.msra.mxu3 %v7842_v47  ;;  %v8098_v5 = vpop.permute.xlu2 %1118 }
 0x176   :  { %1456 = vrot.lane.b32.xlu2 %v7836_v58, %s7540_s22 }
 0x179   :  { %v1113_v14 = vpop.permute.xlu1 %1112  ;;  %v8102_v40 = vpop.permute.xlu0 %1110 }
 0x17a   :  { %1482 = vrot.lane.b32.xlu1 %v7699_v26, %s7540_s22  ;;  %v1167_v52 = vsel %vm1162_vm5, %v8102_v40, %v1113_v14  ;;  %v1168_v53 = vsel %vm1162_vm5, %v1113_v14, %v8059_v4 }
 0x17b   :  { %1458 = vrot.lane.b32.xlu0 %v7834_v39, %s7540_s22 }
 0x17c   :  { %6610 = vmatmul.msk.bf16.vlgmr.msra.gmra.mxu0 %vm327_vm3, %v8034_v54  ;;  %6611 = vmatmul.msk.bf16.vlgmr.msra.gmra.mxu1 %vm327_vm3, %v8034_v54 }
 0x17d   :  { %1028 = vmatpush.bf16.msra.mxu0 %v7846_v50  ;;  %1041 = vmatpush.bf16.msra.mxu1 %v7824_v30  ;;  %v8114_v17 = vpop.permute.xlu2 %1146 }
 0x17e   :  { %1452 = vrot.lane.b32.xlu2 %v7812_v20, %s7540_s22 }
 0x180   :  { %6616 = vmatmul.msk.bf16.vlgmr.msrb.gmra.mxu2 %vm327_vm3, %v8034_v54  ;;  %6617 = vmatmul.msk.bf16.vlgmr.msrb.gmra.mxu3 %vm327_vm3, %v8034_v54 }
 0x181   :  { %1029 = vmatpush.bf16.msra.mxu0 %v7848_v60  ;;  %1042 = vmatpush.bf16.msra.mxu1 %v7836_v58  ;;  %v1109_v56 = vpop.permute.xlu1 %1108  ;;  %v1139_v21 = vpop.permute.xlu0 %1138 }
 0x182   :  { %1230 = vmatpush.bf16.msrb.mxu2 %v1177_v18  ;;  %1243 = vmatpush.bf16.msrb.mxu3 %v1178_v13 }
 0x183   :  { %1494 = vrot.lane.b32.xlu1 %v7854_v61, %s7540_s22  ;;  %1492 = vrot.lane.b32.xlu0 %v7856_v0, %s7540_s22 }
 0x186   :  { %1231 = vmatpush.bf16.msrb.mxu2 %v1163_v22  ;;  %1244 = vmatpush.bf16.msrb.mxu3 %v1164_v23  ;;  %v8134_v32 = vpop.permute.xlu2 %1158 }
 0x187   :  { %1462 = vrot.lane.b32.xlu2 %v7866_v6, %s7540_s22 }
 0x189   :  { %v8138_v34 = vpop.permute.xlu1 %1152  ;;  %v1151_v35 = vpop.permute.xlu0 %1150 }
 0x18a   :  { %v1185_v57 = vsel %vm1162_vm5, %v8080_v15, %v1151_v35 }
 0x18b   :  { %1490 = vrot.lane.b32.xlu1 %v7830_v33, %s7540_s22  ;;  %1464 = vrot.lane.b32.xlu0 %v7860_v1, %s7540_s22 }
 0x18c   :  { %6614 = vmatmul.msk.bf16.vlgmr.msrb.gmra.mxu0 %vm327_vm3, %v8034_v54  ;;  %6615 = vmatmul.msk.bf16.vlgmr.msrb.gmra.mxu1 %vm327_vm3, %v8034_v54 }
 0x18d   :  { %1080 = vmatpush.bf16.msrb.mxu0 %v7856_v0  ;;  %1093 = vmatpush.bf16.msrb.mxu1 %v7854_v61 }
 0x18e   :  { %v8158_v41 = vpop.permute.xlu2 %1128 }
 0x18f   :  { %1460 = vrot.lane.b32.xlu2 %v7842_v47, %s7540_s22 }
 0x190   :  { %6620 = vmatmul.msk.bf16.vlgmr.msra.gmra.mxu2 %vm327_vm3, %v8034_v54  ;;  %6621 = vmatmul.msk.bf16.vlgmr.msra.gmra.mxu3 %vm327_vm3, %v8034_v54 }
 0x191   :  { %1081 = vmatpush.bf16.msrb.mxu0 %v7866_v6  ;;  %1094 = vmatpush.bf16.msrb.mxu1 %v7860_v1  ;;  %v8166_v25 = vpop.permute.xlu1 %1122  ;;  %v1121_v49 = vpop.permute.xlu0 %1120 }
 0x192   :  { %1282 = vmatpush.bf16.msra.mxu2 %v1181_v59  ;;  %1295 = vmatpush.bf16.msra.mxu3 %v1182_v42  ;;  %v1172_v44 = vsel %vm1162_vm5, %v1121_v49, %v8166_v25 }
 0x193   :  { %1806 = vrot.lane.b32.xlu1 %v7655_v46, %s7541_s27  ;;  %1804 = vrot.lane.b32.xlu0 %v7660_v51, %s7541_s27  ;;  %v1179_v51 = vsel %vm1162_vm5, %v7997_v31, %v1139_v21  ;;  %v1166_v31 = vsel %vm1162_vm5, %v1109_v56, %v8102_v40 }
 0x196   :  { %1283 = vmatpush.bf16.msra.mxu2 %v1167_v52  ;;  %1296 = vmatpush.bf16.msra.mxu3 %v1168_v53 }
 0x197   :  { %1808 = vrot.lane.b32.xlu2 %v7686_v11, %s7541_s27  ;;  %v8176_v45 = vpop.permute.xlu2 %1124  ;;  %v1180_v11 = vsel %vm1162_vm5, %v1139_v21, %v8070_v9  ;;  %v1171_v9 = vsel %vm1162_vm5, %v8098_v5, %v1121_v49 }
 0x199   :  { %v8180_v46 = vpop.permute.xlu1 %1156  ;;  %v1117_v63 = vpop.permute.xlu0 %1116 }
 0x19b   :  { %1776 = vrot.lane.b32.xlu1 %v7767_v37, %s7541_s27  ;;  %1774 = vrot.lane.b32.xlu0 %v7765_v36, %s7541_s27  ;;  %v8195_v37 = vld [vmem:[%s10999_s1 + $0x8] sm:$0xf]  ;;  %v1165_v36 = vsel %vm1162_vm5, %v8038_v43, %v1109_v56 }
 0x19c   :  { %6618 = vmatmul.msk.bf16.vlgmr.msra.gmra.mxu0 %vm327_vm3, %v8034_v54  ;;  %6619 = vmatmul.msk.bf16.vlgmr.msra.gmra.mxu1 %vm327_vm3, %v8034_v54 }
 0x19d   :  { %1256 = vmatpush.bf16.msra.mxu0 %v1179_v51  ;;  %1269 = vmatpush.bf16.msra.mxu1 %v1180_v11 }
 0x19f   :  { %1778 = vrot.lane.b32.xlu2 %v7752_v24, %s7541_s27  ;;  %v8209_v2 = vpop.permute.xlu2 %1472  ;;  %v1186_v24 = vsel %vm1162_vm5, %v1151_v35, %v8138_v34 }
 0x1a0   :  { %6625 = vmatmul.msk.bf16.vlgmr.msrb.gmra.mxu2 %vm327_vm3, %v8195_v37  ;;  %6626 = vmatmul.msk.bf16.vlgmr.msrb.gmra.mxu3 %vm327_vm3, %v8195_v37 }
 0x1a1   :  { %1257 = vmatpush.bf16.msra.mxu0 %v1165_v36  ;;  %1270 = vmatpush.bf16.msra.mxu1 %v1166_v31 }
 0x1a2   :  { %1334 = vmatpush.bf16.msrb.mxu2 %v1185_v57  ;;  %1347 = vmatpush.bf16.msrb.mxu3 %v1186_v24  ;;  %v8215_v43 = vpop.permute.xlu1 %1126  ;;  %v8217_v3 = vpop.permute.xlu0 %1160 }
 0x1a3   :  { %1802 = vrot.lane.b32.xlu1 %v7682_v8, %s7541_s27  ;;  %1800 = vrot.lane.b32.xlu0 %v7684_v10, %s7541_s27  ;;  %v1183_v10 = vsel %vm1162_vm5, %v8015_v38, %v8114_v17  ;;  %v1189_v38 = vsel %vm1162_vm5, %v8180_v46, %v8134_v32 }
 0x1a6   :  { %1335 = vmatpush.bf16.msrb.mxu2 %v1171_v9  ;;  %1348 = vmatpush.bf16.msrb.mxu3 %v1172_v44 }
 0x1a7   :  { %1770 = vrot.lane.b32.xlu2 %v7774_v48, %s7541_s27  ;;  %v8227_v16 = vpop.permute.xlu2 %1442  ;;  %v1169_v48 = vsel %vm1162_vm5, %v8059_v4, %v1117_v63 }
 0x1aa   :  { %v1155_v8 = vpop.permute.xlu1 %1154  ;;  %v8231_v14 = vpop.permute.xlu0 %1130 }
 0x1ab   :  { %1812 = vrot.lane.b32.xlu1 %v7701_v27, %s7541_s27  ;;  %1772 = vrot.lane.b32.xlu0 %v7787_v62, %s7541_s27  ;;  %v1184_v27 = vsel %vm1162_vm5, %v8114_v17, %v8080_v15  ;;  %v1170_v62 = vsel %vm1162_vm5, %v1117_v63, %v8098_v5  ;;  %v1175_v17 = vsel %vm1162_vm5, %v8215_v43, %v8158_v41 }
 0x1ac   :  { %6622 = vmatmul.msk.bf16.vlgmr.msrb.gmra.mxu0 %vm327_vm3, %v8034_v54  ;;  %6623 = vmatmul.msk.bf16.vlgmr.msrb.gmra.mxu1 %vm327_vm3, %v8034_v54 }
 0x1ad   :  { %1308 = vmatpush.bf16.msrb.mxu0 %v1183_v10  ;;  %1321 = vmatpush.bf16.msrb.mxu1 %v1184_v27 }
 0x1af   :  { %1814 = vrot.lane.b32.xlu2 %v7703_v29, %s7541_s27  ;;  %v8258_v54 = vpop.permute.xlu2 %1476  ;;  %v1190_v29 = vsel %vm1162_vm5, %v8134_v32, %v8217_v3  ;;  %v1187_v32 = vsel %vm1162_vm5, %v8138_v34, %v1155_v8  ;;  %v1174_v34 = vsel %vm1162_vm5, %v8176_v45, %v8215_v43 }
 0x1b0   :  { %6629 = vmatmul.msk.bf16.vlgmr.msra.gmra.mxu2 %vm327_vm3, %v8195_v37  ;;  %6630 = vmatmul.msk.bf16.vlgmr.msra.gmra.mxu3 %vm327_vm3, %v8195_v37 }
 0x1b1   :  { %1309 = vmatpush.bf16.msrb.mxu0 %v1169_v48  ;;  %1322 = vmatpush.bf16.msrb.mxu1 %v1170_v62  ;;  %v8265_v4 = vpop.f32.mrf.mxu2  ;;  %v8267_v15 = vpop.f32.mrf.mxu3 }
 0x1b2   :  { %1386 = vmatpush.bf16.msra.mxu2 %v1189_v38  ;;  %1399 = vmatpush.bf16.msra.mxu3 %v1190_v29  ;;  %v1471_v5 = vpop.permute.xlu1 %1470  ;;  %v1469_v40 = vpop.permute.xlu0 %1468 }
 0x1b3   :  { %1782 = vrot.lane.b32.xlu1 %v7810_v19, %s7541_s27  ;;  %1816 = vrot.lane.b32.xlu0 %v7699_v26, %s7541_s27  ;;  %v8274_v18 = vpop.f32.mrf.mxu0  ;;  %v8276_v13 = vpop.f32.mrf.mxu1  ;;  %v1176_v19 = vsel %vm1162_vm5, %v8158_v41, %v8231_v14  ;;  %v1512_v59 = vsel %vm1496_vm6, %v1469_v40, %v1471_v5 }
 0x1b6   :  { %1387 = vmatpush.bf16.msra.mxu2 %v1175_v17  ;;  %1400 = vmatpush.bf16.msra.mxu3 %v1176_v19 }
 0x1b7   :  { %1784 = vrot.lane.b32.xlu2 %v7800_v12, %s7541_s27  ;;  %v8283_v26 = vpop.permute.xlu2 %1446 }
 0x1b9   :  { %v714_v56 = vpop.f32.mrf.mxu2  ;;  %v727_v21 = vpop.f32.mrf.mxu3 }
 0x1ba   :  { %v1441_v22 = vpop.permute.xlu1 %1440  ;;  %v1439_v23 = vpop.permute.xlu0 %1438 }
 0x1bb   :  { %1810 = vrot.lane.b32.xlu1 %v7783_v55, %s7541_s27  ;;  %1786 = vrot.lane.b32.xlu0 %v7812_v20, %s7541_s27  ;;  %v1188_v55 = vsel %vm1162_vm5, %v1155_v8, %v8180_v46  ;;  %v688_v12 = vpop.f32.mrf.mxu0  ;;  %v701_v35 = vpop.f32.mrf.mxu1  ;;  %v1173_v20 = vsel %vm1162_vm5, %v8166_v25, %v8176_v45  ;;  %v1498_v53 = vsel %vm1496_vm6, %v1439_v23, %v1441_v22 }
 0x1bc   :  { %6627 = vmatmul.msk.bf16.vlgmr.msra.gmra.mxu0 %vm327_vm3, %v8195_v37  ;;  %6628 = vmatmul.msk.bf16.vlgmr.msra.gmra.mxu1 %vm327_vm3, %v8195_v37  ;;  %v1499_v46 = vsel %vm1496_vm6, %v1441_v22, %v8227_v16 }
 0x1bd   :  { %1360 = vmatpush.bf16.msra.mxu0 %v1187_v32  ;;  %1373 = vmatpush.bf16.msra.mxu1 %v1188_v55 }
 0x1bf   :  { %1780 = vrot.lane.b32.xlu2 %v7818_v7, %s7541_s27  ;;  %v8310_v41 = vpop.permute.xlu2 %1474  ;;  %v1513_v7 = vsel %vm1496_vm6, %v1471_v5, %v8209_v2 }
 0x1c0   :  { %6633 = vmatmul.msk.bf16.vlgmr.msrb.gmra.mxu2 %vm327_vm3, %v8195_v37  ;;  %6634 = vmatmul.msk.bf16.vlgmr.msrb.gmra.mxu3 %vm327_vm3, %v8195_v37 }
 0x1c1   :  { %1361 = vmatpush.bf16.msra.mxu0 %v1173_v20  ;;  %1374 = vmatpush.bf16.msra.mxu1 %v1174_v34 }
 0x1c2   :  { %1577 = vmatpush.bf16.msrb.mxu2 %v1512_v59  ;;  %1590 = vmatpush.bf16.msrb.mxu3 %v1513_v7  ;;  %v8316_v42 = vpop.f32.mrf.mxu2  ;;  %v8320_v49 = vpop.f32.mrf.mxu3 }
 0x1c3   :  { %1822 = vrot.lane.b32.xlu1 %v7820_v28, %s7541_s27  ;;  %1820 = vrot.lane.b32.xlu0 %v7824_v30, %s7541_s27  ;;  %v1437_v25 = vpop.permute.xlu1 %1436  ;;  %v1467_v52 = vpop.permute.xlu0 %1466 }
 0x1c4   :  { %v8323_v45 = vpop.f32.mrf.mxu0  ;;  %v8327_v63 = vpop.f32.mrf.mxu1  ;;  %v1511_v36 = vsel %vm1496_vm6, %v1467_v52, %v1469_v40 }
 0x1c6   :  { %1578 = vmatpush.bf16.msrb.mxu2 %v1498_v53  ;;  %1591 = vmatpush.bf16.msrb.mxu3 %v1499_v46 }
 0x1c7   :  { %1824 = vrot.lane.b32.xlu2 %v7830_v33, %s7541_s27  ;;  %v8331_v28 = vpop.permute.xlu2 %1486 }
 0x1ca   :  { %v766_v30 = vpop.f32.mrf.mxu2  ;;  %v779_v11 = vpop.f32.mrf.mxu3 }
 0x1cb   :  { %1792 = vrot.lane.b32.xlu1 %v7834_v39, %s7541_s27  ;;  %1790 = vrot.lane.b32.xlu0 %v7836_v58, %s7541_s27  ;;  %v8337_v51 = vpop.permute.xlu1 %1480  ;;  %v1479_v31 = vpop.permute.xlu0 %1478  ;;  %v1497_v58 = vsel %vm1496_vm6, %v1437_v25, %v1439_v23 }
 0x1cc   :  { %6631 = vmatmul.msk.bf16.vlgmr.msrb.gmra.mxu0 %vm327_vm3, %v8195_v37  ;;  %6632 = vmatmul.msk.bf16.vlgmr.msrb.gmra.mxu1 %vm327_vm3, %v8195_v37  ;;  %v740_v33 = vpop.f32.mrf.mxu0  ;;  %v753_v39 = vpop.f32.mrf.mxu1  ;;  %v1516_v57 = vsel %vm1496_vm6, %v8258_v54, %v1479_v31 }
 0x1cd   :  { %1412 = vmatpush.bf16.msrb.mxu0 %v8217_v3  ;;  %1564 = vmatpush.bf16.msrb.mxu1 %v1511_v36 }
 0x1cf   :  { %1794 = vrot.lane.b32.xlu2 %v7842_v47, %s7541_s27  ;;  %v1517_v47 = vsel %vm1496_vm6, %v1479_v31, %v8337_v51 }
 0x1d0   :  { %6637 = vmatmul.msk.bf16.vlgmr.msra.gmra.mxu2 %vm327_vm3, %v8195_v37  ;;  %6638 = vmatmul.msk.bf16.vlgmr.msra.gmra.mxu3 %vm327_vm3, %v8195_v37  ;;  %v8355_v24 = vpop.permute.xlu2 %1456 }
 0x1d1   :  { %1413 = vmatpush.bf16.msrb.mxu0 %v8231_v14  ;;  %1565 = vmatpush.bf16.msrb.mxu1 %v1497_v58 }
 0x1d2   :  { %1629 = vmatpush.bf16.msra.mxu2 %v1516_v57  ;;  %1642 = vmatpush.bf16.msra.mxu3 %v1517_v47 }
 0x1d3   :  { %1788 = vrot.lane.b32.xlu1 %v7848_v60, %s7541_s27  ;;  %v8361_v43 = vpop.f32.mrf.mxu2  ;;  %1818 = vrot.lane.b32.xlu0 %v7846_v50, %s7541_s27  ;;  %v8365_v3 = vpop.permute.xlu1 %1450 }
 0x1d4   :  { %v8367_v9 = vpop.f32.mrf.mxu3  ;;  %v1449_v44 = vpop.permute.xlu0 %1448 }
 0x1d5   :  { %v1502_v8 = vsel %vm1496_vm6, %v8283_v26, %v1449_v44  ;;  %v1503_v14 = vsel %vm1496_vm6, %v1449_v44, %v8365_v3 }
 0x1d6   :  { %1630 = vmatpush.bf16.msra.mxu2 %v1502_v8  ;;  %1643 = vmatpush.bf16.msra.mxu3 %v1503_v14 }
 0x1d7   :  { %1828 = vrot.lane.b32.xlu2 %v7854_v61, %s7541_s27  ;;  %v8375_v60 = vpop.f32.mrf.mxu0  ;;  %v1514_v61 = vsel %vm1496_vm6, %v8209_v2, %v8310_v41 }
 0x1d8   :  { %v1453_v10 = vpop.permute.xlu2 %1452  ;;  %v8377_v50 = vpop.f32.mrf.mxu1 }
 0x1d9   :  { %v1504_v52 = vsel %vm1496_vm6, %v8365_v3, %v1453_v10 }
 0x1db   :  { %1826 = vrot.lane.b32.xlu1 %v7856_v0, %s7541_s27  ;;  %v818_v27 = vpop.f32.mrf.mxu2  ;;  %1798 = vrot.lane.b32.xlu0 %v7860_v1, %s7541_s27  ;;  %v1485_v48 = vpop.permute.xlu1 %1484  ;;  %v1515_v0 = vsel %vm1496_vm6, %v8310_v41, %v8258_v54  ;;  %v8396_v1 = vld [vmem:[%s10999_s1 + $0xc] sm:$0xf] }
 0x1dc   :  { %v831_v62 = vpop.f32.mrf.mxu3  ;;  %6635 = vmatmul.msk.bf16.vlgmr.msra.gmra.mxu0 %vm327_vm3, %v8195_v37  ;;  %v1445_v38 = vpop.permute.xlu0 %1444  ;;  %6636 = vmatmul.msk.bf16.vlgmr.msra.gmra.mxu1 %vm327_vm3, %v8195_v37  ;;  %v1520_v29 = vsel %vm1496_vm6, %v1485_v48, %v8331_v28 }
 0x1dd   :  { %1603 = vmatpush.bf16.msra.mxu0 %v1514_v61  ;;  %1616 = vmatpush.bf16.msra.mxu1 %v1515_v0  ;;  %v1500_v2 = vsel %vm1496_vm6, %v8227_v16, %v1445_v38  ;;  %v1501_v54 = vsel %vm1496_vm6, %v1445_v38, %v8283_v26 }
 0x1df   :  { %1796 = vrot.lane.b32.xlu2 %v7866_v6, %s7541_s27  ;;  %v792_v5 = vpop.f32.mrf.mxu0 }
 0x1e0   :  { %6642 = vmatmul.msk.bf16.vlgmr.msrb.gmra.mxu2 %vm327_vm3, %v8396_v1  ;;  %6643 = vmatmul.msk.bf16.vlgmr.msrb.gmra.mxu3 %vm327_vm3, %v8396_v1  ;;  %v805_v17 = vpop.f32.mrf.mxu1 }
 0x1e1   :  { %1604 = vmatpush.bf16.msra.mxu0 %v1500_v2  ;;  %v8410_v40 = vpop.permute.xlu2 %1462  ;;  %1617 = vmatpush.bf16.msra.mxu1 %v1501_v54 }
 0x1e2   :  { %1681 = vmatpush.bf16.msrb.mxu2 %v1520_v29 }
 0x1e3   :  { %v8412_v19 = vpop.f32.mrf.mxu2 }
 0x1e4   :  { %v914_v56 = vpop.f32.mrf.mxu3  ;;  %v1455_v16 = vpop.permute.xlu1 %1454 }
 0x1e5   :  { %v8415_v21 = vadd.f32 %v914_v56, %v8274_v18  ;;  %v1489_v6 = vpop.permute.xlu0 %1488  ;;  %v1506_v22 = vsel %vm1496_vm6, %v1455_v16, %v8355_v24  ;;  %v1505_v53 = vsel %vm1496_vm6, %v1453_v10, %v1455_v16 }
 0x1e6   :  { %1682 = vmatpush.bf16.msrb.mxu2 %v1506_v22  ;;  %v1521_v26 = vsel %vm1496_vm6, %v8331_v28, %v1489_v6 }
 0x1e7   :  { %1694 = vmatpush.bf16.msrb.mxu3 %v1521_v26 }
 0x1e9   :  { %v8421_v23 = vpop.f32.mrf.mxu0  ;;  %v1461_v32 = vpop.permute.xlu2 %1460 }
 0x1ea   :  { %v8423_v55 = vpop.f32.mrf.mxu1  ;;  %v1509_v27 = vsel %vm1496_vm6, %v1461_v32, %v8410_v40 }
 0x1eb   :  { %v870_v12 = vpop.f32.mrf.mxu2 }
 0x1ec   :  { %v916_v35 = vpop.f32.mrf.mxu3  ;;  %6639 = vmatmul.msk.bf16.vlgmr.msrb.gmra.mxu0 %vm327_vm3, %v8195_v37  ;;  %v1483_v18 = vpop.permute.xlu1 %1482  ;;  %6641 = vmatmul.msk.bf16.vlgmr.msrb.gmra.mxu1 %vm327_vm3, %v8396_v1 }
 0x1ed   :  { %v1459_v20 = vpop.permute.xlu0 %1458  ;;  %v1518_v34 = vsel %vm1496_vm6, %v8337_v51, %v1483_v18  ;;  %v1519_v59 = vsel %vm1496_vm6, %v1483_v18, %v1485_v48 }
 0x1ee   :  { %1655 = vmatpush.bf16.msrb.mxu0 %v1518_v34  ;;  %1668 = vmatpush.bf16.msrb.mxu1 %v1519_v59  ;;  %v1507_v41 = vsel %vm1496_vm6, %v8355_v24, %v1459_v20  ;;  %v1508_v10 = vsel %vm1496_vm6, %v1459_v20, %v1461_v32 }
 0x1ef   :  { %1695 = vmatpush.bf16.msrb.mxu3 %v1507_v41  ;;  %v2102_v41 = vld [vmem:[%s11000_s2] sm:$0xff]  ;;  %s7547_s2 = smov 121  }
 0x1f0   :  { %6646 = vmatmul.msk.bf16.vlgmr.msra.gmra.mxu2 %vm327_vm3, %v8396_v1  ;;  %6647 = vmatmul.msk.bf16.vlgmr.msra.gmra.mxu3 %vm327_vm3, %v8396_v1 }
 0x1f1   :  { %v844_v37 = vpop.f32.mrf.mxu0  ;;  %v8438_v7 = vpop.permute.xlu2 %1808  ;;  %2105 = vperm.xlu0 %7328, %v2102_v41  }
 0x1f2   :  { %v857_v25 = vpop.f32.mrf.mxu1  ;;  %1656 = vmatpush.bf16.msrb.mxu0 %v1504_v52  ;;  %1669 = vmatpush.bf16.msrb.mxu1 %v1505_v53 }
 0x1f3   :  { %v953_v46 = vpop.f32.mrf.mxu2 }
 0x1f4   :  { %v8444_v28 = vadd.f32 %v953_v46, %v8267_v15  ;;  %v966_v30 = vpop.f32.mrf.mxu3 }
 0x1f5   :  { %v1495_v51 = vpop.permute.xlu1 %1494  ;;  %v8447_v11 = vadd.f32 %v966_v30, %v8323_v45  ;;  %v1493_v36 = vpop.permute.xlu0 %1492 }
 0x1f6   :  { %1746 = vmatpush.bf16.msra.mxu3 %v1495_v51  ;;  %v1524_v31 = vsel %vm1496_vm6, %v1493_v36, %v1495_v51 }
 0x1f7   :  { %1733 = vmatpush.bf16.msra.mxu2 %v1524_v31 }
 0x1f9   :  { %v927_v33 = vpop.f32.mrf.mxu0  ;;  %v8453_v57 = vpop.permute.xlu2 %1778 }
 0x1fa   :  { %v8451_v39 = vadd.f32 %v927_v33, %v8276_v13  ;;  %v940_v58 = vpop.f32.mrf.mxu1 }
 0x1fb   :  { %v8456_v15 = vadd.f32 %v940_v58, %v8265_v4  ;;  %v955_v24 = vpop.f32.mrf.mxu2  ;;  %v8523_v58 = vld [vmem:[%s10999_s1 + $0x10] sm:$0xf]  ;;  %s7549_s1 = smov 113  }
 0x1fc   :  { %v968_v47 = vpop.f32.mrf.mxu3  ;;  %6644 = vmatmul.msk.bf16.vlgmr.msra.gmra.mxu0 %vm327_vm3, %v8396_v1  ;;  %6645 = vmatmul.msk.bf16.vlgmr.msra.gmra.mxu1 %vm327_vm3, %v8396_v1 }
 0x1fd   :  { %v1491_v45 = vpop.permute.xlu1 %1490  ;;  %v1465_v3 = vpop.permute.xlu0 %1464 }
 0x1fe   :  { %v1522_v44 = vsel %vm1496_vm6, %v1489_v6, %v1491_v45  ;;  %v1523_v13 = vsel %vm1496_vm6, %v1491_v45, %v1493_v36  ;;  %1747 = vmatpush.bf16.msra.mxu3 %v1465_v3  ;;  %v1510_v4 = vsel %vm1496_vm6, %v8410_v40, %v1465_v3 }
 0x1ff   :  { %1707 = vmatpush.bf16.msra.mxu0 %v1522_v44  ;;  %1720 = vmatpush.bf16.msra.mxu1 %v1523_v13 }
 0x200   :  { %1734 = vmatpush.bf16.msra.mxu2 %v1510_v4  ;;  %6651 = vmatmul.msk.bf16.vlgmr.msrb.gmra.mxu3 %vm327_vm3, %v8396_v1 }
 0x201   :  { %6650 = vmatmul.msk.bf16.vlgmr.msrb.gmra.mxu2 %vm327_vm3, %v8396_v1  ;;  %v929_v8 = vpop.f32.mrf.mxu0  ;;  %v1771_v62 = vpop.permute.xlu2 %1770 }
 0x202   :  { %v942_v14 = vpop.f32.mrf.mxu1 }
 0x203   :  { %1708 = vmatpush.bf16.msra.mxu0 %v1508_v10  ;;  %v1005_v48 = vpop.f32.mrf.mxu2  ;;  %1721 = vmatpush.bf16.msra.mxu1 %v1509_v27 }
 0x204   :  { %v8474_v61 = vadd.f32 %v1005_v48, %v8320_v49  ;;  %v1018_v38 = vpop.f32.mrf.mxu3 }
 0x205   :  { %v1807_v0 = vpop.permute.xlu1 %1806  ;;  %v8477_v29 = vadd.f32 %v1018_v38, %v8375_v60  ;;  %v1805_v2 = vpop.permute.xlu0 %1804 }
 0x206   :  { %v1848_v54 = vsel %vm1830_vm7, %v1807_v0, %v8438_v7  ;;  %v1847_v5 = vsel %vm1830_vm7, %v1805_v2, %v1807_v0 }
 0x207   :  { %1937 = vmatpush.bf16.msrb.mxu3 %v1848_v54  ;;  %1924 = vmatpush.bf16.msrb.mxu2 %v1847_v5 }
 0x209   :  { %v979_v40 = vpop.f32.mrf.mxu0  ;;  %v1815_v22 = vpop.permute.xlu2 %1814 }
 0x20a   :  { %v8483_v17 = vadd.f32 %v979_v40, %v8327_v63  ;;  %v992_v49 = vpop.f32.mrf.mxu1 }
 0x20b   :  { %v8486_v56 = vadd.f32 %v992_v49, %v8316_v42  ;;  %v1007_v16 = vpop.f32.mrf.mxu2 }
 0x20c   :  { %v1020_v6 = vpop.f32.mrf.mxu3  ;;  %6648 = vmatmul.msk.bf16.vlgmr.msrb.gmra.mxu0 %vm327_vm3, %v8396_v1  ;;  %6649 = vmatmul.msk.bf16.vlgmr.msrb.gmra.mxu1 %vm327_vm3, %v8396_v1 }
 0x20d   :  { %v1777_v60 = vpop.permute.xlu1 %1776  ;;  %v1775_v26 = vpop.permute.xlu0 %1774 }
 0x20e   :  { %v1834_v32 = vsel %vm1830_vm7, %v1777_v60, %v8453_v57  ;;  %v1833_v63 = vsel %vm1830_vm7, %v1775_v26, %v1777_v60 }
 0x20f   :  { %1938 = vmatpush.bf16.msrb.mxu3 %v1834_v32  ;;  %1925 = vmatpush.bf16.msrb.mxu2 %v1833_v63 }
 0x210   :  { %6655 = vmatmul.msk.bf16.vlgmr.msra.gmra.mxu3 %vm327_vm3, %v8396_v1 }
 0x211   :  { %6654 = vmatmul.msk.bf16.vlgmr.msra.gmra.mxu2 %vm327_vm3, %v8396_v1  ;;  %v981_v42 = vpop.f32.mrf.mxu0  ;;  %v1785_v53 = vpop.permute.xlu2 %1784 }
 0x212   :  { %v994_v12 = vpop.f32.mrf.mxu1 }
 0x213   :  { %v1057_v35 = vpop.f32.mrf.mxu2 }
 0x214   :  { %v8500_v18 = vadd.f32 %v1057_v35, %v8367_v9  ;;  %v1070_v20 = vpop.f32.mrf.mxu3 }
 0x215   :  { %v1803_v34 = vpop.permute.xlu1 %1802  ;;  %v8503_v59 = vadd.f32 %v1070_v20, %v8421_v23  ;;  %v1801_v37 = vpop.permute.xlu0 %1800 }
 0x216   :  { %v1846_v25 = vsel %vm1830_vm7, %v1803_v34, %v1805_v2  ;;  %v1845_v52 = vsel %vm1830_vm7, %v1801_v37, %v1803_v34 }
 0x217   :  { %1911 = vmatpush.bf16.msrb.mxu1 %v1846_v25  ;;  %1898 = vmatpush.bf16.msrb.mxu0 %v1845_v52 }
 0x219   :  { %v1031_v9 = vpop.f32.mrf.mxu0  ;;  %v1781_v47 = vpop.permute.xlu2 %1780 }
 0x21a   :  { %v8511_v46 = vadd.f32 %v1031_v9, %v8377_v50  ;;  %v1044_v30 = vpop.f32.mrf.mxu1  ;;  %v1835_v6 = vsel %vm1830_vm7, %v8453_v57, %v1781_v47 }
 0x21b   :  { %v8514_v23 = vadd.f32 %v1044_v30, %v8361_v43  ;;  %v1059_v51 = vpop.f32.mrf.mxu2 }
 0x21c   :  { %v1072_v36 = vpop.f32.mrf.mxu3  ;;  %6652 = vmatmul.msk.bf16.vlgmr.msra.gmra.mxu0 %vm327_vm3, %v8396_v1  ;;  %6653 = vmatmul.msk.bf16.vlgmr.msra.gmra.mxu1 %vm327_vm3, %v8396_v1 }
 0x21d   :  { %v1813_v31 = vpop.permute.xlu1 %1812  ;;  %v1773_v33 = vpop.permute.xlu0 %1772 }
 0x21e   :  { %v1851_v50 = vsel %vm1830_vm7, %v1813_v31, %v1815_v22  ;;  %v1831_v43 = vsel %vm1830_vm7, %v1771_v62, %v1773_v33  ;;  %v1832_v24 = vsel %vm1830_vm7, %v1773_v33, %v1775_v26 }
 0x21f   :  { %1976 = vmatpush.bf16.msra.mxu2 %v1851_v50  ;;  %1899 = vmatpush.bf16.msrb.mxu0 %v1831_v43 }
 0x220   :  { %1912 = vmatpush.bf16.msrb.mxu1 %v1832_v24  ;;  %6660 = vmatmul.msk.bf16.vlgmr.msrb.gmra.mxu3 %vm327_vm3, %v8523_v58 }
 0x221   :  { %6659 = vmatmul.msk.bf16.vlgmr.msrb.gmra.mxu2 %vm327_vm3, %v8523_v58  ;;  %v1033_v1 = vpop.f32.mrf.mxu0 }
 0x222   :  { %v1046_v45 = vpop.f32.mrf.mxu1 }
 0x223   :  { %v1233_v3 = vpop.f32.mrf.mxu2 }
 0x224   :  { %v8533_v44 = vadd.f32 %v1233_v3, %v8415_v21  ;;  %v1246_v13 = vpop.f32.mrf.mxu3 }
 0x225   :  { %v1783_v4 = vpop.permute.xlu1 %1782  ;;  %v8536_v8 = vadd.f32 %v1246_v13, %v8451_v39  ;;  %v8538_v14 = vpop.permute.xlu0 %1816 }
 0x226   :  { %v1837_v10 = vsel %vm1830_vm7, %v1783_v4, %v1785_v53  ;;  %v1852_v27 = vsel %vm1830_vm7, %v1815_v22, %v8538_v14  ;;  %v8549_v39 = vpop.permute.xlu2 %1824 }
 0x227   :  { %1977 = vmatpush.bf16.msra.mxu2 %v1837_v10  ;;  %1989 = vmatpush.bf16.msra.mxu3 %v1852_v27 }
 0x229   :  { %v1083_v48 = vpop.f32.mrf.mxu0 }
 0x22a   :  { %v8544_v62 = vadd.f32 %v1083_v48, %v8423_v55  ;;  %v1096_v21 = vpop.f32.mrf.mxu1 }
 0x22b   :  { %v8547_v38 = vadd.f32 %v1096_v21, %v8412_v19  ;;  %v1235_v0 = vpop.f32.mrf.mxu2 }
 0x22c   :  { %v1248_v2 = vpop.f32.mrf.mxu3  ;;  %6657 = vmatmul.msk.bf16.vlgmr.msrb.gmra.mxu0 %vm327_vm3, %v8523_v58  ;;  %6658 = vmatmul.msk.bf16.vlgmr.msrb.gmra.mxu1 %vm327_vm3, %v8523_v58 }
 0x22d   :  { %v1811_v54 = vpop.permute.xlu1 %1810  ;;  %v1787_v5 = vpop.permute.xlu0 %1786 }
 0x22e   :  { %v1849_v55 = vsel %vm1830_vm7, %v8438_v7, %v1811_v54  ;;  %v1850_v40 = vsel %vm1830_vm7, %v1811_v54, %v1813_v31  ;;  %v1838_v19 = vsel %vm1830_vm7, %v1785_v53, %v1787_v5  ;;  %v1836_v7 = vsel %vm1830_vm7, %v1781_v47, %v1783_v4  ;;  %v1795_v42 = vpop.permute.xlu2 %1794 }
 0x22f   :  { %1950 = vmatpush.bf16.msra.mxu0 %v1849_v55  ;;  %1963 = vmatpush.bf16.msra.mxu1 %v1850_v40 }
 0x230   :  { %1990 = vmatpush.bf16.msra.mxu3 %v1838_v19 }
 0x231   :  { %6663 = vmatmul.msk.bf16.vlgmr.msra.gmra.mxu2 %vm327_vm3, %v8523_v58  ;;  %v1085_v49 = vpop.f32.mrf.mxu0 }
 0x232   :  { %v1098_v16 = vpop.f32.mrf.mxu1 }
 0x233   :  { %6664 = vmatmul.msk.bf16.vlgmr.msra.gmra.mxu3 %vm327_vm3, %v8523_v58  ;;  %1951 = vmatpush.bf16.msra.mxu0 %v1835_v6  ;;  %v1285_v60 = vpop.f32.mrf.mxu2 }
 0x234   :  { %1964 = vmatpush.bf16.msra.mxu1 %v1836_v7  ;;  %v8567_v22 = vadd.f32 %v1285_v60, %v8447_v11  ;;  %v1298_v26 = vpop.f32.mrf.mxu3 }
 0x235   :  { %v1823_v32 = vpop.permute.xlu1 %1822  ;;  %v8570_v63 = vadd.f32 %v1298_v26, %v8483_v17  ;;  %v1821_v12 = vpop.permute.xlu0 %1820 }
 0x236   :  { %v1856_v57 = vsel %vm1830_vm7, %v1823_v32, %v8549_v39  ;;  %v1855_v35 = vsel %vm1830_vm7, %v1821_v12, %v1823_v32 }
 0x237   :  { %2041 = vmatpush.bf16.msrb.mxu3 %v1856_v57  ;;  %2028 = vmatpush.bf16.msrb.mxu2 %v1855_v35 }
 0x239   :  { %v1259_v20 = vpop.f32.mrf.mxu0 }
 0x23a   :  { %v8576_v34 = vadd.f32 %v1259_v20, %v8456_v15  ;;  %v1272_v11 = vpop.f32.mrf.mxu1  ;;  %v1829_v15 = vpop.permute.xlu2 %1828 }
 0x23b   :  { %v8579_v41 = vadd.f32 %v1272_v11, %v8444_v28  ;;  %v1287_v37 = vpop.f32.mrf.mxu2 }
 0x23c   :  { %v1300_v17 = vpop.f32.mrf.mxu3  ;;  %6661 = vmatmul.msk.bf16.vlgmr.msra.gmra.mxu0 %vm327_vm3, %v8523_v58  ;;  %6662 = vmatmul.msk.bf16.vlgmr.msra.gmra.mxu1 %vm327_vm3, %v8523_v58 }
 0x23d   :  { %v1793_v25 = vpop.permute.xlu1 %1792  ;;  %v1791_v52 = vpop.permute.xlu0 %1790 }
 0x23e   :  { %v1842_v53 = vsel %vm1830_vm7, %v1793_v25, %v1795_v42  ;;  %v1841_v9 = vsel %vm1830_vm7, %v1791_v52, %v1793_v25 }
 0x23f   :  { %2042 = vmatpush.bf16.msrb.mxu3 %v1842_v53  ;;  %2029 = vmatpush.bf16.msrb.mxu2 %v1841_v9 }
 0x241   :  { %v1261_v30 = vpop.f32.mrf.mxu0 }
 0x242   :  { %v1274_v28 = vpop.f32.mrf.mxu1  ;;  %6667 = vmatmul.msk.bf16.vlgmr.msrb.gmra.mxu2 %vm327_vm3, %v8523_v58 }
 0x243   :  { %2080 = vmatpush.bf16.msra.mxu2 %v1829_v15  ;;  %6668 = vmatmul.msk.bf16.vlgmr.msrb.gmra.mxu3 %vm327_vm3, %v8523_v58  ;;  %v1337_v51 = vpop.f32.mrf.mxu2 }
 0x244   :  { %v8592_v36 = vadd.f32 %v1337_v51, %v8477_v29  ;;  %v1350_v31 = vpop.f32.mrf.mxu3 }
 0x245   :  { %v1789_v33 = vpop.permute.xlu1 %1788  ;;  %v8595_v50 = vadd.f32 %v1350_v31, %v8511_v46  ;;  %v1819_v43 = vpop.permute.xlu0 %1818 }
 0x246   :  { %v1853_v24 = vsel %vm1830_vm7, %v8538_v14, %v1819_v43  ;;  %v1854_v1 = vsel %vm1830_vm7, %v1819_v43, %v1821_v12  ;;  %v1839_v13 = vsel %vm1830_vm7, %v1787_v5, %v1789_v33  ;;  %v1840_v46 = vsel %vm1830_vm7, %v1789_v33, %v1791_v52 }
 0x247   :  { %2002 = vmatpush.bf16.msrb.mxu0 %v1853_v24  ;;  %2015 = vmatpush.bf16.msrb.mxu1 %v1854_v1 }
 0x249   :  { %v1311_v47 = vpop.f32.mrf.mxu0 }
 0x24a   :  { %v8601_v45 = vadd.f32 %v1311_v47, %v8486_v56  ;;  %v1324_v3 = vpop.f32.mrf.mxu1 }
 0x24b   :  { %v8604_v29 = vadd.f32 %v1324_v3, %v8474_v61  ;;  %v1339_v4 = vpop.f32.mrf.mxu2  ;;  %2003 = vmatpush.bf16.msrb.mxu0 %v1839_v13  ;;  %2016 = vmatpush.bf16.msrb.mxu1 %v1840_v46  ;;  %v1797_v61 = vpop.permute.xlu2 %1796 }
 0x24c   :  { %v1352_v14 = vpop.f32.mrf.mxu3  ;;  %v1843_v2 = vsel %vm1830_vm7, %v1795_v42, %v1797_v61 }
 0x24d   :  { %v1827_v10 = vpop.permute.xlu1 %1826  ;;  %v1799_v27 = vpop.permute.xlu0 %1798 }
 0x24e   :  { %v1857_v48 = vsel %vm1830_vm7, %v8549_v39, %v1827_v10  ;;  %v1858_v56 = vsel %vm1830_vm7, %v1827_v10, %v1829_v15  ;;  %6665 = vmatmul.msk.bf16.vlgmr.msrb.gmra.mxu0 %vm327_vm3, %v8523_v58  ;;  %6666 = vmatmul.msk.bf16.vlgmr.msrb.gmra.mxu1 %vm327_vm3, %v8523_v58  ;;  %v1844_v54 = vsel %vm1830_vm7, %v1797_v61, %v1799_v27 }
 0x24f   :  { %2081 = vmatpush.bf16.msra.mxu2 %v1799_v27  ;;  %2054 = vmatpush.bf16.msra.mxu0 %v1857_v48 }
 0x250   :  { %2067 = vmatpush.bf16.msra.mxu1 %v1858_v56 }
 0x251   :  { %v1313_v21 = vpop.f32.mrf.mxu0 }
 0x252   :  { %v1326_v0 = vpop.f32.mrf.mxu1  ;;  %6671 = vmatmul.msk.bf16.vlgmr.msra.gmra.mxu2 %vm327_vm3, %v8523_v58 }
 0x253   :  { %v1389_v39 = vpop.f32.mrf.mxu2  ;;  %2055 = vmatpush.bf16.msra.mxu0 %v1843_v2 }
 0x254   :  { %v1431_v5 = vadd.f32 %v1389_v39, %v8503_v59  ;;  %v1402_v55 = vpop.f32.mrf.mxu3  ;;  %2068 = vmatpush.bf16.msra.mxu1 %v1844_v54 }
 0x255   :  { %v1432_v40 = vadd.f32 %v1402_v55, %v8544_v62 }
 0x259   :  { %v1363_v19 = vpop.f32.mrf.mxu0 }
 0x25a   :  { %v1429_v49 = vadd.f32 %v1363_v19, %v8514_v23  ;;  %v1376_v16 = vpop.f32.mrf.mxu1 }
 0x25b   :  { %v8623_v6 = vadd.f32 %v1376_v16, %v8500_v18  ;;  %v1391_v7 = vpop.f32.mrf.mxu2 }
 0x25c   :  { %v1404_v60 = vpop.f32.mrf.mxu3 }
 0x25e   :  { %6669 = vmatmul.msk.bf16.vlgmr.msra.gmra.mxu0 %vm327_vm3, %v8523_v58  ;;  %6670 = vmatmul.msk.bf16.vlgmr.msra.gmra.mxu1 %vm327_vm3, %v8523_v58 }
 0x261   :  { %v1365_v59 = vpop.f32.mrf.mxu0 }
 0x262   :  { %v1378_v26 = vpop.f32.mrf.mxu1 }
 0x263   :  { %v1580_v32 = vpop.f32.mrf.mxu2  ;;  %v8654_v0 = vpop.permute.xlu0 %2105 }
 0x264   :  { %v1754_v62 = vadd.f32 %v1580_v32, %v8536_v8  ;;  %v1593_v42 = vpop.f32.mrf.mxu3 }
 0x265   :  { %v1755_v61 = vadd.f32 %v1593_v42, %v8576_v34 }
 0x269   :  { %v1415_v12 = vpop.f32.mrf.mxu0 }
 0x26a   :  { %v1433_v23 = vadd.f32 %v1415_v12, %v8547_v38  ;;  %v1567_v57 = vpop.f32.mrf.mxu1 }
 0x26b   :  { %v1582_v18 = vpop.f32.mrf.mxu2 }
 0x26c   :  { %v1595_v35 = vpop.f32.mrf.mxu3 }
 0x271   :  { %v1417_v20 = vpop.f32.mrf.mxu0 }
 0x272   :  { %v1569_v11 = vpop.f32.mrf.mxu1 }
 0x273   :  { %v1632_v37 = vpop.f32.mrf.mxu2 }
 0x274   :  { %v8632_v17 = vadd.f32 %v1632_v37, %v8570_v63  ;;  %v1645_v25 = vpop.f32.mrf.mxu3 }
 0x275   :  { %v1759_v35 = vadd.f32 %v1645_v25, %v8601_v45 }
 0x279   :  { %v1606_v58 = vpop.f32.mrf.mxu0 }
 0x27a   :  { %v8634_v52 = vpop.f32.mrf.mxu1  ;;  %v1756_v21 = vadd.f32 %v1606_v58, %v8579_v41 }
 0x27b   :  { %v1634_v53 = vpop.f32.mrf.mxu2  ;;  %v1757_v45 = vadd.f32 %v8634_v52, %v8567_v22 }
 0x27c   :  { %v1647_v9 = vpop.f32.mrf.mxu3 }
 0x281   :  { %v1608_v8 = vpop.f32.mrf.mxu0 }
 0x282   :  { %v1621_v15 = vpop.f32.mrf.mxu1 }
 0x284   :  { %v1684_v30 = vpop.f32.mrf.mxu2  ;;  %v1697_v28 = vpop.f32.mrf.mxu3 }
 0x285   :  { %v8637_v38 = vadd.f32 %v1684_v30, %v8595_v50  ;;  %v8639_v51 = vadd.f32 %v1697_v28, %v1429_v49 }
 0x289   :  { %v1658_v31 = vpop.f32.mrf.mxu0 }
 0x28a   :  { %v1671_v33 = vpop.f32.mrf.mxu1  ;;  %v1760_v37 = vadd.f32 %v1658_v31, %v8604_v29 }
 0x28b   :  { %v8642_v63 = vadd.f32 %v1671_v33, %v8592_v36 }
 0x28c   :  { %v1686_v43 = vpop.f32.mrf.mxu2  ;;  %v1699_v24 = vpop.f32.mrf.mxu3 }
 0x291   :  { %v1660_v1 = vpop.f32.mrf.mxu0 }
 0x292   :  { %v1673_v47 = vpop.f32.mrf.mxu1 }
 0x294   :  { %v1736_v3 = vpop.f32.mrf.mxu2  ;;  %v1749_v13 = vpop.f32.mrf.mxu3 }
 0x295   :  { %v8644_v46 = vadd.f32 %v1736_v3, %v1432_v40  ;;  %v8646_v4 = vadd.f32 %v1749_v13, %v1433_v23 }
 0x299   :  { %v8648_v14 = vpop.f32.mrf.mxu0 }
 0x29a   :  { %v1723_v50 = vpop.f32.mrf.mxu1 }
 0x29b   :  { %v8650_v10 = vadd.f32 %v1723_v50, %v1431_v5  ;;  %v1753_v5 = vadd.f32 %v1567_v57, %v8533_v44 }
 0x29c   :  { %v1738_v27 = vpop.f32.mrf.mxu2  ;;  %v1751_v48 = vpop.f32.mrf.mxu3 }
 0x2a1   :  { %v1712_v56 = vpop.f32.mrf.mxu0 }
 0x2a2   :  { %v1725_v36 = vpop.f32.mrf.mxu1 }
 0x2a4   :  { %v1927_v2 = vpop.f32.mrf.mxu2  ;;  %v1940_v39 = vpop.f32.mrf.mxu3 }
 0x2a5   :  { %v2089_v54 = vadd.f32 %v1927_v2, %v1755_v61  ;;  %v2090_v55 = vadd.f32 %v1940_v39, %v1756_v21 }
 0x2a7   :  { %v2110_v40 = vadd.f32 %v8654_v0, %v2089_v54  ;;  %v2111_v19 = vadd.f32 %v8654_v0, %v2090_v55 }
 0x2a9   :  { %v1901_v49 = vpop.f32.mrf.mxu0  ;;  %v2125_v16 = vmax.f32 %v2110_v40, 0.0  ;;  %v2126_v7 = vmax.f32 %v2111_v19, 0.0 }
 0x2aa   :  { %v2087_v60 = vadd.f32 %v1901_v49, %v1753_v5  ;;  %v1914_v59 = vpop.f32.mrf.mxu1 }
 0x2ab   :  { %v2088_v34 = vadd.f32 %v1914_v59, %v1754_v62  ;;  %2140 = vst [vmem:[#allocation3 + $0x10] sm:$0xff] %v2125_v16 }
 0x2ac   :  { %v2108_v41 = vadd.f32 %v8654_v0, %v2087_v60  ;;  %v1929_v26 = vpop.f32.mrf.mxu2  ;;  %v1942_v32 = vpop.f32.mrf.mxu3  ;;  %2141 = vst [vmem:[#allocation3 + $0x18] sm:$0xff] %v2126_v7 }
 0x2ad   :  { %v2109_v42 = vadd.f32 %v8654_v0, %v2088_v34 }
 0x2ae   :  { %v2123_v12 = vmax.f32 %v2108_v41, 0.0 }
 0x2af   :  { %v2124_v23 = vmax.f32 %v2109_v42, 0.0 }
 0x2b0   :  { %2138 = vst [vmem:[#allocation3] sm:$0xff] %v2123_v12 }
 0x2b1   :  { %2139 = vst [vmem:[#allocation3 + $0x8] sm:$0xff] %v2124_v23  ;;  %v1903_v18 = vpop.f32.mrf.mxu0 }
 0x2b2   :  { %v1916_v44 = vpop.f32.mrf.mxu1  ;;  %v8661_v57 = vld [vmem:[#allocation3 + $0x10] sm:$0x3f] }
 0x2b3   :  { %v8664_v20 = vld [vmem:[#allocation3 + $0x18] sm:$0x3f] }
 0x2b4   :  { %v1979_v62 = vpop.f32.mrf.mxu2  ;;  %v7334_v11 = vpack.i.bf16 %v8664_v20, %v8661_v57 }
 0x2b5   :  { %v2093_v58 = vadd.f32 %v1979_v62, %v1759_v35 }
 0x2b6   :  { %v1992_v53 = vpop.f32.mrf.mxu3  ;;  %7335 = vrot.lane.b32.xlu2 %v7334_v11, %s7538_s0 }
 0x2b7   :  { %v2114_v9 = vadd.f32 %v8654_v0, %v2093_v58  ;;  %v2094_v8 = vadd.f32 %v1992_v53, %v1760_v37  ;;  %v8671_v15 = vld [vmem:[#allocation3] sm:$0x3f] }
 0x2b8   :  { %v8675_v25 = vld [vmem:[#allocation3 + $0x8] sm:$0x3f] }
 0x2b9   :  { %v2129_v30 = vmax.f32 %v2114_v9, 0.0  ;;  %v2115_v28 = vadd.f32 %v8654_v0, %v2094_v8  ;;  %v1953_v33 = vpop.f32.mrf.mxu0  ;;  %v7329_v29 = vpack.i.bf16 %v8675_v25, %v8671_v15 }
 0x2ba   :  { %v2091_v31 = vadd.f32 %v1953_v33, %v1757_v45  ;;  %v1966_v43 = vpop.f32.mrf.mxu1 }
 0x2bb   :  { %2144 = vst [vmem:[#allocation3 + $0x30] sm:$0xff] %v2129_v30  ;;  %v2130_v24 = vmax.f32 %v2115_v28, 0.0  ;;  %v2092_v1 = vadd.f32 %v1966_v43, %v8632_v17  ;;  %7330 = vrot.lane.b32.xlu1 %v7329_v29, %s7538_s0  ;;  %v1764_v17 = vadd.f32 %v8648_v14, %v8623_v6 }
 0x2bc   :  { %v2112_v47 = vadd.f32 %v8654_v0, %v2091_v31  ;;  %v1981_v22 = vpop.f32.mrf.mxu2 }
 0x2bd   :  { %2145 = vst [vmem:[#allocation3 + $0x38] sm:$0xff] %v2130_v24  ;;  %v2113_v52 = vadd.f32 %v8654_v0, %v2092_v1 }
 0x2be   :  { %v2127_v3 = vmax.f32 %v2112_v47, 0.0  ;;  %v1994_v13 = vpop.f32.mrf.mxu3 }
 0x2bf   :  { %v2128_v50 = vmax.f32 %v2113_v52, 0.0 }
 0x2c0   :  { %2142 = vst [vmem:[#allocation3 + $0x20] sm:$0xff] %v2127_v3 }
 0x2c1   :  { %2143 = vst [vmem:[#allocation3 + $0x28] sm:$0xff] %v2128_v50  ;;  %v1955_v27 = vpop.f32.mrf.mxu0 }
 0x2c2   :  { %v1968_v48 = vpop.f32.mrf.mxu1  ;;  %v8684_v56 = vld [vmem:[#allocation3 + $0x30] sm:$0x3f] }
 0x2c4   :  { %v8686_v36 = vld [vmem:[#allocation3 + $0x38] sm:$0x3f] }
 0x2c5   :  { %v7344_v61 = vpack.i.bf16 %v8686_v36, %v8684_v56  ;;  %v2031_v21 = vpop.f32.mrf.mxu2 }
 0x2c6   :  { %v2044_v2 = vpop.f32.mrf.mxu3  ;;  %v2097_v39 = vadd.f32 %v2031_v21, %v8639_v51 }
 0x2c7   :  { %v2098_v54 = vadd.f32 %v2044_v2, %v1764_v17  ;;  %7345 = vrot.lane.b32.xlu2 %v7344_v61, %s7538_s0  ;;  %v8694_v55 = vld [vmem:[#allocation3 + $0x20] sm:$0x3f] }
 0x2c8   :  { %v8696_v40 = vld [vmem:[#allocation3 + $0x28] sm:$0x3f]  ;;  %v2118_v19 = vadd.f32 %v8654_v0, %v2097_v39 }
 0x2c9   :  { %v2119_v5 = vadd.f32 %v8654_v0, %v2098_v54  ;;  %v7339_v6 = vpack.i.bf16 %v8696_v40, %v8694_v55 }
 0x2ca   :  { %v2133_v14 = vmax.f32 %v2118_v19, 0.0 }
 0x2cb   :  { %v2134_v49 = vmax.f32 %v2119_v5, 0.0  ;;  %7340 = vrot.lane.b32.xlu1 %v7339_v6, %s7538_s0  ;;  %v2005_v16 = vpop.f32.mrf.mxu0  ;;  %v2018_v51 = vpop.f32.mrf.mxu1 }
 0x2cc   :  { %2148 = vst [vmem:[#allocation3 + $0x50] sm:$0xff] %v2133_v14  ;;  %v2095_v7 = vadd.f32 %v2005_v16, %v8642_v63  ;;  %v2096_v60 = vadd.f32 %v2018_v51, %v8637_v38 }
 0x2cd   :  { %2149 = vst [vmem:[#allocation3 + $0x58] sm:$0xff] %v2134_v49  ;;  %v2033_v59 = vpop.f32.mrf.mxu2 }
 0x2ce   :  { %v2046_v34 = vpop.f32.mrf.mxu3  ;;  %v2116_v41 = vadd.f32 %v8654_v0, %v2095_v7  ;;  %v2117_v26 = vadd.f32 %v8654_v0, %v2096_v60 }
 0x2d0   :  { %v2131_v32 = vmax.f32 %v2116_v41, 0.0  ;;  %v2132_v42 = vmax.f32 %v2117_v26, 0.0 }
 0x2d2   :  { %2146 = vst [vmem:[#allocation3 + $0x40] sm:$0xff] %v2131_v32 }
 0x2d3   :  { %2147 = vst [vmem:[#allocation3 + $0x48] sm:$0xff] %v2132_v42  ;;  %v2007_v12 = vpop.f32.mrf.mxu0  ;;  %v2020_v23 = vpop.f32.mrf.mxu1  ;;  %v8707_v18 = vld [vmem:[#allocation3 + $0x50] sm:$0x3f] }
 0x2d4   :  { %v8709_v44 = vld [vmem:[#allocation3 + $0x58] sm:$0x3f] }
 0x2d5   :  { %v2083_v63 = vpop.f32.mrf.mxu2  ;;  %v7354_v38 = vpack.i.bf16 %v8709_v44, %v8707_v18 }
 0x2d6   :  { %v2101_v35 = vadd.f32 %v2083_v63, %v8646_v4 }
 0x2d7   :  { %7355 = vrot.lane.b32.xlu1 %v7354_v38, %s7538_s0 }
 0x2d8   :  { %v2122_v62 = vadd.f32 %v8654_v0, %v2101_v35 }
 0x2d9   :  { %v8716_v11 = vld [vmem:[#allocation3 + $0x40] sm:$0x3f] }
 0x2da   :  { %v2137_v37 = vmax.f32 %v2122_v62, 0.0  ;;  %v8718_v58 = vld [vmem:[#allocation3 + $0x48] sm:$0x3f] }
 0x2db   :  { %v2057_v53 = vpop.f32.mrf.mxu0  ;;  %v2070_v9 = vpop.f32.mrf.mxu1  ;;  %v7349_v8 = vpack.i.bf16 %v8718_v58, %v8716_v11 }
 0x2dc   :  { %2153 = vst.msk [vmem:[#allocation3 + $0x70] sm:$0xff] %vm1830_vm7, %v2137_v37  ;;  %v2099_v45 = vadd.f32 %v2057_v53, %v8650_v10  ;;  %v2100_v4 = vadd.f32 %v2070_v9, %v8644_v46 }
 0x2dd   :  { %7350 = vrot.lane.b32.xlu0 %v7349_v8, %s7538_s0  ;;  %v2085_v30 = vpop.f32.mrf.mxu2 }
 0x2de   :  { %v2120_v28 = vadd.f32 %v8654_v0, %v2099_v45  ;;  %v2121_v33 = vadd.f32 %v8654_v0, %v2100_v4 }
 0x2e0   :  { %v2135_v29 = vmax.f32 %v2120_v28, 0.0  ;;  %v2136_v31 = vmax.f32 %v2121_v33, 0.0 }
 0x2e2   :  { %2150 = vst [vmem:[#allocation3 + $0x60] sm:$0xff] %v2135_v29 }
 0x2e3   :  { %2151 = vst [vmem:[#allocation3 + $0x68] sm:$0xff] %v2136_v31  ;;  %v8728_v43 = vld [vmem:[#allocation3 + $0x70] sm:$0x3f]  ;;  %v2059_v24 = vpop.f32.mrf.mxu0  ;;  %v2072_v1 = vpop.f32.mrf.mxu1 }
 0x2e5   :  { %2212 = vrot.lane.b32.xlu0 %v8728_v43, %s7538_s0 }
 0x2e9   :  { %v8732_v10 = vld [vmem:[#allocation3 + $0x60] sm:$0x3f] }
 0x2ea   :  { %v8734_v46 = vld [vmem:[#allocation3 + $0x68] sm:$0x3f] }
 0x2eb   :  { %v7359_v47 = vpack.i.bf16 %v8734_v46, %v8732_v10 }
 0x2ed   :  { %7360 = vrot.lane.b32.xlu2 %v7359_v47, %s7538_s0  ;;  %s7543_s0 = smov 120  }
 0x310   :  { %v7336_v0 = vpop.permute.xlu2 %7335 }
 0x311   :  { %v7337_v52 = vunpack.i.l.bf16 %v7336_v0  ;;  %v7338_v21 = vunpack.i.h.bf16 %v7336_v0 }
 0x313   :  { %v2217_v54 = vsel %vm614_vm4, %v7337_v52, %v7338_v21 }
 0x314   :  { %v8755_v49 = vmax.f32 %v8661_v57, %v2217_v54 }
 0x321   :  { %v7346_v2 = vpop.permute.xlu2 %7345 }
 0x322   :  { %v7347_v19 = vunpack.i.l.bf16 %v7346_v2 }
 0x32d   :  { %v7331_v22 = vpop.permute.xlu1 %7330 }
 0x32e   :  { %v7333_v3 = vunpack.i.h.bf16 %v7331_v22  ;;  %v7332_v13 = vunpack.i.l.bf16 %v7331_v22 }
 0x330   :  { %v2216_v50 = vsel %vm614_vm4, %v7333_v3, %v7337_v52  ;;  %v2215_v27 = vsel %vm614_vm4, %v7332_v13, %v7333_v3 }
 0x331   :  { %v8742_v48 = vmax.f32 %v8675_v25, %v2216_v50  ;;  %v8745_v17 = vmax.f32 %v8671_v15, %v2215_v27  ;;  %v7531_v27 = vld [vmem:[#allocation2 + $0xbc] sm:$0xff] }
 0x332   :  { %2373 = vst.msk [vmem:[#allocation5 + $0xcc] sm:$0x8] %vm2372_vm8, %v7531_v27 }
 0x333   :  { %v7364_v61 = vpack.i.bf16 %v8742_v48, %v8745_v17 }
 0x335   :  { %7365 = vrot.lane.b32.xlu1 %v7364_v61, %s7534_s23 }
 0x33d   :  { %v7341_v39 = vpop.permute.xlu1 %7340 }
 0x33e   :  { %v7343_v5 = vunpack.i.h.bf16 %v7341_v39  ;;  %v7342_v6 = vunpack.i.l.bf16 %v7341_v39 }
 0x340   :  { %v2220_v14 = vsel %vm614_vm4, %v7343_v5, %v7347_v19  ;;  %v2218_v25 = vsel %vm614_vm4, %v7338_v21, %v7342_v6  ;;  %v2219_v15 = vsel %vm614_vm4, %v7342_v6, %v7343_v5 }
 0x341   :  { %v8758_v16 = vmax.f32 %v8696_v40, %v2220_v14  ;;  %v8761_v51 = vmax.f32 %v8664_v20, %v2218_v25  ;;  %v8764_v7 = vmax.f32 %v8694_v55, %v2219_v15  ;;  %v7348_v20 = vunpack.i.h.bf16 %v7346_v2 }
 0x343   :  { %v7374_v60 = vpack.i.bf16 %v8758_v16, %v8764_v7  ;;  %v7369_v59 = vpack.i.bf16 %v8761_v51, %v8755_v49  ;;  %v2221_v38 = vsel %vm614_vm4, %v7347_v19, %v7348_v20 }
 0x344   :  { %v8788_v9 = vmax.f32 %v8684_v56, %v2221_v38 }
 0x345   :  { %7375 = vrot.lane.b32.xlu0 %v7374_v60, %s7534_s23  ;;  %7370 = vrot.lane.b32.xlu2 %v7369_v59, %s7534_s23 }
 0x347   :  { %v7361_v57 = vpop.permute.xlu2 %7360 }
 0x348   :  { %v7362_v40 = vunpack.i.l.bf16 %v7361_v57  ;;  %v7363_v4 = vunpack.i.h.bf16 %v7361_v57 }
 0x349   :  { %v7356_v34 = vpop.permute.xlu1 %7355 }
 0x34a   :  { %v7358_v41 = vunpack.i.h.bf16 %v7356_v34  ;;  %v7357_v26 = vunpack.i.l.bf16 %v7356_v34  ;;  %v2227_v56 = vsel %vm614_vm4, %v7362_v40, %v7363_v4 }
 0x34c   :  { %v2226_v32 = vsel %vm614_vm4, %v7358_v41, %v7362_v40  ;;  %v2225_v55 = vsel %vm614_vm4, %v7357_v26, %v7358_v41 }
 0x34d   :  { %v8775_v42 = vmax.f32 %v8709_v44, %v2226_v32  ;;  %v8778_v12 = vmax.f32 %v8707_v18, %v2225_v55 }
 0x34f   :  { %v7351_v23 = vpop.permute.xlu0 %7350  ;;  %v7389_v63 = vpack.i.bf16 %v8775_v42, %v8778_v12 }
 0x350   :  { %v7353_v35 = vunpack.i.h.bf16 %v7351_v23  ;;  %v7352_v62 = vunpack.i.l.bf16 %v7351_v23 }
 0x351   :  { %7390 = vrot.lane.b32.xlu0 %v7389_v63, %s7534_s23 }
 0x352   :  { %v2222_v37 = vsel %vm614_vm4, %v7348_v20, %v7352_v62  ;;  %v2223_v53 = vsel %vm614_vm4, %v7352_v62, %v7353_v35  ;;  %v2224_v44 = vsel %vm614_vm4, %v7353_v35, %v7357_v26 }
 0x353   :  { %v8791_v18 = vmax.f32 %v8686_v36, %v2222_v37  ;;  %v8794_v8 = vmax.f32 %v8716_v11, %v2223_v53  ;;  %v8797_v45 = vmax.f32 %v8718_v58, %v2224_v44  ;;  %v8811_v58 = vmax.f32 %v8732_v10, %v2227_v56 }
 0x355   :  { %v7384_v30 = vpack.i.bf16 %v8797_v45, %v8794_v8  ;;  %v7379_v28 = vpack.i.bf16 %v8791_v18, %v8788_v9 }
 0x357   :  { %v2213_v33 = vpop.permute.xlu0 %2212  ;;  %7385 = vrot.lane.b32.xlu2 %v7384_v30, %s7534_s23  ;;  %7380 = vrot.lane.b32.xlu1 %v7379_v28, %s7534_s23 }
 0x358   :  { %v2228_v36 = vsel %vm614_vm4, %v7363_v4, %v2213_v33  ;;  %v2258_v29 = vmax.f32 %v8728_v43, %v2213_v33  ;;  %vm5765_vm4 = vcmask 130048  }
 0x359   :  { %v8808_v11 = vmax.f32 %v8734_v46, %v2228_v36 }
 0x35b   :  { %v7394_v31 = vpack.i.bf16 %v8808_v11, %v8811_v58 }
 0x35f   :  { %2302 = vrot.lane.b32.xlu2 %v2258_v29, %s7534_s23  ;;  %7395 = vrot.lane.b32.xlu1 %v7394_v31, %s7534_s23 }
 0x39f   :  { %v7371_v24 = vpop.permute.xlu2 %7370 }
 0x3a0   :  { %v7372_v47 = vunpack.i.l.bf16 %v7371_v24  ;;  %v7373_v50 = vunpack.i.h.bf16 %v7371_v24 }
 0x3a2   :  { %v2307_v54 = vsel %vm152_vm2, %v7372_v47, %v7373_v50 }
 0x3a3   :  { %v2336_v6 = vmax.f32 %v8755_v49, %v2307_v54 }
 0x3a7   :  { %v7366_v1 = vpop.permute.xlu1 %7365 }
 0x3a8   :  { %v7368_v0 = vunpack.i.h.bf16 %v7366_v1  ;;  %v7367_v22 = vunpack.i.l.bf16 %v7366_v1 }
 0x3aa   :  { %v2306_v46 = vsel %vm152_vm2, %v7368_v0, %v7372_v47  ;;  %v2305_v52 = vsel %vm152_vm2, %v7367_v22, %v7368_v0 }
 0x3ab   :  { %v2335_v10 = vmax.f32 %v8742_v48, %v2306_v46  ;;  %v2334_v43 = vmax.f32 %v8745_v17, %v2305_v52 }
 0x3ad   :  { %v2349_v3 = vpack.c.bf16 %v2335_v10, %v2334_v43 }
 0x3af   :  { %2357 = vst [vmem:[#allocation4] sm:$0x77] %v2349_v3 }
 0x3b1   :  { %v7386_v13 = vpop.permute.xlu2 %7385 }
 0x3b2   :  { %v7388_v59 = vunpack.i.h.bf16 %v7386_v13  ;;  %v7387_v57 = vunpack.i.l.bf16 %v7386_v13 }
 0x3b4   :  { %v2313_v40 = vsel %vm152_vm2, %v7387_v57, %v7388_v59 }
 0x3b5   :  { %v2342_v63 = vmax.f32 %v8794_v8, %v2313_v40 }
 0x3b6   :  { %v2374_v61 = vld [vmem:[#allocation4] sm:$0x77] }
 0x3b7   :  { %v2388_v21 = vld [vmem:[#allocation4] sm:$0x77]  ;;  %2381 = vst [vmem:[#allocation5] sm:$0x77] %v2374_v61  ;;  %v7376_v2 = vpop.permute.xlu0 %7375 }
 0x3b8   :  { %v2402_v39 = vrot.slane %v2388_v21, 5  ;;  %v7377_v19 = vunpack.i.l.bf16 %v7376_v2 }
 0x3b9   :  { %v8826_v5 = vpop.permute.xlu2 %2302 }
 0x3ba   :  { %2416 = vrot.lane.b32.xlu1 %v2402_v39, %s7535_s26  ;;  %v2409_v48 = vrot.slane %v2402_v39, 4  ;;  %v2308_v17 = vsel %vm152_vm2, %v7373_v50, %v7377_v19  ;;  %v2348_v25 = vmax.f32 %v2258_v29, %v8826_v5 }
 0x3bb   :  { %v2337_v14 = vmax.f32 %v8761_v51, %v2308_v17  ;;  %v7378_v51 = vunpack.i.h.bf16 %v7376_v2 }
 0x3bc   :  { %2430 = vrot.lane.b32.xlu2 %v2409_v48, %s7535_s26  ;;  %v2356_v60 = vpack.c.bf16 %v2348_v25, %v2348_v25 }
 0x3bd   :  { %v2350_v15 = vpack.c.bf16 %v2337_v14, %v2336_v6  ;;  %v2309_v28 = vsel %vm152_vm2, %v7377_v19, %v7378_v51 }
 0x3be   :  { %2365 = vst.msk [vmem:[#allocation4 + $0x38] sm:$0x7] %vm2364_vm9, %v2356_v60  ;;  %v2338_v29 = vmax.f32 %v8764_v7, %v2309_v28 }
 0x3bf   :  { %2358 = vst [vmem:[#allocation4 + $0x8] sm:$0x77] %v2350_v15 }
 0x3c3   :  { %v7391_v34 = vpop.permute.xlu0 %7390 }
 0x3c4   :  { %v7392_v41 = vunpack.i.l.bf16 %v7391_v34  ;;  %v7393_v13 = vunpack.i.h.bf16 %v7391_v34 }
 0x3c5   :  { %v2647_v55 = vld [vmem:[#allocation4 + $0x38] sm:$0x7] }
 0x3c6   :  { %v2375_v26 = vld [vmem:[#allocation4 + $0x8] sm:$0x77]  ;;  %v2314_v23 = vsel %vm152_vm2, %v7388_v59, %v7392_v41  ;;  %2654 = vst.msk [vmem:[#allocation5 + $0xcc] sm:$0x7] %vm2364_vm9, %v2647_v55 }
 0x3c7   :  { %v2513_v49 = vld [vmem:[#allocation4 + $0x4] sm:$0x77]  ;;  %2382 = vst [vmem:[#allocation5 + $0x8] sm:$0x77] %v2375_v26  ;;  %v2343_v38 = vmax.f32 %v8797_v45, %v2314_v23 }
 0x3c8   :  { %v2641_v20 = vld [vmem:[#allocation4 + $0x8] sm:$0x77]  ;;  %v2527_v32 = vrot.slane %v2513_v49, 6 }
 0x3c9   :  { %2648 = vst [vmem:[#allocation5 + $0x9c] sm:$0x77] %v2641_v20  ;;  %v2571_v35 = vld [vmem:[#allocation4 + $0x4] sm:$0x77]  ;;  %v2353_v4 = vpack.c.bf16 %v2343_v38, %v2342_v63  ;;  %v7381_v30 = vpop.permute.xlu1 %7380 }
 0x3ca   :  { %v2389_v62 = vld [vmem:[#allocation4 + $0x8] sm:$0x77]  ;;  %2555 = vst [vmem:[#allocation5 + $0x34] sm:$0xcc] %v2527_v32  ;;  %v2585_v37 = vrot.slane %v2571_v35, 7  ;;  %v2534_v44 = vrot.slane %v2527_v32, 4  ;;  %v7383_v33 = vunpack.i.h.bf16 %v7381_v30  ;;  %v7382_v56 = vunpack.i.l.bf16 %v7381_v30 }
 0x3cb   :  { %v2403_v53 = vrot.slane %v2389_v62, 5  ;;  %2361 = vst [vmem:[#allocation4 + $0x20] sm:$0x77] %v2353_v4 }
 0x3cc   :  { %2592 = vrot.lane.b32.xlu0 %v2585_v37, %s7535_s26  ;;  %2563 = vst [vmem:[#allocation5 + $0x68] sm:$0x11] %v2534_v44  ;;  %v2312_v8 = vsel %vm152_vm2, %v7383_v33, %v7387_v57  ;;  %v2310_v45 = vsel %vm152_vm2, %v7378_v51, %v7382_v56  ;;  %v2311_v36 = vsel %vm152_vm2, %v7382_v56, %v7383_v33 }
 0x3cd   :  { %2418 = vrot.lane.b32.xlu2 %v2403_v53, %s7535_s26  ;;  %v2341_v31 = vmax.f32 %v8791_v18, %v2312_v8  ;;  %v2339_v24 = vmax.f32 %v8758_v16, %v2310_v45  ;;  %v2340_v1 = vmax.f32 %v8788_v9, %v2311_v36  ;;  %v2410_v22 = vrot.slane %v2403_v53, 4 }
 0x3ce   :  { %v2315_v18 = vsel %vm152_vm2, %v7392_v41, %v7393_v13 }
 0x3cf   :  { %v2351_v47 = vpack.c.bf16 %v2339_v24, %v2338_v29  ;;  %v2352_v0 = vpack.c.bf16 %v2341_v31, %v2340_v1  ;;  %v2344_v48 = vmax.f32 %v8778_v12, %v2315_v18 }
 0x3d1   :  { %2359 = vst [vmem:[#allocation4 + $0x10] sm:$0x77] %v2351_v47  ;;  %v7396_v46 = vpop.permute.xlu1 %7395 }
 0x3d2   :  { %v2378_v52 = vld [vmem:[#allocation4 + $0x20] sm:$0x77]  ;;  %2360 = vst [vmem:[#allocation4 + $0x18] sm:$0x77] %v2352_v0  ;;  %v7398_v43 = vunpack.i.h.bf16 %v7396_v46  ;;  %v7397_v3 = vunpack.i.l.bf16 %v7396_v46 }
 0x3d3   :  { %v2644_v10 = vld [vmem:[#allocation4 + $0x20] sm:$0x77]  ;;  %2385 = vst [vmem:[#allocation5 + $0x20] sm:$0x77] %v2378_v52 }
 0x3d4   :  { %2432 = vrot.lane.b32.xlu0 %v2410_v22, %s7535_s26  ;;  %2651 = vst [vmem:[#allocation5 + $0xb4] sm:$0x77] %v2644_v10  ;;  %v2316_v7 = vsel %vm152_vm2, %v7393_v13, %v7397_v3  ;;  %v2318_v16 = vsel %vm152_vm2, %v7398_v43, %v8826_v5  ;;  %v2317_v9 = vsel %vm152_vm2, %v7397_v3, %v7398_v43  ;;  %v2392_v33 = vld [vmem:[#allocation4 + $0x20] sm:$0x77]  ;;  %vm4725_vm2 = vcmask 3072  }
 0x3d5   :  { %v2345_v21 = vmax.f32 %v8775_v42, %v2316_v7  ;;  %v2347_v54 = vmax.f32 %v8808_v11, %v2318_v16  ;;  %v2346_v19 = vmax.f32 %v8811_v58, %v2317_v9  ;;  %v2406_v36 = vrot.slane %v2392_v33, 5 }
 0x3d7   :  { %v2354_v15 = vpack.c.bf16 %v2345_v21, %v2344_v48  ;;  %v2355_v59 = vpack.c.bf16 %v2347_v54, %v2346_v19  ;;  %v2413_v1 = vrot.slane %v2406_v36, 4 }
 0x3d8   :  { %v2376_v50 = vld [vmem:[#allocation4 + $0x10] sm:$0x77] }
 0x3d9   :  { %v2514_v27 = vld [vmem:[#allocation4 + $0xc] sm:$0x77]  ;;  %v2377_v2 = vld [vmem:[#allocation4 + $0x18] sm:$0x77]  ;;  %2383 = vst [vmem:[#allocation5 + $0x10] sm:$0x77] %v2376_v50 }
 0x3da   :  { %v2642_v61 = vld [vmem:[#allocation4 + $0x10] sm:$0x77]  ;;  %2384 = vst [vmem:[#allocation5 + $0x18] sm:$0x77] %v2377_v2  ;;  %v2516_v17 = vld [vmem:[#allocation4 + $0x1c] sm:$0x77] }
 0x3db   :  { %v2515_v39 = vld [vmem:[#allocation4 + $0x14] sm:$0x77]  ;;  %v2528_v5 = vrot.slane %v2514_v27, 6  ;;  %v2530_v14 = vrot.slane %v2516_v17, 6  ;;  %2649 = vst [vmem:[#allocation5 + $0xa4] sm:$0x77] %v2642_v61 }
 0x3dc   :  { %v2529_v6 = vrot.slane %v2515_v39, 6  ;;  %v2643_v25 = vld [vmem:[#allocation4 + $0x18] sm:$0x77]  ;;  %v2390_v60 = vld [vmem:[#allocation4 + $0x10] sm:$0x77] }
 0x3dd   :  { %2650 = vst [vmem:[#allocation5 + $0xac] sm:$0x77] %v2643_v25  ;;  %v2572_v42 = vld [vmem:[#allocation4 + $0xc] sm:$0x77]  ;;  %v2404_v57 = vrot.slane %v2390_v60, 5  ;;  %v2535_v40 = vrot.slane %v2528_v5, 4 }
 0x3de   :  { %2556 = vst [vmem:[#allocation5 + $0x3c] sm:$0xcc] %v2528_v5  ;;  %v2586_v34 = vrot.slane %v2572_v42, 7  ;;  %v2573_v11 = vld [vmem:[#allocation4 + $0x14] sm:$0x77]  ;;  %v2536_v41 = vrot.slane %v2529_v6, 4 }
 0x3df   :  { %2557 = vst [vmem:[#allocation5 + $0x44] sm:$0xcc] %v2529_v6  ;;  %v2587_v58 = vrot.slane %v2573_v11, 7  ;;  %2420 = vrot.lane.b32.xlu0 %v2404_v57, %s7535_s26  ;;  %v2391_v12 = vld [vmem:[#allocation4 + $0x18] sm:$0x77]  ;;  %v2537_v26 = vrot.slane %v2530_v14, 4 }
 0x3e0   :  { %2558 = vst [vmem:[#allocation5 + $0x4c] sm:$0xcc] %v2530_v14  ;;  %2594 = vrot.lane.b32.xlu1 %v2586_v34, %s7535_s26  ;;  %v2574_v49 = vld [vmem:[#allocation4 + $0x1c] sm:$0x77]  ;;  %v2405_v20 = vrot.slane %v2391_v12, 5  ;;  %v2411_v32 = vrot.slane %v2404_v57, 4 }
 0x3e1   :  { %2362 = vst [vmem:[#allocation4 + $0x28] sm:$0x77] %v2354_v15  ;;  %2596 = vrot.lane.b32.xlu2 %v2587_v58, %s7535_s26  ;;  %v2588_v51 = vrot.slane %v2574_v49, 7 }
 0x3e2   :  { %2363 = vst [vmem:[#allocation4 + $0x30] sm:$0x77] %v2355_v59  ;;  %v2412_v55 = vrot.slane %v2405_v20, 4 }
 0x3e3   :  { %2564 = vst [vmem:[#allocation5 + $0x70] sm:$0x11] %v2535_v40 }
 0x3e4   :  { %2565 = vst [vmem:[#allocation5 + $0x78] sm:$0x11] %v2536_v41 }
 0x3e5   :  { %2566 = vst [vmem:[#allocation5 + $0x80] sm:$0x11] %v2537_v26 }
 0x3e7   :  { %2598 = vrot.lane.b32.xlu0 %v2588_v51, %s7535_s26 }
 0x3e8   :  { %v2379_v23 = vld [vmem:[#allocation4 + $0x28] sm:$0x77]  ;;  %2434 = vrot.lane.b32.xlu1 %v2411_v32, %s7535_s26 }
 0x3e9   :  { %v2517_v63 = vld [vmem:[#allocation4 + $0x24] sm:$0x77]  ;;  %v2380_v35 = vld [vmem:[#allocation4 + $0x30] sm:$0x7]  ;;  %2386 = vst [vmem:[#allocation5 + $0x28] sm:$0x77] %v2379_v23  ;;  %2436 = vrot.lane.b32.xlu2 %v2412_v55, %s7535_s26 }
 0x3ea   :  { %v2645_v38 = vld [vmem:[#allocation4 + $0x28] sm:$0x77]  ;;  %2387 = vst.msk [vmem:[#allocation5 + $0x30] sm:$0x7] %vm2364_vm9, %v2380_v35  ;;  %v2519_v37 = vld [vmem:[#allocation4 + $0x34] sm:$0x7] }
 0x3eb   :  { %v2518_v62 = vld [vmem:[#allocation4 + $0x2c] sm:$0x77]  ;;  %v2531_v53 = vrot.slane %v2517_v63, 6  ;;  %v2533_v4 = vrot.slane %v2519_v37, 6  ;;  %2652 = vst [vmem:[#allocation5 + $0xbc] sm:$0x77] %v2645_v38 }
 0x3ec   :  { %v2532_v44 = vrot.slane %v2518_v62, 6  ;;  %v2646_v30 = vld [vmem:[#allocation4 + $0x30] sm:$0x77]  ;;  %v2575_v28 = vld [vmem:[#allocation4 + $0x24] sm:$0x77] }
 0x3ed   :  { %2653 = vst [vmem:[#allocation5 + $0xc4] sm:$0x77] %v2646_v30  ;;  %v2538_v56 = vrot.slane %v2531_v53, 4  ;;  %v2540_v8 = vrot.slane %v2533_v4, 4  ;;  %v2589_v45 = vrot.slane %v2575_v28, 7 }
 0x3ee   :  { %2559 = vst [vmem:[#allocation5 + $0x54] sm:$0xcc] %v2531_v53  ;;  %v2539_v29 = vrot.slane %v2532_v44, 4  ;;  %v2393_v31 = vld [vmem:[#allocation4 + $0x28] sm:$0x77] }
 0x3ef   :  { %2560 = vst [vmem:[#allocation5 + $0x5c] sm:$0xcc] %v2532_v44  ;;  %2600 = vrot.lane.b32.xlu0 %v2589_v45, %s7535_s26  ;;  %v2407_v24 = vrot.slane %v2393_v31, 5  ;;  %v2394_v0 = vld [vmem:[#allocation4 + $0x30] sm:$0x77] }
 0x3f0   :  { %2422 = vrot.lane.b32.xlu1 %v2405_v20, %s7535_s26  ;;  %2567 = vst [vmem:[#allocation5 + $0x88] sm:$0x11] %v2538_v56  ;;  %v2577_v22 = vld [vmem:[#allocation4 + $0x34] sm:$0x77]  ;;  %v2576_v46 = vld [vmem:[#allocation4 + $0x2c] sm:$0x77] }
 0x3f1   :  { %2424 = vrot.lane.b32.xlu2 %v2406_v36, %s7535_s26  ;;  %2568 = vst [vmem:[#allocation5 + $0x90] sm:$0x11] %v2539_v29  ;;  %v2414_v47 = vrot.slane %v2407_v24, 4  ;;  %v2408_v52 = vrot.slane %v2394_v0, 5  ;;  %v2591_v10 = vrot.slane %v2577_v22, 7  ;;  %v2590_v43 = vrot.slane %v2576_v46, 7 }
 0x3f2   :  { %2570 = vst.msk [vmem:[#allocation5 + $0x98] sm:$0x1] %vm2569_vm10, %v2540_v8  ;;  %v7219_v45 = vld [vmem:[#allocation5 + $0x98] sm:$0xf0]  ;;  %v6734_v36 = vld [vmem:[#allocation5 + $0x9c] sm:$0xf0] }
 0x3f3   :  { %2562 = vst.msk [vmem:[#allocation5 + $0x64] sm:$0xc] %vm2561_vm11, %v2533_v4  ;;  %v2415_v3 = vrot.slane %v2408_v52, 4  ;;  %v6742_v29 = vld [vmem:[#allocation5 + $0xa4] sm:$0xf0] }
 0x3f7   :  { %2426 = vrot.lane.b32.xlu0 %v2407_v24, %s7535_s26 }
 0x3f8   :  { %2438 = vrot.lane.b32.xlu1 %v2413_v1, %s7535_s26 }
 0x3f9   :  { %2440 = vrot.lane.b32.xlu2 %v2414_v47, %s7535_s26 }
 0x3ff   :  { %2604 = vrot.lane.b32.xlu0 %v2591_v10, %s7535_s26 }
 0x400   :  { %2602 = vrot.lane.b32.xlu1 %v2590_v43, %s7535_s26 }
 0x401   :  { %2442 = vrot.lane.b32.xlu2 %v2415_v3, %s7535_s26 }
 0x408   :  { %2428 = vrot.lane.b32.xlu1 %v2408_v52, %s7535_s26 }
 0x416   :  { %v2431_v13 = vpop.permute.xlu2 %2430 }
 0x417   :  { %v2451_v54 = vrot.slane %v2431_v13, 4 }
 0x427   :  { %v2419_v7 = vpop.permute.xlu2 %2418 }
 0x428   :  { %v2445_v9 = vrot.slane %v2419_v7, 4 }
 0x42c   :  { %v2417_v16 = vpop.permute.xlu1 %2416 }
 0x42d   :  { %v2444_v18 = vrot.slane %v2417_v16, 4 }
 0x42f   :  { %v2458_v50 = vsel %vm150_vm0, %v2444_v18, %v2445_v9 }
 0x430   :  { %v2459_v27 = vsel %vm239_vm1, %v2417_v16, %v2458_v50 }
 0x431   :  { %2498 = vst [vmem:[#allocation5] sm:$0x88] %v2459_v27 }
 0x438   :  { %v6680_v6 = vld [vmem:[#allocation5] sm:$0xf]  ;;  %v7200_v25 = vld [vmem:[#allocation5 + $0x4] sm:$0xf] }
 0x43b   :  { %v2597_v61 = vpop.permute.xlu2 %2596 }
 0x43c   :  { %v2608_v34 = vrot.slane %v2597_v61, 4 }
 0x43e   :  { %v2593_v21 = vpop.permute.xlu0 %2592 }
 0x43f   :  { %v2606_v11 = vrot.slane %v2593_v21, 4 }
 0x443   :  { %v8877_v2 = vpop.permute.xlu2 %2436 }
 0x444   :  { %v2454_v63 = vrot.slane %v8877_v2, 4 }
 0x446   :  { %v2433_v39 = vpop.permute.xlu0 %2432 }
 0x447   :  { %v2452_v19 = vrot.slane %v2433_v39, 4 }
 0x449   :  { %v2471_v48 = vsel %vm150_vm0, %v2451_v54, %v2452_v19 }
 0x44a   :  { %v2472_v17 = vsel %vm239_vm1, %v2431_v13, %v2471_v48  ;;  %v7220_v48 = vld [vmem:[#allocation5 + $0xa0] sm:$0xf0] }
 0x44b   :  { %2505 = vst [vmem:[#allocation5 + $0x34] sm:$0x33] %v2472_v17  ;;  %v8881_v5 = vpop.permute.xlu2 %2424 }
 0x44c   :  { %v2448_v3 = vrot.slane %v8881_v5, 4 }
 0x451   :  { %v8883_v60 = vpop.permute.xlu0 %2420 }
 0x452   :  { %v7206_v14 = vld [vmem:[#allocation5 + $0x30] sm:$0xf0]  ;;  %v6682_v15 = vld [vmem:[#allocation5 + $0x34] sm:$0xf0]  ;;  %v2595_v42 = vpop.permute.xlu1 %2594  ;;  %v2446_v58 = vrot.slane %v8883_v60, 4 }
 0x453   :  { %v8885_v59 = vor.u32 %v7206_v14, %v6680_v6  ;;  %v8887_v57 = vor.u32 %v7200_v25, %v6682_v15  ;;  %v2607_v40 = vrot.slane %v2595_v42, 4  ;;  %v8890_v12 = vpop.permute.xlu2 %2440 }
 0x454   :  { %v2460_v41 = vsel %vm150_vm0, %v2445_v9, %v2446_v58  ;;  %v2456_v37 = vrot.slane %v8890_v12, 4 }
 0x455   :  { %2799 = vrot.lane.b32.xlu1 %v8885_v59, %s7539_s19  ;;  %2801 = vrot.lane.b32.xlu2 %v8887_v57, %s7539_s19  ;;  %v2613_v26 = vsel %vm150_vm0, %v2606_v11, %v2607_v40  ;;  %v2615_v49 = vsel %vm150_vm0, %v2607_v40, %v2608_v34  ;;  %v2461_v20 = vsel %vm239_vm1, %v2419_v7, %v2460_v41 }
 0x456   :  { %v2614_v51 = vsel %vm239_vm1, %v2593_v21, %v2613_v26  ;;  %v2616_v32 = vsel %vm239_vm1, %v2595_v42, %v2615_v49  ;;  %2499 = vst [vmem:[#allocation5 + $0x8] sm:$0x88] %v2461_v20 }
 0x457   :  { %2633 = vst [vmem:[#allocation5 + $0x68] sm:$0xee] %v2614_v51 }
 0x458   :  { %2634 = vst [vmem:[#allocation5 + $0x70] sm:$0xee] %v2616_v32 }
 0x459   :  { %v2599_v55 = vpop.permute.xlu0 %2598 }
 0x45a   :  { %v2435_v23 = vpop.permute.xlu1 %2434  ;;  %v2609_v38 = vrot.slane %v2599_v55, 4 }
 0x45b   :  { %v2453_v35 = vrot.slane %v2435_v23, 4  ;;  %v2443_v62 = vpop.permute.xlu2 %2442 }
 0x45c   :  { %v2457_v53 = vrot.slane %v2443_v62, 4  ;;  %v2617_v44 = vsel %vm150_vm0, %v2608_v34, %v2609_v38 }
 0x45d   :  { %v2473_v4 = vsel %vm150_vm0, %v2452_v19, %v2453_v35  ;;  %v2475_v30 = vsel %vm150_vm0, %v2453_v35, %v2454_v63  ;;  %v2618_v28 = vsel %vm239_vm1, %v2597_v61, %v2617_v44  ;;  %v6688_v41 = vld [vmem:[#allocation5 + $0x8] sm:$0xf]  ;;  %v7221_v44 = vld [vmem:[#allocation5 + $0xa8] sm:$0xf0] }
 0x45e   :  { %v2474_v33 = vsel %vm239_vm1, %v2433_v39, %v2473_v4  ;;  %v2476_v56 = vsel %vm239_vm1, %v2435_v23, %v2475_v30  ;;  %v2481_v8 = vsel %vm150_vm0, %v2456_v37, %v2457_v53  ;;  %2635 = vst [vmem:[#allocation5 + $0x78] sm:$0xee] %v2618_v28  ;;  %v6732_v24 = vld [vmem:[#allocation5 + $0x68] sm:$0xf]  ;;  %v7213_v1 = vld [vmem:[#allocation5 + $0x6c] sm:$0xf]  ;;  %v2483_v47 = vsel %vm239_vm1, %v2443_v62, %v2457_v53 }
 0x45f   :  { %v2482_v31 = vsel %vm239_vm1, %v8890_v12, %v2481_v8  ;;  %2506 = vst [vmem:[#allocation5 + $0x3c] sm:$0x33] %v2474_v33  ;;  %v8914_v0 = vor.u32 %v7219_v45, %v6732_v24  ;;  %v8916_v22 = vor.u32 %v7213_v1, %v6734_v36  ;;  %v7214_v46 = vld [vmem:[#allocation5 + $0x74] sm:$0xf]  ;;  %v6740_v21 = vld [vmem:[#allocation5 + $0x70] sm:$0xf] }
 0x460   :  { %2507 = vst [vmem:[#allocation5 + $0x44] sm:$0x33] %v2476_v56  ;;  %v8918_v52 = vor.u32 %v7214_v46, %v6742_v29  ;;  %v7201_v39 = vld [vmem:[#allocation5 + $0xc] sm:$0xf]  ;;  %v8936_v17 = vor.u32 %v7220_v48, %v6740_v21 }
 0x461   :  { %2510 = vst [vmem:[#allocation5 + $0x5c] sm:$0x33] %v2482_v31  ;;  %2825 = vrot.lane.b32.xlu0 %v8914_v0, %s7539_s19  ;;  %2827 = vrot.lane.b32.xlu1 %v8916_v22, %s7539_s19  ;;  %v2601_v10 = vpop.permute.xlu0 %2600 }
 0x462   :  { %v2423_v43 = vpop.permute.xlu1 %2422  ;;  %2512 = vst.msk [vmem:[#allocation5 + $0x64] sm:$0x3] %vm2511_vm12, %v2483_v47  ;;  %2831 = vrot.lane.b32.xlu2 %v8918_v52, %s7539_s19  ;;  %v2610_v13 = vrot.slane %v2601_v10, 4 }
 0x463   :  { %v2447_v7 = vrot.slane %v2423_v43, 4 }
 0x464   :  { %v2619_v16 = vsel %vm150_vm0, %v2609_v38, %v2610_v13 }
 0x465   :  { %v2462_v9 = vsel %vm150_vm0, %v2446_v58, %v2447_v7  ;;  %v2464_v18 = vsel %vm150_vm0, %v2447_v7, %v2448_v3  ;;  %v2620_v50 = vsel %vm239_vm1, %v2599_v55, %v2619_v16  ;;  %v6748_v35 = vld [vmem:[#allocation5 + $0x78] sm:$0xf]  ;;  %v7215_v47 = vld [vmem:[#allocation5 + $0x7c] sm:$0xf] }
 0x466   :  { %v2463_v27 = vsel %vm239_vm1, %v8883_v60, %v2462_v9  ;;  %v2465_v61 = vsel %vm239_vm1, %v2423_v43, %v2464_v18  ;;  %2636 = vst [vmem:[#allocation5 + $0x80] sm:$0xee] %v2620_v50  ;;  %v6690_v54 = vld [vmem:[#allocation5 + $0x3c] sm:$0xf0]  ;;  %v7207_v11 = vld [vmem:[#allocation5 + $0x38] sm:$0xf0]  ;;  %v8963_v33 = vor.u32 %v7221_v44, %v6748_v35 }
 0x467   :  { %2500 = vst [vmem:[#allocation5 + $0x10] sm:$0x88] %v2463_v27  ;;  %v8934_v19 = vor.u32 %v7201_v39, %v6690_v54  ;;  %v7208_v49 = vld [vmem:[#allocation5 + $0x40] sm:$0xf0]  ;;  %v8950_v20 = vor.u32 %v7207_v11, %v6688_v41  ;;  %v6698_v4 = vld [vmem:[#allocation5 + $0x44] sm:$0xf0] }
 0x468   :  { %2501 = vst [vmem:[#allocation5 + $0x18] sm:$0x88] %v2465_v61  ;;  %v6750_v43 = vld [vmem:[#allocation5 + $0xac] sm:$0xf0]  ;;  %v6758_v7 = vld [vmem:[#allocation5 + $0xb4] sm:$0xf0] }
 0x469   :  { %2805 = vrot.lane.b32.xlu0 %v8934_v19, %s7539_s19  ;;  %v2427_v6 = vpop.permute.xlu0 %2426  ;;  %v7223_v27 = vld [vmem:[#allocation5 + $0xb8] sm:$0xf0]  ;;  %v7222_v61 = vld [vmem:[#allocation5 + $0xb0] sm:$0xf0]  ;;  %v7225_v11 = vld [vmem:[#allocation5 + $0xc8] sm:$0xf0] }
 0x46a   :  { %v2439_v14 = vpop.permute.xlu1 %2438  ;;  %2829 = vrot.lane.b32.xlu2 %v8936_v17, %s7539_s19  ;;  %v2449_v25 = vrot.slane %v2427_v6, 4  ;;  %v7211_v35 = vld [vmem:[#allocation5 + $0x58] sm:$0xf0] }
 0x46b   :  { %v2455_v15 = vrot.slane %v2439_v14, 4 }
 0x46c   :  { %v2466_v60 = vsel %vm150_vm0, %v2448_v3, %v2449_v25 }
 0x46d   :  { %v2477_v42 = vsel %vm150_vm0, %v2454_v63, %v2455_v15  ;;  %v2479_v34 = vsel %vm150_vm0, %v2455_v15, %v2456_v37  ;;  %v2467_v58 = vsel %vm239_vm1, %v8881_v5, %v2466_v60  ;;  %v6756_v18 = vld [vmem:[#allocation5 + $0x80] sm:$0xf]  ;;  %v6774_v60 = vld [vmem:[#allocation5 + $0xc4] sm:$0xf0] }
 0x46e   :  { %v2478_v40 = vsel %vm239_vm1, %v8877_v2, %v2477_v42  ;;  %v2480_v12 = vsel %vm239_vm1, %v2439_v14, %v2479_v34  ;;  %2502 = vst [vmem:[#allocation5 + $0x20] sm:$0x88] %v2467_v58  ;;  %v6696_v26 = vld [vmem:[#allocation5 + $0x10] sm:$0xf]  ;;  %v7202_v62 = vld [vmem:[#allocation5 + $0x14] sm:$0xf]  ;;  %v8993_v39 = vor.u32 %v7222_v61, %v6756_v18 }
 0x46f   :  { %2508 = vst [vmem:[#allocation5 + $0x4c] sm:$0x33] %v2478_v40  ;;  %v8952_v51 = vor.u32 %v7208_v49, %v6696_v26  ;;  %v7203_v30 = vld [vmem:[#allocation5 + $0x1c] sm:$0xf]  ;;  %v8965_v56 = vor.u32 %v7202_v62, %v6698_v4  ;;  %v6704_v54 = vld [vmem:[#allocation5 + $0x18] sm:$0xf] }
 0x470   :  { %2509 = vst [vmem:[#allocation5 + $0x54] sm:$0x33] %v2480_v12  ;;  %v6766_v26 = vld [vmem:[#allocation5 + $0xbc] sm:$0xf0] }
 0x471   :  { %2803 = vrot.lane.b32.xlu0 %v8950_v20, %s7539_s19  ;;  %2807 = vrot.lane.b32.xlu1 %v8952_v51, %s7539_s19  ;;  %v2605_v5 = vpop.permute.xlu0 %2604  ;;  %v6722_v49 = vld [vmem:[#allocation5 + $0x5c] sm:$0xf0] }
 0x472   :  { %v2603_v2 = vpop.permute.xlu1 %2602  ;;  %v2612_v32 = vrot.slane %v2605_v5, 4 }
 0x473   :  { %v2611_v55 = vrot.slane %v2603_v2, 4 }
 0x474   :  { %v2625_v23 = vsel %vm239_vm1, %v2605_v5, %v2612_v32 }
 0x475   :  { %v2621_v63 = vsel %vm150_vm0, %v2610_v13, %v2611_v55  ;;  %v2623_v38 = vsel %vm150_vm0, %v2611_v55, %v2612_v32  ;;  %2640 = vst.msk [vmem:[#allocation5 + $0x98] sm:$0xe] %vm2639_vm13, %v2625_v23  ;;  %v6712_v24 = vld [vmem:[#allocation5 + $0x20] sm:$0xf]  ;;  %v8981_v13 = vor.u32 %v7215_v47, %v6750_v43  ;;  %v7212_v32 = vld [vmem:[#allocation5 + $0x60] sm:$0xf0] }
 0x476   :  { %v2622_v37 = vsel %vm239_vm1, %v2601_v10, %v2621_v63  ;;  %v2624_v53 = vsel %vm239_vm1, %v2603_v2, %v2623_v38  ;;  %v6706_v28 = vld [vmem:[#allocation5 + $0x4c] sm:$0xf0]  ;;  %v7216_v10 = vld [vmem:[#allocation5 + $0x84] sm:$0xf]  ;;  %v7209_v50 = vld [vmem:[#allocation5 + $0x48] sm:$0xf0] }
 0x477   :  { %2637 = vst [vmem:[#allocation5 + $0x88] sm:$0xee] %v2622_v37  ;;  %v8967_v8 = vor.u32 %v7203_v30, %v6706_v28  ;;  %v7210_v1 = vld [vmem:[#allocation5 + $0x50] sm:$0xf0]  ;;  %v8983_v16 = vor.u32 %v7216_v10, %v6758_v7  ;;  %v8995_v48 = vor.u32 %v7209_v50, %v6704_v54  ;;  %v6714_v14 = vld [vmem:[#allocation5 + $0x54] sm:$0xf0] }
 0x478   :  { %2638 = vst [vmem:[#allocation5 + $0x90] sm:$0xee] %v2624_v53  ;;  %v8979_v3 = vor.u32 %v7210_v1, %v6712_v24  ;;  %v7224_v38 = vld [vmem:[#allocation5 + $0xc0] sm:$0xf0]  ;;  %v9086_v47 = vld [vmem:[%s11001_s3 + $0x8] sm:$0xff] }
 0x479   :  { %2833 = vrot.lane.b32.xlu0 %v8963_v33, %s7539_s19  ;;  %2809 = vrot.lane.b32.xlu1 %v8965_v56, %s7539_s19 }
 0x47a   :  { %v2429_v45 = vpop.permute.xlu1 %2428  ;;  %2813 = vrot.lane.b32.xlu2 %v8967_v8, %s7539_s19 }
 0x47b   :  { %v2450_v36 = vrot.slane %v2429_v45, 4 }
 0x47c   :  { %v6780_v15 = vld [vmem:[#allocation5 + $0x98] sm:$0xf] }
 0x47d   :  { %v2468_v29 = vsel %vm150_vm0, %v2449_v25, %v2450_v36  ;;  %v2470_v31 = vsel %vm239_vm1, %v2429_v45, %v2450_v36  ;;  %v9007_v58 = vor.u32 %v7225_v11, %v6780_v15  ;;  %vm4343_vm0 = vcmask 678912  }
 0x47e   :  { %v2469_v46 = vsel %vm239_vm1, %v2427_v6, %v2468_v29  ;;  %2504 = vst.msk [vmem:[#allocation5 + $0x30] sm:$0x8] %vm2372_vm8, %v2470_v31  ;;  %v6764_v9 = vld [vmem:[#allocation5 + $0x88] sm:$0xf]  ;;  %v7204_v6 = vld [vmem:[#allocation5 + $0x24] sm:$0xf] }
 0x47f   :  { %2503 = vst [vmem:[#allocation5 + $0x28] sm:$0x88] %v2469_v46  ;;  %v8991_v21 = vor.u32 %v7223_v27, %v6764_v9  ;;  %v7218_v25 = vld [vmem:[#allocation5 + $0x94] sm:$0xf]  ;;  %v9003_v42 = vor.u32 %v7204_v6, %v6714_v14  ;;  %v7217_v40 = vld [vmem:[#allocation5 + $0x8c] sm:$0xf] }
 0x480   :  { %v9005_v34 = vor.u32 %v7218_v25, %v6774_v60  ;;  %v9015_v5 = vor.u32 %v7217_v40, %v6766_v26  ;;  %v6772_v23 = vld [vmem:[#allocation5 + $0x90] sm:$0xf] }
 0x481   :  { %2815 = vrot.lane.b32.xlu0 %v8979_v3, %s7539_s19  ;;  %2835 = vrot.lane.b32.xlu1 %v8981_v13, %s7539_s19  ;;  %v9027_v62 = vor.u32 %v7224_v38, %v6772_v23 }
 0x482   :  { %2839 = vrot.lane.b32.xlu2 %v8983_v16, %s7539_s19 }
 0x485   :  { %v6728_v41 = vld [vmem:[#allocation5 + $0x30] sm:$0xf] }
 0x486   :  { %v7205_v12 = vld [vmem:[#allocation5 + $0x2c] sm:$0xf]  ;;  %v9019_v55 = vor.u32 %v7212_v32, %v6728_v41  ;;  %v6720_v63 = vld [vmem:[#allocation5 + $0x28] sm:$0xf] }
 0x487   :  { %v9017_v2 = vor.u32 %v7205_v12, %v6722_v49  ;;  %v9029_v37 = vor.u32 %v7211_v35, %v6720_v63 }
 0x489   :  { %2841 = vrot.lane.b32.xlu0 %v8991_v21, %s7539_s19  ;;  %2837 = vrot.lane.b32.xlu1 %v8993_v39, %s7539_s19 }
 0x48a   :  { %2811 = vrot.lane.b32.xlu2 %v8995_v48, %s7539_s19 }
 0x491   :  { %2817 = vrot.lane.b32.xlu0 %v9003_v42, %s7539_s19  ;;  %2847 = vrot.lane.b32.xlu1 %v9005_v34, %s7539_s19 }
 0x492   :  { %2849 = vrot.lane.b32.xlu2 %v9007_v58, %s7539_s19 }
 0x499   :  { %2843 = vrot.lane.b32.xlu0 %v9015_v5, %s7539_s19  ;;  %2821 = vrot.lane.b32.xlu1 %v9017_v2, %s7539_s19 }
 0x49a   :  { %2823 = vrot.lane.b32.xlu2 %v9019_v55, %s7539_s19 }
 0x4a1   :  { %2845 = vrot.lane.b32.xlu0 %v9027_v62, %s7539_s19  ;;  %2819 = vrot.lane.b32.xlu1 %v9029_v37, %s7539_s19 }
 0x4a2   :  { %3338 = vrot.lane.b32.xlu2 %v8916_v22, %s7541_s27 }
 0x4a9   :  { %3340 = vrot.lane.b32.xlu0 %v8936_v17, %s7541_s27  ;;  %3312 = vrot.lane.b32.xlu1 %v8887_v57, %s7541_s27 }
 0x4aa   :  { %3314 = vrot.lane.b32.xlu2 %v8950_v20, %s7541_s27 }
 0x4af   :  { %v2802_v53 = vpop.permute.xlu2 %2801 }
 0x4b1   :  { %3336 = vrot.lane.b32.xlu0 %v8914_v0, %s7541_s27  ;;  %3310 = vrot.lane.b32.xlu1 %v8885_v59, %s7541_s27 }
 0x4b2   :  { %3342 = vrot.lane.b32.xlu2 %v8918_v52, %s7541_s27 }
 0x4b9   :  { %3346 = vrot.lane.b32.xlu0 %v8981_v13, %s7541_s27  ;;  %3348 = vrot.lane.b32.xlu1 %v8993_v39, %s7541_s27 }
 0x4ba   :  { %3316 = vrot.lane.b32.xlu2 %v8934_v19, %s7541_s27 }
 0x4bc   :  { %v2832_v44 = vpop.permute.xlu2 %2831 }
 0x4c1   :  { %3320 = vrot.lane.b32.xlu0 %v8965_v56, %s7541_s27  ;;  %3322 = vrot.lane.b32.xlu1 %v8995_v48, %s7541_s27 }
 0x4c2   :  { %3344 = vrot.lane.b32.xlu2 %v8963_v33, %s7541_s27 }
 0x4c4   :  { %v2830_v4 = vpop.permute.xlu2 %2829 }
 0x4c5   :  { %v2865_v30 = vsel %vm1162_vm5, %v2830_v4, %v2832_v44 }
 0x4c6   :  { %2938 = vmatpush.bf16.msrb.mxu1 %v2865_v30 }
 0x4c7   :  { %v2800_v28 = vpop.permute.xlu1 %2799 }
 0x4c8   :  { %v2851_v1 = vsel %vm1162_vm5, %v2800_v28, %v2802_v53 }
 0x4c9   :  { %3318 = vrot.lane.b32.xlu0 %v8952_v51, %s7541_s27  ;;  %3350 = vrot.lane.b32.xlu1 %v8983_v16, %s7541_s27 }
 0x4ca   :  { %3354 = vrot.lane.b32.xlu2 %v9015_v5, %s7541_s27 }
 0x4d1   :  { %3356 = vrot.lane.b32.xlu0 %v9027_v62, %s7541_s27  ;;  %3324 = vrot.lane.b32.xlu1 %v8967_v8, %s7541_s27 }
 0x4d2   :  { %3328 = vrot.lane.b32.xlu2 %v9003_v42, %s7541_s27 }
 0x4d3   :  { %v2826_v45 = vpop.permute.xlu0 %2825  ;;  %v2828_v36 = vpop.permute.xlu1 %2827 }
 0x4d4   :  { %v9074_v29 = vpop.permute.xlu2 %2813  ;;  %v2863_v31 = vsel %vm1162_vm5, %v2826_v45, %v2828_v36  ;;  %v2864_v24 = vsel %vm1162_vm5, %v2828_v36, %v2830_v4 }
 0x4d5   :  { %2910 = vmatpush.bf16.msra.mxu3 %v2863_v31  ;;  %2924 = vmatpush.bf16.msrb.mxu0 %v2864_v24 }
 0x4d9   :  { %3358 = vrot.lane.b32.xlu0 %v9005_v34, %s7541_s27  ;;  %3352 = vrot.lane.b32.xlu1 %v8991_v21, %s7541_s27 }
 0x4da   :  { %3326 = vrot.lane.b32.xlu2 %v8979_v3, %s7541_s27  ;;  %2911 = vmatpush.bf16.msra.mxu3 %v2851_v1 }
 0x4db   :  { %v2806_v46 = vpop.permute.xlu0 %2805 }
 0x4dc   :  { %v2840_v10 = vpop.permute.xlu2 %2839 }
 0x4dd   :  { %6782 = vmatmul.msk.bf16.vlgmr.msra.gmra.mxu3 %vm327_vm3, %v9086_v47 }
 0x4e1   :  { %3360 = vrot.lane.b32.xlu0 %v9007_v58, %s7541_s27  ;;  %3657 = vrot.lane.b32.xlu1 %v8914_v0, %s7542_s16 }
 0x4e2   :  { %3659 = vrot.lane.b32.xlu2 %v8916_v22, %s7542_s16 }
 0x4e3   :  { %v2804_v43 = vpop.permute.xlu0 %2803  ;;  %v2808_v7 = vpop.permute.xlu1 %2807 }
 0x4e4   :  { %v2812_v9 = vpop.permute.xlu2 %2811  ;;  %v2852_v18 = vsel %vm1162_vm5, %v2802_v53, %v2804_v43  ;;  %v2853_v50 = vsel %vm1162_vm5, %v2804_v43, %v2806_v46  ;;  %v2854_v14 = vsel %vm1162_vm5, %v2806_v46, %v2808_v7 }
 0x4e5   :  { %2925 = vmatpush.bf16.msrb.mxu0 %v2852_v18  ;;  %2939 = vmatpush.bf16.msrb.mxu1 %v2853_v50  ;;  %v2857_v38 = vsel %vm1162_vm5, %v2812_v9, %v9074_v29 }
 0x4e8   :  { %6783 = vmatmul.msk.bf16.vlgmr.msrb.gmra.mxu0 %vm327_vm3, %v9086_v47  ;;  %6784 = vmatmul.msk.bf16.vlgmr.msrb.gmra.mxu1 %vm327_vm3, %v9086_v47 }
 0x4e9   :  { %3665 = vrot.lane.b32.xlu0 %v8963_v33, %s7542_s16  ;;  %3631 = vrot.lane.b32.xlu1 %v8885_v59, %s7542_s16 }
 0x4ea   :  { %3633 = vrot.lane.b32.xlu2 %v8887_v57, %s7542_s16 }
 0x4eb   :  { %v2834_v27 = vpop.permute.xlu0 %2833  ;;  %v2810_v61 = vpop.permute.xlu1 %2809 }
 0x4ec   :  { %v2850_v54 = vpop.permute.xlu2 %2849  ;;  %v2866_v6 = vsel %vm1162_vm5, %v2832_v44, %v2834_v27  ;;  %v2855_v40 = vsel %vm1162_vm5, %v2808_v7, %v2810_v61  ;;  %v2856_v63 = vsel %vm1162_vm5, %v2810_v61, %v2812_v9 }
 0x4ed   :  { %2952 = vmatpush.bf16.msrb.mxu2 %v2866_v6 }
 0x4f1   :  { %3639 = vrot.lane.b32.xlu0 %v8952_v51, %s7542_s16  ;;  %3334 = vrot.lane.b32.xlu1 %v9019_v55, %s7541_s27 }
 0x4f2   :  { %3661 = vrot.lane.b32.xlu2 %v8936_v17, %s7542_s16  ;;  %2953 = vmatpush.bf16.msrb.mxu2 %v2854_v14 }
 0x4f3   :  { %v2816_v25 = vpop.permute.xlu0 %2815  ;;  %v2836_v15 = vpop.permute.xlu1 %2835 }
 0x4f4   :  { %v9118_v60 = vpop.permute.xlu2 %2823  ;;  %v2867_v11 = vsel %vm1162_vm5, %v2834_v27, %v2836_v15  ;;  %v2858_v35 = vsel %vm1162_vm5, %v9074_v29, %v2816_v25 }
 0x4f5   :  { %6785 = vmatmul.msk.bf16.vlgmr.msrb.gmra.mxu2 %vm327_vm3, %v9086_v47  ;;  %2966 = vmatpush.bf16.msrb.mxu3 %v2867_v11 }
 0x4f9   :  { %3330 = vrot.lane.b32.xlu0 %v9029_v37, %s7541_s27  ;;  %3667 = vrot.lane.b32.xlu1 %v8981_v13, %s7542_s16 }
 0x4fa   :  { %3635 = vrot.lane.b32.xlu2 %v8950_v20, %s7542_s16  ;;  %2967 = vmatpush.bf16.msrb.mxu3 %v2855_v40 }
 0x4fb   :  { %v2842_v12 = vpop.permute.xlu0 %2841  ;;  %v2838_v41 = vpop.permute.xlu1 %2837 }
 0x4fc   :  { %v9130_v26 = vpop.permute.xlu2 %3338  ;;  %v2868_v49 = vsel %vm1162_vm5, %v2836_v15, %v2838_v41  ;;  %v2869_v32 = vsel %vm1162_vm5, %v2838_v41, %v2840_v10  ;;  %v2870_v23 = vsel %vm1162_vm5, %v2840_v10, %v2842_v12 }
 0x4fd   :  { %2980 = vmatpush.bf16.msra.mxu0 %v2868_v49  ;;  %2994 = vmatpush.bf16.msra.mxu1 %v2869_v32 }
 0x4fe   :  { %3008 = vmatpush.bf16.msra.mxu2 %v2870_v23  ;;  %6786 = vmatmul.msk.bf16.vlgmr.msrb.gmra.mxu3 %vm327_vm3, %v9086_v47 }
 0x501   :  { %3637 = vrot.lane.b32.xlu0 %v8934_v19, %s7542_s16  ;;  %3641 = vrot.lane.b32.xlu1 %v8965_v56, %s7542_s16 }
 0x502   :  { %3663 = vrot.lane.b32.xlu2 %v8918_v52, %s7542_s16  ;;  %2981 = vmatpush.bf16.msra.mxu0 %v2856_v63 }
 0x503   :  { %2995 = vmatpush.bf16.msra.mxu1 %v2857_v38  ;;  %3009 = vmatpush.bf16.msra.mxu2 %v2858_v35  ;;  %v2818_v53 = vpop.permute.xlu0 %2817  ;;  %v2848_v44 = vpop.permute.xlu1 %2847 }
 0x504   :  { %v9148_v4 = vpop.permute.xlu2 %3314  ;;  %v2874_v30 = vsel %vm1162_vm5, %v2848_v44, %v2850_v54  ;;  %v2859_v24 = vsel %vm1162_vm5, %v2816_v25, %v2818_v53 }
 0x505   :  { %6787 = vmatmul.msk.bf16.vlgmr.msra.gmra.mxu0 %vm327_vm3, %v9086_v47 }
 0x506   :  { %6789 = vmatmul.msk.bf16.vlgmr.msra.gmra.mxu2 %vm327_vm3, %v9086_v47  ;;  %6788 = vmatmul.msk.bf16.vlgmr.msra.gmra.mxu1 %vm327_vm3, %v9086_v47 }
 0x507   :  { %3064 = vmatpush.bf16.msrb.mxu2 %v2874_v30 }
 0x509   :  { %3332 = vrot.lane.b32.xlu0 %v9017_v2, %s7541_s27  ;;  %3669 = vrot.lane.b32.xlu1 %v8993_v39, %s7542_s16 }
 0x50a   :  { %3673 = vrot.lane.b32.xlu2 %v8991_v21, %s7542_s16 }
 0x50b   :  { %v2844_v28 = vpop.permute.xlu0 %2843  ;;  %v2822_v45 = vpop.permute.xlu1 %2821 }
 0x50c   :  { %v9163_v36 = vpop.permute.xlu2 %3342  ;;  %v2871_v29 = vsel %vm1162_vm5, %v2842_v12, %v2844_v28  ;;  %v2862_v31 = vsel %vm1162_vm5, %v2822_v45, %v9118_v60 }
 0x50d   :  { %3022 = vmatpush.bf16.msra.mxu3 %v2871_v29  ;;  %3065 = vmatpush.bf16.msrb.mxu2 %v2862_v31 }
 0x511   :  { %3154 = vmatpush.bf16.msra.mxu2 %v8936_v17  ;;  %3675 = vrot.lane.b32.xlu0 %v9015_v5, %s7542_s16 }
 0x512   :  { %3643 = vrot.lane.b32.xlu1 %v8995_v48, %s7542_s16  ;;  %3647 = vrot.lane.b32.xlu2 %v8979_v3, %s7542_s16 }
 0x513   :  { %3023 = vmatpush.bf16.msra.mxu3 %v2859_v24  ;;  %v2846_v1 = vpop.permute.xlu0 %2845  ;;  %v2820_v46 = vpop.permute.xlu1 %2819 }
 0x514   :  { %v9177_v10 = vpop.permute.xlu2 %3316  ;;  %v2872_v43 = vsel %vm1162_vm5, %v2844_v28, %v2846_v1  ;;  %v2873_v7 = vsel %vm1162_vm5, %v2846_v1, %v2848_v44  ;;  %v2860_v9 = vsel %vm1162_vm5, %v2818_v53, %v2820_v46  ;;  %v2861_v18 = vsel %vm1162_vm5, %v2820_v46, %v2822_v45  ;;  %v9352_v44 = vld [vmem:[%s11001_s3 + $0x10] sm:$0xff] }
 0x515   :  { %3155 = vmatpush.bf16.msra.mxu2 %v8950_v20  ;;  %3036 = vmatpush.bf16.msrb.mxu0 %v2872_v43 }
 0x516   :  { %6790 = vmatmul.msk.bf16.vlgmr.msra.gmra.mxu3 %vm327_vm3, %v9086_v47  ;;  %6793 = vmatmul.msk.bf16.vlgmr.msrb.gmra.mxu2 %vm327_vm3, %v9086_v47 }
 0x517   :  { %3078 = vmatpush.bf16.msrb.mxu3 %v2850_v54  ;;  %3050 = vmatpush.bf16.msrb.mxu1 %v2873_v7  ;;  %v9221_v54 = vld [vmem:[%s11001_s3] sm:$0xff] }
 0x519   :  { %3210 = vmatpush.bf16.msrb.mxu2 %v8993_v39  ;;  %3649 = vrot.lane.b32.xlu0 %v9003_v42, %s7542_s16 }
 0x51a   :  { %3671 = vrot.lane.b32.xlu1 %v8983_v16, %s7542_s16  ;;  %3645 = vrot.lane.b32.xlu2 %v8967_v8, %s7542_s16 }
 0x51b   :  { %3079 = vmatpush.bf16.msrb.mxu3 %v9118_v60  ;;  %3037 = vmatpush.bf16.msrb.mxu0 %v2860_v9  ;;  %v9197_v50 = vpop.permute.xlu0 %3340  ;;  %v9199_v27 = vpop.permute.xlu1 %3312 }
 0x51c   :  { %3051 = vmatpush.bf16.msrb.mxu1 %v2861_v18  ;;  %v9203_v61 = vpop.permute.xlu2 %3344 }
 0x51d   :  { %3211 = vmatpush.bf16.msrb.mxu2 %v8995_v48 }
 0x51e   :  { %6791 = vmatmul.msk.bf16.vlgmr.msrb.gmra.mxu0 %vm327_vm3, %v9086_v47 }
 0x51f   :  { %3168 = vmatpush.bf16.msra.mxu3 %v8918_v52  ;;  %3126 = vmatpush.bf16.msra.mxu0 %v8914_v0 }
 0x520   :  { %3140 = vmatpush.bf16.msra.mxu1 %v8916_v22 }
 0x521   :  { %6792 = vmatmul.msk.bf16.vlgmr.msrb.gmra.mxu1 %vm327_vm3, %v9086_v47  ;;  %3677 = vrot.lane.b32.xlu0 %v9027_v62, %s7542_s16 }
 0x522   :  { %3681 = vrot.lane.b32.xlu1 %v9007_v58, %s7542_s16  ;;  %3985 = vrot.lane.b32.xlu2 %v8918_v52, %s7543_s0 }
 0x523   :  { %3169 = vmatpush.bf16.msra.mxu3 %v8934_v19  ;;  %3127 = vmatpush.bf16.msra.mxu0 %v8885_v59  ;;  %v3337_v6 = vpop.permute.xlu0 %3336  ;;  %v3311_v14 = vpop.permute.xlu1 %3310 }
 0x524   :  { %3141 = vmatpush.bf16.msra.mxu1 %v8887_v57  ;;  %v9225_v25 = vpop.permute.xlu2 %3354 }
 0x526   :  { %6794 = vmatmul.msk.bf16.vlgmr.msrb.gmra.mxu3 %vm327_vm3, %v9086_v47  ;;  %6801 = vmatmul.msk.bf16.vlgmr.msra.gmra.mxu2 %vm327_vm3, %v9221_v54 }
 0x527   :  { %3182 = vmatpush.bf16.msrb.mxu0 %v8963_v33  ;;  %3224 = vmatpush.bf16.msrb.mxu3 %v8983_v16 }
 0x528   :  { %3196 = vmatpush.bf16.msrb.mxu1 %v8981_v13  ;;  %3266 = vmatpush.bf16.msra.mxu2 %v9027_v62 }
 0x529   :  { %3655 = vrot.lane.b32.xlu0 %v9019_v55, %s7542_s16 }
 0x52a   :  { %3679 = vrot.lane.b32.xlu1 %v9005_v34, %s7542_s16  ;;  %3955 = vrot.lane.b32.xlu2 %v8887_v57, %s7543_s0 }
 0x52b   :  { %3183 = vmatpush.bf16.msrb.mxu0 %v8952_v51  ;;  %3225 = vmatpush.bf16.msrb.mxu3 %v8967_v8  ;;  %v9241_v52 = vpop.permute.xlu0 %3346  ;;  %v9243_v47 = vpop.permute.xlu1 %3348 }
 0x52c   :  { %3197 = vmatpush.bf16.msrb.mxu1 %v8965_v56  ;;  %3267 = vmatpush.bf16.msra.mxu2 %v9029_v37  ;;  %v9247_v15 = vpop.permute.xlu2 %3328  ;;  %v3379_v23 = vsel %vm1830_vm7, %v9241_v52, %v9243_v47 }
 0x52e   :  { %6799 = vmatmul.msk.bf16.vlgmr.msra.gmra.mxu0 %vm327_vm3, %v9221_v54 }
 0x52f   :  { %3238 = vmatpush.bf16.msra.mxu0 %v8991_v21 }
 0x531   :  { %6800 = vmatmul.msk.bf16.vlgmr.msra.gmra.mxu1 %vm327_vm3, %v9221_v54  ;;  %3979 = vrot.lane.b32.xlu0 %v8914_v0, %s7543_s0  ;;  %v3375_v0 = vsel %vm1830_vm7, %v9130_v26, %v9197_v50 }
 0x532   :  { %3252 = vmatpush.bf16.msra.mxu1 %v9015_v5  ;;  %3981 = vrot.lane.b32.xlu1 %v8916_v22, %s7543_s0  ;;  %v3363_v22 = vsel %vm1830_vm7, %v9199_v27, %v9148_v4 }
 0x533   :  { %3239 = vmatpush.bf16.msra.mxu0 %v8979_v3  ;;  %v3321_v57 = vpop.permute.xlu0 %3320  ;;  %v9261_v60 = vpop.permute.xlu1 %3322  ;;  %3651 = vrot.lane.b32.xlu2 %v9029_v37, %s7542_s16 }
 0x534   :  { %v9265_v11 = vpop.permute.xlu2 %3326 }
 0x536   :  { %3253 = vmatpush.bf16.msra.mxu1 %v9003_v42  ;;  %6802 = vmatmul.msk.bf16.vlgmr.msra.gmra.mxu3 %vm327_vm3, %v9221_v54 }
 0x537   :  { %6805 = vmatmul.msk.bf16.vlgmr.msrb.gmra.mxu2 %vm327_vm3, %v9221_v54  ;;  %3280 = vmatpush.bf16.msra.mxu3 %v9005_v34 }
 0x538   :  { %3435 = vmatpush.bf16.msrb.mxu2 %v3375_v0 }
 0x539   :  { %3987 = vrot.lane.b32.xlu0 %v8963_v33, %s7543_s0  ;;  %v3374_v33 = vsel %vm1830_vm7, %v3337_v6, %v9130_v26 }
 0x53a   :  { %3953 = vrot.lane.b32.xlu1 %v8885_v59, %s7543_s0  ;;  %v3362_v59 = vsel %vm1830_vm7, %v3311_v14, %v9199_v27 }
 0x53b   :  { %3281 = vmatpush.bf16.msra.mxu3 %v9017_v2  ;;  %v3319_v40 = vpop.permute.xlu0 %3318  ;;  %v9281_v12 = vpop.permute.xlu1 %3350  ;;  %3653 = vrot.lane.b32.xlu2 %v9017_v2, %s7542_s16 }
 0x53c   :  { %3436 = vmatpush.bf16.msrb.mxu2 %v3363_v22  ;;  %v9287_v41 = vpop.permute.xlu2 %3659  ;;  %v3366_v53 = vsel %vm1830_vm7, %v3319_v40, %v3321_v57 }
 0x53e   :  { %6803 = vmatmul.msk.bf16.vlgmr.msrb.gmra.mxu0 %vm327_vm3, %v9221_v54 }
 0x53f   :  { %3294 = vmatpush.bf16.msrb.mxu0 %v9007_v58 }
 0x541   :  { %6804 = vmatmul.msk.bf16.vlgmr.msrb.gmra.mxu1 %vm327_vm3, %v9221_v54  ;;  %3959 = vrot.lane.b32.xlu0 %v8934_v19, %s7543_s0  ;;  %v3376_v19 = vsel %vm1830_vm7, %v9197_v50, %v9163_v36 }
 0x542   :  { %3421 = vmatpush.bf16.msrb.mxu1 %v3374_v33  ;;  %3961 = vrot.lane.b32.xlu1 %v8952_v51, %s7543_s0  ;;  %v3367_v51 = vsel %vm1830_vm7, %v3321_v57, %v9261_v60 }
 0x543   :  { %3295 = vmatpush.bf16.msrb.mxu0 %v9019_v55  ;;  %v9301_v49 = vpop.permute.xlu0 %3356  ;;  %v3325_v32 = vpop.permute.xlu1 %3324  ;;  %3983 = vrot.lane.b32.xlu2 %v8936_v17, %s7543_s0  ;;  %v3364_v17 = vsel %vm1830_vm7, %v9148_v4, %v9177_v10 }
 0x544   :  { %v9307_v26 = vpop.permute.xlu2 %3633  ;;  %v3383_v45 = vsel %vm1830_vm7, %v9225_v25, %v9301_v49 }
 0x546   :  { %3422 = vmatpush.bf16.msrb.mxu1 %v3362_v59  ;;  %6806 = vmatmul.msk.bf16.vlgmr.msrb.gmra.mxu3 %vm327_vm3, %v9221_v54 }
 0x547   :  { %6809 = vmatmul.msk.bf16.vlgmr.msra.gmra.mxu2 %vm327_vm3, %v9221_v54  ;;  %3449 = vmatpush.bf16.msrb.mxu3 %v3376_v19 }
 0x548   :  { %3491 = vmatpush.bf16.msra.mxu2 %v3379_v23 }
 0x549   :  { %3957 = vrot.lane.b32.xlu0 %v8950_v20, %s7543_s0  ;;  %v3377_v20 = vsel %vm1830_vm7, %v9163_v36, %v9203_v61 }
 0x54a   :  { %3989 = vrot.lane.b32.xlu1 %v8981_v13, %s7543_s0  ;;  %v3378_v13 = vsel %vm1830_vm7, %v9203_v61, %v9241_v52 }
 0x54b   :  { %3450 = vmatpush.bf16.msrb.mxu3 %v3364_v17  ;;  %v9326_v63 = vpop.permute.xlu0 %3358  ;;  %v3353_v38 = vpop.permute.xlu1 %3352  ;;  %3993 = vrot.lane.b32.xlu2 %v8983_v16, %s7543_s0  ;;  %v3365_v16 = vsel %vm1830_vm7, %v9177_v10, %v3319_v40 }
 0x54c   :  { %3492 = vmatpush.bf16.msra.mxu2 %v3367_v51  ;;  %v9332_v35 = vpop.permute.xlu2 %3661  ;;  %v3381_v31 = vsel %vm1830_vm7, %v9281_v12, %v3353_v38 }
 0x54d   :  { %v3697_v0 = vsel %vm3683_vm14, %v9287_v41, %v9332_v35 }
 0x54e   :  { %6807 = vmatmul.msk.bf16.vlgmr.msra.gmra.mxu0 %vm327_vm3, %v9221_v54 }
 0x54f   :  { %3463 = vmatpush.bf16.msra.mxu0 %v3377_v20 }
 0x551   :  { %6808 = vmatmul.msk.bf16.vlgmr.msra.gmra.mxu1 %vm327_vm3, %v9221_v54  ;;  %3995 = vrot.lane.b32.xlu0 %v8991_v21, %s7543_s0  ;;  %v3380_v21 = vsel %vm1830_vm7, %v9243_v47, %v9281_v12 }
 0x552   :  { %3477 = vmatpush.bf16.msra.mxu1 %v3378_v13  ;;  %3963 = vrot.lane.b32.xlu1 %v8965_v56, %s7543_s0  ;;  %v3368_v56 = vsel %vm1830_vm7, %v9261_v60, %v3325_v32 }
 0x553   :  { %3464 = vmatpush.bf16.msra.mxu0 %v3365_v16  ;;  %v3361_v4 = vpop.permute.xlu0 %3360  ;;  %v3658_v30 = vpop.permute.xlu1 %3657  ;;  %3967 = vrot.lane.b32.xlu2 %v8967_v8, %s7543_s0 }
 0x554   :  { %v9358_v28 = vpop.permute.xlu2 %3635  ;;  %v3696_v7 = vsel %vm3683_vm14, %v3658_v30, %v9287_v41  ;;  %v9493_v41 = vld [vmem:[%s11001_s3 + $0x18] sm:$0xff] }
 0x555   :  { %v3685_v59 = vsel %vm3683_vm14, %v9307_v26, %v9358_v28 }
 0x556   :  { %3478 = vmatpush.bf16.msra.mxu1 %v3366_v53  ;;  %6810 = vmatmul.msk.bf16.vlgmr.msra.gmra.mxu3 %vm327_vm3, %v9221_v54 }
 0x557   :  { %6819 = vmatmul.msk.bf16.vlgmr.msrb.gmra.mxu2 %vm327_vm3, %v9352_v44  ;;  %3505 = vmatpush.bf16.msra.mxu3 %v3380_v21 }
 0x558   :  { %3547 = vmatpush.bf16.msrb.mxu2 %v3383_v45 }
 0x559   :  { %3969 = vrot.lane.b32.xlu0 %v8979_v3, %s7543_s0  ;;  %v3382_v3 = vsel %vm1830_vm7, %v3353_v38, %v9225_v25 }
 0x55a   :  { %3991 = vrot.lane.b32.xlu1 %v8993_v39, %s7543_s0  ;;  %v3369_v39 = vsel %vm1830_vm7, %v3325_v32, %v9265_v11 }
 0x55b   :  { %3506 = vmatpush.bf16.msra.mxu3 %v3368_v56  ;;  %v9374_v8 = vpop.permute.xlu0 %3665  ;;  %v3632_v36 = vpop.permute.xlu1 %3631  ;;  %3965 = vrot.lane.b32.xlu2 %v8995_v48, %s7543_s0  ;;  %v3370_v48 = vsel %vm1830_vm7, %v9265_v11, %v9247_v15 }
 0x55c   :  { %v9380_v29 = vpop.permute.xlu2 %3663 }
 0x55d   :  { %v3699_v11 = vsel %vm3683_vm14, %v9380_v29, %v9374_v8  ;;  %v3698_v40 = vsel %vm3683_vm14, %v9332_v35, %v9380_v29 }
 0x55e   :  { %6811 = vmatmul.msk.bf16.vlgmr.msrb.gmra.mxu0 %vm327_vm3, %v9221_v54  ;;  %v4268_v54 = vld [vmem:[%s11002_s4 + $0x8] sm:$0xff] }
 0x55f   :  { %3519 = vmatpush.bf16.msrb.mxu0 %v3381_v31 }
 0x561   :  { %6818 = vmatmul.msk.bf16.vlgmr.msrb.gmra.mxu1 %vm327_vm3, %v9352_v44  ;;  %3997 = vrot.lane.b32.xlu0 %v9015_v5, %s7543_s0  ;;  %v3384_v5 = vsel %vm1830_vm7, %v9301_v49, %v9326_v63 }
 0x562   :  { %3533 = vmatpush.bf16.msrb.mxu1 %v3382_v3  ;;  %4001 = vrot.lane.b32.xlu1 %v9005_v34, %s7543_s0 }
 0x563   :  { %3520 = vmatpush.bf16.msrb.mxu0 %v3369_v39  ;;  %v9397_v24 = vpop.permute.xlu0 %3639  ;;  %v3335_v1 = vpop.permute.xlu1 %3334  ;;  %4003 = vrot.lane.b32.xlu2 %v9007_v58, %s7543_s0 }
 0x564   :  { %v9403_v46 = vpop.permute.xlu2 %3673 }
 0x565   :  { %v9438_v9 = vpop.f32.mrf.mxu1  ;;  %v9442_v27 = vpop.f32.mrf.mxu0 }
 0x566   :  { %3534 = vmatpush.bf16.msrb.mxu1 %v3370_v48  ;;  %6820 = vmatmul.msk.bf16.vlgmr.msrb.gmra.mxu3 %vm327_vm3, %v9352_v44 }
 0x567   :  { %6823 = vmatmul.msk.bf16.vlgmr.msra.gmra.mxu2 %vm327_vm3, %v9352_v44  ;;  %3561 = vmatpush.bf16.msrb.mxu3 %v3384_v5 }
 0x569   :  { %3971 = vrot.lane.b32.xlu0 %v9003_v42, %s7543_s0  ;;  %v3385_v42 = vsel %vm1830_vm7, %v9326_v63, %v3361_v4 }
 0x56a   :  { %3975 = vrot.lane.b32.xlu1 %v9017_v2, %s7543_s0  ;;  %v9434_v2 = vpop.f32.mrf.mxu3 }
 0x56b   :  { %v3331_v34 = vpop.permute.xlu0 %3330  ;;  %v9414_v10 = vpop.permute.xlu1 %3667  ;;  %3977 = vrot.lane.b32.xlu2 %v9019_v55, %s7543_s0  ;;  %v3684_v55 = vsel %vm3683_vm14, %v3632_v36, %v9307_v26 }
 0x56c   :  { %v9420_v58 = vpop.permute.xlu2 %3647  ;;  %v3371_v43 = vsel %vm1830_vm7, %v9247_v15, %v3331_v34 }
 0x56d   :  { %3548 = vmatpush.bf16.msrb.mxu2 %v3371_v43  ;;  %v9466_v57 = vpop.f32.mrf.mxu1  ;;  %v9468_v60 = vpop.f32.mrf.mxu0 }
 0x56e   :  { %6821 = vmatmul.msk.bf16.vlgmr.msra.gmra.mxu0 %vm327_vm3, %v9352_v44 }
 0x56f   :  { %3575 = vmatpush.bf16.msra.mxu0 %v3385_v42 }
 0x571   :  { %6822 = vmatmul.msk.bf16.vlgmr.msra.gmra.mxu1 %vm327_vm3, %v9352_v44  ;;  %3743 = vmatpush.bf16.msra.mxu2 %v3696_v7 }
 0x572   :  { %3589 = vmatpush.bf16.msra.mxu1 %v3361_v4  ;;  %3999 = vrot.lane.b32.xlu0 %v9027_v62, %s7543_s0  ;;  %v3700_v62 = vsel %vm3683_vm14, %v9374_v8, %v9414_v10  ;;  %v9460_v52 = vpop.f32.mrf.mxu3 }
 0x573   :  { %v3638_v18 = vpop.permute.xlu0 %3637  ;;  %v3642_v50 = vpop.permute.xlu1 %3641  ;;  %3973 = vrot.lane.b32.xlu1 %v9029_v37, %s7543_s0 }
 0x574   :  { %v9444_v61 = vpop.permute.xlu2 %3645  ;;  %v3688_v6 = vsel %vm3683_vm14, %v9397_v24, %v3642_v50  ;;  %v3687_v33 = vsel %vm3683_vm14, %v3638_v18, %v9397_v24  ;;  %v3686_v49 = vsel %vm3683_vm14, %v9358_v28, %v3638_v18 }
 0x575   :  { %3744 = vmatpush.bf16.msra.mxu2 %v3684_v55  ;;  %v3691_v36 = vsel %vm3683_vm14, %v9444_v61, %v9420_v58 }
 0x576   :  { %3590 = vmatpush.bf16.msra.mxu1 %v3335_v1  ;;  %6824 = vmatmul.msk.bf16.vlgmr.msra.gmra.mxu3 %vm327_vm3, %v9352_v44 }
 0x577   :  { %6827 = vmatmul.msk.bf16.vlgmr.msrb.gmra.mxu2 %vm327_vm3, %v9352_v44 }
 0x578   :  { %v9456_v37 = vpop.f32.mrf.mxu2 }
 0x579   :  { %3799 = vmatpush.bf16.msrb.mxu2 %v3700_v62 }
 0x57a   :  { %4276 = vperm.xlu0 %7328, %v4268_v54  }
 0x57b   :  { %v3333_v14 = vpop.permute.xlu0 %3332  ;;  %v3670_v25 = vpop.permute.xlu1 %3669 }
 0x57c   :  { %v3372_v47 = vsel %vm1830_vm7, %v3331_v34, %v3333_v14  ;;  %v3373_v15 = vsel %vm1830_vm7, %v3333_v14, %v3335_v1  ;;  %v9478_v22 = vpop.permute.xlu2 %3985  ;;  %v3701_v26 = vsel %vm3683_vm14, %v9414_v10, %v3670_v25 }
 0x57d   :  { %3800 = vmatpush.bf16.msrb.mxu2 %v3688_v6  ;;  %3562 = vmatpush.bf16.msrb.mxu3 %v3372_v47 }
 0x57e   :  { %6825 = vmatmul.msk.bf16.vlgmr.msrb.gmra.mxu0 %vm327_vm3, %v9352_v44 }
 0x57f   :  { %3576 = vmatpush.bf16.msra.mxu0 %v3373_v15 }
 0x580   :  { %v9483_v12 = vpop.f32.mrf.mxu2 }
 0x581   :  { %6826 = vmatmul.msk.bf16.vlgmr.msrb.gmra.mxu1 %vm327_vm3, %v9352_v44  ;;  %3757 = vmatpush.bf16.msra.mxu3 %v3697_v0  ;;  %v9499_v17 = vpop.f32.mrf.mxu3 }
 0x582   :  { %3785 = vmatpush.bf16.msrb.mxu1 %v3699_v11  ;;  %v9509_v63 = vpop.f32.mrf.mxu0 }
 0x583   :  { %3771 = vmatpush.bf16.msrb.mxu0 %v3698_v40  ;;  %v3676_v32 = vpop.permute.xlu0 %3675  ;;  %v9507_v51 = vpop.f32.mrf.mxu1 }
 0x584   :  { %v3644_v19 = vpop.permute.xlu1 %3643  ;;  %v3704_v23 = vsel %vm3683_vm14, %v9403_v46, %v3676_v32  ;;  %v9511_v38 = vpop.permute.xlu2 %3955 }
 0x585   :  { %3758 = vmatpush.bf16.msra.mxu3 %v3685_v59  ;;  %v3689_v20 = vsel %vm3683_vm14, %v3642_v50, %v3644_v19  ;;  %v3690_v56 = vsel %vm3683_vm14, %v3644_v19, %v9444_v61 }
 0x586   :  { %3786 = vmatpush.bf16.msrb.mxu1 %v3687_v33  ;;  %6828 = vmatmul.msk.bf16.vlgmr.msrb.gmra.mxu3 %vm327_vm3, %v9352_v44 }
 0x587   :  { %3772 = vmatpush.bf16.msrb.mxu0 %v3686_v49  ;;  %6837 = vmatmul.msk.bf16.vlgmr.msra.gmra.mxu2 %vm327_vm3, %v9493_v41 }
 0x588   :  { %3855 = vmatpush.bf16.msra.mxu2 %v3704_v23 }
 0x589   :  { %3813 = vmatpush.bf16.msrb.mxu3 %v3701_v26  ;;  %v9513_v35 = vpop.f32.mrf.mxu2  ;;  %v9525_v28 = vpop.f32.mrf.mxu3 }
 0x58a   :  { %v9533_v8 = vpop.f32.mrf.mxu0 }
 0x58b   :  { %v3650_v13 = vpop.permute.xlu0 %3649  ;;  %v9529_v45 = vpop.f32.mrf.mxu1 }
 0x58c   :  { %v3672_v16 = vpop.permute.xlu1 %3671  ;;  %v3692_v30 = vsel %vm3683_vm14, %v9420_v58, %v3650_v13 }
 0x58d   :  { %3814 = vmatpush.bf16.msrb.mxu3 %v3689_v20  ;;  %v3702_v53 = vsel %vm3683_vm14, %v3670_v25, %v3672_v16  ;;  %v3703_v4 = vsel %vm3683_vm14, %v3672_v16, %v9403_v46  ;;  %3856 = vmatpush.bf16.msra.mxu2 %v3692_v30  ;;  %v3652_v29 = vpop.permute.xlu2 %3651 }
 0x58e   :  { %6829 = vmatmul.msk.bf16.vlgmr.msra.gmra.mxu0 %vm327_vm3, %v9352_v44  ;;  %v3693_v1 = vsel %vm3683_vm14, %v3650_v13, %v3652_v29 }
 0x58f   :  { %3827 = vmatpush.bf16.msra.mxu0 %v3702_v53 }
 0x591   :  { %6830 = vmatmul.msk.bf16.vlgmr.msra.gmra.mxu1 %vm327_vm3, %v9352_v44  ;;  %v9527_v21 = vpop.f32.mrf.mxu2 }
 0x592   :  { %3841 = vmatpush.bf16.msra.mxu1 %v3703_v4 }
 0x593   :  { %3828 = vmatpush.bf16.msra.mxu0 %v3690_v56  ;;  %v3678_v44 = vpop.permute.xlu0 %3677 }
 0x594   :  { %v3682_v31 = vpop.permute.xlu1 %3681  ;;  %v3705_v3 = vsel %vm3683_vm14, %v3676_v32, %v3678_v44 }
 0x595   :  { %v3654_v43 = vpop.permute.xlu2 %3653 }
 0x596   :  { %3842 = vmatpush.bf16.msra.mxu1 %v3691_v36  ;;  %6838 = vmatmul.msk.bf16.vlgmr.msra.gmra.mxu3 %vm327_vm3, %v9493_v41  ;;  %v3694_v55 = vsel %vm3683_vm14, %v3652_v29, %v3654_v43 }
 0x597   :  { %6841 = vmatmul.msk.bf16.vlgmr.msrb.gmra.mxu2 %vm327_vm3, %v9493_v41  ;;  %3869 = vmatpush.bf16.msra.mxu3 %v3705_v3 }
 0x598   :  { %3911 = vmatpush.bf16.msrb.mxu2 %v3682_v31 }
 0x599   :  { %v9543_v39 = vpop.f32.mrf.mxu3  ;;  %v9545_v48 = vpop.f32.mrf.mxu2 }
 0x59b   :  { %v9547_v24 = vpop.f32.mrf.mxu0  ;;  %3870 = vmatpush.bf16.msra.mxu3 %v3693_v1  ;;  %v3656_v5 = vpop.permute.xlu0 %3655 }
 0x59c   :  { %v3680_v34 = vpop.permute.xlu1 %3679  ;;  %3912 = vmatpush.bf16.msrb.mxu2 %v3656_v5  ;;  %v3695_v50 = vsel %vm3683_vm14, %v3654_v43, %v3656_v5 }
 0x59d   :  { %v3706_v10 = vsel %vm3683_vm14, %v3678_v44, %v3680_v34  ;;  %v3707_v58 = vsel %vm3683_vm14, %v3680_v34, %v3682_v31  ;;  %v3984_v11 = vpop.permute.xlu2 %3983 }
 0x59e   :  { %v9550_v46 = vpop.f32.mrf.mxu1  ;;  %6839 = vmatmul.msk.bf16.vlgmr.msrb.gmra.mxu0 %vm327_vm3, %v9493_v41 }
 0x59f   :  { %3883 = vmatpush.bf16.msrb.mxu0 %v3706_v10 }
 0x5a1   :  { %6840 = vmatmul.msk.bf16.vlgmr.msrb.gmra.mxu1 %vm327_vm3, %v9493_v41  ;;  %v9558_v42 = vpop.f32.mrf.mxu3  ;;  %v9560_v7 = vpop.f32.mrf.mxu2 }
 0x5a2   :  { %3897 = vmatpush.bf16.msrb.mxu1 %v3707_v58  ;;  %11010 = vst [vmem:[#allocation9_spill] sm:$0xff] %v9558_v42 }
 0x5a3   :  { %11011 = vst [vmem:[#allocation10_spill] sm:$0xff] %v9560_v7  ;;  %v9563_v18 = vpop.f32.mrf.mxu0  ;;  %3884 = vmatpush.bf16.msrb.mxu0 %v3694_v55  ;;  %v3980_v62 = vpop.permute.xlu0 %3979 }
 0x5a4   :  { %11012 = vst [vmem:[#allocation11_spill] sm:$0xff] %v9563_v18  ;;  %v3982_v54 = vpop.permute.xlu1 %3981 }
 0x5a5   :  { %v4018_v6 = vsel %vm4005_vm15, %v3980_v62, %v3982_v54  ;;  %v4019_v59 = vsel %vm4005_vm15, %v3982_v54, %v3984_v11  ;;  %v3994_v4 = vpop.permute.xlu2 %3993 }
 0x5a6   :  { %v9566_v61 = vpop.f32.mrf.mxu1  ;;  %3898 = vmatpush.bf16.msrb.mxu1 %v3695_v50  ;;  %6842 = vmatmul.msk.bf16.vlgmr.msrb.gmra.mxu3 %vm327_vm3, %v9493_v41 }
 0x5a7   :  { %11013 = vst [vmem:[#allocation12_spill] sm:$0xff] %v9566_v61  ;;  %6845 = vmatmul.msk.bf16.vlgmr.msra.gmra.mxu2 %vm327_vm3, %v9493_v41  ;;  %4065 = vmatpush.bf16.msrb.mxu3 %v4018_v6 }
 0x5a9   :  { %v9573_v14 = vpop.f32.mrf.mxu3  ;;  %v3157_v25 = vpop.f32.mrf.mxu2 }
 0x5aa   :  { %v9576_v47 = vadd.f32 %v3157_v25, %v9438_v9  ;;  %v4020_v9 = vsel %vm4005_vm15, %v3984_v11, %v9478_v22 }
 0x5ab   :  { %v9578_v15 = vpop.f32.mrf.mxu0  ;;  %v3988_v33 = vpop.permute.xlu0 %3987 }
 0x5ac   :  { %v4021_v49 = vsel %vm4005_vm15, %v9478_v22, %v3988_v33  ;;  %v3954_v32 = vpop.permute.xlu1 %3953 }
 0x5ad   :  { %4107 = vmatpush.bf16.msra.mxu2 %v4021_v49 }
 0x5ae   :  { %v3143_v0 = vpop.f32.mrf.mxu1  ;;  %6843 = vmatmul.msk.bf16.vlgmr.msra.gmra.mxu0 %vm327_vm3, %v9493_v41 }
 0x5af   :  { %v9581_v40 = vadd.f32 %v3143_v0, %v9442_v27  ;;  %4079 = vmatpush.bf16.msra.mxu0 %v4019_v59  ;;  %v4006_v27 = vsel %vm4005_vm15, %v3954_v32, %v9511_v38 }
 0x5b0   :  { %4066 = vmatpush.bf16.msrb.mxu3 %v4006_v27 }
 0x5b1   :  { %6844 = vmatmul.msk.bf16.vlgmr.msra.gmra.mxu1 %vm327_vm3, %v9493_v41  ;;  %v9594_v19 = vpop.f32.mrf.mxu3  ;;  %v3159_v23 = vpop.f32.mrf.mxu2 }
 0x5b2   :  { %4093 = vmatpush.bf16.msra.mxu1 %v4020_v9  ;;  %11014 = vst [vmem:[#allocation13_spill] sm:$0xff] %v9594_v19  ;;  %v9597_v26 = vadd.f32 %v3159_v23, %v9466_v57 }
 0x5b3   :  { %v3131_v20 = vpop.f32.mrf.mxu0  ;;  %v3960_v22 = vpop.permute.xlu0 %3959 }
 0x5b4   :  { %v9600_v13 = vadd.f32 %v3131_v20, %v9460_v52  ;;  %v3962_v30 = vpop.permute.xlu1 %3961 }
 0x5b5   :  { %v4009_v57 = vsel %vm4005_vm15, %v3960_v22, %v3962_v30 }
 0x5b6   :  { %v3145_v16 = vpop.f32.mrf.mxu1  ;;  %6846 = vmatmul.msk.bf16.vlgmr.msra.gmra.mxu3 %vm327_vm3, %v9493_v41  ;;  %4108 = vmatpush.bf16.msra.mxu2 %v4009_v57 }
 0x5b7   :  { %v9603_v53 = vadd.f32 %v3145_v16, %v9468_v60  ;;  %6849 = vmatmul.msk.bf16.vlgmr.msrb.gmra.mxu2 %vm327_vm3, %v9493_v41 }
 0x5b9   :  { %v3171_v56 = vpop.f32.mrf.mxu3 }
 0x5ba   :  { %v3213_v36 = vpop.f32.mrf.mxu2  ;;  %v9611_v52 = vadd.f32 %v3171_v56, %v9456_v37 }
 0x5bb   :  { %v9614_v60 = vadd.f32 %v3213_v36, %v9507_v51  ;;  %v3185_v29 = vpop.f32.mrf.mxu0  ;;  %v3958_v1 = vpop.permute.xlu0 %3957 }
 0x5bc   :  { %v9617_v44 = vadd.f32 %v3185_v29, %v9499_v17  ;;  %v4007_v5 = vsel %vm4005_vm15, %v9511_v38, %v3958_v1  ;;  %v4008_v37 = vsel %vm4005_vm15, %v3958_v1, %v3960_v22  ;;  %v3990_v34 = vpop.permute.xlu1 %3989  ;;  %v3968_v51 = vpop.permute.xlu2 %3967  ;;  %v9640_v38 = vld [vmem:[%s11001_s3 + $0x20] sm:$0xff] }
 0x5bd   :  { %4080 = vmatpush.bf16.msra.mxu0 %v4007_v5  ;;  %4094 = vmatpush.bf16.msra.mxu1 %v4008_v37  ;;  %v4022_v17 = vsel %vm4005_vm15, %v3988_v33, %v3990_v34  ;;  %v3130_v37 = vadd.f32 %v9578_v15, %v9434_v2 }
 0x5be   :  { %v3199_v31 = vpop.f32.mrf.mxu1  ;;  %6847 = vmatmul.msk.bf16.vlgmr.msrb.gmra.mxu0 %vm327_vm3, %v9493_v41  ;;  %4121 = vmatpush.bf16.msra.mxu3 %v4022_v17 }
 0x5bf   :  { %v9620_v3 = vadd.f32 %v3199_v31, %v9509_v63 }
 0x5c1   :  { %6848 = vmatmul.msk.bf16.vlgmr.msrb.gmra.mxu1 %vm327_vm3, %v9493_v41  ;;  %v3173_v63 = vpop.f32.mrf.mxu3 }
 0x5c2   :  { %v9630_v10 = vpop.f32.mrf.mxu2  ;;  %v9633_v58 = vadd.f32 %v3173_v63, %v9483_v12 }
 0x5c3   :  { %v9635_v43 = vpop.f32.mrf.mxu0  ;;  %v3996_v55 = vpop.permute.xlu0 %3995 }
 0x5c4   :  { %v4025_v50 = vsel %vm4005_vm15, %v3994_v4, %v3996_v55  ;;  %v3964_v62 = vpop.permute.xlu1 %3963  ;;  %v3966_v25 = vpop.permute.xlu2 %3965 }
 0x5c5   :  { %v4010_v12 = vsel %vm4005_vm15, %v3962_v30, %v3964_v62  ;;  %4163 = vmatpush.bf16.msrb.mxu2 %v4025_v50  ;;  %v4011_v30 = vsel %vm4005_vm15, %v3964_v62, %v3966_v25  ;;  %v4012_v57 = vsel %vm4005_vm15, %v3966_v25, %v3968_v51 }
 0x5c6   :  { %v9642_v41 = vpop.f32.mrf.mxu1  ;;  %6856 = vmatmul.msk.bf16.vlgmr.msrb.gmra.mxu3 %vm327_vm3, %v9640_v38 }
 0x5c7   :  { %6859 = vmatmul.msk.bf16.vlgmr.msra.gmra.mxu2 %vm327_vm3, %v9640_v38  ;;  %4122 = vmatpush.bf16.msra.mxu3 %v4010_v12 }
 0x5c9   :  { %v3227_v54 = vpop.f32.mrf.mxu3 }
 0x5ca   :  { %v3269_v6 = vpop.f32.mrf.mxu2  ;;  %v9651_v11 = vadd.f32 %v3227_v54, %v9513_v35  ;;  %v4267_v35 = vld [vmem:[%s11002_s4] sm:$0xff]  ;;  %s7544_s4 = smov 116  }
 0x5cb   :  { %v9654_v0 = vadd.f32 %v3269_v6, %v9550_v46  ;;  %v3241_v33 = vpop.f32.mrf.mxu0  ;;  %v3970_v9 = vpop.permute.xlu0 %3969  ;;  %4271 = vperm.xlu2 %7399, %v4267_v35  }
 0x5cc   :  { %v9657_v59 = vadd.f32 %v3241_v33, %v9543_v39  ;;  %v4013_v27 = vsel %vm4005_vm15, %v3968_v51, %v3970_v9  ;;  %v3992_v23 = vpop.permute.xlu1 %3991  ;;  %v4004_v56 = vpop.permute.xlu2 %4003 }
 0x5cd   :  { %4164 = vmatpush.bf16.msrb.mxu2 %v4013_v27  ;;  %v4023_v39 = vsel %vm4005_vm15, %v3990_v34, %v3992_v23 }
 0x5ce   :  { %v3255_v49 = vpop.f32.mrf.mxu1  ;;  %6857 = vmatmul.msk.bf16.vlgmr.msra.gmra.mxu0 %vm327_vm3, %v9640_v38 }
 0x5cf   :  { %v9660_v32 = vadd.f32 %v3255_v49, %v9547_v24  ;;  %v4024_v24 = vsel %vm4005_vm15, %v3992_v23, %v3994_v4  ;;  %4135 = vmatpush.bf16.msrb.mxu0 %v4023_v39 }
 0x5d0   :  { %4149 = vmatpush.bf16.msrb.mxu1 %v4024_v24 }
 0x5d1   :  { %6858 = vmatmul.msk.bf16.vlgmr.msra.gmra.mxu1 %vm327_vm3, %v9640_v38  ;;  %v9672_v46 = vpop.f32.mrf.mxu3 }
 0x5d2   :  { %v9674_v20 = vpop.f32.mrf.mxu2 }
 0x5d3   :  { %11015 = vst [vmem:[#allocation14_spill] sm:$0xff] %v9674_v20  ;;  %v9676_v16 = vpop.f32.mrf.mxu0  ;;  %4136 = vmatpush.bf16.msrb.mxu0 %v4011_v30  ;;  %v3998_v36 = vpop.permute.xlu0 %3997 }
 0x5d4   :  { %11016 = vst [vmem:[#allocation15_spill] sm:$0xff] %v9676_v16  ;;  %4150 = vmatpush.bf16.msrb.mxu1 %v4012_v57  ;;  %v4026_v4 = vsel %vm4005_vm15, %v3996_v55, %v3998_v36  ;;  %v4002_v29 = vpop.permute.xlu1 %4001  ;;  %v3978_v2 = vpop.permute.xlu2 %3977 }
 0x5d5   :  { %4177 = vmatpush.bf16.msrb.mxu3 %v4026_v4  ;;  %v4029_v31 = vsel %vm4005_vm15, %v4002_v29, %v4004_v56 }
 0x5d6   :  { %v9678_v22 = vpop.f32.mrf.mxu1  ;;  %6860 = vmatmul.msk.bf16.vlgmr.msra.gmra.mxu3 %vm327_vm3, %v9640_v38  ;;  %4219 = vmatpush.bf16.msra.mxu2 %v4029_v31 }
 0x5d7   :  { %11017 = vst [vmem:[#allocation16_spill] sm:$0xff] %v9678_v22  ;;  %6863 = vmatmul.msk.bf16.vlgmr.msrb.gmra.mxu2 %vm327_vm3, %v9640_v38 }
 0x5d9   :  { %v3283_v1 = vpop.f32.mrf.mxu3 }
 0x5da   :  { %v3438_v5 = vpop.f32.mrf.mxu2  ;;  %v9691_v34 = vadd.f32 %v3283_v1, %v9545_v48 }
 0x5db   :  { %v9694_v17 = vadd.f32 %v3438_v5, %v9581_v40  ;;  %v3297_v51 = vpop.f32.mrf.mxu0  ;;  %v3972_v62 = vpop.permute.xlu0 %3971 }
 0x5dc   :  { %v9697_v63 = vadd.f32 %v3297_v51, %v9573_v14  ;;  %v4014_v12 = vsel %vm4005_vm15, %v3970_v9, %v3972_v62  ;;  %v3976_v15 = vpop.permute.xlu1 %3975 }
 0x5dd   :  { %4178 = vmatpush.bf16.msrb.mxu3 %v4014_v12  ;;  %v4017_v48 = vsel %vm4005_vm15, %v3976_v15, %v3978_v2 }
 0x5de   :  { %v3424_v55 = vpop.f32.mrf.mxu1  ;;  %6861 = vmatmul.msk.bf16.vlgmr.msrb.gmra.mxu0 %vm327_vm3, %v9640_v38  ;;  %4220 = vmatpush.bf16.msra.mxu2 %v4017_v48 }
 0x5df   :  { %v9699_v50 = vadd.f32 %v3424_v55, %v3130_v37 }
 0x5e1   :  { %6862 = vmatmul.msk.bf16.vlgmr.msrb.gmra.mxu1 %vm327_vm3, %v9640_v38  ;;  %4233 = vmatpush.bf16.msra.mxu3 %v4004_v56  ;;  %v9707_v14 = vpop.f32.mrf.mxu3 }
 0x5e2   :  { %11018 = vst [vmem:[#allocation17_spill] sm:$0xff] %v9707_v14  ;;  %v9709_v40 = vpop.f32.mrf.mxu2 }
 0x5e3   :  { %v9711_v54 = vpop.f32.mrf.mxu0 }
 0x5e4   :  { %11019 = vst [vmem:[#allocation18_spill] sm:$0xff] %v9711_v54  ;;  %v4000_v25 = vpop.permute.xlu0 %3999 }
 0x5e5   :  { %4234 = vmatpush.bf16.msra.mxu3 %v3978_v2  ;;  %v4027_v33 = vsel %vm4005_vm15, %v3998_v36, %v4000_v25  ;;  %v4028_v49 = vsel %vm4005_vm15, %v4000_v25, %v4002_v29  ;;  %v3974_v9 = vpop.permute.xlu1 %3973 }
 0x5e6   :  { %v9713_v6 = vpop.f32.mrf.mxu1  ;;  %6864 = vmatmul.msk.bf16.vlgmr.msrb.gmra.mxu3 %vm327_vm3, %v9640_v38  ;;  %4191 = vmatpush.bf16.msra.mxu0 %v4027_v33  ;;  %v4015_v30 = vsel %vm4005_vm15, %v3972_v62, %v3974_v9  ;;  %v4016_v57 = vsel %vm4005_vm15, %v3974_v9, %v3976_v15 }
 0x5e7   :  { %6867 = vmatmul.msk.bf16.vlgmr.msra.gmra.mxu2 %vm327_vm3, %v9640_v38  ;;  %4205 = vmatpush.bf16.msra.mxu1 %v4028_v49 }
 0x5e9   :  { %v3452_v27 = vpop.f32.mrf.mxu3 }
 0x5ea   :  { %v3494_v23 = vpop.f32.mrf.mxu2  ;;  %v9722_v35 = vadd.f32 %v3452_v27, %v9576_v47  ;;  %4192 = vmatpush.bf16.msra.mxu0 %v4015_v30 }
 0x5eb   :  { %v9725_v39 = vadd.f32 %v3494_v23, %v9620_v3  ;;  %v3466_v24 = vpop.f32.mrf.mxu0  ;;  %4206 = vmatpush.bf16.msra.mxu1 %v4016_v57 }
 0x5ec   :  { %v3600_v56 = vadd.f32 %v3466_v24, %v9611_v52 }
 0x5ee   :  { %v3480_v36 = vpop.f32.mrf.mxu1  ;;  %6865 = vmatmul.msk.bf16.vlgmr.msra.gmra.mxu0 %vm327_vm3, %v9640_v38 }
 0x5ef   :  { %v9731_v4 = vadd.f32 %v3480_v36, %v9617_v44 }
 0x5f1   :  { %6866 = vmatmul.msk.bf16.vlgmr.msra.gmra.mxu1 %vm327_vm3, %v9640_v38  ;;  %v9737_v47 = vpop.f32.mrf.mxu3 }
 0x5f2   :  { %v9739_v3 = vpop.f32.mrf.mxu2 }
 0x5f3   :  { %v9741_v29 = vpop.f32.mrf.mxu0 }
 0x5f6   :  { %v9743_v31 = vpop.f32.mrf.mxu1  ;;  %6868 = vmatmul.msk.bf16.vlgmr.msra.gmra.mxu3 %vm327_vm3, %v9640_v38  ;;  %vm4714_vm3 = vcmask 134144  }
 0x5f9   :  { %v3508_v52 = vpop.f32.mrf.mxu3 }
 0x5fa   :  { %v3550_v44 = vpop.f32.mrf.mxu2  ;;  %v9748_v1 = vadd.f32 %v3508_v52, %v9614_v60 }
 0x5fb   :  { %v9751_v5 = vadd.f32 %v3550_v44, %v9660_v32  ;;  %v3522_v37 = vpop.f32.mrf.mxu0 }
 0x5fc   :  { %v9754_v51 = vadd.f32 %v3522_v37, %v9651_v11 }
 0x5fe   :  { %v3536_v55 = vpop.f32.mrf.mxu1 }
 0x5ff   :  { %v9757_v62 = vadd.f32 %v3536_v55, %v9657_v59 }
 0x601   :  { %v9759_v12 = vpop.f32.mrf.mxu3 }
 0x602   :  { %v9761_v2 = vpop.f32.mrf.mxu2 }
 0x603   :  { %11020 = vst [vmem:[#allocation19_spill] sm:$0xff] %v9761_v2  ;;  %v9763_v38 = vpop.f32.mrf.mxu0 }
 0x606   :  { %v9765_v15 = vpop.f32.mrf.mxu1 }
 0x607   :  { %11021 = vst [vmem:[#allocation20_spill] sm:$0xff] %v9765_v15 }
 0x609   :  { %v3564_v60 = vpop.f32.mrf.mxu3 }
 0x60a   :  { %v3746_v48 = vpop.f32.mrf.mxu2  ;;  %v9768_v32 = vadd.f32 %v3564_v60, %v9654_v0 }
 0x60b   :  { %v3578_v25 = vpop.f32.mrf.mxu0 }
 0x60c   :  { %11022 = vst [vmem:[#allocation21_spill] sm:$0xff] %v9768_v32  ;;  %v9771_v11 = vadd.f32 %v3578_v25, %v9691_v34 }
 0x60e   :  { %v3592_v33 = vpop.f32.mrf.mxu1 }
 0x60f   :  { %v9774_v59 = vadd.f32 %v3592_v33, %v9697_v63 }
 0x611   :  { %11023 = vst [vmem:[#allocation22_spill] sm:$0xff] %v9774_v59  ;;  %v9776_v49 = vpop.f32.mrf.mxu3 }
 0x612   :  { %11024 = vst [vmem:[#allocation23_spill] sm:$0xff] %v9776_v49  ;;  %v3748_v9 = vpop.f32.mrf.mxu2 }
 0x613   :  { %v9778_v27 = vpop.f32.mrf.mxu0 }
 0x614   :  { %11025 = vst [vmem:[#allocation24_spill] sm:$0xff] %v9778_v27 }
 0x616   :  { %v9780_v23 = vpop.f32.mrf.mxu1 }
 0x617   :  { %11026 = vst [vmem:[#allocation25_spill] sm:$0xff] %v9780_v23 }
 0x619   :  { %v3760_v24 = vpop.f32.mrf.mxu3 }
 0x61a   :  { %v9782_v30 = vpop.f32.mrf.mxu2  ;;  %v3920_v14 = vadd.f32 %v3760_v24, %v9694_v17 }
 0x61b   :  { %v3774_v0 = vpop.f32.mrf.mxu0 }
 0x61c   :  { %v3921_v16 = vadd.f32 %v3774_v0, %v9722_v35  ;;  %v3613_v35 = vadd.f32 %v9741_v29, %v9633_v58 }
 0x61e   :  { %v3788_v57 = vpop.f32.mrf.mxu1 }
 0x61f   :  { %v3922_v20 = vadd.f32 %v3788_v57, %v3600_v56  ;;  %v3610_v56 = vadd.f32 %v9713_v6, %v9600_v13  ;;  %v3612_v13 = vadd.f32 %v9737_v47, %v9597_v26  ;;  %v9855_v47 = vpop.permute.xlu0 %4276 }
 0x621   :  { %v3762_v36 = vpop.f32.mrf.mxu3  ;;  %v3932_v6 = vadd.f32 %v3748_v9, %v3610_v56 }
 0x622   :  { %v9784_v52 = vpop.f32.mrf.mxu2 }
 0x623   :  { %v3776_v34 = vpop.f32.mrf.mxu0 }
 0x625   :  { %v9819_v61 = vpop.permute.xlu2 %4271 }
 0x626   :  { %v3790_v44 = vpop.f32.mrf.mxu1 }
 0x629   :  { %v9786_v37 = vpop.f32.mrf.mxu3 }
 0x62a   :  { %v9788_v63 = vpop.f32.mrf.mxu2 }
 0x62b   :  { %v9790_v55 = vpop.f32.mrf.mxu0 }
 0x62e   :  { %v9792_v60 = vpop.f32.mrf.mxu1 }
 0x631   :  { %v9794_v25 = vpop.f32.mrf.mxu3 }
 0x632   :  { %v9796_v33 = vpop.f32.mrf.mxu2 }
 0x633   :  { %11027 = vst [vmem:[#allocation26_spill] sm:$0xff] %v9796_v33  ;;  %v9798_v23 = vpop.f32.mrf.mxu0  ;;  %v3919_v33 = vadd.f32 %v3746_v48, %v9699_v50 }
 0x636   :  { %v9800_v54 = vpop.f32.mrf.mxu1 }
 0x639   :  { %v9802_v19 = vpop.f32.mrf.mxu3 }
 0x63a   :  { %11028 = vst [vmem:[#allocation27_spill] sm:$0xff] %v9802_v19  ;;  %v9804_v59 = vpop.f32.mrf.mxu2 }
 0x63b   :  { %11029 = vst [vmem:[#allocation28_spill] sm:$0xff] %v9804_v59  ;;  %v9806_v49 = vpop.f32.mrf.mxu0 }
 0x63c   :  { %11030 = vst [vmem:[#allocation29_spill] sm:$0xff] %v9806_v49 }
 0x63e   :  { %v9808_v2 = vpop.f32.mrf.mxu1 }
 0x641   :  { %v9810_v27 = vpop.f32.mrf.mxu3 }
 0x642   :  { %11031 = vst [vmem:[#allocation30_spill] sm:$0xff] %v9810_v27  ;;  %v9812_v15 = vpop.f32.mrf.mxu2 }
 0x643   :  { %11032 = vst [vmem:[#allocation31_spill] sm:$0xff] %v9812_v15  ;;  %v9814_v22 = vpop.f32.mrf.mxu0 }
 0x644   :  { %11033 = vst [vmem:[#allocation32_spill] sm:$0xff] %v9814_v22 }
 0x646   :  { %v9816_v18 = vpop.f32.mrf.mxu1 }
 0x649   :  { %v4068_v59 = vpop.f32.mrf.mxu3 }
 0x64a   :  { %v4110_v7 = vpop.f32.mrf.mxu2  ;;  %v4241_v42 = vadd.f32 %v4068_v59, %v3919_v33  ;;  %v3934_v59 = vadd.f32 %v3776_v34, %v3612_v13 }
 0x64b   :  { %v4244_v49 = vadd.f32 %v4110_v7, %v3922_v20  ;;  %v4082_v27 = vpop.f32.mrf.mxu0 }
 0x64c   :  { %v4242_v32 = vadd.f32 %v4082_v27, %v3920_v14  ;;  %v9827_v50 = vadd.f32 %v9819_v61, %v4241_v42  ;;  %v3611_v42 = vadd.f32 %v9709_v40, %v9603_v53 }
 0x64d   :  { %v9824_v22 = vadd.f32 %v9819_v61, %v4244_v49 }
 0x64e   :  { %v4096_v15 = vpop.f32.mrf.mxu1  ;;  %v9832_v17 = vadd.f32 %v9819_v61, %v4242_v32  ;;  %v3933_v58 = vadd.f32 %v3762_v36, %v3611_v42  ;;  %v3926_v42 = vadd.f32 %v9792_v60, %v9754_v51 }
 0x64f   :  { %v4243_v19 = vadd.f32 %v4096_v15, %v3921_v16  ;;  %v4308_v20 = vmax.f32 %v9824_v22, 0.0  ;;  %v4305_v16 = vmax.f32 %v9827_v50, 0.0  ;;  %v3935_v15 = vadd.f32 %v3790_v44, %v3613_v35 }
 0x650   :  { %v4306_v14 = vmax.f32 %v9832_v17, 0.0  ;;  %v3923_v35 = vadd.f32 %v9782_v30, %v9731_v4 }
 0x651   :  { %v9837_v7 = vadd.f32 %v9819_v61, %v4243_v19  ;;  %v4070_v29 = vpop.f32.mrf.mxu3 }
 0x652   :  { %v4112_v19 = vpop.f32.mrf.mxu2  ;;  %v7400_v32 = vpack.i.bf16 %v4306_v14, %v4305_v16  ;;  %v4254_v49 = vadd.f32 %v4070_v29, %v3932_v6  ;;  %v3924_v6 = vadd.f32 %v9786_v37, %v9725_v39  ;;  %v3188_v39 = vadd.f32 %v9635_v43, %v9525_v28 }
 0x653   :  { %v4307_v48 = vmax.f32 %v9837_v7, 0.0  ;;  %v4257_v53 = vadd.f32 %v4112_v19, %v3935_v15  ;;  %v4084_v40 = vpop.f32.mrf.mxu0  ;;  %v3925_v19 = vadd.f32 %v9790_v55, %v9748_v1  ;;  %v3202_v28 = vadd.f32 %v9642_v41, %v9533_v8 }
 0x654   :  { %v4255_v9 = vadd.f32 %v4084_v40, %v3933_v58  ;;  %7401 = vrot.lane.b32.xlu1 %v7400_v32, %s7539_s19  ;;  %v9859_v24 = vadd.f32 %v9855_v47, %v4254_v49  ;;  %v3614_v43 = vadd.f32 %v9743_v31, %v3188_v39  ;;  %v3927_v39 = vadd.f32 %v9788_v63, %v9757_v62 }
 0x655   :  { %v7410_v26 = vpack.i.bf16 %v4308_v20, %v4307_v48  ;;  %v9862_v0 = vadd.f32 %v9855_v47, %v4257_v53  ;;  %v3216_v53 = vadd.f32 %v9630_v10, %v9529_v45 }
 0x656   :  { %v4098_v27 = vpop.f32.mrf.mxu1  ;;  %v9866_v36 = vadd.f32 %v9855_v47, %v4255_v9  ;;  %v4318_v34 = vmax.f32 %v9859_v24, 0.0  ;;  %v3936_v8 = vadd.f32 %v9784_v52, %v3614_v43  ;;  %v11035_v43 = vld [vmem:[#allocation21_spill] sm:$0xff] }
 0x657   :  { %v4256_v57 = vadd.f32 %v4098_v27, %v3934_v59  ;;  %7411 = vrot.lane.b32.xlu2 %v7410_v26, %s7539_s19  ;;  %v4321_v44 = vmax.f32 %v9862_v0, 0.0  ;;  %v3230_v59 = vadd.f32 %v9672_v46, %v9527_v21  ;;  %v3615_v27 = vadd.f32 %v9739_v3, %v3202_v28 }
 0x658   :  { %v4319_v56 = vmax.f32 %v9866_v36, 0.0  ;;  %v3616_v10 = vadd.f32 %v9759_v12, %v3216_v53 }
 0x659   :  { %v9871_v33 = vadd.f32 %v9855_v47, %v4256_v57  ;;  %v4124_v15 = vpop.f32.mrf.mxu3  ;;  %v3617_v21 = vadd.f32 %v9763_v38, %v3230_v59  ;;  %v3937_v38 = vadd.f32 %v9794_v25, %v3615_v27  ;;  %v11034_v59 = vld [vmem:[#allocation27_spill] sm:$0xff] }
 0x65a   :  { %v4166_v58 = vpop.f32.mrf.mxu2  ;;  %v7405_v29 = vpack.i.bf16 %v4319_v56, %v4318_v34  ;;  %v4245_v32 = vadd.f32 %v4124_v15, %v3923_v35  ;;  %v11038_v27 = vld [vmem:[#allocation15_spill] sm:$0xff] }
 0x65b   :  { %v4320_v13 = vmax.f32 %v9871_v33, 0.0  ;;  %v4248_v4 = vadd.f32 %v4166_v58, %v3926_v42  ;;  %v4138_v30 = vpop.f32.mrf.mxu0  ;;  %v3939_v41 = vadd.f32 %v9800_v54, %v3617_v21  ;;  %v3938_v42 = vadd.f32 %v9798_v23, %v3616_v10  ;;  %v11036_v21 = vld [vmem:[#allocation29_spill] sm:$0xff] }
 0x65c   :  { %v4246_v37 = vadd.f32 %v4138_v30, %v3924_v6  ;;  %7406 = vrot.lane.b32.xlu0 %v7405_v29, %s7539_s19  ;;  %v9897_v1 = vadd.f32 %v9819_v61, %v4245_v32 }
 0x65d   :  { %v7420_v51 = vpack.i.bf16 %v4321_v44, %v4320_v13  ;;  %v4286_v55 = vadd.f32 %v9819_v61, %v4248_v4 }
 0x65e   :  { %v4152_v60 = vpop.f32.mrf.mxu1  ;;  %v9907_v40 = vadd.f32 %v9819_v61, %v4246_v37  ;;  %v4309_v46 = vmax.f32 %v9897_v1, 0.0  ;;  %v3930_v37 = vadd.f32 %v9808_v2, %v9771_v11  ;;  %v11037_v11 = vld [vmem:[#allocation9_spill] sm:$0xff] }
 0x65f   :  { %v4247_v49 = vadd.f32 %v4152_v60, %v3925_v19  ;;  %7421 = vrot.lane.b32.xlu1 %v7420_v51, %s7539_s19  ;;  %v4312_v26 = vmax.f32 %v4286_v55, 0.0  ;;  %v3928_v55 = vadd.f32 %v11034_v59, %v9751_v5  ;;  %v3244_v10 = vadd.f32 %v11038_v27, %v11037_v11  ;;  %v11039_v5 = vld [vmem:[#allocation10_spill] sm:$0xff] }
 0x660   :  { %v4310_v45 = vmax.f32 %v9907_v40, 0.0 }
 0x661   :  { %v9912_v9 = vadd.f32 %v9819_v61, %v4247_v49  ;;  %4338 = vst [vmem:[#allocation6 + $0x38] sm:$0xff] %v4312_v26  ;;  %v4126_v57 = vpop.f32.mrf.mxu3 }
 0x662   :  { %v4168_v35 = vpop.f32.mrf.mxu2  ;;  %v7415_v3 = vpack.i.bf16 %v4310_v45, %v4309_v46  ;;  %v4258_v6 = vadd.f32 %v4126_v57, %v3936_v8  ;;  %v11040_v8 = vld [vmem:[#allocation17_spill] sm:$0xff] }
 0x663   :  { %v4311_v31 = vmax.f32 %v9912_v9, 0.0  ;;  %v4261_v12 = vadd.f32 %v4168_v35, %v3939_v41  ;;  %v4140_v15 = vpop.f32.mrf.mxu0  ;;  %v3286_v41 = vadd.f32 %v11040_v8, %v11039_v5  ;;  %v11051_v8 = vld [vmem:[#allocation32_spill] sm:$0xff] }
 0x664   :  { %v4259_v52 = vadd.f32 %v4140_v15, %v3937_v38  ;;  %7416 = vrot.lane.b32.xlu0 %v7415_v3, %s7539_s19  ;;  %v9930_v25 = vadd.f32 %v9855_v47, %v4258_v6  ;;  %v11042_v15 = vld [vmem:[#allocation14_spill] sm:$0xff] }
 0x665   :  { %v7430_v54 = vpack.i.bf16 %v4312_v26, %v4311_v31  ;;  %v4299_v29 = vadd.f32 %v9855_v47, %v4261_v12  ;;  %v3929_v26 = vadd.f32 %v11036_v21, %v11035_v43  ;;  %v11041_v12 = vld [vmem:[#allocation12_spill] sm:$0xff]  ;;  %v11048_v21 = vld [vmem:[#allocation23_spill] sm:$0xff] }
 0x666   :  { %v4154_v58 = vpop.f32.mrf.mxu1  ;;  %v9935_v23 = vadd.f32 %v9855_v47, %v4259_v52  ;;  %v4322_v32 = vmax.f32 %v9930_v25, 0.0  ;;  %v11043_v52 = vld [vmem:[#allocation11_spill] sm:$0xff] }
 0x667   :  { %v4260_v19 = vadd.f32 %v4154_v58, %v3938_v42  ;;  %7431 = vrot.lane.b32.xlu1 %v7430_v54, %s7539_s19  ;;  %v4325_v4 = vmax.f32 %v4299_v29, 0.0  ;;  %v3272_v54 = vadd.f32 %v11042_v15, %v11041_v12  ;;  %v11044_v58 = vld [vmem:[#allocation16_spill] sm:$0xff] }
 0x668   :  { %v4323_v51 = vmax.f32 %v9935_v23, 0.0  ;;  %v3258_v29 = vadd.f32 %v11044_v58, %v11043_v52 }
 0x669   :  { %v9939_v30 = vadd.f32 %v9855_v47, %v4260_v19  ;;  %4352 = vst [vmem:[#allocation6 + $0xa0] sm:$0xff] %v4325_v4  ;;  %v4180_v49 = vpop.f32.mrf.mxu3  ;;  %v11045_v19 = vld [vmem:[#allocation20_spill] sm:$0xff] }
 0x66a   :  { %v4222_v53 = vpop.f32.mrf.mxu2  ;;  %v7425_v28 = vpack.i.bf16 %v4323_v51, %v4322_v32  ;;  %v4249_v62 = vadd.f32 %v4180_v49, %v3927_v39  ;;  %v11046_v39 = vld [vmem:[#allocation24_spill] sm:$0xff] }
 0x66b   :  { %v4324_v60 = vmax.f32 %v9939_v30, 0.0  ;;  %v4252_v63 = vadd.f32 %v4222_v53, %v3930_v37  ;;  %v4194_v38 = vpop.f32.mrf.mxu0  ;;  %v3621_v37 = vadd.f32 %v11046_v39, %v3286_v41 }
 0x66c   :  { %7426 = vrot.lane.b32.xlu2 %v7425_v28, %s7539_s19  ;;  %v9963_v35 = vadd.f32 %v9819_v61, %v4249_v62  ;;  %v4250_v42 = vadd.f32 %v4194_v38, %v3928_v55  ;;  %v11047_v28 = vld [vmem:[#allocation19_spill] sm:$0xff]  ;;  %v11049_v62 = vld [vmem:[#allocation26_spill] sm:$0xff] }
 0x66d   :  { %v7440_v2 = vpack.i.bf16 %v4325_v4, %v4324_v60  ;;  %v9966_v3 = vadd.f32 %v9819_v61, %v4252_v63  ;;  %v3618_v4 = vadd.f32 %v11045_v19, %v3244_v10  ;;  %v3619_v43 = vadd.f32 %v11047_v28, %v3258_v29  ;;  %v11050_v10 = vld [vmem:[#allocation30_spill] sm:$0xff] }
 0x66e   :  { %v4208_v57 = vpop.f32.mrf.mxu1  ;;  %v4313_v59 = vmax.f32 %v9963_v35, 0.0  ;;  %v9978_v53 = vadd.f32 %v9819_v61, %v4250_v42 }
 0x66f   :  { %v4251_v6 = vadd.f32 %v4208_v57, %v3929_v26  ;;  %7441 = vrot.lane.b32.xlu0 %v7440_v2, %s7539_s19  ;;  %v4316_v49 = vmax.f32 %v9966_v3, 0.0  ;;  %v3620_v26 = vadd.f32 %v11048_v21, %v3272_v54  ;;  %v3940_v63 = vadd.f32 %v11049_v62, %v3618_v4  ;;  %v11053_v21 = vld [vmem:[#allocation28_spill] sm:$0xff] }
 0x670   :  { %v3943_v2 = vadd.f32 %v9816_v18, %v3621_v37  ;;  %v4314_v11 = vmax.f32 %v9978_v53, 0.0  ;;  %v3941_v5 = vadd.f32 %v11050_v10, %v3619_v43  ;;  %v11052_v43 = vld [vmem:[#allocation22_spill] sm:$0xff] }
 0x671   :  { %v9981_v55 = vadd.f32 %v9819_v61, %v4251_v6  ;;  %v3942_v41 = vadd.f32 %v11051_v8, %v3620_v26  ;;  %v4182_v38 = vpop.f32.mrf.mxu3  ;;  %v3931_v26 = vadd.f32 %v11053_v21, %v11052_v43 }
 0x672   :  { %v4224_v57 = vpop.f32.mrf.mxu2  ;;  %v4262_v42 = vadd.f32 %v4182_v38, %v3940_v63  ;;  %v7435_v18 = vpack.i.bf16 %v4314_v11, %v4313_v59  ;;  %v11055_v38 = vld [vmem:[#allocation18_spill] sm:$0xff] }
 0x673   :  { %v4315_v27 = vmax.f32 %v9981_v55, 0.0  ;;  %v4265_v6 = vadd.f32 %v4224_v57, %v3943_v2  ;;  %v4196_v15 = vpop.f32.mrf.mxu0 }
 0x674   :  { %v10000_v52 = vadd.f32 %v9855_v47, %v4262_v42  ;;  %v4263_v29 = vadd.f32 %v4196_v15, %v3941_v5  ;;  %7436 = vrot.lane.b32.xlu2 %v7435_v18, %s7539_s19  ;;  %v11057_v15 = vld [vmem:[#allocation31_spill] sm:$0xff] }
 0x675   :  { %v7450_v12 = vpack.i.bf16 %v4316_v49, %v4315_v27  ;;  %v10003_v58 = vadd.f32 %v9855_v47, %v4265_v6  ;;  %v11056_v6 = vld [vmem:[#allocation25_spill] sm:$0xff] }
 0x676   :  { %v4210_v54 = vpop.f32.mrf.mxu1  ;;  %v4326_v4 = vmax.f32 %v10000_v52, 0.0  ;;  %v10010_v37 = vadd.f32 %v9855_v47, %v4263_v29 }
 0x677   :  { %v4264_v19 = vadd.f32 %v4210_v54, %v3942_v41  ;;  %7451 = vrot.lane.b32.xlu0 %v7450_v12, %s7539_s19  ;;  %v4329_v39 = vmax.f32 %v10003_v58, 0.0  ;;  %v11054_v41 = vld [vmem:[#allocation13_spill] sm:$0xff] }
 0x678   :  { %v4327_v62 = vmax.f32 %v10010_v37, 0.0  ;;  %v3300_v57 = vadd.f32 %v11055_v38, %v11054_v41 }
 0x679   :  { %v10013_v28 = vadd.f32 %v9855_v47, %v4264_v19  ;;  %v4236_v2 = vpop.f32.mrf.mxu3 }
 0x67a   :  { %v4253_v10 = vadd.f32 %v4236_v2, %v3931_v26  ;;  %v7445_v8 = vpack.i.bf16 %v4327_v62, %v4326_v4  ;;  %v3622_v12 = vadd.f32 %v11056_v6, %v3300_v57 }
 0x67b   :  { %v4328_v63 = vmax.f32 %v10013_v28, 0.0 }
 0x67c   :  { %v4291_v42 = vadd.f32 %v9819_v61, %v4253_v10  ;;  %7446 = vrot.lane.b32.xlu1 %v7445_v8, %s7539_s19  ;;  %v3944_v54 = vadd.f32 %v11057_v15, %v3622_v12 }
 0x67d   :  { %v7455_v5 = vpack.i.bf16 %v4329_v39, %v4328_v63 }
 0x67e   :  { %v4317_v18 = vmax.f32 %v4291_v42, 0.0 }
 0x67f   :  { %7456 = vrot.lane.b32.xlu2 %v7455_v5, %s7539_s19 }
 0x680   :  { %4344 = vst.msk [vmem:[#allocation6 + $0x60] sm:$0xff] %vm4343_vm0, %v4317_v18 }
 0x681   :  { %v4238_v29 = vpop.f32.mrf.mxu3 }
 0x682   :  { %v4266_v19 = vadd.f32 %v4238_v29, %v3944_v54 }
 0x684   :  { %v4304_v43 = vadd.f32 %v9855_v47, %v4266_v19 }
 0x686   :  { %v4330_v21 = vmax.f32 %v4304_v43, 0.0 }
 0x687   :  { %v10035_v26 = vld [vmem:[#allocation6 + $0x60] sm:$0xff] }
 0x688   :  { %4357 = vst.msk [vmem:[#allocation6 + $0xc8] sm:$0xff] %vm4343_vm0, %v4330_v21 }
 0x68f   :  { %v10037_v61 = vld [vmem:[#allocation6 + $0xc8] sm:$0xff] }
 0x690   :  { %v7460_v2 = vpack.i.bf16 %v10037_v61, %v10035_v26 }
 0x692   :  { %7461 = vrot.lane.b32.xlu1 %v7460_v2, %s7539_s19  ;;  %s7545_s19 = smov 112  }
 0x6b1   :  { %v7412_v10 = vpop.permute.xlu2 %7411 }
 0x6b2   :  { %v7413_v8 = vunpack.i.l.bf16 %v7412_v10  ;;  %v7414_v12 = vunpack.i.h.bf16 %v7412_v10 }
 0x6b4   :  { %v4465_v29 = vsel %vm1162_vm5, %v7413_v8, %v7414_v12 }
 0x6b5   :  { %v10059_v50 = vmax.f32 %v4307_v48, %v4465_v29 }
 0x6c6   :  { %v7402_v5 = vpop.permute.xlu1 %7401  ;;  %v7427_v18 = vpop.permute.xlu2 %7426 }
 0x6c7   :  { %v7404_v41 = vunpack.i.h.bf16 %v7402_v5  ;;  %v7403_v38 = vunpack.i.l.bf16 %v7402_v5  ;;  %v7429_v0 = vunpack.i.h.bf16 %v7427_v18 }
 0x6c9   :  { %v4464_v57 = vsel %vm1162_vm5, %v7404_v41, %v7413_v8  ;;  %v4463_v47 = vsel %vm1162_vm5, %v7403_v38, %v7404_v41  ;;  %v7428_v38 = vunpack.i.l.bf16 %v7427_v18 }
 0x6ca   :  { %v10046_v42 = vmax.f32 %v4306_v14, %v4464_v57  ;;  %v10050_v6 = vmax.f32 %v4305_v16, %v4463_v47 }
 0x6cb   :  { %v4479_v1 = vsel %vm1162_vm5, %v7428_v38, %v7429_v0 }
 0x6cc   :  { %v7465_v15 = vpack.i.bf16 %v10046_v42, %v10050_v6 }
 0x6ce   :  { %v7407_v54 = vpop.permute.xlu0 %7406  ;;  %7466 = vrot.lane.b32.xlu2 %v7465_v15, %s7535_s26  ;;  %v7437_v48 = vpop.permute.xlu2 %7436 }
 0x6cf   :  { %v7409_v19 = vunpack.i.h.bf16 %v7407_v54  ;;  %v7408_v43 = vunpack.i.l.bf16 %v7407_v54  ;;  %v7438_v33 = vunpack.i.l.bf16 %v7437_v48 }
 0x6d1   :  { %v7422_v21 = vpop.permute.xlu1 %7421  ;;  %v4475_v2 = vsel %vm1162_vm5, %v7408_v43, %v7409_v19 }
 0x6d2   :  { %v7424_v17 = vunpack.i.h.bf16 %v7422_v21  ;;  %v7423_v14 = vunpack.i.l.bf16 %v7422_v21  ;;  %v10063_v16 = vmax.f32 %v4318_v34, %v4475_v2  ;;  %v10116_v2 = vmax.f32 %v4322_v32, %v4479_v1 }
 0x6d4   :  { %v4476_v10 = vsel %vm1162_vm5, %v7409_v19, %v7423_v14  ;;  %v4477_v5 = vsel %vm1162_vm5, %v7423_v14, %v7424_v17  ;;  %v7470_v7 = vpack.i.bf16 %v10063_v16, %v10059_v50  ;;  %v4478_v34 = vsel %vm1162_vm5, %v7424_v17, %v7428_v38 }
 0x6d5   :  { %v10069_v8 = vmax.f32 %v4319_v56, %v4476_v10  ;;  %v10073_v41 = vmax.f32 %v4320_v13, %v4477_v5  ;;  %v10084_v54 = vmax.f32 %v4321_v44, %v4478_v34 }
 0x6d6   :  { %v7417_v57 = vpop.permute.xlu0 %7416  ;;  %7471 = vrot.lane.b32.xlu0 %v7470_v7, %s7535_s26 }
 0x6d7   :  { %v7480_v24 = vpack.i.bf16 %v10073_v41, %v10069_v8  ;;  %v7419_v36 = vunpack.i.h.bf16 %v7417_v57  ;;  %v7418_v56 = vunpack.i.l.bf16 %v7417_v57 }
 0x6d9   :  { %v7432_v47 = vpop.permute.xlu1 %7431  ;;  %7481 = vrot.lane.b32.xlu1 %v7480_v24, %s7535_s26  ;;  %v4466_v29 = vsel %vm1162_vm5, %v7414_v12, %v7418_v56  ;;  %v4467_v19 = vsel %vm1162_vm5, %v7418_v56, %v7419_v36  ;;  %v7439_v24 = vunpack.i.h.bf16 %v7437_v48  ;;  %v7457_v57 = vpop.permute.xlu2 %7456 }
 0x6da   :  { %v7434_v13 = vunpack.i.h.bf16 %v7432_v47  ;;  %v7433_v15 = vunpack.i.l.bf16 %v7432_v47  ;;  %v10090_v43 = vmax.f32 %v4308_v20, %v4466_v29  ;;  %v10094_v21 = vmax.f32 %v4309_v46, %v4467_v19 }
 0x6db   :  { %v4471_v32 = vsel %vm1162_vm5, %v7438_v33, %v7439_v24  ;;  %v7458_v48 = vunpack.i.l.bf16 %v7457_v57 }
 0x6dc   :  { %v10097_v17 = vsel %vm1162_vm5, %v7434_v13, %v7438_v33  ;;  %v4468_v14 = vsel %vm1162_vm5, %v7419_v36, %v7433_v15  ;;  %v7485_v12 = vpack.i.bf16 %v10084_v54, %v10090_v43  ;;  %v4469_v22 = vsel %vm1162_vm5, %v7433_v15, %v7434_v13 }
 0x6dd   :  { %v10102_v44 = vmax.f32 %v4310_v45, %v4468_v14  ;;  %v4519_v40 = vmax.f32 %v4311_v31, %v4469_v22  ;;  %v10134_v30 = vmax.f32 %v4313_v59, %v4471_v32 }
 0x6de   :  { %7486 = vrot.lane.b32.xlu0 %v7485_v12, %s7535_s26 }
 0x6df   :  { %v7475_v20 = vpack.i.bf16 %v10102_v44, %v10094_v21  ;;  %v7490_v9 = vpack.i.bf16 %v10116_v2, %v4519_v40 }
 0x6e1   :  { %v7442_v46 = vpop.permute.xlu0 %7441  ;;  %7476 = vrot.lane.b32.xlu2 %v7475_v20, %s7535_s26 }
 0x6e2   :  { %v7444_v45 = vunpack.i.h.bf16 %v7442_v46  ;;  %v7443_v18 = vunpack.i.l.bf16 %v7442_v46 }
 0x6e4   :  { %v4480_v10 = vsel %vm1162_vm5, %v7429_v0, %v7443_v18  ;;  %v4481_v5 = vsel %vm1162_vm5, %v7443_v18, %v7444_v45 }
 0x6e5   :  { %v10122_v7 = vmax.f32 %v4323_v51, %v4480_v10  ;;  %v4532_v38 = vmax.f32 %v4324_v60, %v4481_v5  ;;  %v7459_v60 = vunpack.i.h.bf16 %v7457_v57 }
 0x6e6   :  { %7491 = vrot.lane.b32.xlu0 %v7490_v9, %s7535_s26 }
 0x6e7   :  { %v7500_v31 = vpack.i.bf16 %v4532_v38, %v10122_v7  ;;  %v4485_v33 = vsel %vm1162_vm5, %v7458_v48, %v7459_v60 }
 0x6e8   :  { %v10152_v29 = vmax.f32 %v4328_v63, %v4485_v33 }
 0x6e9   :  { %v7452_v25 = vpop.permute.xlu0 %7451  ;;  %7501 = vrot.lane.b32.xlu1 %v7500_v31, %s7535_s26 }
 0x6ea   :  { %v7453_v34 = vunpack.i.l.bf16 %v7452_v25  ;;  %v7454_v36 = vunpack.i.h.bf16 %v7452_v25 }
 0x6ec   :  { %v4472_v23 = vsel %vm1162_vm5, %v7439_v24, %v7453_v34  ;;  %v4473_v13 = vsel %vm1162_vm5, %v7453_v34, %v7454_v36 }
 0x6ed   :  { %v10138_v51 = vmax.f32 %v4314_v11, %v4472_v23  ;;  %v10156_v19 = vmax.f32 %v4315_v27, %v4473_v13 }
 0x6ee   :  { %v7447_v47 = vpop.permute.xlu1 %7446 }
 0x6ef   :  { %v7495_v56 = vpack.i.bf16 %v10138_v51, %v10134_v30  ;;  %v7449_v35 = vunpack.i.h.bf16 %v7447_v47  ;;  %v7448_v59 = vunpack.i.l.bf16 %v7447_v47 }
 0x6f1   :  { %7496 = vrot.lane.b32.xlu2 %v7495_v56, %s7535_s26  ;;  %v4484_v15 = vsel %vm1162_vm5, %v7449_v35, %v7458_v48  ;;  %v10147_v53 = vsel %vm1162_vm5, %v7444_v45, %v7448_v59  ;;  %v4483_v11 = vsel %vm1162_vm5, %v7448_v59, %v7449_v35 }
 0x6f2   :  { %v10160_v14 = vmax.f32 %v4327_v62, %v4484_v15  ;;  %v10164_v0 = vmax.f32 %v4326_v4, %v4483_v11 }
 0x6f4   :  { %v7505_v12 = vpack.i.bf16 %v10164_v0, %v10156_v19  ;;  %v7515_v28 = vpack.i.bf16 %v10152_v29, %v10160_v14 }
 0x6f6   :  { %7506 = vrot.lane.b32.xlu0 %v7505_v12, %s7535_s26  ;;  %7516 = vrot.lane.b32.xlu1 %v7515_v28, %s7535_s26 }
 0x704   :  { %v7462_v55 = vpop.permute.xlu1 %7461 }
 0x705   :  { %v7464_v27 = vunpack.i.h.bf16 %v7462_v55  ;;  %v7463_v63 = vunpack.i.l.bf16 %v7462_v55 }
 0x707   :  { %v4486_v37 = vsel %vm1162_vm5, %v7459_v60, %v7464_v27  ;;  %v10174_v62 = vmax.f32 %v10037_v61, %v7464_v27  ;;  %v4474_v52 = vsel %vm1162_vm5, %v7454_v36, %v7463_v63  ;;  %v10178_v4 = vmax.f32 %v10035_v26, %v7463_v63 }
 0x708   :  { %v10182_v22 = vmax.f32 %v4329_v39, %v4486_v37  ;;  %v10186_v20 = vmax.f32 %v4316_v49, %v4474_v52  ;;  %vm6452_vm5 = vcmask 15360  }
 0x709   :  { %v7510_v1 = vpack.i.bf16 %v10174_v62, %v10178_v4 }
 0x70a   :  { %v7520_v61 = vpack.i.bf16 %v10182_v22, %v10186_v20 }
 0x70b   :  { %7511 = vrot.lane.b32.xlu2 %v7510_v1, %s7535_s26 }
 0x70c   :  { %7521 = vrot.lane.b32.xlu1 %v7520_v61, %s7535_s26 }
 0x728   :  { %v7467_v26 = vpop.permute.xlu2 %7466 }
 0x729   :  { %v7469_v46 = vunpack.i.h.bf16 %v7467_v26  ;;  %v7468_v40 = vunpack.i.l.bf16 %v7467_v26 }
 0x72b   :  { %v4618_v39 = vsel %vm239_vm1, %v7468_v40, %v7469_v46 }
 0x72c   :  { %v4668_v38 = vmax.f32 %v10050_v6, %v4618_v39 }
 0x73b   :  { %v7477_v34 = vpop.permute.xlu2 %7476 }
 0x73c   :  { %v7478_v48 = vunpack.i.l.bf16 %v7477_v34  ;;  %v7479_v56 = vunpack.i.h.bf16 %v7477_v34 }
 0x73e   :  { %v4622_v15 = vsel %vm239_vm1, %v7478_v48, %v7479_v56 }
 0x73f   :  { %v4672_v63 = vmax.f32 %v10094_v21, %v4622_v15 }
 0x748   :  { %v7472_v58 = vpop.permute.xlu0 %7471 }
 0x749   :  { %v7474_v45 = vunpack.i.h.bf16 %v7472_v58  ;;  %v7473_v3 = vunpack.i.l.bf16 %v7472_v58 }
 0x74b   :  { %v7482_v49 = vpop.permute.xlu1 %7481  ;;  %v4619_v5 = vsel %vm239_vm1, %v7469_v46, %v7473_v3 }
 0x74c   :  { %v7484_v18 = vunpack.i.h.bf16 %v7482_v49  ;;  %v7483_v10 = vunpack.i.l.bf16 %v7482_v49  ;;  %v4669_v24 = vmax.f32 %v10046_v42, %v4619_v5 }
 0x74e   :  { %v4630_v9 = vsel %vm239_vm1, %v7474_v45, %v7483_v10  ;;  %v4631_v31 = vsel %vm239_vm1, %v7483_v10, %v7484_v18  ;;  %v4694_v57 = vpack.c.bf16 %v4669_v24, %v4668_v38  ;;  %v7497_v45 = vpop.permute.xlu2 %7496 }
 0x74f   :  { %v4681_v25 = vmax.f32 %v10063_v16, %v4630_v9  ;;  %v4682_v32 = vmax.f32 %v10069_v8, %v4631_v31  ;;  %v7499_v24 = vunpack.i.h.bf16 %v7497_v45  ;;  %v7498_v9 = vunpack.i.l.bf16 %v7497_v45 }
 0x750   :  { %4708 = vst [vmem:[#allocation7] sm:$0xff] %v4694_v57  ;;  %v7487_v60 = vpop.permute.xlu0 %7486 }
 0x751   :  { %v4701_v23 = vpack.c.bf16 %v4682_v32, %v4681_v25  ;;  %v7488_v36 = vunpack.i.l.bf16 %v7487_v60  ;;  %v7489_v47 = vunpack.i.h.bf16 %v7487_v60  ;;  %v4626_v60 = vsel %vm239_vm1, %v7498_v9, %v7499_v24 }
 0x753   :  { %4716 = vst [vmem:[#allocation7 + $0x34] sm:$0xff] %v4701_v23  ;;  %v4620_v6 = vsel %vm239_vm1, %v7473_v3, %v7488_v36  ;;  %v4621_v42 = vsel %vm239_vm1, %v7488_v36, %v7478_v48  ;;  %v4632_v11 = vsel %vm239_vm1, %v7484_v18, %v7489_v47 }
 0x754   :  { %v4670_v33 = vmax.f32 %v10059_v50, %v4620_v6  ;;  %v4671_v16 = vmax.f32 %v10090_v43, %v4621_v42  ;;  %v4683_v37 = vmax.f32 %v10073_v41, %v4632_v11 }
 0x756   :  { %v4695_v13 = vpack.c.bf16 %v4671_v16, %v4670_v33 }
 0x757   :  { %v4877_v8 = vld [vmem:[#allocation7 + $0x4] sm:$0xf]  ;;  %v4789_v59 = vld [vmem:[#allocation7] sm:$0xf] }
 0x758   :  { %v4853_v35 = vld [vmem:[#allocation7 + $0x4] sm:$0xf]  ;;  %4709 = vst [vmem:[#allocation7 + $0x8] sm:$0xff] %v4695_v13  ;;  %v7492_v12 = vpop.permute.xlu0 %7491  ;;  %4881 = vrot.lane.b32.xlu2 %v4877_v8, %s7543_s0  ;;  %4793 = vrot.lane.b32.xlu1 %v4789_v59, %s7544_s4  ;;  %v4723_v39 = vld [vmem:[#allocation7] sm:$0xf] }
 0x759   :  { %4857 = vrot.lane.b32.xlu0 %v4853_v35, %s7541_s27  ;;  %v7494_v28 = vunpack.i.h.bf16 %v7492_v12  ;;  %v7493_v55 = vunpack.i.l.bf16 %v7492_v12  ;;  %v4837_v61 = vld [vmem:[#allocation7 + $0x4] sm:$0xf]  ;;  %4726 = vst.msk [vmem:[#allocation8] sm:$0xf] %vm4725_vm2, %v4723_v39  ;;  %v4741_v57 = vld [vmem:[#allocation7] sm:$0xf] }
 0x75a   :  { %4839 = vst.msk [vmem:[#allocation8 + $0x28] sm:$0xf] %vm4725_vm2, %v4837_v61  ;;  %v4838_v5 = vld [vmem:[#allocation7 + $0x38] sm:$0xf]  ;;  %v4790_v61 = vld [vmem:[#allocation7 + $0x34] sm:$0xf] }
 0x75b   :  { %v7502_v27 = vpop.permute.xlu1 %7501  ;;  %v4623_v52 = vsel %vm239_vm1, %v7479_v56, %v7493_v55  ;;  %v4633_v1 = vsel %vm239_vm1, %v7489_v47, %v7494_v28  ;;  %4840 = vst.msk [vmem:[#allocation8 + $0x2c] sm:$0xf] %vm4725_vm2, %v4838_v5  ;;  %v4854_v23 = vld [vmem:[#allocation7 + $0x38] sm:$0xf] }
 0x75c   :  { %v7504_v50 = vunpack.i.h.bf16 %v7502_v27  ;;  %v7503_v43 = vunpack.i.l.bf16 %v7502_v27  ;;  %v4673_v26 = vmax.f32 %v10102_v44, %v4623_v52  ;;  %v4684_v46 = vmax.f32 %v10084_v54, %v4633_v1  ;;  %v4813_v44 = vld [vmem:[#allocation7] sm:$0xf]  ;;  %v4814_v52 = vld [vmem:[#allocation7 + $0x34] sm:$0xf] }
 0x75d   :  { %v4765_v54 = vld [vmem:[#allocation7] sm:$0xf] }
 0x75e   :  { %v4634_v40 = vsel %vm239_vm1, %v7494_v28, %v7503_v43  ;;  %v4635_v58 = vsel %vm239_vm1, %v7503_v43, %v7504_v50  ;;  %v4696_v3 = vpack.c.bf16 %v4673_v26, %v4672_v63  ;;  %v4702_v49 = vpack.c.bf16 %v4684_v46, %v4683_v37  ;;  %v4766_v26 = vld [vmem:[#allocation7 + $0x34] sm:$0xf] }
 0x75f   :  { %v4685_v21 = vmax.f32 %v10116_v2, %v4634_v40  ;;  %v4686_v41 = vmax.f32 %v10122_v7, %v4635_v58  ;;  %v5101_v10 = vld [vmem:[#allocation7 + $0xc] sm:$0xf]  ;;  %v4724_v7 = vld [vmem:[#allocation7 + $0x34] sm:$0xf]  ;;  %v4949_v38 = vld [vmem:[#allocation7 + $0x8] sm:$0xf] }
 0x760   :  { %4710 = vst [vmem:[#allocation7 + $0x10] sm:$0xff] %v4696_v3  ;;  %4769 = vrot.lane.b32.xlu2 %v4765_v54, %s7543_s0  ;;  %5105 = vrot.lane.b32.xlu1 %v5101_v10, %s7543_s0  ;;  %v5061_v2 = vld [vmem:[#allocation7 + $0xc] sm:$0xf] }
 0x761   :  { %v4703_v18 = vpack.c.bf16 %v4686_v41, %v4685_v21  ;;  %4817 = vrot.lane.b32.xlu0 %v4813_v44, %s7545_s19  ;;  %4717 = vst [vmem:[#allocation7 + $0x3c] sm:$0xff] %v4702_v49  ;;  %v5149_v34 = vld [vmem:[#allocation7 + $0xc] sm:$0xf] }
 0x762   :  { %5063 = vst.msk [vmem:[#allocation8 + $0x78] sm:$0xf] %vm4725_vm2, %v5061_v2  ;;  %v5077_v63 = vld [vmem:[#allocation7 + $0xc] sm:$0xf] }
 0x763   :  { %4718 = vst [vmem:[#allocation7 + $0x44] sm:$0xff] %v4703_v18  ;;  %v5125_v37 = vld [vmem:[#allocation7 + $0xc] sm:$0xf] }
 0x764   :  { %4727 = vst.msk [vmem:[#allocation8 + $0x4] sm:$0xf] %vm4725_vm2, %v4724_v7 }
 0x765   :  { %v10229_v31 = vpop.permute.xlu2 %7511  ;;  %4951 = vst.msk [vmem:[#allocation8 + $0x50] sm:$0xf] %vm4725_vm2, %v4949_v38 }
 0x766   :  { %v7514_v25 = vunpack.i.h.bf16 %v10229_v31  ;;  %v7513_v32 = vunpack.i.l.bf16 %v10229_v31 }
 0x767   :  { %v5173_v35 = vld [vmem:[#allocation7 + $0x10] sm:$0xf] }
 0x768   :  { %5153 = vrot.lane.b32.xlu2 %v5149_v34, %s7545_s19  ;;  %v4693_v48 = vmax.f32 %v10174_v62, %v7514_v25  ;;  %v4680_v36 = vmax.f32 %v10178_v4, %v7513_v32  ;;  %v7507_v6 = vpop.permute.xlu0 %7506  ;;  %v7517_v42 = vpop.permute.xlu1 %7516  ;;  %4859 = vrot.lane.b32.xlu1 %v4854_v23, %s7541_s27  ;;  %5175 = vst.msk [vmem:[#allocation8 + $0xa0] sm:$0xf] %vm4725_vm2, %v5173_v35  ;;  %v5062_v27 = vld [vmem:[#allocation7 + $0x40] sm:$0xf]  ;;  %v5213_v7 = vld [vmem:[#allocation7 + $0x10] sm:$0xf] }
 0x769   :  { %4745 = vrot.lane.b32.xlu0 %v4741_v57, %s7541_s27  ;;  %v7509_v56 = vunpack.i.h.bf16 %v7507_v6  ;;  %v7508_v47 = vunpack.i.l.bf16 %v7507_v6  ;;  %v7519_v33 = vunpack.i.h.bf16 %v7517_v42  ;;  %v7518_v16 = vunpack.i.l.bf16 %v7517_v42  ;;  %5064 = vst.msk [vmem:[#allocation8 + $0x7c] sm:$0xf] %vm4725_vm2, %v5062_v27  ;;  %v5126_v58 = vld [vmem:[#allocation7 + $0x40] sm:$0xf]  ;;  %v5237_v31 = vld [vmem:[#allocation7 + $0x10] sm:$0xf] }
 0x76a   :  { %v4707_v13 = vpack.c.bf16 %v4693_v48, %v4693_v48  ;;  %v4700_v8 = vpack.c.bf16 %v4680_v36, %v4680_v36  ;;  %v4676_v4 = vmax.f32 %v10134_v30, %v4626_v60  ;;  %v5174_v55 = vld [vmem:[#allocation7 + $0x44] sm:$0xf]  ;;  %v4950_v30 = vld [vmem:[#allocation7 + $0x3c] sm:$0xf]  ;;  %v5102_v5 = vld [vmem:[#allocation7 + $0x40] sm:$0xf] }
 0x76b   :  { %v4627_v59 = vsel %vm239_vm1, %v7499_v24, %v7508_v47  ;;  %v4638_v15 = vsel %vm239_vm1, %v7509_v56, %v7518_v16  ;;  %v4639_v62 = vsel %vm239_vm1, %v7518_v16, %v7519_v33  ;;  %5176 = vst.msk [vmem:[#allocation8 + $0xa4] sm:$0xf] %vm4725_vm2, %v5174_v55  ;;  %v5150_v2 = vld [vmem:[#allocation7 + $0x40] sm:$0xf]  ;;  %v5190_v34 = vld [vmem:[#allocation7 + $0x44] sm:$0xf] }
 0x76c   :  { %4722 = vst.msk [vmem:[#allocation7 + $0x64] sm:$0xf] %vm4714_vm3, %v4707_v13  ;;  %v4677_v11 = vmax.f32 %v10138_v51, %v4627_v59  ;;  %v4689_v12 = vmax.f32 %v10164_v0, %v4638_v15  ;;  %v4690_v28 = vmax.f32 %v10160_v14, %v4639_v62  ;;  %v5037_v51 = vld [vmem:[#allocation7 + $0x8] sm:$0xf]  ;;  %v4878_v14 = vld [vmem:[#allocation7 + $0x38] sm:$0xf] }
 0x76d   :  { %4715 = vst.msk [vmem:[#allocation7 + $0x30] sm:$0xf] %vm4714_vm3, %v4700_v8  ;;  %v4742_v0 = vld [vmem:[#allocation7 + $0x34] sm:$0xf]  ;;  %v5078_v38 = vld [vmem:[#allocation7 + $0x40] sm:$0xf] }
 0x76e   :  { %v4698_v50 = vpack.c.bf16 %v4677_v11, %v4676_v4  ;;  %v4705_v43 = vpack.c.bf16 %v4690_v28, %v4689_v12  ;;  %4952 = vst.msk [vmem:[#allocation8 + $0x54] sm:$0xf] %vm4725_vm2, %v4950_v30 }
 0x770   :  { %5081 = vrot.lane.b32.xlu2 %v5077_v63, %s7541_s27  ;;  %4712 = vst [vmem:[#allocation7 + $0x20] sm:$0xff] %v4698_v50  ;;  %4819 = vrot.lane.b32.xlu1 %v4814_v52, %s7545_s19 }
 0x771   :  { %5129 = vrot.lane.b32.xlu0 %v5125_v37, %s7544_s4  ;;  %4720 = vst [vmem:[#allocation7 + $0x54] sm:$0xff] %v4705_v43 }
 0x773   :  { %v5202_v35 = vld [vmem:[#allocation7 + $0x64] sm:$0xf] }
 0x774   :  { %v5201_v24 = vld [vmem:[#allocation7 + $0x30] sm:$0xf]  ;;  %v5226_v55 = vld [vmem:[#allocation7 + $0x64] sm:$0xf] }
 0x775   :  { %v5249_v9 = vld [vmem:[#allocation7 + $0x30] sm:$0xf]  ;;  %v5250_v37 = vld [vmem:[#allocation7 + $0x64] sm:$0xf] }
 0x776   :  { %v5225_v60 = vld [vmem:[#allocation7 + $0x30] sm:$0xf]  ;;  %v5178_v52 = vld [vmem:[#allocation7 + $0x64] sm:$0xf] }
 0x777   :  { %v4841_v57 = vld [vmem:[#allocation7 + $0x24] sm:$0xf]  ;;  %v4825_v23 = vld [vmem:[#allocation7 + $0x20] sm:$0xf]  ;;  %v5177_v42 = vld [vmem:[#allocation7 + $0x30] sm:$0xf] }
 0x778   :  { %5041 = vrot.lane.b32.xlu2 %v5037_v51, %s7545_s19  ;;  %4747 = vrot.lane.b32.xlu1 %v4742_v0, %s7541_s27  ;;  %v4777_v48 = vld [vmem:[#allocation7 + $0x20] sm:$0xf]  ;;  %v4890_v12 = vld [vmem:[#allocation7 + $0x58] sm:$0xf]  ;;  %v4778_v0 = vld [vmem:[#allocation7 + $0x54] sm:$0xf] }
 0x779   :  { %4883 = vrot.lane.b32.xlu0 %v4878_v14, %s7543_s0  ;;  %v4753_v6 = vld [vmem:[#allocation7 + $0x20] sm:$0xf]  ;;  %v4842_v63 = vld [vmem:[#allocation7 + $0x58] sm:$0xf] }
 0x77a   :  { %v4728_v56 = vld [vmem:[#allocation7 + $0x20] sm:$0xf] }
 0x77b   :  { %v4801_v16 = vld [vmem:[#allocation7 + $0x20] sm:$0xf] }
 0x77e   :  { %v7522_v1 = vpop.permute.xlu1 %7521 }
 0x77f   :  { %v7524_v46 = vunpack.i.h.bf16 %v7522_v1  ;;  %v7523_v40 = vunpack.i.l.bf16 %v7522_v1  ;;  %v4866_v1 = vld [vmem:[#allocation7 + $0x58] sm:$0xf] }
 0x780   :  { %4795 = vrot.lane.b32.xlu2 %v4790_v61, %s7544_s4  ;;  %5131 = vrot.lane.b32.xlu1 %v5126_v58, %s7544_s4  ;;  %v4802_v61 = vld [vmem:[#allocation7 + $0x54] sm:$0xf] }
 0x781   :  { %4771 = vrot.lane.b32.xlu0 %v4766_v26, %s7543_s0  ;;  %v4628_v39 = vsel %vm239_vm1, %v7508_v47, %v7523_v40  ;;  %v4629_v21 = vsel %vm239_vm1, %v7523_v40, %v7513_v32  ;;  %v4640_v41 = vsel %vm239_vm1, %v7519_v33, %v7524_v46  ;;  %v4641_v45 = vsel %vm239_vm1, %v7524_v46, %v7514_v25  ;;  %v4889_v25 = vld [vmem:[#allocation7 + $0x24] sm:$0xf] }
 0x782   :  { %v4678_v3 = vmax.f32 %v10156_v19, %v4628_v39  ;;  %v4679_v49 = vmax.f32 %v10186_v20, %v4629_v21  ;;  %v4691_v18 = vmax.f32 %v10152_v29, %v4640_v41  ;;  %v4692_v44 = vmax.f32 %v10182_v22, %v4641_v45  ;;  %v5189_v19 = vld [vmem:[#allocation7 + $0x10] sm:$0xf]  ;;  %v5238_v20 = vld [vmem:[#allocation7 + $0x44] sm:$0xf]  ;;  %v5038_v22 = vld [vmem:[#allocation7 + $0x3c] sm:$0xf] }
 0x783   :  { %v5214_v29 = vld [vmem:[#allocation7 + $0x44] sm:$0xf]  ;;  %v4826_v39 = vld [vmem:[#allocation7 + $0x54] sm:$0xf]  ;;  %vm4738_vm1 = vcmask 11272  }
 0x784   :  { %v4699_v10 = vpack.c.bf16 %v4679_v49, %v4678_v3  ;;  %v4706_v54 = vpack.c.bf16 %v4692_v44, %v4691_v18  ;;  %v4865_v32 = vld [vmem:[#allocation7 + $0x24] sm:$0xf]  ;;  %v4990_v49 = vld [vmem:[#allocation7 + $0x3c] sm:$0xf]  ;;  %v4754_v18 = vld [vmem:[#allocation7 + $0x54] sm:$0xf] }
 0x785   :  { %v5014_v44 = vld [vmem:[#allocation7 + $0x3c] sm:$0xf] }
 0x786   :  { %4713 = vst [vmem:[#allocation7 + $0x28] sm:$0xff] %v4699_v10 }
 0x787   :  { %4721 = vst [vmem:[#allocation7 + $0x5c] sm:$0xff] %v4706_v54 }
 0x788   :  { %5107 = vrot.lane.b32.xlu2 %v5102_v5, %s7543_s0  ;;  %5217 = vrot.lane.b32.xlu1 %v5213_v7, %s7543_s0  ;;  %v5013_v7 = vld [vmem:[#allocation7 + $0x8] sm:$0xf] }
 0x789   :  { %5155 = vrot.lane.b32.xlu0 %v5150_v2, %s7545_s19  ;;  %v4729_v2 = vld [vmem:[#allocation7 + $0x54] sm:$0xf] }
 0x78d   :  { %v5137_v33 = vld [vmem:[#allocation7 + $0x2c] sm:$0xf]  ;;  %v5025_v58 = vld [vmem:[#allocation7 + $0x28] sm:$0xf] }
 0x78e   :  { %v5161_v13 = vld [vmem:[#allocation7 + $0x2c] sm:$0xf]  ;;  %v5049_v21 = vld [vmem:[#allocation7 + $0x28] sm:$0xf] }
 0x78f   :  { %v5113_v59 = vld [vmem:[#allocation7 + $0x2c] sm:$0xf] }
 0x790   :  { %5193 = vrot.lane.b32.xlu2 %v5189_v19, %s7541_s27  ;;  %5243 = vrot.lane.b32.xlu1 %v5238_v20, %s7544_s4  ;;  %v5089_v15 = vld [vmem:[#allocation7 + $0x2c] sm:$0xf]  ;;  %v4989_v19 = vld [vmem:[#allocation7 + $0x8] sm:$0xf] }
 0x791   :  { %5083 = vrot.lane.b32.xlu0 %v5078_v38, %s7541_s27  ;;  %v5065_v28 = vld [vmem:[#allocation7 + $0x2c] sm:$0xf] }
 0x798   :  { %5219 = vrot.lane.b32.xlu2 %v5214_v29, %s7543_s0  ;;  %5205 = vrot.lane.b32.xlu1 %v5201_v24, %s7540_s22  ;;  %v5001_v24 = vld [vmem:[#allocation7 + $0x28] sm:$0xf] }
 0x799   :  { %5043 = vrot.lane.b32.xlu0 %v5038_v22, %s7545_s19  ;;  %v4965_v22 = vld [vmem:[#allocation7 + $0x8] sm:$0xf] }
 0x7a0   :  { %5253 = vrot.lane.b32.xlu2 %v5249_v9, %s7546_s14  ;;  %4893 = vrot.lane.b32.xlu1 %v4889_v25, %s7547_s2  ;;  %v4977_v9 = vld [vmem:[#allocation7 + $0x28] sm:$0xf] }
 0x7a1   :  { %5241 = vrot.lane.b32.xlu0 %v5237_v31, %s7544_s4 }
 0x7a8   :  { %4869 = vrot.lane.b32.xlu2 %v4865_v32, %s7540_s22  ;;  %4845 = vrot.lane.b32.xlu1 %v4841_v57, %s7548_s15  ;;  %v4966_v57 = vld [vmem:[#allocation7 + $0x3c] sm:$0xf] }
 0x7a9   :  { %5195 = vrot.lane.b32.xlu0 %v5190_v34, %s7541_s27  ;;  %v5162_v34 = vld [vmem:[#allocation7 + $0x60] sm:$0xf] }
 0x7b0   :  { %4829 = vrot.lane.b32.xlu2 %v4825_v23, %s7549_s1  ;;  %4781 = vrot.lane.b32.xlu1 %v4777_v48, %s7547_s2  ;;  %v5114_v23 = vld [vmem:[#allocation7 + $0x60] sm:$0xf] }
 0x7b1   :  { %5229 = vrot.lane.b32.xlu0 %v5225_v60, %s7547_s2 }
 0x7b2   :  { %v4882_v36 = vpop.permute.xlu2 %4881 }
 0x7b3   :  { %4887 = vst.msk [vmem:[#allocation8 + $0x38] sm:$0xf] %vm4725_vm2, %v4882_v36 }
 0x7b8   :  { %4757 = vrot.lane.b32.xlu2 %v4753_v6, %s7540_s22  ;;  %4732 = vrot.lane.b32.xlu1 %v4728_v56, %s7548_s15  ;;  %v4925_v6 = vld [vmem:[#allocation7 + $0x4] sm:$0xf]  ;;  %v5066_v56 = vld [vmem:[#allocation7 + $0x60] sm:$0xf] }
 0x7b9   :  { %5181 = vrot.lane.b32.xlu0 %v5177_v42, %s7548_s15  ;;  %v5138_v42 = vld [vmem:[#allocation7 + $0x60] sm:$0xf] }
 0x7ba   :  { %v4770_v47 = vpop.permute.xlu2 %4769 }
 0x7bb   :  { %4775 = vst.msk [vmem:[#allocation8 + $0x10] sm:$0xf] %vm4725_vm2, %v4770_v47 }
 0x7c0   :  { %5141 = vrot.lane.b32.xlu2 %v5137_v33, %s7546_s14  ;;  %5165 = vrot.lane.b32.xlu1 %v5161_v13, %s7549_s1  ;;  %v5090_v13 = vld [vmem:[#allocation7 + $0x60] sm:$0xf] }
 0x7c1   :  { %4805 = vrot.lane.b32.xlu0 %v4801_v16, %s7546_s14 }
 0x7c2   :  { %v5154_v8 = vpop.permute.xlu2 %5153 }
 0x7c3   :  { %5159 = vst.msk [vmem:[#allocation8 + $0x98] sm:$0xf] %vm4725_vm2, %v5154_v8  ;;  %v4953_v8 = vld [vmem:[#allocation7 + $0x28] sm:$0xf] }
 0x7c8   :  { %5207 = vrot.lane.b32.xlu2 %v5202_v35, %s7540_s22  ;;  %5093 = vrot.lane.b32.xlu1 %v5089_v15, %s7540_s22  ;;  %v4937_v35 = vld [vmem:[#allocation7 + $0x24] sm:$0xf] }
 0x7c9   :  { %5117 = vrot.lane.b32.xlu0 %v5113_v59, %s7547_s2 }
 0x7ca   :  { %v5082_v4 = vpop.permute.xlu2 %5081  ;;  %v4794_v11 = vpop.permute.xlu1 %4793 }
 0x7cb   :  { %v4858_v62 = vpop.permute.xlu0 %4857  ;;  %4799 = vst.msk [vmem:[#allocation8 + $0x18] sm:$0xf] %vm4725_vm2, %v4794_v11  ;;  %v5026_v11 = vld [vmem:[#allocation7 + $0x5c] sm:$0xf] }
 0x7cc   :  { %4863 = vst.msk [vmem:[#allocation8 + $0x30] sm:$0xf] %vm4725_vm2, %v4858_v62 }
 0x7cd   :  { %5087 = vst.msk [vmem:[#allocation8 + $0x80] sm:$0xf] %vm4725_vm2, %v5082_v4  ;;  %v5050_v4 = vld [vmem:[#allocation7 + $0x5c] sm:$0xf] }
 0x7d0   :  { %4895 = vrot.lane.b32.xlu2 %v4890_v12, %s7547_s2  ;;  %5231 = vrot.lane.b32.xlu1 %v5226_v55, %s7547_s2  ;;  %v5002_v12 = vld [vmem:[#allocation7 + $0x5c] sm:$0xf] }
 0x7d1   :  { %5069 = vrot.lane.b32.xlu0 %v5065_v28, %s7548_s15 }
 0x7d2   :  { %v5042_v50 = vpop.permute.xlu2 %5041  ;;  %v5106_v43 = vpop.permute.xlu1 %5105 }
 0x7d3   :  { %v4818_v27 = vpop.permute.xlu0 %4817  ;;  %5111 = vst.msk [vmem:[#allocation8 + $0x88] sm:$0xf] %vm4725_vm2, %v5106_v43  ;;  %v4926_v43 = vld [vmem:[#allocation7 + $0x38] sm:$0xf] }
 0x7d4   :  { %4823 = vst.msk [vmem:[#allocation8 + $0x20] sm:$0xf] %vm4725_vm2, %v4818_v27 }
 0x7d5   :  { %5047 = vst.msk [vmem:[#allocation8 + $0x70] sm:$0xf] %vm4725_vm2, %v5042_v50  ;;  %v4978_v50 = vld [vmem:[#allocation7 + $0x5c] sm:$0xf] }
 0x7d8   :  { %4847 = vrot.lane.b32.xlu2 %v4842_v63, %s7548_s15  ;;  %5183 = vrot.lane.b32.xlu1 %v5178_v52, %s7548_s15  ;;  %v4954_v63 = vld [vmem:[#allocation7 + $0x5c] sm:$0xf] }
 0x7d9   :  { %5255 = vrot.lane.b32.xlu0 %v5250_v37, %s7546_s14 }
 0x7da   :  { %v4796_v30 = vpop.permute.xlu2 %4795  ;;  %v4860_v14 = vpop.permute.xlu1 %4859 }
 0x7db   :  { %v4746_v51 = vpop.permute.xlu0 %4745  ;;  %4800 = vst.msk [vmem:[#allocation8 + $0x1c] sm:$0xf] %vm4725_vm2, %v4796_v30 }
 0x7dc   :  { %4864 = vst.msk [vmem:[#allocation8 + $0x34] sm:$0xf] %vm4725_vm2, %v4860_v14  ;;  %v4901_v14 = vld [vmem:[#allocation7 + $0x4] sm:$0xf] }
 0x7dd   :  { %4751 = vst.msk [vmem:[#allocation8 + $0x8] sm:$0xf] %vm4725_vm2, %v4746_v51  ;;  %v4938_v51 = vld [vmem:[#allocation7 + $0x58] sm:$0xf] }
 0x7e0   :  { %4783 = vrot.lane.b32.xlu2 %v4778_v0, %s7547_s2  ;;  %4807 = vrot.lane.b32.xlu1 %v4802_v61, %s7546_s14  ;;  %v4902_v0 = vld [vmem:[#allocation7 + $0x38] sm:$0xf] }
 0x7e1   :  { %4871 = vrot.lane.b32.xlu0 %v4866_v1, %s7540_s22 }
 0x7e2   :  { %v5108_v26 = vpop.permute.xlu2 %5107  ;;  %v4820_v40 = vpop.permute.xlu1 %4819 }
 0x7e3   :  { %v5130_v46 = vpop.permute.xlu0 %5129  ;;  %5112 = vst.msk [vmem:[#allocation8 + $0x8c] sm:$0xf] %vm4725_vm2, %v5108_v26 }
 0x7e4   :  { %4824 = vst.msk [vmem:[#allocation8 + $0x24] sm:$0xf] %vm4725_vm2, %v4820_v40  ;;  %v4913_v40 = vld [vmem:[#allocation7 + $0x24] sm:$0xf] }
 0x7e5   :  { %5135 = vst.msk [vmem:[#allocation8 + $0x90] sm:$0xf] %vm4725_vm2, %v5130_v46 }
 0x7e8   :  { %5029 = vrot.lane.b32.xlu2 %v5025_v58, %s7546_s14  ;;  %5053 = vrot.lane.b32.xlu1 %v5049_v21, %s7549_s1  ;;  %v4914_v58 = vld [vmem:[#allocation7 + $0x58] sm:$0xf] }
 0x7e9   :  { %4831 = vrot.lane.b32.xlu0 %v4826_v39, %s7549_s1  ;;  %v5261_v39 = vld [vmem:[#allocation7 + $0x10] sm:$0xf] }
 0x7ea   :  { %v5194_v41 = vpop.permute.xlu2 %5193  ;;  %v4748_v3 = vpop.permute.xlu1 %4747 }
 0x7eb   :  { %v4884_v45 = vpop.permute.xlu0 %4883  ;;  %5199 = vst.msk [vmem:[#allocation8 + $0xa8] sm:$0xf] %vm4725_vm2, %v5194_v41 }
 0x7ec   :  { %4752 = vst.msk [vmem:[#allocation8 + $0xc] sm:$0xf] %vm4725_vm2, %v4748_v3  ;;  %v5262_v3 = vld [vmem:[#allocation7 + $0x44] sm:$0xf] }
 0x7ed   :  { %4888 = vst.msk [vmem:[#allocation8 + $0x3c] sm:$0xf] %vm4725_vm2, %v4884_v45 }
 0x7f0   :  { %4995 = vrot.lane.b32.xlu2 %v4990_v49, %s7543_s0  ;;  %5019 = vrot.lane.b32.xlu1 %v5014_v44, %s7544_s4  ;;  %v5273_v49 = vld [vmem:[#allocation7 + $0x30] sm:$0xf] }
 0x7f1   :  { %4759 = vrot.lane.b32.xlu0 %v4754_v18, %s7540_s22  ;;  %v5274_v18 = vld [vmem:[#allocation7 + $0x64] sm:$0xf] }
 0x7f2   :  { %v5220_v10 = vpop.permute.xlu2 %5219  ;;  %v5132_v5 = vpop.permute.xlu1 %5131 }
 0x7f3   :  { %v4772_v54 = vpop.permute.xlu0 %4771  ;;  %5224 = vst.msk [vmem:[#allocation8 + $0xb4] sm:$0xf] %vm4725_vm2, %v5220_v10 }
 0x7f4   :  { %5136 = vst.msk [vmem:[#allocation8 + $0x94] sm:$0xf] %vm4725_vm2, %v5132_v5  ;;  %v5381_v5 = vld [vmem:[%s11003_s6 + $0x70] sm:$0xff] }
 0x7f5   :  { %4776 = vst.msk [vmem:[#allocation8 + $0x14] sm:$0xf] %vm4725_vm2, %v4772_v54 }
 0x7f8   :  { %4734 = vrot.lane.b32.xlu2 %v4729_v2, %s7548_s15  ;;  %4993 = vrot.lane.b32.xlu1 %v4989_v19, %s7543_s0  ;;  %v5382_v2 = vld [vmem:[%s11003_s6 + $0x78] sm:$0xff] }
 0x7f9   :  { %5017 = vrot.lane.b32.xlu0 %v5013_v7, %s7544_s4  ;;  %v5379_v7 = vld [vmem:[%s11003_s6 + $0x60] sm:$0xff] }
 0x7fa   :  { %v5254_v38 = vpop.permute.xlu2 %5253  ;;  %v5218_v29 = vpop.permute.xlu1 %5217 }
 0x7fb   :  { %v5156_v20 = vpop.permute.xlu0 %5155  ;;  %5223 = vst.msk [vmem:[#allocation8 + $0xb0] sm:$0xf] %vm4725_vm2, %v5218_v29  ;;  %v5380_v29 = vld [vmem:[%s11003_s6 + $0x68] sm:$0xff] }
 0x7fc   :  { %5160 = vst.msk [vmem:[#allocation8 + $0x9c] sm:$0xf] %vm4725_vm2, %v5156_v20 }
 0x800   :  { %4969 = vrot.lane.b32.xlu2 %v4965_v22, %s7541_s27  ;;  %4981 = vrot.lane.b32.xlu1 %v4977_v9, %s7540_s22  ;;  %v5377_v22 = vld [vmem:[%s11003_s6 + $0x50] sm:$0xff] }
 0x801   :  { %5005 = vrot.lane.b32.xlu0 %v5001_v24, %s7547_s2  ;;  %v5378_v24 = vld [vmem:[%s11003_s6 + $0x58] sm:$0xff] }
 0x802   :  { %v4870_v31 = vpop.permute.xlu2 %4869  ;;  %v5244_v32 = vpop.permute.xlu1 %5243 }
 0x803   :  { %v5084_v25 = vpop.permute.xlu0 %5083  ;;  %4875 = vst.msk [vmem:[#allocation8 + $0x30] sm:$0xf] %vm4738_vm1, %v4870_v31 }
 0x804   :  { %5248 = vst.msk [vmem:[#allocation8 + $0xbc] sm:$0xf] %vm4725_vm2, %v5244_v32 }
 0x805   :  { %5088 = vst.msk [vmem:[#allocation8 + $0x84] sm:$0xf] %vm4725_vm2, %v5084_v25 }
 0x808   :  { %5167 = vrot.lane.b32.xlu2 %v5162_v34, %s7549_s1  ;;  %5119 = vrot.lane.b32.xlu1 %v5114_v23, %s7547_s2  ;;  %v5375_v34 = vld [vmem:[%s11003_s6 + $0x40] sm:$0xff]  ;;  %v5373_v23 = vld [vmem:[%s11003_s6 + $0x30] sm:$0xff] }
 0x809   :  { %4971 = vrot.lane.b32.xlu0 %v4966_v57, %s7541_s27  ;;  %v5376_v57 = vld [vmem:[%s11003_s6 + $0x48] sm:$0xff] }
 0x80a   :  { %v4830_v60 = vpop.permute.xlu2 %4829  ;;  %v5206_v36 = vpop.permute.xlu1 %5205 }
 0x80b   :  { %v5044_v48 = vpop.permute.xlu0 %5043  ;;  %4835 = vst.msk [vmem:[#allocation8 + $0x20] sm:$0xf] %vm4738_vm1, %v4830_v60 }
 0x80c   :  { %5211 = vst.msk [vmem:[#allocation8 + $0xa8] sm:$0xf] %vm4738_vm1, %v5206_v36 }
 0x80d   :  { %5048 = vst.msk [vmem:[#allocation8 + $0x74] sm:$0xf] %vm4725_vm2, %v5044_v48 }
 0x810   :  { %4929 = vrot.lane.b32.xlu2 %v4925_v6, %s7545_s19  ;;  %5071 = vrot.lane.b32.xlu1 %v5066_v56, %s7548_s15 }
 0x811   :  { %5143 = vrot.lane.b32.xlu0 %v5138_v42, %s7546_s14 }
 0x812   :  { %v4758_v47 = vpop.permute.xlu2 %4757  ;;  %v4894_v16 = vpop.permute.xlu1 %4893 }
 0x813   :  { %v5242_v33 = vpop.permute.xlu0 %5241  ;;  %4763 = vst.msk [vmem:[#allocation8 + $0x8] sm:$0xf] %vm4738_vm1, %v4758_v47  ;;  %v5374_v47 = vld [vmem:[%s11003_s6 + $0x38] sm:$0xff] }
 0x814   :  { %4899 = vst.msk [vmem:[#allocation8 + $0x38] sm:$0xf] %vm4738_vm1, %v4894_v16  ;;  %v5372_v16 = vld [vmem:[%s11003_s6 + $0x28] sm:$0xff] }
 0x815   :  { %5247 = vst.msk [vmem:[#allocation8 + $0xb8] sm:$0xf] %vm4725_vm2, %v5242_v33  ;;  %v5371_v33 = vld [vmem:[%s11003_s6 + $0x20] sm:$0xff] }
 0x816   :  { %5259 = vst.msk [vmem:[#allocation8 + $0xb8] sm:$0xf] %vm4738_vm1, %v5254_v38 }
 0x818   :  { %5095 = vrot.lane.b32.xlu2 %v5090_v13, %s7540_s22  ;;  %4941 = vrot.lane.b32.xlu1 %v4937_v35, %s7549_s1 }
 0x819   :  { %4957 = vrot.lane.b32.xlu0 %v4953_v8, %s7548_s15 }
 0x81a   :  { %v5142_v59 = vpop.permute.xlu2 %5141  ;;  %v4846_v62 = vpop.permute.xlu1 %4845 }
 0x81b   :  { %v5196_v15 = vpop.permute.xlu0 %5195  ;;  %5147 = vst.msk [vmem:[#allocation8 + $0x90] sm:$0xf] %vm4738_vm1, %v5142_v59 }
 0x81c   :  { %4851 = vst.msk [vmem:[#allocation8 + $0x28] sm:$0xf] %vm4738_vm1, %v4846_v62 }
 0x81d   :  { %5200 = vst.msk [vmem:[#allocation8 + $0xac] sm:$0xf] %vm4725_vm2, %v5196_v15 }
 0x820   :  { %5055 = vrot.lane.b32.xlu2 %v5050_v4, %s7549_s1  ;;  %5007 = vrot.lane.b32.xlu1 %v5002_v12, %s7547_s2  ;;  %v5369_v4 = vld [vmem:[%s11003_s6 + $0x10] sm:$0xff]  ;;  %v5367_v12 = vld [vmem:[%s11003_s6] sm:$0xff] }
 0x821   :  { %5031 = vrot.lane.b32.xlu0 %v5026_v11, %s7546_s14  ;;  %v5370_v11 = vld [vmem:[%s11003_s6 + $0x18] sm:$0xff] }
 0x822   :  { %v5208_v28 = vpop.permute.xlu2 %5207  ;;  %v4782_v27 = vpop.permute.xlu1 %4781 }
 0x823   :  { %v5230_v55 = vpop.permute.xlu0 %5229  ;;  %5212 = vst.msk [vmem:[#allocation8 + $0xac] sm:$0xf] %vm4738_vm1, %v5208_v28 }
 0x824   :  { %4787 = vst.msk [vmem:[#allocation8 + $0x10] sm:$0xf] %vm4738_vm1, %v4782_v27 }
 0x825   :  { %5235 = vst.msk [vmem:[#allocation8 + $0xb0] sm:$0xf] %vm4738_vm1, %v5230_v55 }
 0x828   :  { %4983 = vrot.lane.b32.xlu2 %v4978_v50, %s7540_s22  ;;  %4959 = vrot.lane.b32.xlu1 %v4954_v63, %s7548_s15 }
 0x829   :  { %4931 = vrot.lane.b32.xlu0 %v4926_v43, %s7545_s19 }
 0x82a   :  { %v4896_v37 = vpop.permute.xlu2 %4895  ;;  %v4733_v30 = vpop.permute.xlu1 %4732  ;;  %v7283_v56 = vld [vmem:[#allocation8 + $0xa8] sm:$0xff] }
 0x82b   :  { %v5182_v52 = vpop.permute.xlu0 %5181  ;;  %4900 = vst.msk [vmem:[#allocation8 + $0x3c] sm:$0xf] %vm4738_vm1, %v4896_v37  ;;  %v5368_v37 = vld [vmem:[%s11003_s6 + $0x8] sm:$0xff] }
 0x82c   :  { %4739 = vst.msk [vmem:[#allocation8] sm:$0xf] %vm4738_vm1, %v4733_v30  ;;  %v6041_v30 = vld [vmem:[%s11004_s8 + $0x78] sm:$0xff] }
 0x82d   :  { %5187 = vst.msk [vmem:[#allocation8 + $0xa0] sm:$0xf] %vm4738_vm1, %v5182_v52  ;;  %v6040_v52 = vld [vmem:[%s11004_s8 + $0x70] sm:$0xff] }
 0x830   :  { %4943 = vrot.lane.b32.xlu2 %v4938_v51, %s7549_s1  ;;  %4907 = vrot.lane.b32.xlu1 %v4902_v0, %s7544_s4 }
 0x831   :  { %4905 = vrot.lane.b32.xlu0 %v4901_v14, %s7544_s4 }
 0x832   :  { %v4848_v1 = vpop.permute.xlu2 %4847  ;;  %v7269_v26 = vld [vmem:[#allocation8 + $0x38] sm:$0xff]  ;;  %v5166_v46 = vpop.permute.xlu1 %5165 }
 0x833   :  { %v4806_v61 = vpop.permute.xlu0 %4805  ;;  %4852 = vst.msk [vmem:[#allocation8 + $0x2c] sm:$0xf] %vm4738_vm1, %v4848_v1  ;;  %5790 = vmatpush.bf16.msrb.mxu0 %v7269_v26  ;;  %7303 = vmatpush.bf16.msrb.mxu1 %v7269_v26  ;;  %v6871_v1 = vld [vmem:[%s11005_s5] sm:$0xf] }
 0x834   :  { %5171 = vst.msk [vmem:[#allocation8 + $0x98] sm:$0xf] %vm4738_vm1, %v5166_v46  ;;  %v6935_v46 = vld [vmem:[%s11005_s5 + $0x80] sm:$0xf] }
 0x835   :  { %4811 = vst.msk [vmem:[#allocation8 + $0x18] sm:$0xf] %vm4738_vm1, %v4806_v61  ;;  %v7232_v61 = vld [vmem:[%s11005_s5 + $0xc] sm:$0xf0] }
 0x838   :  { %4917 = vrot.lane.b32.xlu2 %v4913_v40, %s7546_s14  ;;  %5265 = vrot.lane.b32.xlu1 %v5261_v39, %s7545_s19  ;;  %v7248_v40 = vld [vmem:[%s11005_s5 + $0x8c] sm:$0xf0]  ;;  %v6038_v39 = vld [vmem:[%s11004_s8 + $0x60] sm:$0xff] }
 0x839   :  { %4919 = vrot.lane.b32.xlu0 %v4914_v58, %s7546_s14 }
 0x83a   :  { %v4784_v21 = vpop.permute.xlu2 %4783  ;;  %v5094_v45 = vpop.permute.xlu1 %5093  ;;  %v7267_v13 = vld [vmem:[#allocation8 + $0x28] sm:$0xff] }
 0x83b   :  { %v5118_v41 = vpop.permute.xlu0 %5117  ;;  %4788 = vst.msk [vmem:[#allocation8 + $0x14] sm:$0xf] %vm4738_vm1, %v4784_v21  ;;  %v6039_v21 = vld [vmem:[%s11004_s8 + $0x68] sm:$0xff] }
 0x83c   :  { %5099 = vst.msk [vmem:[#allocation8 + $0x80] sm:$0xf] %vm4738_vm1, %v5094_v45  ;;  %v6036_v45 = vld [vmem:[%s11004_s8 + $0x50] sm:$0xff] }
 0x83d   :  { %5123 = vst.msk [vmem:[#allocation8 + $0x88] sm:$0xf] %vm4738_vm1, %v5118_v41  ;;  %v6872_v41 = vor.u32 %v7232_v61, %v6871_v1  ;;  %v6260_v1 = vld [vmem:[%s11006_s10 + $0x8] sm:$0xff] }
 0x840   :  { %5267 = vrot.lane.b32.xlu2 %v5262_v3, %s7545_s19  ;;  %5279 = vrot.lane.b32.xlu1 %v5274_v18, %s7549_s1  ;;  %v6936_v3 = vor.u32 %v7248_v40, %v6935_v46  ;;  %v7244_v46 = vld [vmem:[%s11005_s5 + $0x6c] sm:$0xf0] }
 0x841   :  { %5277 = vrot.lane.b32.xlu0 %v5273_v49, %s7549_s1 }
 0x842   :  { %v10398_v44 = vpop.permute.xlu2 %5029  ;;  %v5232_v54 = vpop.permute.xlu1 %5231  ;;  %v7264_v63 = vld [vmem:[#allocation8 + $0x10] sm:$0xff] }
 0x843   :  { %v5070_v10 = vpop.permute.xlu0 %5069  ;;  %5236 = vst.msk [vmem:[#allocation8 + $0xb4] sm:$0xf] %vm4738_vm1, %v5232_v54  ;;  %v6034_v54 = vld [vmem:[%s11004_s8 + $0x40] sm:$0xff] }
 0x844   :  { %5075 = vst.msk [vmem:[#allocation8 + $0x78] sm:$0xf] %vm4738_vm1, %v5070_v10  ;;  %v6037_v10 = vld [vmem:[%s11004_s8 + $0x58] sm:$0xff] }
 0x848   :  { %5455 = vperm.xlu2 %7399, %v5381_v5   ;;  %5445 = vperm.xlu1 %7525, %v5379_v7   ;;  %v6035_v5 = vld [vmem:[%s11004_s8 + $0x48] sm:$0xff] }
 0x849   :  { %5460 = vperm.xlu0 %7328, %v5382_v2  }
 0x84a   :  { %v4996_v19 = vpop.permute.xlu2 %4995  ;;  %v5184_v20 = vpop.permute.xlu1 %5183  ;;  %v7284_v60 = vld [vmem:[#allocation8 + $0xb0] sm:$0xff] }
 0x84b   :  { %v5256_v38 = vpop.permute.xlu0 %5255  ;;  %5000 = vst.msk [vmem:[#allocation8 + $0x64] sm:$0xf] %vm4725_vm2, %v4996_v19  ;;  %v6887_v19 = vld [vmem:[%s11005_s5 + $0x20] sm:$0xf] }
 0x84c   :  { %5188 = vst.msk [vmem:[#allocation8 + $0xa4] sm:$0xf] %vm4738_vm1, %v5184_v20 }
 0x84d   :  { %5260 = vst.msk [vmem:[#allocation8 + $0xbc] sm:$0xf] %vm4738_vm1, %v5256_v38  ;;  %v7236_v38 = vld [vmem:[%s11005_s5 + $0x2c] sm:$0xf0] }
 0x850   :  { %5450 = vperm.xlu2 %7399, %v5380_v29   ;;  %5440 = vperm.xlu1 %7525, %v5378_v24   ;;  %v6951_v29 = vld [vmem:[%s11005_s5 + $0xa0] sm:$0xf]  ;;  %v6032_v24 = vld [vmem:[%s11004_s8 + $0x30] sm:$0xff] }
 0x851   :  { %5435 = vperm.xlu0 %7328, %v5377_v22   ;;  %v7252_v22 = vld [vmem:[%s11005_s5 + $0xac] sm:$0xf0] }
 0x852   :  { %v4735_v9 = vpop.permute.xlu2 %4734  ;;  %v4808_v25 = vpop.permute.xlu1 %4807 }
 0x853   :  { %v4872_v31 = vpop.permute.xlu0 %4871  ;;  %4740 = vst.msk [vmem:[#allocation8 + $0x4] sm:$0xf] %vm4738_vm1, %v4735_v9  ;;  %v7282_v8 = vld [vmem:[#allocation8 + $0xa0] sm:$0xff] }
 0x854   :  { %4812 = vst.msk [vmem:[#allocation8 + $0x1c] sm:$0xf] %vm4738_vm1, %v4808_v25  ;;  %v7285_v32 = vld [vmem:[#allocation8 + $0xb8] sm:$0xff]  ;;  %v6033_v9 = vld [vmem:[%s11004_s8 + $0x38] sm:$0xff]  ;;  %v6030_v25 = vld [vmem:[%s11004_s8 + $0x20] sm:$0xff] }
 0x855   :  { %4876 = vst.msk [vmem:[#allocation8 + $0x34] sm:$0xf] %vm4738_vm1, %v4872_v31  ;;  %5888 = vmatpush.bf16.msrb.mxu2 %v7285_v32  ;;  %v6888_v31 = vor.u32 %v7236_v38, %v6887_v19  ;;  %v6952_v32 = vor.u32 %v7252_v22, %v6951_v29  ;;  %v6265_v38 = vld [vmem:[%s11006_s10 + $0x30] sm:$0xff] }
 0x858   :  { %5425 = vperm.xlu2 %7399, %v5375_v34   ;;  %5415 = vperm.xlu1 %7525, %v5373_v23  }
 0x859   :  { %5430 = vperm.xlu0 %7328, %v5376_v57   ;;  %5889 = vmatpush.bf16.msrb.mxu2 %v7284_v60 }
 0x85a   :  { %v4970_v48 = vpop.permute.xlu2 %4969  ;;  %v5054_v6 = vpop.permute.xlu1 %5053  ;;  %v7262_v58 = vld [vmem:[#allocation8] sm:$0xff] }
 0x85b   :  { %v4832_v36 = vpop.permute.xlu0 %4831  ;;  %4975 = vst.msk [vmem:[#allocation8 + $0x58] sm:$0xf] %vm4725_vm2, %v4970_v48  ;;  %v7265_v28 = vld [vmem:[#allocation8 + $0x18] sm:$0xff] }
 0x85c   :  { %5059 = vst.msk [vmem:[#allocation8 + $0x70] sm:$0xf] %vm4738_vm1, %v5054_v6  ;;  %v7268_v42 = vld [vmem:[#allocation8 + $0x30] sm:$0xff]  ;;  %v6028_v6 = vld [vmem:[%s11004_s8 + $0x10] sm:$0xff] }
 0x85d   :  { %4836 = vst.msk [vmem:[#allocation8 + $0x24] sm:$0xf] %vm4738_vm1, %v4832_v36  ;;  %5791 = vmatpush.bf16.msrb.mxu0 %v7268_v42  ;;  %7304 = vmatpush.bf16.msrb.mxu1 %v7268_v42  ;;  %v6031_v36 = vld [vmem:[%s11004_s8 + $0x28] sm:$0xff]  ;;  %v6029_v42 = vld [vmem:[%s11004_s8 + $0x18] sm:$0xff] }
 0x85e   :  { %5890 = vmatpush.bf16.msrb.mxu2 %v7283_v56 }
 0x860   :  { %5420 = vperm.xlu2 %7399, %v5374_v47   ;;  %5410 = vperm.xlu1 %7525, %v5372_v16  }
 0x861   :  { %5405 = vperm.xlu0 %7328, %v5371_v33   ;;  %5792 = vmatpush.bf16.msrb.mxu0 %v7267_v13  ;;  %v6903_v33 = vld [vmem:[%s11005_s5 + $0x40] sm:$0xf] }
 0x862   :  { %7305 = vmatpush.bf16.msrb.mxu1 %v7267_v13  ;;  %v5168_v35 = vpop.permute.xlu2 %5167  ;;  %5891 = vmatpush.bf16.msrb.mxu2 %v7282_v8  ;;  %v5020_v15 = vpop.permute.xlu1 %5019  ;;  %v7240_v8 = vld [vmem:[%s11005_s5 + $0x4c] sm:$0xf0] }
 0x863   :  { %v4760_v59 = vpop.permute.xlu0 %4759  ;;  %5172 = vst.msk [vmem:[#allocation8 + $0x9c] sm:$0xf] %vm4738_vm1, %v5168_v35  ;;  %v6967_v35 = vld [vmem:[%s11005_s5 + $0xc0] sm:$0xf] }
 0x864   :  { %5024 = vst.msk [vmem:[#allocation8 + $0x6c] sm:$0xf] %vm4725_vm2, %v5020_v15  ;;  %v7266_v62 = vld [vmem:[#allocation8 + $0x20] sm:$0xff]  ;;  %v7532_v15 = vld [vmem:[#allocation6 + $0xa0] sm:$0xff] }
 0x865   :  { %4764 = vst.msk [vmem:[#allocation8 + $0xc] sm:$0xf] %vm4738_vm1, %v4760_v59  ;;  %5793 = vmatpush.bf16.msrb.mxu0 %v7266_v62  ;;  %v7256_v59 = vld [vmem:[%s11005_s5 + $0xcc] sm:$0xf0] }
 0x866   :  { %7306 = vmatpush.bf16.msrb.mxu1 %v7266_v62  ;;  %v4533_v62 = vmax.f32 %v7532_v15, %v10147_v53  ;;  %v6026_v53 = vld [vmem:[%s11004_s8] sm:$0xff]  ;;  %v6274_v15 = vld [vmem:[%s11006_s10 + $0x78] sm:$0xff] }
 0x868   :  { %5395 = vperm.xlu2 %7399, %v5369_v4   ;;  %5385 = vperm.xlu1 %7525, %v5367_v12   ;;  %v7233_v12 = vld [vmem:[%s11005_s5 + $0x14] sm:$0xf0] }
 0x869   :  { %5400 = vperm.xlu0 %7328, %v5370_v11   ;;  %5794 = vmatpush.bf16.msrb.mxu0 %v7265_v28  ;;  %v6879_v11 = vld [vmem:[%s11005_s5 + $0x8] sm:$0xf] }
 0x86a   :  { %7307 = vmatpush.bf16.msrb.mxu1 %v7265_v28  ;;  %v4930_v55 = vpop.permute.xlu2 %4929  ;;  %v7281_v50 = vld [vmem:[#allocation8 + $0x98] sm:$0xff]  ;;  %v4994_v43 = vpop.permute.xlu1 %4993 }
 0x86b   :  { %v5018_v27 = vpop.permute.xlu0 %5017  ;;  %4935 = vst.msk [vmem:[#allocation8 + $0x48] sm:$0xf] %vm4725_vm2, %v4930_v55  ;;  %5892 = vmatpush.bf16.msrb.mxu2 %v7281_v50  ;;  %v7533_v55 = vld [vmem:[#allocation6 + $0x38] sm:$0xff]  ;;  %v6027_v50 = vld [vmem:[%s11004_s8 + $0x8] sm:$0xff] }
 0x86c   :  { %4999 = vst.msk [vmem:[#allocation8 + $0x60] sm:$0xf] %vm4725_vm2, %v4994_v43  ;;  %v7263_v51 = vld [vmem:[#allocation8 + $0x8] sm:$0xff]  ;;  %v6904_v43 = vor.u32 %v7240_v8, %v6903_v33  ;;  %v6889_v8 = vld [vmem:[%s11005_s5 + $0x30] sm:$0xf0] }
 0x86d   :  { %5023 = vst.msk [vmem:[#allocation8 + $0x68] sm:$0xf] %vm4725_vm2, %v5018_v27  ;;  %5795 = vmatpush.bf16.msrb.mxu0 %v7264_v63  ;;  %v4520_v27 = vmax.f32 %v7533_v55, %v10097_v17 }
 0x86e   :  { %5035 = vst.msk [vmem:[#allocation8 + $0x68] sm:$0xf] %vm4738_vm1, %v10398_v44  ;;  %7308 = vmatpush.bf16.msrb.mxu1 %v7264_v63  ;;  %v6968_v63 = vor.u32 %v7256_v59, %v6967_v35  ;;  %v6927_v35 = vld [vmem:[%s11005_s5 + $0x68] sm:$0xf]  ;;  %v7245_v59 = vld [vmem:[%s11005_s5 + $0x74] sm:$0xf0] }
 0x870   :  { %5390 = vperm.xlu2 %7399, %v5368_v37   ;;  %6119 = vperm.xlu1 %7525, %v6041_v30   ;;  %v6880_v37 = vor.u32 %v7233_v12, %v6879_v11  ;;  %v7247_v12 = vld [vmem:[%s11005_s5 + $0x8c] sm:$0xf] }
 0x871   :  { %6114 = vperm.xlu0 %7328, %v6040_v52   ;;  %5796 = vmatpush.bf16.msrb.mxu0 %v7263_v51  ;;  %v7526_v52 = vpack.i.bf16 %v4533_v62, %v4520_v27  ;;  %v7238_v27 = vld [vmem:[%s11005_s5 + $0x44] sm:$0xf] }
 0x872   :  { %7309 = vmatpush.bf16.msrb.mxu1 %v7263_v51  ;;  %v5096_v14 = vpop.permute.xlu2 %5095  ;;  %v4982_v26 = vpop.permute.xlu1 %4981 }
 0x873   :  { %v5006_v0 = vpop.permute.xlu0 %5005  ;;  %5100 = vst.msk [vmem:[#allocation8 + $0x84] sm:$0xf] %vm4738_vm1, %v5096_v14 }
 0x874   :  { %4987 = vst.msk [vmem:[#allocation8 + $0x58] sm:$0xf] %vm4738_vm1, %v4982_v26  ;;  %v6919_v26 = vld [vmem:[%s11005_s5 + $0x60] sm:$0xf] }
 0x875   :  { %5011 = vst.msk [vmem:[#allocation8 + $0x60] sm:$0xf] %vm4738_vm1, %v5006_v0  ;;  %5797 = vmatpush.bf16.msrb.mxu0 %v7262_v58  ;;  %v6259_v0 = vld [vmem:[%s11006_s10] sm:$0xff] }
 0x876   :  { %7310 = vmatpush.bf16.msrb.mxu1 %v7262_v58 }
 0x878   :  { %6104 = vperm.xlu2 %7399, %v6038_v39   ;;  %6094 = vperm.xlu1 %7525, %v6036_v45   ;;  %v6983_v39 = vld [vmem:[%s11005_s5 + $0xe0] sm:$0xf]  ;;  %v6895_v45 = vld [vmem:[%s11005_s5 + $0x28] sm:$0xf] }
 0x879   :  { %6109 = vperm.xlu0 %7328, %v6039_v21   ;;  %5798 = vmatmul.bf16.vlgmr.msrb.gmra.mxu0 %v6872_v41  ;;  %v7260_v21 = vld [vmem:[%s11005_s5 + $0xec] sm:$0xf0] }
 0x87a   :  { %5818 = vmatmul.bf16.vlgmr.msrb.gmra.mxu1 %v6936_v3  ;;  %v5056_v49 = vpop.permute.xlu2 %5055  ;;  %v5120_v44 = vpop.permute.xlu1 %5119  ;;  %v7278_v28 = vld [vmem:[#allocation8 + $0x80] sm:$0xff] }
 0x87b   :  { %v4972_v18 = vpop.permute.xlu0 %4971  ;;  %5060 = vst.msk [vmem:[#allocation8 + $0x74] sm:$0xf] %vm4738_vm1, %v5056_v49  ;;  %v7237_v3 = vld [vmem:[%s11005_s5 + $0x34] sm:$0xf0] }
 0x87c   :  { %5124 = vst.msk [vmem:[#allocation8 + $0x8c] sm:$0xf] %vm4738_vm1, %v5120_v44  ;;  %v6262_v49 = vld [vmem:[%s11006_s10 + $0x18] sm:$0xff]  ;;  %v6920_v44 = vor.u32 %v7244_v46, %v6919_v26  ;;  %v6959_v26 = vld [vmem:[%s11005_s5 + $0xa8] sm:$0xf] }
 0x87d   :  { %4976 = vst.msk [vmem:[#allocation8 + $0x5c] sm:$0xf] %vm4725_vm2, %v4972_v18  ;;  %v6263_v18 = vld [vmem:[%s11006_s10 + $0x20] sm:$0xff]  ;;  %v7253_v46 = vld [vmem:[%s11005_s5 + $0xb4] sm:$0xf0] }
 0x880   :  { %6099 = vperm.xlu2 %7399, %v6037_v10   ;;  %6089 = vperm.xlu1 %7525, %v6035_v5   ;;  %v6984_v10 = vor.u32 %v7260_v21, %v6983_v39  ;;  %v7246_v21 = vld [vmem:[%s11005_s5 + $0x84] sm:$0xf] }
 0x881   :  { %6084 = vperm.xlu0 %7328, %v6034_v54   ;;  %v6896_v54 = vor.u32 %v7237_v3, %v6895_v45  ;;  %v6937_v45 = vld [vmem:[%s11005_s5 + $0x90] sm:$0xf0]  ;;  %v6975_v3 = vld [vmem:[%s11005_s5 + $0xc8] sm:$0xf] }
 0x882   :  { %v4984_v2 = vpop.permute.xlu2 %4983  ;;  %v5072_v20 = vpop.permute.xlu1 %5071  ;;  %v7276_v56 = vld [vmem:[#allocation8 + $0x70] sm:$0xff] }
 0x883   :  { %v5144_v7 = vpop.permute.xlu0 %5143  ;;  %4988 = vst.msk [vmem:[#allocation8 + $0x5c] sm:$0xf] %vm4738_vm1, %v4984_v2  ;;  %v7279_v47 = vld [vmem:[#allocation8 + $0x88] sm:$0xff] }
 0x884   :  { %5076 = vst.msk [vmem:[#allocation8 + $0x7c] sm:$0xf] %vm4738_vm1, %v5072_v20  ;;  %v6266_v20 = vld [vmem:[%s11006_s10 + $0x38] sm:$0xff] }
 0x885   :  { %5148 = vst.msk [vmem:[#allocation8 + $0x94] sm:$0xf] %vm4738_vm1, %v5144_v7 }
 0x888   :  { %6074 = vperm.xlu2 %7399, %v6032_v24   ;;  %6064 = vperm.xlu1 %7525, %v6030_v25   ;;  %v7230_v24 = vld [vmem:[%s11005_s5 + $0x4] sm:$0xf]  ;;  %v6911_v25 = vld [vmem:[%s11005_s5 + $0x48] sm:$0xf] }
 0x889   :  { %6079 = vperm.xlu0 %7328, %v6033_v9   ;;  %5803 = vmatmul.bf16.gmra.mxu0 %v6888_v31  ;;  %v6873_v9 = vld [vmem:[%s11005_s5 + $0x10] sm:$0xf0] }
 0x88a   :  { %5823 = vmatmul.bf16.gmra.mxu1 %v6952_v32  ;;  %v4944_v34 = vpop.permute.xlu2 %4943  ;;  %v4942_v23 = vpop.permute.xlu1 %4941  ;;  %v7273_v58 = vld [vmem:[#allocation8 + $0x58] sm:$0xff]  ;;  %v7241_v32 = vld [vmem:[%s11005_s5 + $0x54] sm:$0xf0] }
 0x88b   :  { %v4958_v57 = vpop.permute.xlu0 %4957  ;;  %v7277_v60 = vld [vmem:[#allocation8 + $0x78] sm:$0xff]  ;;  %4947 = vst.msk [vmem:[#allocation8 + $0x48] sm:$0xf] %vm4738_vm1, %v4942_v23  ;;  %v6876_v23 = vor.u32 %v7230_v24, %v6873_v9  ;;  %v7250_v9 = vld [vmem:[%s11005_s5 + $0xa4] sm:$0xf] }
 0x88c   :  { %4963 = vst.msk [vmem:[#allocation8 + $0x50] sm:$0xf] %vm4738_vm1, %v4958_v57  ;;  %v7280_v48 = vld [vmem:[#allocation8 + $0x90] sm:$0xff]  ;;  %5839 = vmatpush.bf16.msra.mxu1 %v7277_v60  ;;  %v6269_v57 = vld [vmem:[%s11006_s10 + $0x50] sm:$0xff]  ;;  %v6912_v60 = vor.u32 %v7241_v32, %v6911_v25 }
 0x88d   :  { %5893 = vmatpush.bf16.msrb.mxu2 %v7280_v48  ;;  %v6261_v24 = vld [vmem:[%s11006_s10 + $0x10] sm:$0xff]  ;;  %v6991_v32 = vld [vmem:[%s11005_s5 + $0xe8] sm:$0xf] }
 0x88e   :  { %v6953_v25 = vld [vmem:[%s11005_s5 + $0xb0] sm:$0xf0] }
 0x890   :  { %6069 = vperm.xlu2 %7399, %v6031_v36   ;;  %6059 = vperm.xlu1 %7525, %v6029_v42   ;;  %v6929_v42 = vld [vmem:[%s11005_s5 + $0x78] sm:$0xf0] }
 0x891   :  { %6054 = vperm.xlu0 %7328, %v6028_v6   ;;  %5840 = vmatpush.bf16.msra.mxu1 %v7276_v56  ;;  %v7243_v6 = vld [vmem:[%s11005_s5 + $0x6c] sm:$0xf]  ;;  %v6271_v56 = vld [vmem:[%s11006_s10 + $0x60] sm:$0xff] }
 0x892   :  { %5894 = vmatpush.bf16.msrb.mxu2 %v7279_v47  ;;  %v4918_v16 = vpop.permute.xlu2 %4917  ;;  %v5008_v4 = vpop.permute.xlu1 %5007  ;;  %v6272_v47 = vld [vmem:[%s11006_s10 + $0x68] sm:$0xff]  ;;  %v6932_v33 = vor.u32 %v7243_v6, %v6929_v42 }
 0x893   :  { %v5032_v13 = vpop.permute.xlu0 %5031  ;;  %5012 = vst.msk [vmem:[#allocation8 + $0x64] sm:$0xf] %vm4738_vm1, %v5008_v4  ;;  %v6928_v4 = vor.u32 %v7245_v59, %v6927_v35  ;;  %v6264_v6 = vld [vmem:[%s11006_s10 + $0x28] sm:$0xff]  ;;  %v6881_v59 = vld [vmem:[%s11005_s5 + $0x18] sm:$0xf0] }
 0x894   :  { %5036 = vst.msk [vmem:[#allocation8 + $0x6c] sm:$0xf] %vm4738_vm1, %v5032_v13  ;;  %v7231_v35 = vld [vmem:[%s11005_s5 + $0xc] sm:$0xf] }
 0x896   :  { %5895 = vmatpush.bf16.msrb.mxu2 %v7278_v28  ;;  %v6945_v28 = vld [vmem:[%s11005_s5 + $0x98] sm:$0xf0] }
 0x897   :  { %v6948_v55 = vor.u32 %v7247_v12, %v6945_v28  ;;  %v6270_v28 = vld [vmem:[%s11006_s10 + $0x58] sm:$0xff] }
 0x898   :  { %6044 = vperm.xlu2 %7399, %v6026_v53   ;;  %7527 = vrot.lane.b32.xlu1 %v7526_v52, %s7535_s26 }
 0x899   :  { %6049 = vperm.xlu0 %7328, %v6027_v50   ;;  %5808 = vmatmul.bf16.gmra.mxu0 %v6904_v43  ;;  %v6905_v50 = vld [vmem:[%s11005_s5 + $0x50] sm:$0xf0]  ;;  %v6943_v43 = vld [vmem:[%s11005_s5 + $0x88] sm:$0xf] }
 0x89a   :  { %5828 = vmatmul.bf16.gmra.mxu1 %v6968_v63  ;;  %5896 = vmatmul.bf16.vlgmr.msrb.gmra.mxu2 %v6880_v37  ;;  %v5268_v17 = vpop.permute.xlu2 %5267  ;;  %v4960_v14 = vpop.permute.xlu1 %4959  ;;  %v7274_v61 = vld [vmem:[#allocation8 + $0x60] sm:$0xff]  ;;  %v6908_v37 = vor.u32 %v7238_v27, %v6905_v50 }
 0x89b   :  { %v4932_v30 = vpop.permute.xlu0 %4931  ;;  %v7275_v51 = vld [vmem:[#allocation8 + $0x68] sm:$0xff]  ;;  %5272 = vst.msk [vmem:[#allocation8 + $0xc4] sm:$0xf] %vm4725_vm2, %v5268_v17  ;;  %v7249_v63 = vld [vmem:[%s11005_s5 + $0x94] sm:$0xf0] }
 0x89c   :  { %4964 = vst.msk [vmem:[#allocation8 + $0x54] sm:$0xf] %vm4738_vm1, %v4960_v14  ;;  %5841 = vmatpush.bf16.msra.mxu1 %v7275_v51  ;;  %v6944_v52 = vor.u32 %v7249_v63, %v6943_v43  ;;  %v6961_v51 = vld [vmem:[%s11005_s5 + $0xb8] sm:$0xf0]  ;;  %v6273_v43 = vld [vmem:[%s11006_s10 + $0x70] sm:$0xff] }
 0x89d   :  { %4936 = vst.msk [vmem:[#allocation8 + $0x4c] sm:$0xf] %vm4725_vm2, %v4932_v30  ;;  %v7251_v30 = vld [vmem:[%s11005_s5 + $0xac] sm:$0xf]  ;;  %v7258_v63 = vld [vmem:[%s11005_s5 + $0xe4] sm:$0xf] }
 0x89e   :  { %4948 = vst.msk [vmem:[#allocation8 + $0x4c] sm:$0xf] %vm4738_vm1, %v4944_v34  ;;  %v6268_v34 = vld [vmem:[%s11006_s10 + $0x48] sm:$0xff]  ;;  %v6964_v14 = vor.u32 %v7251_v30, %v6961_v51 }
 0x8a0   :  { %6277 = vperm.xlu2 %7399, %v6259_v0   ;;  %5842 = vmatpush.bf16.msra.mxu1 %v7274_v61  ;;  %v7242_v0 = vld [vmem:[%s11005_s5 + $0x64] sm:$0xf]  ;;  %v6921_v61 = vld [vmem:[%s11005_s5 + $0x70] sm:$0xf0] }
 0x8a1   :  { %6282 = vperm.xlu0 %7328, %v6260_v1   ;;  %6287 = vperm.xlu1 %7525, %v6261_v24  }
 0x8a2   :  { %v4908_v41 = vpop.permute.xlu1 %4907  ;;  %v10774_v42 = vpop.permute.xlu2 %5455 }
 0x8a3   :  { %v4906_v40 = vpop.permute.xlu0 %4905  ;;  %4912 = vst.msk [vmem:[#allocation8 + $0x44] sm:$0xf] %vm4725_vm2, %v4908_v41  ;;  %v7272_v5 = vld [vmem:[#allocation8 + $0x50] sm:$0xff] }
 0x8a4   :  { %4911 = vst.msk [vmem:[#allocation8 + $0x40] sm:$0xf] %vm4725_vm2, %v4906_v40  ;;  %5843 = vmatpush.bf16.msra.mxu1 %v7273_v58  ;;  %v6924_v40 = vor.u32 %v7242_v0, %v6921_v61  ;;  %v6960_v58 = vor.u32 %v7253_v46, %v6959_v26 }
 0x8a5   :  { %4923 = vst.msk [vmem:[#allocation8 + $0x40] sm:$0xf] %vm4738_vm1, %v4918_v16  ;;  %v7271_v19 = vld [vmem:[#allocation8 + $0x48] sm:$0xff]  ;;  %v7234_v16 = vld [vmem:[%s11005_s5 + $0x24] sm:$0xf] }
 0x8a6   :  { %v6892_v62 = vor.u32 %v7234_v16, %v6889_v8  ;;  %v7254_v16 = vld [vmem:[%s11005_s5 + $0xc4] sm:$0xf]  ;;  %v6969_v8 = vld [vmem:[%s11005_s5 + $0xd0] sm:$0xf0] }
 0x8a8   :  { %6292 = vperm.xlu2 %7399, %v6262_v49   ;;  %5844 = vmatpush.bf16.msra.mxu1 %v7272_v5  ;;  %v7257_v49 = vld [vmem:[%s11005_s5 + $0xd4] sm:$0xf0]  ;;  %v6940_v5 = vor.u32 %v7246_v21, %v6937_v45 }
 0x8a9   :  { %6297 = vperm.xlu0 %7328, %v6263_v18   ;;  %5813 = vmatmul.bf16.gmra.mxu0 %v6920_v44  ;;  %v7255_v18 = vld [vmem:[%s11005_s5 + $0xcc] sm:$0xf]  ;;  %v6977_v44 = vld [vmem:[%s11005_s5 + $0xd8] sm:$0xf0] }
 0x8aa   :  { %5833 = vmatmul.bf16.gmra.mxu1 %v6984_v10  ;;  %5901 = vmatmul.bf16.gmra.mxu2 %v6896_v54  ;;  %v5266_v7 = vpop.permute.xlu1 %5265  ;;  %v6980_v10 = vor.u32 %v7255_v18, %v6977_v44 }
 0x8ab   :  { %v4920_v2 = vpop.permute.xlu0 %4919  ;;  %5271 = vst.msk [vmem:[#allocation8 + $0xc0] sm:$0xf] %vm4725_vm2, %v5266_v7  ;;  %6302 = vperm.xlu1 %7525, %v6264_v6  }
 0x8ac   :  { %4924 = vst.msk [vmem:[#allocation8 + $0x44] sm:$0xf] %vm4738_vm1, %v4920_v2  ;;  %5845 = vmatpush.bf16.msra.mxu1 %v7271_v19  ;;  %v6976_v2 = vor.u32 %v7257_v49, %v6975_v3  ;;  %v7239_v3 = vld [vmem:[%s11005_s5 + $0x4c] sm:$0xf]  ;;  %v6913_v49 = vld [vmem:[%s11005_s5 + $0x58] sm:$0xf0] }
 0x8ad   :  { %v6916_v44 = vor.u32 %v7239_v3, %v6913_v49 }
 0x8b0   :  { %6307 = vperm.xlu2 %7399, %v6265_v38  }
 0x8b1   :  { %6312 = vperm.xlu0 %7328, %v6266_v20  }
 0x8b2   :  { %v5280_v31 = vpop.permute.xlu1 %5279 }
 0x8b3   :  { %v5278_v29 = vpop.permute.xlu0 %5277  ;;  %v7270_v22 = vld [vmem:[#allocation8 + $0x40] sm:$0xff]  ;;  %5284 = vst.msk [vmem:[#allocation8 + $0xc4] sm:$0xf] %vm4738_vm1, %v5280_v31 }
 0x8b4   :  { %5283 = vst.msk [vmem:[#allocation8 + $0xc0] sm:$0xf] %vm4738_vm1, %v5278_v29  ;;  %5846 = vmatpush.bf16.msra.mxu1 %v7270_v22  ;;  %v7259_v29 = vld [vmem:[%s11005_s5 + $0xec] sm:$0xf]  ;;  %v6993_v22 = vld [vmem:[%s11005_s5 + $0xf8] sm:$0xf0] }
 0x8b8   :  { %6322 = vperm.xlu2 %7399, %v6268_v34   ;;  %v7261_v34 = vld [vmem:[%s11005_s5 + $0xf4] sm:$0xf0] }
 0x8b9   :  { %6327 = vperm.xlu0 %7328, %v6269_v57   ;;  %v6996_v57 = vor.u32 %v7259_v29, %v6993_v22 }
 0x8ba   :  { %5847 = vmatmul.bf16.vlgmr.msra.gmra.mxu1 %v6876_v23  ;;  %5906 = vmatmul.bf16.gmra.mxu2 %v6912_v60  ;;  %v10638_v48 = vpop.permute.xlu1 %5445  ;;  %v6956_v23 = vor.u32 %v7250_v9, %v6953_v25  ;;  %v6992_v60 = vor.u32 %v7261_v34, %v6991_v32 }
 0x8bb   :  { %v7286_v36 = vld [vmem:[#allocation8 + $0xc0] sm:$0xff]  ;;  %v10820_v30 = vpop.permute.xlu0 %5460 }
 0x8bc   :  { %5944 = vmatpush.bf16.msra.mxu2 %v7286_v36  ;;  %7311 = vmatpush.bf16.msrb.mxu3 %v7286_v36 }
 0x8bf   :  { %7100 = vmatmul.msk.bf16.vlgmr.msrb.gmra.mxu3 %vm5765_vm4, %v6932_v33  ;;  %v6267_v33 = vld [vmem:[%s11006_s10 + $0x40] sm:$0xff] }
 0x8c0   :  { %6337 = vperm.xlu2 %7399, %v6271_v56   ;;  %6317 = vperm.xlu1 %7525, %v6267_v33  }
 0x8c1   :  { %6342 = vperm.xlu0 %7328, %v6272_v47  }
 0x8c2   :  { %v10656_v13 = vpop.permute.xlu1 %5440 }
 0x8c8   :  { %6352 = vperm.xlu2 %7399, %v6274_v15   ;;  %v10793_v15 = vpop.permute.xlu2 %5450  ;;  %6332 = vperm.xlu1 %7525, %v6270_v28  }
 0x8ca   :  { %5852 = vmatmul.bf16.gmra.mxu1 %v6892_v62  ;;  %5911 = vmatmul.bf16.gmra.mxu2 %v6928_v4  ;;  %v10670_v11 = vpop.permute.xlu1 %5415  ;;  %v6972_v62 = vor.u32 %v7254_v16, %v6969_v8  ;;  %v6884_v4 = vor.u32 %v7231_v35, %v6881_v59 }
 0x8cf   :  { %7101 = vmatmul.msk.bf16.gmra.mxu3 %vm5765_vm4, %v6948_v55 }
 0x8d0   :  { %v10801_v27 = vpop.permute.xlu2 %5425  ;;  %6347 = vperm.xlu1 %7525, %v6273_v43  }
 0x8d2   :  { %v10682_v53 = vpop.permute.xlu1 %5410 }
 0x8d8   :  { %v5421_v26 = vpop.permute.xlu2 %5420 }
 0x8da   :  { %5857 = vmatmul.bf16.gmra.mxu1 %v6908_v37  ;;  %5916 = vmatmul.bf16.gmra.mxu2 %v6944_v52  ;;  %v5386_v17 = vpop.permute.xlu1 %5385  ;;  %v6985_v37 = vld [vmem:[%s11005_s5 + $0xf0] sm:$0xf0]  ;;  %v7235_v52 = vld [vmem:[%s11005_s5 + $0x2c] sm:$0xf] }
 0x8df   :  { %7102 = vmatmul.msk.bf16.gmra.mxu3 %vm5765_vm4, %v6964_v14  ;;  %v6988_v14 = vor.u32 %v7258_v63, %v6985_v37 }
 0x8e0   :  { %v5396_v45 = vpop.permute.xlu2 %5395 }
 0x8e2   :  { %v10702_v1 = vpop.permute.xlu1 %6119 }
 0x8e8   :  { %v5391_v22 = vpop.permute.xlu2 %5390 }
 0x8ea   :  { %5862 = vmatmul.bf16.gmra.mxu1 %v6924_v40  ;;  %5921 = vmatmul.bf16.gmra.mxu2 %v6960_v58  ;;  %v10714_v39 = vpop.permute.xlu1 %6094  ;;  %v10825_v40 = vpop.permute.xlu0 %5435 }
 0x8ef   :  { %7103 = vmatmul.msk.bf16.gmra.mxu3 %vm5765_vm4, %v6980_v10 }
 0x8f2   :  { %v10719_v41 = vpop.permute.xlu1 %6089 }
 0x8f6   :  { %v5799_v54 = vpop.f32.mrf.mxu0 }
 0x8f7   :  { %v10736_v7 = vadd.f32 %v5799_v54, %v5386_v17  ;;  %v10738_v19 = vpop.f32.mrf.mxu1  ;;  %v6897_v17 = vld [vmem:[%s11005_s5 + $0x38] sm:$0xf0]  ;;  %v10835_v54 = vpop.permute.xlu0 %5430 }
 0x8f8   :  { %v6900_v0 = vor.u32 %v7235_v52, %v6897_v17 }
 0x8fa   :  { %5867 = vmatmul.bf16.gmra.mxu1 %v6940_v5  ;;  %5926 = vmatmul.bf16.gmra.mxu2 %v6976_v2  ;;  %v10741_v38 = vpop.permute.xlu1 %6064 }
 0x8fe   :  { %v5801_v58 = vpop.f32.mrf.mxu0 }
 0x8ff   :  { %v10743_v20 = vpop.f32.mrf.mxu1  ;;  %7104 = vmatmul.msk.bf16.gmra.mxu3 %vm5765_vm4, %v6996_v57  ;;  %v5802_v9 = vadd.f32 %v5801_v58, %v5391_v22  ;;  %v5406_v34 = vpop.permute.xlu0 %5405 }
 0x902   :  { %v10757_v31 = vpop.permute.xlu1 %6059 }
 0x906   :  { %v5804_v2 = vpop.f32.mrf.mxu0 }
 0x907   :  { %v10768_v36 = vpop.f32.mrf.mxu1  ;;  %v5805_v6 = vadd.f32 %v5804_v2, %v5396_v45 }
 0x90a   :  { %5872 = vmatmul.bf16.gmra.mxu1 %v6956_v23  ;;  %5931 = vmatmul.bf16.gmra.mxu2 %v6992_v60  ;;  %v7528_v56 = vpop.permute.xlu1 %7527 }
 0x90e   :  { %v5806_v23 = vpop.f32.mrf.mxu0 }
 0x90f   :  { %v10776_v47 = vpop.f32.mrf.mxu1 }
 0x916   :  { %v5809_v8 = vpop.f32.mrf.mxu0 }
 0x917   :  { %v10795_v12 = vpop.f32.mrf.mxu1  ;;  %v5810_v43 = vadd.f32 %v5809_v8, %v5406_v34 }
 0x91a   :  { %5877 = vmatmul.bf16.gmra.mxu1 %v6972_v62  ;;  %7097 = vmatmul.msk.bf16.vlgmr.msra.gmra.mxu2 %vm5765_vm4, %v6884_v4 }
 0x91d   :  { %v5897_v55 = vpop.f32.mrf.mxu2 }
 0x91e   :  { %v5811_v63 = vpop.f32.mrf.mxu0 }
 0x91f   :  { %v10803_v50 = vpop.f32.mrf.mxu1 }
 0x925   :  { %v5899_v51 = vpop.f32.mrf.mxu2 }
 0x926   :  { %v5814_v45 = vpop.f32.mrf.mxu0 }
 0x927   :  { %v10822_v61 = vpop.f32.mrf.mxu1 }
 0x92a   :  { %5882 = vmatmul.bf16.gmra.mxu1 %v6988_v14  ;;  %7098 = vmatmul.msk.bf16.gmra.mxu2 %vm5765_vm4, %v6900_v0  ;;  %v5812_v14 = vadd.f32 %v5811_v63, %v10682_v53 }
 0x92d   :  { %v5902_v46 = vpop.f32.mrf.mxu2 }
 0x92e   :  { %v5816_v22 = vpop.f32.mrf.mxu0 }
 0x92f   :  { %v10827_v21 = vpop.f32.mrf.mxu1 }
 0x935   :  { %v5904_v18 = vpop.f32.mrf.mxu2 }
 0x937   :  { %v5848_v10 = vpop.f32.mrf.mxu1 }
 0x938   :  { %v5849_v5 = vadd.f32 %v5848_v10, %v10736_v7  ;;  %v5401_v7 = vpop.permute.xlu0 %5400 }
 0x939   :  { %v5807_v59 = vadd.f32 %v5806_v23, %v5401_v7 }
 0x93a   :  { %7099 = vmatmul.msk.bf16.gmra.mxu2 %vm5765_vm4, %v6916_v44  ;;  %v10839_v29 = vadd.f32 %v5897_v55, %v5849_v5 }
 0x93d   :  { %v5907_v24 = vpop.f32.mrf.mxu2 }
 0x93f   :  { %v5850_v25 = vpop.f32.mrf.mxu1 }
 0x940   :  { %v5851_v32 = vadd.f32 %v5850_v25, %v5802_v9 }
 0x942   :  { %v10841_v57 = vadd.f32 %v5899_v51, %v5851_v32  ;;  %v5961_v17 = vpop.f32.mrf.mxu3  ;;  %v5817_v32 = vadd.f32 %v5816_v22, %v5421_v26  ;;  %v5822_v26 = vadd.f32 %v10743_v20, %v10835_v54  ;;  %v5827_v20 = vadd.f32 %v10776_v47, %v10656_v13 }
 0x945   :  { %v5909_v60 = vpop.f32.mrf.mxu2 }
 0x947   :  { %v5853_v56 = vpop.f32.mrf.mxu1 }
 0x948   :  { %v5854_v33 = vadd.f32 %v5853_v56, %v5805_v6 }
 0x94a   :  { %v10843_v16 = vadd.f32 %v5902_v46, %v5854_v33  ;;  %v5963_v49 = vpop.f32.mrf.mxu3 }
 0x94d   :  { %v5912_v35 = vpop.f32.mrf.mxu2 }
 0x94f   :  { %v5855_v62 = vpop.f32.mrf.mxu1 }
 0x950   :  { %v5856_v4 = vadd.f32 %v5855_v62, %v5807_v59 }
 0x952   :  { %v10845_v28 = vadd.f32 %v5904_v18, %v5856_v4  ;;  %v5815_v18 = vadd.f32 %v5814_v45, %v10670_v11 }
 0x955   :  { %v5914_v55 = vpop.f32.mrf.mxu2 }
 0x957   :  { %v5858_v37 = vpop.f32.mrf.mxu1 }
 0x958   :  { %v5859_v52 = vadd.f32 %v5858_v37, %v5810_v43 }
 0x95a   :  { %v10847_v51 = vadd.f32 %v5907_v24, %v5859_v52  ;;  %v5966_v24 = vpop.f32.mrf.mxu3 }
 0x95d   :  { %v5917_v0 = vpop.f32.mrf.mxu2 }
 0x95f   :  { %v5860_v46 = vpop.f32.mrf.mxu1 }
 0x960   :  { %v5861_v58 = vadd.f32 %v5860_v46, %v5812_v14 }
 0x962   :  { %v10850_v3 = vadd.f32 %v5909_v60, %v5861_v58  ;;  %v5820_v60 = vadd.f32 %v10738_v19, %v10801_v27  ;;  %v5968_v8 = vpop.f32.mrf.mxu3  ;;  %v5825_v19 = vadd.f32 %v10768_v36, %v10825_v40 }
 0x965   :  { %v5919_v44 = vpop.f32.mrf.mxu2 }
 0x967   :  { %v5863_v10 = vpop.f32.mrf.mxu1 }
 0x968   :  { %v5864_v5 = vadd.f32 %v5863_v10, %v5815_v18 }
 0x96a   :  { %v5913_v2 = vadd.f32 %v5912_v35, %v5864_v5  ;;  %v5971_v37 = vpop.f32.mrf.mxu3 }
 0x96c   :  { %v5962_v9 = vadd.f32 %v5961_v17, %v5913_v2 }
 0x96d   :  { %v5922_v25 = vpop.f32.mrf.mxu2 }
 0x96e   :  { %v5992_v33 = vmax.f32 %v5962_v9, 0.0 }
 0x96f   :  { %v5865_v34 = vpop.f32.mrf.mxu1 }
 0x970   :  { %v5866_v53 = vadd.f32 %v5865_v34, %v5817_v32  ;;  %v5830_v34 = vadd.f32 %v10795_v12, %v10638_v48 }
 0x972   :  { %v5915_v23 = vadd.f32 %v5914_v55, %v5866_v53  ;;  %v5973_v18 = vpop.f32.mrf.mxu3 }
 0x974   :  { %v5964_v6 = vadd.f32 %v5963_v49, %v5915_v23 }
 0x975   :  { %v5924_v56 = vpop.f32.mrf.mxu2 }
 0x976   :  { %v5993_v7 = vmax.f32 %v5964_v6, 0.0  ;;  %v5832_v6 = vadd.f32 %v10803_v50, %v10793_v15 }
 0x977   :  { %v5868_v11 = vpop.f32.mrf.mxu1 }
 0x978   :  { %v5869_v59 = vadd.f32 %v5868_v11, %v5820_v60  ;;  %v10855_v62 = vpack.c.bf16 %v5993_v7, %v5992_v33 }
 0x97a   :  { %v5918_v35 = vadd.f32 %v5917_v0, %v5869_v59  ;;  %v5976_v9 = vpop.f32.mrf.mxu3 }
 0x97c   :  { %v5967_v4 = vadd.f32 %v5966_v24, %v5918_v35 }
 0x97d   :  { %v5927_v43 = vpop.f32.mrf.mxu2 }
 0x97e   :  { %v5994_v27 = vmax.f32 %v5967_v4, 0.0 }
 0x97f   :  { %v5870_v63 = vpop.f32.mrf.mxu1 }
 0x980   :  { %v5871_v55 = vadd.f32 %v5870_v63, %v5822_v26  ;;  %v5835_v26 = vadd.f32 %v10822_v61, %v10774_v42 }
 0x982   :  { %v5920_v52 = vadd.f32 %v5919_v44, %v5871_v55  ;;  %v5978_v47 = vpop.f32.mrf.mxu3 }
 0x984   :  { %v5969_v17 = vadd.f32 %v5968_v8, %v5920_v52 }
 0x985   :  { %v5929_v14 = vpop.f32.mrf.mxu2 }
 0x986   :  { %v5995_v46 = vmax.f32 %v5969_v17, 0.0 }
 0x987   :  { %v5873_v58 = vpop.f32.mrf.mxu1 }
 0x988   :  { %v5874_v45 = vadd.f32 %v5873_v58, %v5825_v19  ;;  %v10861_v49 = vpack.c.bf16 %v5995_v46, %v5994_v27 }
 0x98a   :  { %v5923_v0 = vadd.f32 %v5922_v25, %v5874_v45 }
 0x98c   :  { %v5972_v44 = vadd.f32 %v5971_v37, %v5923_v0 }
 0x98d   :  { %v5932_v10 = vpop.f32.mrf.mxu2 }
 0x98e   :  { %v5996_v36 = vmax.f32 %v5972_v44, 0.0 }
 0x98f   :  { %v5875_v54 = vpop.f32.mrf.mxu1 }
 0x990   :  { %v5876_v5 = vadd.f32 %v5875_v54, %v5827_v20 }
 0x992   :  { %v5925_v2 = vadd.f32 %v5924_v56, %v5876_v5 }
 0x994   :  { %v5974_v22 = vadd.f32 %v5973_v18, %v5925_v2 }
 0x995   :  { %v5934_v24 = vpop.f32.mrf.mxu2 }
 0x996   :  { %v5997_v40 = vmax.f32 %v5974_v22, 0.0 }
 0x997   :  { %v5878_v32 = vpop.f32.mrf.mxu1 }
 0x998   :  { %v6023_v53 = vpack.c.bf16 %v5997_v40, %v5996_v36  ;;  %v5879_v25 = vadd.f32 %v5878_v32, %v5830_v34  ;;  %v6115_v36 = vpop.permute.xlu0 %6114  ;;  %v7293_v40 = vld [vmem:[%s11007_s7 + $0x30] sm:$0xff]  ;;  %v6105_v32 = vpop.permute.xlu2 %6104 }
 0x99a   :  { %v5928_v13 = vadd.f32 %v5927_v43, %v5879_v25  ;;  %v5981_v43 = vpop.f32.mrf.mxu3  ;;  %v7294_v25 = vld [vmem:[%s11007_s7 + $0x38] sm:$0xff] }
 0x99c   :  { %v5977_v56 = vadd.f32 %v5976_v9, %v5928_v13 }
 0x99d   :  { %v5946_v23 = vpop.f32.mrf.mxu2 }
 0x99e   :  { %v5947_v11 = vadd.f32 %v5946_v23, %v10839_v29  ;;  %v5998_v35 = vmax.f32 %v5977_v56, 0.0  ;;  %v5837_v29 = vadd.f32 %v10827_v21, %v10820_v30 }
 0x99f   :  { %v5880_v60 = vpop.f32.mrf.mxu1 }
 0x9a0   :  { %v5881_v33 = vadd.f32 %v5880_v60, %v5832_v6  ;;  %v5986_v63 = vmax.f32 %v5947_v11, 0.0  ;;  %v6110_v34 = vpop.permute.xlu0 %6109 }
 0x9a2   :  { %v5930_v7 = vadd.f32 %v5929_v14, %v5881_v33 }
 0x9a4   :  { %v5979_v8 = vadd.f32 %v5978_v47, %v5930_v7 }
 0x9a5   :  { %v5948_v59 = vpop.f32.mrf.mxu2 }
 0x9a6   :  { %v5999_v4 = vmax.f32 %v5979_v8, 0.0  ;;  %v5949_v48 = vadd.f32 %v5948_v59, %v10841_v57  ;;  %v5983_v57 = vpop.f32.mrf.mxu3 }
 0x9a7   :  { %v5883_v12 = vpop.f32.mrf.mxu1 }
 0x9a8   :  { %v5987_v15 = vmax.f32 %v5949_v48, 0.0  ;;  %v6024_v50 = vpack.c.bf16 %v5999_v4, %v5998_v35  ;;  %v5884_v37 = vadd.f32 %v5883_v12, %v5835_v26  ;;  %v6085_v23 = vpop.permute.xlu0 %6084 }
 0x9aa   :  { %v6018_v55 = vpack.c.bf16 %v5987_v15, %v5986_v63  ;;  %v5933_v17 = vadd.f32 %v5932_v10, %v5884_v37 }
 0x9ac   :  { %v5982_v27 = vadd.f32 %v5981_v43, %v5933_v17 }
 0x9ad   :  { %v5951_v52 = vpop.f32.mrf.mxu2 }
 0x9ae   :  { %v5952_v58 = vadd.f32 %v5951_v52, %v10843_v16  ;;  %v6000_v61 = vmax.f32 %v5982_v27, 0.0 }
 0x9af   :  { %v5885_v14 = vpop.f32.mrf.mxu1 }
 0x9b0   :  { %v5886_v19 = vadd.f32 %v5885_v14, %v5837_v29  ;;  %v5988_v20 = vmax.f32 %v5952_v58, 0.0  ;;  %v6080_v13 = vpop.permute.xlu0 %6079 }
 0x9b2   :  { %v5935_v46 = vadd.f32 %v5934_v24, %v5886_v19  ;;  %v7292_v24 = vld [vmem:[%s11007_s7 + $0x28] sm:$0xff] }
 0x9b4   :  { %v5984_v45 = vadd.f32 %v5983_v57, %v5935_v46 }
 0x9b5   :  { %v5953_v42 = vpop.f32.mrf.mxu2 }
 0x9b6   :  { %v6001_v0 = vmax.f32 %v5984_v45, 0.0  ;;  %v5954_v18 = vadd.f32 %v5953_v42, %v10845_v28  ;;  %v7287_v28 = vld [vmem:[%s11007_s7] sm:$0xff] }
 0x9b8   :  { %v6025_v54 = vpack.c.bf16 %v6001_v0, %v6000_v61  ;;  %v5989_v5 = vmax.f32 %v5954_v18, 0.0  ;;  %v6055_v60 = vpop.permute.xlu0 %6054 }
 0x9ba   :  { %v6019_v44 = vpack.c.bf16 %v5989_v5, %v5988_v20  ;;  %6170 = vmatpush.bf16.msra.mxu3 %v6025_v54 }
 0x9bd   :  { %v5956_v30 = vpop.f32.mrf.mxu2 }
 0x9be   :  { %6171 = vmatpush.bf16.msra.mxu3 %v6024_v50  ;;  %v5957_v21 = vadd.f32 %v5956_v30, %v10847_v51  ;;  %v7288_v51 = vld [vmem:[%s11007_s7 + $0x8] sm:$0xff] }
 0x9c0   :  { %v5990_v16 = vmax.f32 %v5957_v21, 0.0  ;;  %v6050_v11 = vpop.permute.xlu0 %6049 }
 0x9c2   :  { %6172 = vmatpush.bf16.msra.mxu3 %v6023_v53  ;;  %v6100_v53 = vpop.permute.xlu2 %6099 }
 0x9c5   :  { %v5958_v10 = vpop.f32.mrf.mxu2 }
 0x9c6   :  { %v5959_v2 = vadd.f32 %v5958_v10, %v10850_v3  ;;  %6173 = vmatpush.bf16.msra.mxu3 %v10861_v49  ;;  %v7289_v3 = vld [vmem:[%s11007_s7 + $0x10] sm:$0xff]  ;;  %v7291_v49 = vld [vmem:[%s11007_s7 + $0x20] sm:$0xff] }
 0x9c8   :  { %v5991_v22 = vmax.f32 %v5959_v2, 0.0 }
 0x9ca   :  { %v6020_v9 = vpack.c.bf16 %v5991_v22, %v5990_v16  ;;  %6174 = vmatpush.bf16.msra.mxu3 %v10855_v62  ;;  %v7290_v62 = vld [vmem:[%s11007_s7 + $0x18] sm:$0xff]  ;;  %v6075_v6 = vpop.permute.xlu2 %6074 }
 0x9ce   :  { %6175 = vmatpush.bf16.msra.mxu3 %v6020_v9 }
 0x9d2   :  { %6176 = vmatpush.bf16.msra.mxu3 %v6019_v44  ;;  %v6070_v47 = vpop.permute.xlu2 %6069 }
 0x9d6   :  { %6177 = vmatpush.bf16.msra.mxu3 %v6018_v55 }
 0x9d9   :  { %6178 = vmatmul.bf16.vlgmr.msra.gmra.mxu3 %v7287_v28 }
 0x9da   :  { %v6045_v56 = vpop.permute.xlu2 %6044 }
 0x9e9   :  { %6183 = vmatmul.bf16.gmra.mxu3 %v7288_v51 }
 0x9f9   :  { %6188 = vmatmul.bf16.gmra.mxu3 %v7289_v3 }
 0xa09   :  { %6193 = vmatmul.bf16.gmra.mxu3 %v7290_v62 }
 0xa19   :  { %6198 = vmatmul.bf16.gmra.mxu3 %v7291_v49 }
 0xa29   :  { %6203 = vmatmul.bf16.gmra.mxu3 %v7292_v24 }
 0xa39   :  { %6208 = vmatmul.bf16.gmra.mxu3 %v7293_v40 }
 0xa49   :  { %6213 = vmatmul.bf16.gmra.mxu3 %v7294_v25 }
 0xa5c   :  { %v6179_v33 = vpop.f32.mrf.mxu3 }
 0xa5d   :  { %v6180_v7 = vadd.f32 %v6179_v33, %v6045_v56  ;;  %v7301_v33 = vld [vmem:[%s11008_s9 + $0x30] sm:$0xff]  ;;  %v7302_v56 = vld [vmem:[%s11008_s9 + $0x38] sm:$0xff] }
 0xa5f   :  { %v6219_v35 = vmax.f32 %v6180_v7, 0.0  ;;  %v6278_v7 = vpop.permute.xlu2 %6277 }
 0xa64   :  { %v6181_v8 = vpop.f32.mrf.mxu3 }
 0xa65   :  { %v6182_v59 = vadd.f32 %v6181_v8, %v6050_v11 }
 0xa67   :  { %v6220_v4 = vmax.f32 %v6182_v59, 0.0  ;;  %v6283_v59 = vpop.permute.xlu0 %6282 }
 0xa69   :  { %v6251_v48 = vpack.c.bf16 %v6220_v4, %v6219_v35 }
 0xa6c   :  { %v6184_v12 = vpop.f32.mrf.mxu3 }
 0xa6d   :  { %v6185_v26 = vadd.f32 %v6184_v12, %v6055_v60  ;;  %v7300_v60 = vld [vmem:[%s11008_s9 + $0x28] sm:$0xff] }
 0xa6f   :  { %v6221_v50 = vmax.f32 %v6185_v26, 0.0 }
 0xa74   :  { %v6186_v63 = vpop.f32.mrf.mxu3 }
 0xa75   :  { %v6187_v15 = vadd.f32 %v6186_v63, %v10757_v31  ;;  %v6293_v63 = vpop.permute.xlu2 %6292 }
 0xa77   :  { %v6222_v43 = vmax.f32 %v6187_v15, 0.0 }
 0xa79   :  { %v6252_v55 = vpack.c.bf16 %v6222_v43, %v6221_v50  ;;  %v6298_v43 = vpop.permute.xlu0 %6297 }
 0xa7c   :  { %v6189_v37 = vpop.f32.mrf.mxu3 }
 0xa7d   :  { %v6190_v52 = vadd.f32 %v6189_v37, %v10741_v38 }
 0xa7f   :  { %v6223_v14 = vmax.f32 %v6190_v52, 0.0 }
 0xa84   :  { %v6191_v29 = vpop.f32.mrf.mxu3 }
 0xa85   :  { %v6192_v17 = vadd.f32 %v6191_v29, %v6070_v47  ;;  %v7299_v47 = vld [vmem:[%s11008_s9 + $0x20] sm:$0xff] }
 0xa87   :  { %v6224_v19 = vmax.f32 %v6192_v17, 0.0 }
 0xa89   :  { %v6253_v27 = vpack.c.bf16 %v6224_v19, %v6223_v14  ;;  %v6308_v14 = vpop.permute.xlu2 %6307 }
 0xa8c   :  { %v6194_v46 = vpop.f32.mrf.mxu3 }
 0xa8d   :  { %v6195_v57 = vadd.f32 %v6194_v46, %v6075_v6  ;;  %v6313_v46 = vpop.permute.xlu0 %6312 }
 0xa8f   :  { %v6225_v42 = vmax.f32 %v6195_v57, 0.0 }
 0xa94   :  { %v6196_v58 = vpop.f32.mrf.mxu3 }
 0xa95   :  { %v6197_v45 = vadd.f32 %v6196_v58, %v6080_v13 }
 0xa97   :  { %v6226_v61 = vmax.f32 %v6197_v45, 0.0 }
 0xa99   :  { %v6254_v0 = vpack.c.bf16 %v6226_v61, %v6225_v42 }
 0xa9c   :  { %v6199_v18 = vpop.f32.mrf.mxu3 }
 0xa9d   :  { %v6200_v6 = vadd.f32 %v6199_v18, %v6085_v23  ;;  %v7298_v23 = vld [vmem:[%s11008_s9 + $0x18] sm:$0xff] }
 0xaa4   :  { %v6201_v31 = vpop.f32.mrf.mxu3 }
 0xaa5   :  { %v6202_v24 = vadd.f32 %v6201_v31, %v10719_v41  ;;  %v7296_v41 = vld [vmem:[%s11008_s9 + $0x8] sm:$0xff] }
 0xaac   :  { %v6204_v20 = vpop.f32.mrf.mxu3 }
 0xaad   :  { %v6205_v62 = vadd.f32 %v6204_v20, %v10714_v39  ;;  %v7295_v39 = vld [vmem:[%s11008_s9] sm:$0xff]  ;;  %v6328_v20 = vpop.permute.xlu0 %6327 }
 0xab4   :  { %v6206_v54 = vpop.f32.mrf.mxu3 }
 0xab5   :  { %v6207_v28 = vadd.f32 %v6206_v54, %v6100_v53  ;;  %v7297_v53 = vld [vmem:[%s11008_s9 + $0x10] sm:$0xff] }
 0xab7   :  { %v6230_v40 = vmax.f32 %v6207_v28, 0.0 }
 0xabc   :  { %v6209_v5 = vpop.f32.mrf.mxu3 }
 0xabd   :  { %v6210_v16 = vadd.f32 %v6209_v5, %v6105_v32 }
 0xabf   :  { %v6231_v49 = vmax.f32 %v6210_v16, 0.0  ;;  %v6343_v16 = vpop.permute.xlu0 %6342 }
 0xac4   :  { %v6211_v44 = vpop.f32.mrf.mxu3 }
 0xac5   :  { %v6212_v10 = vadd.f32 %v6211_v44, %v6110_v34  ;;  %v6228_v34 = vmax.f32 %v6202_v24, 0.0 }
 0xac7   :  { %v6232_v51 = vmax.f32 %v6212_v10, 0.0 }
 0xac9   :  { %v6257_v25 = vpack.c.bf16 %v6232_v51, %v6231_v49 }
 0xacc   :  { %v6214_v30 = vpop.f32.mrf.mxu3 }
 0xacd   :  { %v6215_v38 = vadd.f32 %v6214_v30, %v6115_v36  ;;  %v6229_v36 = vmax.f32 %v6205_v62, 0.0 }
 0xacf   :  { %v6233_v22 = vmax.f32 %v6215_v38, 0.0  ;;  %v6256_v13 = vpack.c.bf16 %v6230_v40, %v6229_v36 }
 0xad4   :  { %v6216_v21 = vpop.f32.mrf.mxu3 }
 0xad5   :  { %v6217_v2 = vadd.f32 %v6216_v21, %v10702_v1  ;;  %v6227_v1 = vmax.f32 %v6200_v6, 0.0 }
 0xad7   :  { %v6234_v9 = vmax.f32 %v6217_v2, 0.0  ;;  %v6255_v32 = vpack.c.bf16 %v6228_v34, %v6227_v1 }
 0xad9   :  { %v6258_v3 = vpack.c.bf16 %v6234_v9, %v6233_v22 }
 0xadb   :  { %6403 = vmatpush.bf16.msra.mxu0 %v6258_v3 }
 0xadf   :  { %6404 = vmatpush.bf16.msra.mxu0 %v6257_v25 }
 0xae3   :  { %6405 = vmatpush.bf16.msra.mxu0 %v6256_v13 }
 0xae7   :  { %6406 = vmatpush.bf16.msra.mxu0 %v6255_v32 }
 0xaeb   :  { %6407 = vmatpush.bf16.msra.mxu0 %v6254_v0  ;;  %v6323_v0 = vpop.permute.xlu2 %6322 }
 0xaef   :  { %6408 = vmatpush.bf16.msra.mxu0 %v6253_v27 }
 0xaf3   :  { %6409 = vmatpush.bf16.msra.mxu0 %v6252_v55  ;;  %v6338_v21 = vpop.permute.xlu2 %6337 }
 0xaf7   :  { %6410 = vmatpush.bf16.msra.mxu0 %v6251_v48  ;;  %v6288_v48 = vpop.permute.xlu1 %6287 }
 0xafa   :  { %6411 = vmatmul.bf16.vlgmr.msra.gmra.mxu0 %v7295_v39 }
 0xafb   :  { %v6353_v62 = vpop.permute.xlu2 %6352 }
 0xaff   :  { %v6303_v52 = vpop.permute.xlu1 %6302 }
 0xb07   :  { %v6318_v45 = vpop.permute.xlu1 %6317 }
 0xb0a   :  { %6416 = vmatmul.bf16.gmra.mxu0 %v7296_v41 }
 0xb0f   :  { %v6333_v44 = vpop.permute.xlu1 %6332 }
 0xb17   :  { %v6348_v28 = vpop.permute.xlu1 %6347 }
 0xb1a   :  { %6421 = vmatmul.bf16.gmra.mxu0 %v7297_v53 }
 0xb2a   :  { %6426 = vmatmul.bf16.gmra.mxu0 %v7298_v23 }
 0xb3a   :  { %6431 = vmatmul.bf16.gmra.mxu0 %v7299_v47 }
 0xb4a   :  { %6436 = vmatmul.bf16.gmra.mxu0 %v7300_v60 }
 0xb5a   :  { %6441 = vmatmul.bf16.gmra.mxu0 %v7301_v33 }
 0xb6a   :  { %6446 = vmatmul.bf16.gmra.mxu0 %v7302_v56 }
 0xb77   :  { %v6412_v11 = vpop.f32.mrf.mxu0 }
 0xb78   :  { %v6413_v8 = vadd.f32 %v6412_v11, %v6278_v7 }
 0xb7a   :  { %6453 = vst.msk [vmem:[%s11009_s11] sm:$0xff] %vm6452_vm5, %v6413_v8 }
 0xb7f   :  { %v6414_v35 = vpop.f32.mrf.mxu0 }
 0xb80   :  { %v6415_v4 = vadd.f32 %v6414_v35, %v6283_v59 }
 0xb82   :  { %6454 = vst.msk [vmem:[%s11009_s11 + $0x8] sm:$0xff] %vm6452_vm5, %v6415_v4 }
 0xb87   :  { %v6417_v12 = vpop.f32.mrf.mxu0 }
 0xb88   :  { %v6418_v26 = vadd.f32 %v6417_v12, %v6288_v48 }
 0xb8a   :  { %6455 = vst.msk [vmem:[%s11009_s11 + $0x10] sm:$0xff] %vm6452_vm5, %v6418_v26 }
 0xb8f   :  { %v6419_v15 = vpop.f32.mrf.mxu0 }
 0xb90   :  { %v6420_v50 = vadd.f32 %v6419_v15, %v6293_v63 }
 0xb92   :  { %6456 = vst.msk [vmem:[%s11009_s11 + $0x18] sm:$0xff] %vm6452_vm5, %v6420_v50 }
 0xb97   :  { %v6422_v55 = vpop.f32.mrf.mxu0 }
 0xb98   :  { %v6423_v37 = vadd.f32 %v6422_v55, %v6298_v43 }
 0xb9a   :  { %6457 = vst.msk [vmem:[%s11009_s11 + $0x20] sm:$0xff] %vm6452_vm5, %v6423_v37 }
 0xb9f   :  { %v6424_v29 = vpop.f32.mrf.mxu0 }
 0xba0   :  { %v6425_v17 = vadd.f32 %v6424_v29, %v6303_v52 }
 0xba2   :  { %6458 = vst.msk [vmem:[%s11009_s11 + $0x28] sm:$0xff] %vm6452_vm5, %v6425_v17 }
 0xba7   :  { %v6427_v19 = vpop.f32.mrf.mxu0 }
 0xba8   :  { %v6428_v27 = vadd.f32 %v6427_v19, %v6308_v14 }
 0xbaa   :  { %6459 = vst.msk [vmem:[%s11009_s11 + $0x30] sm:$0xff] %vm6452_vm5, %v6428_v27 }
 0xbaf   :  { %v6429_v57 = vpop.f32.mrf.mxu0 }
 0xbb0   :  { %v6430_v58 = vadd.f32 %v6429_v57, %v6313_v46 }
 0xbb2   :  { %6460 = vst.msk [vmem:[%s11009_s11 + $0x38] sm:$0xff] %vm6452_vm5, %v6430_v58 }
 0xbb7   :  { %v6432_v42 = vpop.f32.mrf.mxu0 }
 0xbb8   :  { %v6433_v61 = vadd.f32 %v6432_v42, %v6318_v45 }
 0xbba   :  { %6461 = vst.msk [vmem:[%s11009_s11 + $0x40] sm:$0xff] %vm6452_vm5, %v6433_v61 }
 0xbbf   :  { %v6434_v18 = vpop.f32.mrf.mxu0 }
 0xbc0   :  { %v6435_v31 = vadd.f32 %v6434_v18, %v6323_v0 }
 0xbc2   :  { %6462 = vst.msk [vmem:[%s11009_s11 + $0x48] sm:$0xff] %vm6452_vm5, %v6435_v31 }
 0xbc7   :  { %v6437_v54 = vpop.f32.mrf.mxu0 }
 0xbc8   :  { %v6438_v5 = vadd.f32 %v6437_v54, %v6328_v20 }
 0xbca   :  { %6463 = vst.msk [vmem:[%s11009_s11 + $0x50] sm:$0xff] %vm6452_vm5, %v6438_v5 }
 0xbcf   :  { %v6439_v30 = vpop.f32.mrf.mxu0 }
 0xbd0   :  { %v6440_v38 = vadd.f32 %v6439_v30, %v6333_v44 }
 0xbd2   :  { %6464 = vst.msk [vmem:[%s11009_s11 + $0x58] sm:$0xff] %vm6452_vm5, %v6440_v38 }
 0xbd7   :  { %v6442_v10 = vpop.f32.mrf.mxu0 }
 0xbd8   :  { %v6443_v2 = vadd.f32 %v6442_v10, %v6338_v21 }
 0xbda   :  { %6465 = vst.msk [vmem:[%s11009_s11 + $0x60] sm:$0xff] %vm6452_vm5, %v6443_v2 }
 0xbdf   :  { %v6444_v22 = vpop.f32.mrf.mxu0 }
 0xbe0   :  { %v6445_v9 = vadd.f32 %v6444_v22, %v6343_v16 }
 0xbe2   :  { %6466 = vst.msk [vmem:[%s11009_s11 + $0x68] sm:$0xff] %vm6452_vm5, %v6445_v9 }
 0xbe7   :  { %v6447_v51 = vpop.f32.mrf.mxu0 }
 0xbe8   :  { %v6448_v3 = vadd.f32 %v6447_v51, %v6348_v28 }
 0xbea   :  { %6467 = vst.msk [vmem:[%s11009_s11 + $0x70] sm:$0xff] %vm6452_vm5, %v6448_v3 }
 0xbef   :  { %v6449_v49 = vpop.f32.mrf.mxu0 }
 0xbf0   :  { %v6450_v24 = vadd.f32 %v6449_v49, %v6353_v62 }
 0xbf2   :  { %6468 = vst.msk [vmem:[%s11009_s11 + $0x78] sm:$0xff] %vm6452_vm5, %v6450_v24 }

</bundles_post_ra>
